<compile_context>
chip_gen: v7x
topology: tpu7x:2x2x1
jax: 0.10.0
libtpu: 0.0.40
codegen_flags: <defaults>
</compile_context>

<pallas_src>
import functools

import numpy as np
import jax
import jax.numpy as jnp
from jax.experimental import pallas as pl
from jax.experimental.pallas import tpu as pltpu

BN_EPS = 1e-3


# ----------------------------------------------------------------------------
# Host-side (trace-time) constants
# ----------------------------------------------------------------------------
def _stride2_selection(H, W):
    """(9, Ho*Wo, H*W) 0/1: tap t = dy*3+dx of the 3x3 / stride-2 / 'valid' window.
    Shared by both stride-2 convs and the max-pool downsample (tap 0)."""
    Ho, Wo = (H - 3) // 2 + 1, (W - 3) // 2 + 1
    S = np.zeros((9, Ho * Wo, H * W), np.float32)
    for dy in range(3):
        for dx in range(3):
            t = dy * 3 + dx
            for i in range(Ho):
                for j in range(Wo):
                    S[t, i * Wo + j, (2 * i + dy) * W + (2 * j + dx)] = 1.0
    return S


def _wshift_masks(H, W):
    """(7, H*W, 1) 0/1: rows whose source column w + (k-3) stays inside [0, W)
    (validity mask for the 1x7 'same' conv taps)."""
    m = np.zeros((7, H * W, 1), np.float32)
    for k in range(7):
        d = k - 3
        for h in range(H):
            for w in range(W):
                if 0 <= w + d < W:
                    m[k, h * W + w, 0] = 1.0
    return m


# ----------------------------------------------------------------------------
# Fused Pallas kernel (one batch element per grid step)
# ----------------------------------------------------------------------------
def _inception_d_kernel(W,                     # static row width (bound via partial)
                        x_ref,                 # (1, HW, Cin)   bf16
                        w1_ref,                # (Cin, 512)     bf16  [1x1 a | pad | 1x1 b | pad]
                        sb1a_ref, sb1b_ref,    # (2, 192) f32 each
                        w17_ref, sb17_ref,     # (192, 7*256) bf16, (2, 192) f32
                        w71_ref, sb71_ref,     # (192, 7*256) bf16, (2, 192) f32
                        w33a_ref, sb33a_ref,   # (9, 192, 320) bf16, (2, 320) f32
                        w33b_ref, sb33b_ref,   # (9, 192, 192) bf16, (2, 192) f32
                        mw_ref,                # (7, HW, 1) f32  (1x7 validity masks)
                        s_ref,                 # (9, HoWo, HW) bf16 0/1 (stride-2 gather)
                        o_ref):                # (1, HoWo, 512 + Cin) f32
    f32, bf16 = jnp.float32, jnp.bfloat16

    def bn_relu(acc, sb_ref):
        return jnp.maximum(acc * sb_ref[0:1, :] + sb_ref[1:2, :], 0.0)

    def shift_rows(z, d):
        # out[i] = z[i + d] if 0 <= i + d < rows else 0  (flat row shift, zero fill)
        if d == 0:
            return z
        rows, cols = z.shape
        zero = jnp.zeros((abs(d), cols), z.dtype)
        if d > 0:
            return jnp.concatenate([z[d:, :], zero], axis=0)
        return jnp.concatenate([zero, z[:d, :]], axis=0)

    xb = x_ref[0]                        # (HW, Cin) bf16, read once, shared by branches
    cin = xb.shape[1]

    # ---- fused 1x1 stems: ONE matmul for both branches (lane-aligned 256 packing) --
    y_all = jnp.dot(xb, w1_ref[...], preferred_element_type=f32)        # (HW, 512)
    y3 = bn_relu(y_all[:, 0:192], sb1a_ref)                             # branch3x3 stem
    y7 = bn_relu(y_all[:, 256:448], sb1b_ref)                           # branch7x7x3 stem

    # ---- 1x7 / 7x1 'same' convs: one packed tap matmul + sublane shifts (+ mask) ---
    def conv7(y, wpk_ref, sb_ref, step, masked):
        z_all = jnp.dot(y.astype(bf16), wpk_ref[...], preferred_element_type=f32)
        acc = z_all[:, 3 * 256:3 * 256 + 192]                           # tap d = 0
        for k in (0, 1, 2, 4, 5, 6):
            d = k - 3
            z = shift_rows(z_all[:, k * 256:k * 256 + 192], d * step)
            if masked:                                                  # zero wrapped rows
                z = z * mw_ref[k]                                       # (HW,1) broadcast
            acc = acc + z
        return bn_relu(acc, sb_ref)

    y7 = conv7(y7, w17_ref, sb17_ref, step=1, masked=True)    # 1x7, padding (0, 3)
    y7 = conv7(y7, w71_ref, sb71_ref, step=W, masked=False)   # 7x1, padding (3, 0)

    # ---- 3x3 / stride-2 / 'valid' convs: bf16 one-hot gather + per-tap matmul ------
    def conv3s2(y, w_ref, sb_ref):
        yb = y.astype(bf16)
        acc = None
        for t in range(9):
            g = jnp.dot(s_ref[t], yb, preferred_element_type=f32)       # exact bf16 gather
            z = jnp.dot(g.astype(bf16), w_ref[t], preferred_element_type=f32)
            acc = z if acc is None else acc + z
        return bn_relu(acc, sb_ref)

    b3 = conv3s2(y3, w33a_ref, sb33a_ref)      # (HoWo, 320)
    b7 = conv3s2(y7, w33b_ref, sb33b_ref)      # (HoWo, 192)

    # ---- branch_pool: VPU max over 9 shifted planes, then ONE bf16 one-hot gather --
    xf = xb.astype(f32)
    pool = xf
    for dy in range(3):
        for dx in range(3):
            if dy == 0 and dx == 0:
                continue
            pool = jnp.maximum(pool, shift_rows(xf, dy * W + dx))
    bp = jnp.dot(s_ref[0], pool.astype(bf16), preferred_element_type=f32)  # (HoWo, Cin)

    # ---- direct slice stores (no concat / no extra temporaries) --------------------
    o_ref[0, :, 0:320] = b3
    o_ref[0, :, 320:512] = b7
    o_ref[0, :, 512:512 + cin] = bp


# ----------------------------------------------------------------------------
# Wrapper (NCHW in / NCHW out, like the PyTorch module)
# ----------------------------------------------------------------------------
def _sb(p):
    return jnp.stack([p["scale"], p["bias"]], axis=0).astype(jnp.float32)  # (2, Cout)


def _pack7_taps(w):
    """HWIO (1,7,c,192) or (7,1,c,192) -> (c, 7*256) bf16; tap k in cols [256k, 256k+192)."""
    kh, kw, cin, cout = w.shape
    t = w.reshape(kh * kw, cin, cout).astype(jnp.bfloat16)
    pad = jnp.zeros((cin, 256 - cout), jnp.bfloat16)
    return jnp.concatenate(
        [jnp.concatenate([t[k], pad], axis=1) for k in range(kh * kw)], axis=1)


def _flatten_taps(w):
    kh, kw, cin, cout = w.shape
    return w.reshape(kh * kw, cin, cout).astype(jnp.bfloat16)


@jax.jit
def inception_d_forward(params, x_nchw):
    N, Cin, H, W = x_nchw.shape
    HW = H * W
    Ho, Wo = (H - 3) // 2 + 1, (W - 3) // 2 + 1
    HoWo = Ho * Wo
    Ctot = 320 + 192 + Cin

    # trace-time constants (derived only from static shapes)
    S = jnp.asarray(_stride2_selection(H, W), jnp.bfloat16)   # (9, HoWo, HW) 0/1, exact
    MW = jnp.asarray(_wshift_masks(H, W), jnp.float32)        # (7, HW, 1)

    # kernel-ready packed weights (bf16 MXU operands)
    w1a = params["branch3x3_1"]["w"].reshape(Cin, 192).astype(jnp.bfloat16)
    w1b = params["branch7x7x3_1"]["w"].reshape(Cin, 192).astype(jnp.bfloat16)
    pad64 = jnp.zeros((Cin, 64), jnp.bfloat16)
    w1 = jnp.concatenate([w1a, pad64, w1b, pad64], axis=1)    # (Cin, 512)
    w17 = _pack7_taps(params["branch7x7x3_2"]["w"])           # (192, 1792)
    w71 = _pack7_taps(params["branch7x7x3_3"]["w"])           # (192, 1792)
    w33a = _flatten_taps(params["branch3x3_2"]["w"])          # (9, 192, 320)
    w33b = _flatten_taps(params["branch7x7x3_4"]["w"])        # (9, 192, 192)

    # NCHW -> (N, H*W, C) bf16: channels on lanes, spatial on sublanes, cast once
    xf = jnp.transpose(x_nchw, (0, 2, 3, 1)).reshape(N, HW, Cin).astype(jnp.bfloat16)

    def const_spec(shape):
        zeros = (0,) * len(shape)
        return pl.BlockSpec(shape, lambda n: zeros)

    kernel = functools.partial(_inception_d_kernel, W)

    out2d = pl.pallas_call(
        kernel,
        out_shape=jax.ShapeDtypeStruct((N, HoWo, Ctot), jnp.float32),
        grid_spec=pltpu.PrefetchScalarGridSpec(
            num_scalar_prefetch=0,
            grid=(N,),
            in_specs=[
                pl.BlockSpec((1, HW, Cin), lambda n: (n, 0, 0)),
                const_spec((Cin, 512)),
                const_spec((2, 192)), const_spec((2, 192)),
                const_spec((192, 7 * 256)), const_spec((2, 192)),
                const_spec((192, 7 * 256)), const_spec((2, 192)),
                const_spec((9, 192, 320)), const_spec((2, 320)),
                const_spec((9, 192, 192)), const_spec((2, 192)),
                const_spec((7, HW, 1)),
                const_spec((9, HoWo, HW)),
            ],
            out_specs=pl.BlockSpec((1, HoWo, Ctot), lambda n: (n, 0, 0)),
        ),
        compiler_params=pltpu.CompilerParams(
            dimension_semantics=("parallel",),
            vmem_limit_bytes=32 * 1024 * 1024,
        ),
    )(xf,
      w1, _sb(params["branch3x3_1"]), _sb(params["branch7x7x3_1"]),
      w17, _sb(params["branch7x7x3_2"]),
      w71, _sb(params["branch7x7x3_3"]),
      w33a, _sb(params["branch3x3_2"]),
      w33b, _sb(params["branch7x7x3_4"]),
      MW, S)

    out = out2d.reshape(N, Ho, Wo, Ctot)
    return jnp.transpose(out, (0, 3, 1, 2))   # -> NCHW


# ----------------------------------------------------------------------------
# Deterministic synthetic parameters (inference-folded BatchNorm)
# ----------------------------------------------------------------------------
def make_basic_conv_params(key, cin, cout, kh, kw):
    kconv, kg, kb, km, kv = jax.random.split(key, 5)
    w = jax.random.normal(kconv, (kh, kw, cin, cout), jnp.float32) / np.sqrt(kh * kw * cin)
    gamma = 1.0 + 0.1 * jax.random.normal(kg, (cout,), jnp.float32)
    beta = 0.1 * jax.random.normal(kb, (cout,), jnp.float32)
    mean = 0.1 * jax.random.normal(km, (cout,), jnp.float32)
    var = 1.0 + 0.1 * jax.random.uniform(kv, (cout,), jnp.float32)
    scale = gamma / jnp.sqrt(var + BN_EPS)
    bias = beta - mean * scale
    return {"w": w, "scale": scale, "bias": bias}


def make_inception_d_params(key, in_channels):
    ks = jax.random.split(key, 6)
    return {
        "branch3x3_1": make_basic_conv_params(ks[0], in_channels, 192, 1, 1),
        "branch3x3_2": make_basic_conv_params(ks[1], 192, 320, 3, 3),
        "branch7x7x3_1": make_basic_conv_params(ks[2], in_channels, 192, 1, 1),
        "branch7x7x3_2": make_basic_conv_params(ks[3], 192, 192, 1, 7),
        "branch7x7x3_3": make_basic_conv_params(ks[4], 192, 192, 7, 1),
        "branch7x7x3_4": make_basic_conv_params(ks[5], 192, 192, 3, 3),
    }


# ----------------------------------------------------------------------------
# Pure-JAX reference (same bf16-operand / f32-accumulate conv arithmetic)
# ----------------------------------------------------------------------------
def _ref_conv(x, p, *, stride=(1, 1), padding=((0, 0), (0, 0))):
    y = jax.lax.conv_general_dilated(
        x.astype(jnp.bfloat16), p["w"].astype(jnp.bfloat16),
        window_strides=stride, padding=padding,
        dimension_numbers=("NHWC", "HWIO", "NHWC"),
        preferred_element_type=jnp.float32)
    return jnp.maximum(y * p["scale"] + p["bias"], 0.0)


def inception_d_ref(params, x_nchw):
    x = jnp.transpose(x_nchw, (0, 2, 3, 1))
    b3 = _ref_conv(x, params["branch3x3_1"])
    b3 = _ref_conv(b3, params["branch3x3_2"], stride=(2, 2))
    b7 = _ref_conv(x, params["branch7x7x3_1"])
    b7 = _ref_conv(b7, params["branch7x7x3_2"], padding=((0, 0), (3, 3)))
    b7 = _ref_conv(b7, params["branch7x7x3_3"], padding=((3, 3), (0, 0)))
    b7 = _ref_conv(b7, params["branch7x7x3_4"], stride=(2, 2))
    bp = jax.lax.reduce_window(x, -jnp.inf, jax.lax.max,
                               (1, 3, 3, 1), (1, 2, 2, 1), "VALID")
    out = jnp.concatenate([b3, b7, bp], axis=-1)
    return jnp.transpose(out, (0, 3, 1, 2))


# ----------------------------------------------------------------------------
if __name__ == "__main__":
    key = jax.random.PRNGKey(0)
    kp, kx = jax.random.split(key)

    batch, in_channels, H, W = 2, 32, 9, 9   # stride-2 'valid' => 4x4 spatial output
    params = make_inception_d_params(kp, in_channels)
    x = jax.random.normal(kx, (batch, in_channels, H, W), jnp.float32)

    out = jax.block_until_ready(inception_d_forward(params, x))

    Ho = (H - 3) // 2 + 1
    assert out.shape == (batch, 320 + 192 + in_channels, Ho, Ho), out.shape

    ref = jax.block_until_ready(inception_d_ref(params, x))
    np.testing.assert_allclose(np.asarray(out), np.asarray(ref),
                               rtol=1e-2, atol=1e-2)

    print("KERNEL_OK")
</pallas_src>

<mosaic_0001>
module attributes {stable_mosaic.version = 11 : i64} {
  func.func @_inception_d_kernel(%arg0: i32, %arg1: memref<1x81x32xbf16, #tpu.memory_space<vmem>>, %arg2: memref<32x512xbf16, #tpu.memory_space<vmem>>, %arg3: memref<2x192xf32, #tpu.memory_space<vmem>>, %arg4: memref<2x192xf32, #tpu.memory_space<vmem>>, %arg5: memref<192x1792xbf16, #tpu.memory_space<vmem>>, %arg6: memref<2x192xf32, #tpu.memory_space<vmem>>, %arg7: memref<192x1792xbf16, #tpu.memory_space<vmem>>, %arg8: memref<2x192xf32, #tpu.memory_space<vmem>>, %arg9: memref<9x192x320xbf16, #tpu.memory_space<vmem>>, %arg10: memref<2x320xf32, #tpu.memory_space<vmem>>, %arg11: memref<9x192x192xbf16, #tpu.memory_space<vmem>>, %arg12: memref<2x192xf32, #tpu.memory_space<vmem>>, %arg13: memref<7x81x1xf32, #tpu.memory_space<vmem>>, %arg14: memref<9x16x81xbf16, #tpu.memory_space<vmem>>, %arg15: memref<1x16x544xf32, #tpu.memory_space<vmem>>) attributes {dimension_semantics = [#tpu.dimension_semantics<parallel>], iteration_bounds = array<i64: 2>, scalar_prefetch = 0 : i64, scratch_operands = 0 : i64, tpu.core_type = #tpu.core_type<tc>, window_params = [{transform_indices = @transform_0, window_bounds = array<i64: 1, 81, 32>}, {pipeline_mode = #tpu.pipeline_mode<synchronous>, transform_indices = @transform_1, window_bounds = array<i64: 32, 512>}, {pipeline_mode = #tpu.pipeline_mode<synchronous>, transform_indices = @transform_2, window_bounds = array<i64: 2, 192>}, {pipeline_mode = #tpu.pipeline_mode<synchronous>, transform_indices = @transform_3, window_bounds = array<i64: 2, 192>}, {pipeline_mode = #tpu.pipeline_mode<synchronous>, transform_indices = @transform_4, window_bounds = array<i64: 192, 1792>}, {pipeline_mode = #tpu.pipeline_mode<synchronous>, transform_indices = @transform_5, window_bounds = array<i64: 2, 192>}, {pipeline_mode = #tpu.pipeline_mode<synchronous>, transform_indices = @transform_6, window_bounds = array<i64: 192, 1792>}, {pipeline_mode = #tpu.pipeline_mode<synchronous>, transform_indices = @transform_7, window_bounds = array<i64: 2, 192>}, {pipeline_mode = #tpu.pipeline_mode<synchronous>, transform_indices = @transform_8, window_bounds = array<i64: 9, 192, 320>}, {pipeline_mode = #tpu.pipeline_mode<synchronous>, transform_indices = @transform_9, window_bounds = array<i64: 2, 320>}, {pipeline_mode = #tpu.pipeline_mode<synchronous>, transform_indices = @transform_10, window_bounds = array<i64: 9, 192, 192>}, {pipeline_mode = #tpu.pipeline_mode<synchronous>, transform_indices = @transform_11, window_bounds = array<i64: 2, 192>}, {pipeline_mode = #tpu.pipeline_mode<synchronous>, transform_indices = @transform_12, window_bounds = array<i64: 7, 81, 1>}, {pipeline_mode = #tpu.pipeline_mode<synchronous>, transform_indices = @transform_13, window_bounds = array<i64: 9, 16, 81>}, {transform_indices = @transform_14, window_bounds = array<i64: 1, 16, 544>}]} {
    %c0 = arith.constant 0 : index
    %c0_0 = arith.constant 0 : index
    %c0_1 = arith.constant 0 : index
    %0 = vector.load %arg1[%c0, %c0_0, %c0_1] : memref<1x81x32xbf16, #tpu.memory_space<vmem>>, vector<1x81x32xbf16>
    %1 = vector.shape_cast %0 : vector<1x81x32xbf16> to vector<81x32xbf16>
    %c0_2 = arith.constant 0 : index
    %c0_3 = arith.constant 0 : index
    %2 = vector.load %arg2[%c0_2, %c0_3] : memref<32x512xbf16, #tpu.memory_space<vmem>>, vector<32x512xbf16>
    %cst = arith.constant dense<0.000000e+00> : vector<81x512xf32>
    %3 = tpu.matmul %1, %2, %cst {dimension_numbers = #tpu.dot_dimension_numbers<[1], [0], [0], [1], [0, 0, 1, 1], [], []>} : vector<81x32xbf16>, vector<32x512xbf16>, vector<81x512xf32> -> vector<81x512xf32>
    %4 = vector.extract_strided_slice %3 {offsets = [0, 0], sizes = [81, 192], strides = [1, 1]} : vector<81x512xf32> to vector<81x192xf32>
    %c0_4 = arith.constant 0 : index
    %c0_5 = arith.constant 0 : index
    %5 = vector.load %arg3[%c0_4, %c0_5] : memref<2x192xf32, #tpu.memory_space<vmem>>, vector<1x192xf32>
    %6 = vector.broadcast %5 : vector<1x192xf32> to vector<81x192xf32>
    %7 = arith.mulf %4, %6 : vector<81x192xf32>
    %c1 = arith.constant 1 : index
    %c0_6 = arith.constant 0 : index
    %8 = vector.load %arg3[%c1, %c0_6] : memref<2x192xf32, #tpu.memory_space<vmem>>, vector<1x192xf32>
    %9 = vector.broadcast %8 : vector<1x192xf32> to vector<81x192xf32>
    %10 = arith.addf %7, %9 : vector<81x192xf32>
    %cst_7 = arith.constant 0.000000e+00 : f32
    %11 = vector.broadcast %cst_7 : f32 to vector<81x192xf32>
    %12 = arith.maximumf %10, %11 : vector<81x192xf32>
    %13 = vector.extract_strided_slice %3 {offsets = [0, 256], sizes = [81, 192], strides = [1, 1]} : vector<81x512xf32> to vector<81x192xf32>
    %c0_8 = arith.constant 0 : index
    %c0_9 = arith.constant 0 : index
    %14 = vector.load %arg4[%c0_8, %c0_9] : memref<2x192xf32, #tpu.memory_space<vmem>>, vector<1x192xf32>
    %15 = vector.broadcast %14 : vector<1x192xf32> to vector<81x192xf32>
    %16 = arith.mulf %13, %15 : vector<81x192xf32>
    %c1_10 = arith.constant 1 : index
    %c0_11 = arith.constant 0 : index
    %17 = vector.load %arg4[%c1_10, %c0_11] : memref<2x192xf32, #tpu.memory_space<vmem>>, vector<1x192xf32>
    %18 = vector.broadcast %17 : vector<1x192xf32> to vector<81x192xf32>
    %19 = arith.addf %16, %18 : vector<81x192xf32>
    %cst_12 = arith.constant 0.000000e+00 : f32
    %20 = vector.broadcast %cst_12 : f32 to vector<81x192xf32>
    %21 = arith.maximumf %19, %20 : vector<81x192xf32>
    %22 = arith.truncf %21 : vector<81x192xf32> to vector<81x192xbf16>
    %c0_13 = arith.constant 0 : index
    %c0_14 = arith.constant 0 : index
    %23 = vector.load %arg5[%c0_13, %c0_14] : memref<192x1792xbf16, #tpu.memory_space<vmem>>, vector<192x1792xbf16>
    %cst_15 = arith.constant dense<0.000000e+00> : vector<81x1792xf32>
    %24 = tpu.matmul %22, %23, %cst_15 {dimension_numbers = #tpu.dot_dimension_numbers<[1], [0], [0], [1], [0, 0, 1, 1], [], []>} : vector<81x192xbf16>, vector<192x1792xbf16>, vector<81x1792xf32> -> vector<81x1792xf32>
    %25 = vector.extract_strided_slice %24 {offsets = [0, 768], sizes = [81, 192], strides = [1, 1]} : vector<81x1792xf32> to vector<81x192xf32>
    %26 = vector.extract_strided_slice %24 {offsets = [0, 0], sizes = [81, 192], strides = [1, 1]} : vector<81x1792xf32> to vector<81x192xf32>
    %cst_16 = arith.constant 0.000000e+00 : f32
    %27 = vector.broadcast %cst_16 : f32 to vector<3x192xf32>
    %28 = vector.extract_strided_slice %26 {offsets = [0, 0], sizes = [78, 192], strides = [1, 1]} : vector<81x192xf32> to vector<78x192xf32>
    %29 = tpu.concatenate %27, %28 in 0 : vector<3x192xf32>, vector<78x192xf32> -> vector<81x192xf32>
    %c0_17 = arith.constant 0 : index
    %c0_18 = arith.constant 0 : index
    %c0_19 = arith.constant 0 : index
    %30 = vector.load %arg13[%c0_17, %c0_18, %c0_19] : memref<7x81x1xf32, #tpu.memory_space<vmem>>, vector<1x81x1xf32>
    %31 = vector.shape_cast %30 : vector<1x81x1xf32> to vector<81x1xf32>
    %32 = vector.broadcast %31 : vector<81x1xf32> to vector<81x192xf32>
    %33 = arith.mulf %29, %32 : vector<81x192xf32>
    %34 = arith.addf %25, %33 : vector<81x192xf32>
    %35 = vector.extract_strided_slice %24 {offsets = [0, 256], sizes = [81, 192], strides = [1, 1]} : vector<81x1792xf32> to vector<81x192xf32>
    %cst_20 = arith.constant 0.000000e+00 : f32
    %36 = vector.broadcast %cst_20 : f32 to vector<2x192xf32>
    %37 = vector.extract_strided_slice %35 {offsets = [0, 0], sizes = [79, 192], strides = [1, 1]} : vector<81x192xf32> to vector<79x192xf32>
    %38 = tpu.concatenate %36, %37 in 0 : vector<2x192xf32>, vector<79x192xf32> -> vector<81x192xf32>
    %c1_21 = arith.constant 1 : index
    %c0_22 = arith.constant 0 : index
    %c0_23 = arith.constant 0 : index
    %39 = vector.load %arg13[%c1_21, %c0_22, %c0_23] : memref<7x81x1xf32, #tpu.memory_space<vmem>>, vector<1x81x1xf32>
    %40 = vector.shape_cast %39 : vector<1x81x1xf32> to vector<81x1xf32>
    %41 = vector.broadcast %40 : vector<81x1xf32> to vector<81x192xf32>
    %42 = arith.mulf %38, %41 : vector<81x192xf32>
    %43 = arith.addf %34, %42 : vector<81x192xf32>
    %44 = vector.extract_strided_slice %24 {offsets = [0, 512], sizes = [81, 192], strides = [1, 1]} : vector<81x1792xf32> to vector<81x192xf32>
    %cst_24 = arith.constant 0.000000e+00 : f32
    %45 = vector.broadcast %cst_24 : f32 to vector<1x192xf32>
    %46 = vector.extract_strided_slice %44 {offsets = [0, 0], sizes = [80, 192], strides = [1, 1]} : vector<81x192xf32> to vector<80x192xf32>
    %47 = tpu.concatenate %45, %46 in 0 : vector<1x192xf32>, vector<80x192xf32> -> vector<81x192xf32>
    %c2 = arith.constant 2 : index
    %c0_25 = arith.constant 0 : index
    %c0_26 = arith.constant 0 : index
    %48 = vector.load %arg13[%c2, %c0_25, %c0_26] : memref<7x81x1xf32, #tpu.memory_space<vmem>>, vector<1x81x1xf32>
    %49 = vector.shape_cast %48 : vector<1x81x1xf32> to vector<81x1xf32>
    %50 = vector.broadcast %49 : vector<81x1xf32> to vector<81x192xf32>
    %51 = arith.mulf %47, %50 : vector<81x192xf32>
    %52 = arith.addf %43, %51 : vector<81x192xf32>
    %53 = vector.extract_strided_slice %24 {offsets = [0, 1024], sizes = [81, 192], strides = [1, 1]} : vector<81x1792xf32> to vector<81x192xf32>
    %cst_27 = arith.constant 0.000000e+00 : f32
    %54 = vector.broadcast %cst_27 : f32 to vector<1x192xf32>
    %55 = vector.extract_strided_slice %53 {offsets = [1, 0], sizes = [80, 192], strides = [1, 1]} : vector<81x192xf32> to vector<80x192xf32>
    %56 = tpu.concatenate %55, %54 in 0 : vector<80x192xf32>, vector<1x192xf32> -> vector<81x192xf32>
    %c4 = arith.constant 4 : index
    %c0_28 = arith.constant 0 : index
    %c0_29 = arith.constant 0 : index
    %57 = vector.load %arg13[%c4, %c0_28, %c0_29] : memref<7x81x1xf32, #tpu.memory_space<vmem>>, vector<1x81x1xf32>
    %58 = vector.shape_cast %57 : vector<1x81x1xf32> to vector<81x1xf32>
    %59 = vector.broadcast %58 : vector<81x1xf32> to vector<81x192xf32>
    %60 = arith.mulf %56, %59 : vector<81x192xf32>
    %61 = arith.addf %52, %60 : vector<81x192xf32>
    %62 = vector.extract_strided_slice %24 {offsets = [0, 1280], sizes = [81, 192], strides = [1, 1]} : vector<81x1792xf32> to vector<81x192xf32>
    %cst_30 = arith.constant 0.000000e+00 : f32
    %63 = vector.broadcast %cst_30 : f32 to vector<2x192xf32>
    %64 = vector.extract_strided_slice %62 {offsets = [2, 0], sizes = [79, 192], strides = [1, 1]} : vector<81x192xf32> to vector<79x192xf32>
    %65 = tpu.concatenate %64, %63 in 0 : vector<79x192xf32>, vector<2x192xf32> -> vector<81x192xf32>
    %c5 = arith.constant 5 : index
    %c0_31 = arith.constant 0 : index
    %c0_32 = arith.constant 0 : index
    %66 = vector.load %arg13[%c5, %c0_31, %c0_32] : memref<7x81x1xf32, #tpu.memory_space<vmem>>, vector<1x81x1xf32>
    %67 = vector.shape_cast %66 : vector<1x81x1xf32> to vector<81x1xf32>
    %68 = vector.broadcast %67 : vector<81x1xf32> to vector<81x192xf32>
    %69 = arith.mulf %65, %68 : vector<81x192xf32>
    %70 = arith.addf %61, %69 : vector<81x192xf32>
    %71 = vector.extract_strided_slice %24 {offsets = [0, 1536], sizes = [81, 192], strides = [1, 1]} : vector<81x1792xf32> to vector<81x192xf32>
    %cst_33 = arith.constant 0.000000e+00 : f32
    %72 = vector.broadcast %cst_33 : f32 to vector<3x192xf32>
    %73 = vector.extract_strided_slice %71 {offsets = [3, 0], sizes = [78, 192], strides = [1, 1]} : vector<81x192xf32> to vector<78x192xf32>
    %74 = tpu.concatenate %73, %72 in 0 : vector<78x192xf32>, vector<3x192xf32> -> vector<81x192xf32>
    %c6 = arith.constant 6 : index
    %c0_34 = arith.constant 0 : index
    %c0_35 = arith.constant 0 : index
    %75 = vector.load %arg13[%c6, %c0_34, %c0_35] : memref<7x81x1xf32, #tpu.memory_space<vmem>>, vector<1x81x1xf32>
    %76 = vector.shape_cast %75 : vector<1x81x1xf32> to vector<81x1xf32>
    %77 = vector.broadcast %76 : vector<81x1xf32> to vector<81x192xf32>
    %78 = arith.mulf %74, %77 : vector<81x192xf32>
    %79 = arith.addf %70, %78 : vector<81x192xf32>
    %c0_36 = arith.constant 0 : index
    %c0_37 = arith.constant 0 : index
    %80 = vector.load %arg6[%c0_36, %c0_37] : memref<2x192xf32, #tpu.memory_space<vmem>>, vector<1x192xf32>
    %81 = vector.broadcast %80 : vector<1x192xf32> to vector<81x192xf32>
    %82 = arith.mulf %79, %81 : vector<81x192xf32>
    %c1_38 = arith.constant 1 : index
    %c0_39 = arith.constant 0 : index
    %83 = vector.load %arg6[%c1_38, %c0_39] : memref<2x192xf32, #tpu.memory_space<vmem>>, vector<1x192xf32>
    %84 = vector.broadcast %83 : vector<1x192xf32> to vector<81x192xf32>
    %85 = arith.addf %82, %84 : vector<81x192xf32>
    %cst_40 = arith.constant 0.000000e+00 : f32
    %86 = vector.broadcast %cst_40 : f32 to vector<81x192xf32>
    %87 = arith.maximumf %85, %86 : vector<81x192xf32>
    %88 = arith.truncf %87 : vector<81x192xf32> to vector<81x192xbf16>
    %c0_41 = arith.constant 0 : index
    %c0_42 = arith.constant 0 : index
    %89 = vector.load %arg7[%c0_41, %c0_42] : memref<192x1792xbf16, #tpu.memory_space<vmem>>, vector<192x1792xbf16>
    %cst_43 = arith.constant dense<0.000000e+00> : vector<81x1792xf32>
    %90 = tpu.matmul %88, %89, %cst_43 {dimension_numbers = #tpu.dot_dimension_numbers<[1], [0], [0], [1], [0, 0, 1, 1], [], []>} : vector<81x192xbf16>, vector<192x1792xbf16>, vector<81x1792xf32> -> vector<81x1792xf32>
    %91 = vector.extract_strided_slice %90 {offsets = [0, 768], sizes = [81, 192], strides = [1, 1]} : vector<81x1792xf32> to vector<81x192xf32>
    %92 = vector.extract_strided_slice %90 {offsets = [0, 0], sizes = [81, 192], strides = [1, 1]} : vector<81x1792xf32> to vector<81x192xf32>
    %cst_44 = arith.constant 0.000000e+00 : f32
    %93 = vector.broadcast %cst_44 : f32 to vector<27x192xf32>
    %94 = vector.extract_strided_slice %92 {offsets = [0, 0], sizes = [54, 192], strides = [1, 1]} : vector<81x192xf32> to vector<54x192xf32>
    %95 = tpu.concatenate %93, %94 in 0 : vector<27x192xf32>, vector<54x192xf32> -> vector<81x192xf32>
    %96 = arith.addf %91, %95 : vector<81x192xf32>
    %97 = vector.extract_strided_slice %90 {offsets = [0, 256], sizes = [81, 192], strides = [1, 1]} : vector<81x1792xf32> to vector<81x192xf32>
    %cst_45 = arith.constant 0.000000e+00 : f32
    %98 = vector.broadcast %cst_45 : f32 to vector<18x192xf32>
    %99 = vector.extract_strided_slice %97 {offsets = [0, 0], sizes = [63, 192], strides = [1, 1]} : vector<81x192xf32> to vector<63x192xf32>
    %100 = tpu.concatenate %98, %99 in 0 : vector<18x192xf32>, vector<63x192xf32> -> vector<81x192xf32>
    %101 = arith.addf %96, %100 : vector<81x192xf32>
    %102 = vector.extract_strided_slice %90 {offsets = [0, 512], sizes = [81, 192], strides = [1, 1]} : vector<81x1792xf32> to vector<81x192xf32>
    %cst_46 = arith.constant 0.000000e+00 : f32
    %103 = vector.broadcast %cst_46 : f32 to vector<9x192xf32>
    %104 = vector.extract_strided_slice %102 {offsets = [0, 0], sizes = [72, 192], strides = [1, 1]} : vector<81x192xf32> to vector<72x192xf32>
    %105 = tpu.concatenate %103, %104 in 0 : vector<9x192xf32>, vector<72x192xf32> -> vector<81x192xf32>
    %106 = arith.addf %101, %105 : vector<81x192xf32>
    %107 = vector.extract_strided_slice %90 {offsets = [0, 1024], sizes = [81, 192], strides = [1, 1]} : vector<81x1792xf32> to vector<81x192xf32>
    %cst_47 = arith.constant 0.000000e+00 : f32
    %108 = vector.broadcast %cst_47 : f32 to vector<9x192xf32>
    %109 = vector.extract_strided_slice %107 {offsets = [9, 0], sizes = [72, 192], strides = [1, 1]} : vector<81x192xf32> to vector<72x192xf32>
    %110 = tpu.concatenate %109, %108 in 0 : vector<72x192xf32>, vector<9x192xf32> -> vector<81x192xf32>
    %111 = arith.addf %106, %110 : vector<81x192xf32>
    %112 = vector.extract_strided_slice %90 {offsets = [0, 1280], sizes = [81, 192], strides = [1, 1]} : vector<81x1792xf32> to vector<81x192xf32>
    %cst_48 = arith.constant 0.000000e+00 : f32
    %113 = vector.broadcast %cst_48 : f32 to vector<18x192xf32>
    %114 = vector.extract_strided_slice %112 {offsets = [18, 0], sizes = [63, 192], strides = [1, 1]} : vector<81x192xf32> to vector<63x192xf32>
    %115 = tpu.concatenate %114, %113 in 0 : vector<63x192xf32>, vector<18x192xf32> -> vector<81x192xf32>
    %116 = arith.addf %111, %115 : vector<81x192xf32>
    %117 = vector.extract_strided_slice %90 {offsets = [0, 1536], sizes = [81, 192], strides = [1, 1]} : vector<81x1792xf32> to vector<81x192xf32>
    %cst_49 = arith.constant 0.000000e+00 : f32
    %118 = vector.broadcast %cst_49 : f32 to vector<27x192xf32>
    %119 = vector.extract_strided_slice %117 {offsets = [27, 0], sizes = [54, 192], strides = [1, 1]} : vector<81x192xf32> to vector<54x192xf32>
    %120 = tpu.concatenate %119, %118 in 0 : vector<54x192xf32>, vector<27x192xf32> -> vector<81x192xf32>
    %121 = arith.addf %116, %120 : vector<81x192xf32>
    %c0_50 = arith.constant 0 : index
    %c0_51 = arith.constant 0 : index
    %122 = vector.load %arg8[%c0_50, %c0_51] : memref<2x192xf32, #tpu.memory_space<vmem>>, vector<1x192xf32>
    %123 = vector.broadcast %122 : vector<1x192xf32> to vector<81x192xf32>
    %124 = arith.mulf %121, %123 : vector<81x192xf32>
    %c1_52 = arith.constant 1 : index
    %c0_53 = arith.constant 0 : index
    %125 = vector.load %arg8[%c1_52, %c0_53] : memref<2x192xf32, #tpu.memory_space<vmem>>, vector<1x192xf32>
    %126 = vector.broadcast %125 : vector<1x192xf32> to vector<81x192xf32>
    %127 = arith.addf %124, %126 : vector<81x192xf32>
    %cst_54 = arith.constant 0.000000e+00 : f32
    %128 = vector.broadcast %cst_54 : f32 to vector<81x192xf32>
    %129 = arith.maximumf %127, %128 : vector<81x192xf32>
    %130 = arith.truncf %12 : vector<81x192xf32> to vector<81x192xbf16>
    %c0_55 = arith.constant 0 : index
    %c0_56 = arith.constant 0 : index
    %c0_57 = arith.constant 0 : index
    %131 = vector.load %arg14[%c0_55, %c0_56, %c0_57] : memref<9x16x81xbf16, #tpu.memory_space<vmem>>, vector<1x16x81xbf16>
    %132 = vector.shape_cast %131 : vector<1x16x81xbf16> to vector<16x81xbf16>
    %cst_58 = arith.constant dense<0.000000e+00> : vector<16x192xf32>
    %133 = tpu.matmul %132, %130, %cst_58 {dimension_numbers = #tpu.dot_dimension_numbers<[1], [0], [0], [1], [0, 0, 1, 1], [], []>} : vector<16x81xbf16>, vector<81x192xbf16>, vector<16x192xf32> -> vector<16x192xf32>
    %134 = arith.truncf %133 : vector<16x192xf32> to vector<16x192xbf16>
    %c0_59 = arith.constant 0 : index
    %c0_60 = arith.constant 0 : index
    %c0_61 = arith.constant 0 : index
    %135 = vector.load %arg9[%c0_59, %c0_60, %c0_61] : memref<9x192x320xbf16, #tpu.memory_space<vmem>>, vector<1x192x320xbf16>
    %136 = vector.shape_cast %135 : vector<1x192x320xbf16> to vector<192x320xbf16>
    %cst_62 = arith.constant dense<0.000000e+00> : vector<16x320xf32>
    %137 = tpu.matmul %134, %136, %cst_62 {dimension_numbers = #tpu.dot_dimension_numbers<[1], [0], [0], [1], [0, 0, 1, 1], [], []>} : vector<16x192xbf16>, vector<192x320xbf16>, vector<16x320xf32> -> vector<16x320xf32>
    %c1_63 = arith.constant 1 : index
    %c0_64 = arith.constant 0 : index
    %c0_65 = arith.constant 0 : index
    %138 = vector.load %arg14[%c1_63, %c0_64, %c0_65] : memref<9x16x81xbf16, #tpu.memory_space<vmem>>, vector<1x16x81xbf16>
    %139 = vector.shape_cast %138 : vector<1x16x81xbf16> to vector<16x81xbf16>
    %cst_66 = arith.constant dense<0.000000e+00> : vector<16x192xf32>
    %140 = tpu.matmul %139, %130, %cst_66 {dimension_numbers = #tpu.dot_dimension_numbers<[1], [0], [0], [1], [0, 0, 1, 1], [], []>} : vector<16x81xbf16>, vector<81x192xbf16>, vector<16x192xf32> -> vector<16x192xf32>
    %141 = arith.truncf %140 : vector<16x192xf32> to vector<16x192xbf16>
    %c1_67 = arith.constant 1 : index
    %c0_68 = arith.constant 0 : index
    %c0_69 = arith.constant 0 : index
    %142 = vector.load %arg9[%c1_67, %c0_68, %c0_69] : memref<9x192x320xbf16, #tpu.memory_space<vmem>>, vector<1x192x320xbf16>
    %143 = vector.shape_cast %142 : vector<1x192x320xbf16> to vector<192x320xbf16>
    %cst_70 = arith.constant dense<0.000000e+00> : vector<16x320xf32>
    %144 = tpu.matmul %141, %143, %cst_70 {dimension_numbers = #tpu.dot_dimension_numbers<[1], [0], [0], [1], [0, 0, 1, 1], [], []>} : vector<16x192xbf16>, vector<192x320xbf16>, vector<16x320xf32> -> vector<16x320xf32>
    %145 = arith.addf %137, %144 : vector<16x320xf32>
    %c2_71 = arith.constant 2 : index
    %c0_72 = arith.constant 0 : index
    %c0_73 = arith.constant 0 : index
    %146 = vector.load %arg14[%c2_71, %c0_72, %c0_73] : memref<9x16x81xbf16, #tpu.memory_space<vmem>>, vector<1x16x81xbf16>
    %147 = vector.shape_cast %146 : vector<1x16x81xbf16> to vector<16x81xbf16>
    %cst_74 = arith.constant dense<0.000000e+00> : vector<16x192xf32>
    %148 = tpu.matmul %147, %130, %cst_74 {dimension_numbers = #tpu.dot_dimension_numbers<[1], [0], [0], [1], [0, 0, 1, 1], [], []>} : vector<16x81xbf16>, vector<81x192xbf16>, vector<16x192xf32> -> vector<16x192xf32>
    %149 = arith.truncf %148 : vector<16x192xf32> to vector<16x192xbf16>
    %c2_75 = arith.constant 2 : index
    %c0_76 = arith.constant 0 : index
    %c0_77 = arith.constant 0 : index
    %150 = vector.load %arg9[%c2_75, %c0_76, %c0_77] : memref<9x192x320xbf16, #tpu.memory_space<vmem>>, vector<1x192x320xbf16>
    %151 = vector.shape_cast %150 : vector<1x192x320xbf16> to vector<192x320xbf16>
    %cst_78 = arith.constant dense<0.000000e+00> : vector<16x320xf32>
    %152 = tpu.matmul %149, %151, %cst_78 {dimension_numbers = #tpu.dot_dimension_numbers<[1], [0], [0], [1], [0, 0, 1, 1], [], []>} : vector<16x192xbf16>, vector<192x320xbf16>, vector<16x320xf32> -> vector<16x320xf32>
    %153 = arith.addf %145, %152 : vector<16x320xf32>
    %c3 = arith.constant 3 : index
    %c0_79 = arith.constant 0 : index
    %c0_80 = arith.constant 0 : index
    %154 = vector.load %arg14[%c3, %c0_79, %c0_80] : memref<9x16x81xbf16, #tpu.memory_space<vmem>>, vector<1x16x81xbf16>
    %155 = vector.shape_cast %154 : vector<1x16x81xbf16> to vector<16x81xbf16>
    %cst_81 = arith.constant dense<0.000000e+00> : vector<16x192xf32>
    %156 = tpu.matmul %155, %130, %cst_81 {dimension_numbers = #tpu.dot_dimension_numbers<[1], [0], [0], [1], [0, 0, 1, 1], [], []>} : vector<16x81xbf16>, vector<81x192xbf16>, vector<16x192xf32> -> vector<16x192xf32>
    %157 = arith.truncf %156 : vector<16x192xf32> to vector<16x192xbf16>
    %c3_82 = arith.constant 3 : index
    %c0_83 = arith.constant 0 : index
    %c0_84 = arith.constant 0 : index
    %158 = vector.load %arg9[%c3_82, %c0_83, %c0_84] : memref<9x192x320xbf16, #tpu.memory_space<vmem>>, vector<1x192x320xbf16>
    %159 = vector.shape_cast %158 : vector<1x192x320xbf16> to vector<192x320xbf16>
    %cst_85 = arith.constant dense<0.000000e+00> : vector<16x320xf32>
    %160 = tpu.matmul %157, %159, %cst_85 {dimension_numbers = #tpu.dot_dimension_numbers<[1], [0], [0], [1], [0, 0, 1, 1], [], []>} : vector<16x192xbf16>, vector<192x320xbf16>, vector<16x320xf32> -> vector<16x320xf32>
    %161 = arith.addf %153, %160 : vector<16x320xf32>
    %c4_86 = arith.constant 4 : index
    %c0_87 = arith.constant 0 : index
    %c0_88 = arith.constant 0 : index
    %162 = vector.load %arg14[%c4_86, %c0_87, %c0_88] : memref<9x16x81xbf16, #tpu.memory_space<vmem>>, vector<1x16x81xbf16>
    %163 = vector.shape_cast %162 : vector<1x16x81xbf16> to vector<16x81xbf16>
    %cst_89 = arith.constant dense<0.000000e+00> : vector<16x192xf32>
    %164 = tpu.matmul %163, %130, %cst_89 {dimension_numbers = #tpu.dot_dimension_numbers<[1], [0], [0], [1], [0, 0, 1, 1], [], []>} : vector<16x81xbf16>, vector<81x192xbf16>, vector<16x192xf32> -> vector<16x192xf32>
    %165 = arith.truncf %164 : vector<16x192xf32> to vector<16x192xbf16>
    %c4_90 = arith.constant 4 : index
    %c0_91 = arith.constant 0 : index
    %c0_92 = arith.constant 0 : index
    %166 = vector.load %arg9[%c4_90, %c0_91, %c0_92] : memref<9x192x320xbf16, #tpu.memory_space<vmem>>, vector<1x192x320xbf16>
    %167 = vector.shape_cast %166 : vector<1x192x320xbf16> to vector<192x320xbf16>
    %cst_93 = arith.constant dense<0.000000e+00> : vector<16x320xf32>
    %168 = tpu.matmul %165, %167, %cst_93 {dimension_numbers = #tpu.dot_dimension_numbers<[1], [0], [0], [1], [0, 0, 1, 1], [], []>} : vector<16x192xbf16>, vector<192x320xbf16>, vector<16x320xf32> -> vector<16x320xf32>
    %169 = arith.addf %161, %168 : vector<16x320xf32>
    %c5_94 = arith.constant 5 : index
    %c0_95 = arith.constant 0 : index
    %c0_96 = arith.constant 0 : index
    %170 = vector.load %arg14[%c5_94, %c0_95, %c0_96] : memref<9x16x81xbf16, #tpu.memory_space<vmem>>, vector<1x16x81xbf16>
    %171 = vector.shape_cast %170 : vector<1x16x81xbf16> to vector<16x81xbf16>
    %cst_97 = arith.constant dense<0.000000e+00> : vector<16x192xf32>
    %172 = tpu.matmul %171, %130, %cst_97 {dimension_numbers = #tpu.dot_dimension_numbers<[1], [0], [0], [1], [0, 0, 1, 1], [], []>} : vector<16x81xbf16>, vector<81x192xbf16>, vector<16x192xf32> -> vector<16x192xf32>
    %173 = arith.truncf %172 : vector<16x192xf32> to vector<16x192xbf16>
    %c5_98 = arith.constant 5 : index
    %c0_99 = arith.constant 0 : index
    %c0_100 = arith.constant 0 : index
    %174 = vector.load %arg9[%c5_98, %c0_99, %c0_100] : memref<9x192x320xbf16, #tpu.memory_space<vmem>>, vector<1x192x320xbf16>
    %175 = vector.shape_cast %174 : vector<1x192x320xbf16> to vector<192x320xbf16>
    %cst_101 = arith.constant dense<0.000000e+00> : vector<16x320xf32>
    %176 = tpu.matmul %173, %175, %cst_101 {dimension_numbers = #tpu.dot_dimension_numbers<[1], [0], [0], [1], [0, 0, 1, 1], [], []>} : vector<16x192xbf16>, vector<192x320xbf16>, vector<16x320xf32> -> vector<16x320xf32>
    %177 = arith.addf %169, %176 : vector<16x320xf32>
    %c6_102 = arith.constant 6 : index
    %c0_103 = arith.constant 0 : index
    %c0_104 = arith.constant 0 : index
    %178 = vector.load %arg14[%c6_102, %c0_103, %c0_104] : memref<9x16x81xbf16, #tpu.memory_space<vmem>>, vector<1x16x81xbf16>
    %179 = vector.shape_cast %178 : vector<1x16x81xbf16> to vector<16x81xbf16>
    %cst_105 = arith.constant dense<0.000000e+00> : vector<16x192xf32>
    %180 = tpu.matmul %179, %130, %cst_105 {dimension_numbers = #tpu.dot_dimension_numbers<[1], [0], [0], [1], [0, 0, 1, 1], [], []>} : vector<16x81xbf16>, vector<81x192xbf16>, vector<16x192xf32> -> vector<16x192xf32>
    %181 = arith.truncf %180 : vector<16x192xf32> to vector<16x192xbf16>
    %c6_106 = arith.constant 6 : index
    %c0_107 = arith.constant 0 : index
    %c0_108 = arith.constant 0 : index
    %182 = vector.load %arg9[%c6_106, %c0_107, %c0_108] : memref<9x192x320xbf16, #tpu.memory_space<vmem>>, vector<1x192x320xbf16>
    %183 = vector.shape_cast %182 : vector<1x192x320xbf16> to vector<192x320xbf16>
    %cst_109 = arith.constant dense<0.000000e+00> : vector<16x320xf32>
    %184 = tpu.matmul %181, %183, %cst_109 {dimension_numbers = #tpu.dot_dimension_numbers<[1], [0], [0], [1], [0, 0, 1, 1], [], []>} : vector<16x192xbf16>, vector<192x320xbf16>, vector<16x320xf32> -> vector<16x320xf32>
    %185 = arith.addf %177, %184 : vector<16x320xf32>
    %c7 = arith.constant 7 : index
    %c0_110 = arith.constant 0 : index
    %c0_111 = arith.constant 0 : index
    %186 = vector.load %arg14[%c7, %c0_110, %c0_111] : memref<9x16x81xbf16, #tpu.memory_space<vmem>>, vector<1x16x81xbf16>
    %187 = vector.shape_cast %186 : vector<1x16x81xbf16> to vector<16x81xbf16>
    %cst_112 = arith.constant dense<0.000000e+00> : vector<16x192xf32>
    %188 = tpu.matmul %187, %130, %cst_112 {dimension_numbers = #tpu.dot_dimension_numbers<[1], [0], [0], [1], [0, 0, 1, 1], [], []>} : vector<16x81xbf16>, vector<81x192xbf16>, vector<16x192xf32> -> vector<16x192xf32>
    %189 = arith.truncf %188 : vector<16x192xf32> to vector<16x192xbf16>
    %c7_113 = arith.constant 7 : index
    %c0_114 = arith.constant 0 : index
    %c0_115 = arith.constant 0 : index
    %190 = vector.load %arg9[%c7_113, %c0_114, %c0_115] : memref<9x192x320xbf16, #tpu.memory_space<vmem>>, vector<1x192x320xbf16>
    %191 = vector.shape_cast %190 : vector<1x192x320xbf16> to vector<192x320xbf16>
    %cst_116 = arith.constant dense<0.000000e+00> : vector<16x320xf32>
    %192 = tpu.matmul %189, %191, %cst_116 {dimension_numbers = #tpu.dot_dimension_numbers<[1], [0], [0], [1], [0, 0, 1, 1], [], []>} : vector<16x192xbf16>, vector<192x320xbf16>, vector<16x320xf32> -> vector<16x320xf32>
    %193 = arith.addf %185, %192 : vector<16x320xf32>
    %c8 = arith.constant 8 : index
    %c0_117 = arith.constant 0 : index
    %c0_118 = arith.constant 0 : index
    %194 = vector.load %arg14[%c8, %c0_117, %c0_118] : memref<9x16x81xbf16, #tpu.memory_space<vmem>>, vector<1x16x81xbf16>
    %195 = vector.shape_cast %194 : vector<1x16x81xbf16> to vector<16x81xbf16>
    %cst_119 = arith.constant dense<0.000000e+00> : vector<16x192xf32>
    %196 = tpu.matmul %195, %130, %cst_119 {dimension_numbers = #tpu.dot_dimension_numbers<[1], [0], [0], [1], [0, 0, 1, 1], [], []>} : vector<16x81xbf16>, vector<81x192xbf16>, vector<16x192xf32> -> vector<16x192xf32>
    %197 = arith.truncf %196 : vector<16x192xf32> to vector<16x192xbf16>
    %c8_120 = arith.constant 8 : index
    %c0_121 = arith.constant 0 : index
    %c0_122 = arith.constant 0 : index
    %198 = vector.load %arg9[%c8_120, %c0_121, %c0_122] : memref<9x192x320xbf16, #tpu.memory_space<vmem>>, vector<1x192x320xbf16>
    %199 = vector.shape_cast %198 : vector<1x192x320xbf16> to vector<192x320xbf16>
    %cst_123 = arith.constant dense<0.000000e+00> : vector<16x320xf32>
    %200 = tpu.matmul %197, %199, %cst_123 {dimension_numbers = #tpu.dot_dimension_numbers<[1], [0], [0], [1], [0, 0, 1, 1], [], []>} : vector<16x192xbf16>, vector<192x320xbf16>, vector<16x320xf32> -> vector<16x320xf32>
    %201 = arith.addf %193, %200 : vector<16x320xf32>
    %c0_124 = arith.constant 0 : index
    %c0_125 = arith.constant 0 : index
    %202 = vector.load %arg10[%c0_124, %c0_125] : memref<2x320xf32, #tpu.memory_space<vmem>>, vector<1x320xf32>
    %203 = vector.broadcast %202 : vector<1x320xf32> to vector<16x320xf32>
    %204 = arith.mulf %201, %203 : vector<16x320xf32>
    %c1_126 = arith.constant 1 : index
    %c0_127 = arith.constant 0 : index
    %205 = vector.load %arg10[%c1_126, %c0_127] : memref<2x320xf32, #tpu.memory_space<vmem>>, vector<1x320xf32>
    %206 = vector.broadcast %205 : vector<1x320xf32> to vector<16x320xf32>
    %207 = arith.addf %204, %206 : vector<16x320xf32>
    %cst_128 = arith.constant 0.000000e+00 : f32
    %208 = vector.broadcast %cst_128 : f32 to vector<16x320xf32>
    %209 = arith.maximumf %207, %208 : vector<16x320xf32>
    %210 = arith.truncf %129 : vector<81x192xf32> to vector<81x192xbf16>
    %c0_129 = arith.constant 0 : index
    %c0_130 = arith.constant 0 : index
    %c0_131 = arith.constant 0 : index
    %211 = vector.load %arg14[%c0_129, %c0_130, %c0_131] : memref<9x16x81xbf16, #tpu.memory_space<vmem>>, vector<1x16x81xbf16>
    %212 = vector.shape_cast %211 : vector<1x16x81xbf16> to vector<16x81xbf16>
    %cst_132 = arith.constant dense<0.000000e+00> : vector<16x192xf32>
    %213 = tpu.matmul %212, %210, %cst_132 {dimension_numbers = #tpu.dot_dimension_numbers<[1], [0], [0], [1], [0, 0, 1, 1], [], []>} : vector<16x81xbf16>, vector<81x192xbf16>, vector<16x192xf32> -> vector<16x192xf32>
    %214 = arith.truncf %213 : vector<16x192xf32> to vector<16x192xbf16>
    %c0_133 = arith.constant 0 : index
    %c0_134 = arith.constant 0 : index
    %c0_135 = arith.constant 0 : index
    %215 = vector.load %arg11[%c0_133, %c0_134, %c0_135] : memref<9x192x192xbf16, #tpu.memory_space<vmem>>, vector<1x192x192xbf16>
    %216 = vector.shape_cast %215 : vector<1x192x192xbf16> to vector<192x192xbf16>
    %cst_136 = arith.constant dense<0.000000e+00> : vector<16x192xf32>
    %217 = tpu.matmul %214, %216, %cst_136 {dimension_numbers = #tpu.dot_dimension_numbers<[1], [0], [0], [1], [0, 0, 1, 1], [], []>} : vector<16x192xbf16>, vector<192x192xbf16>, vector<16x192xf32> -> vector<16x192xf32>
    %c1_137 = arith.constant 1 : index
    %c0_138 = arith.constant 0 : index
    %c0_139 = arith.constant 0 : index
    %218 = vector.load %arg14[%c1_137, %c0_138, %c0_139] : memref<9x16x81xbf16, #tpu.memory_space<vmem>>, vector<1x16x81xbf16>
    %219 = vector.shape_cast %218 : vector<1x16x81xbf16> to vector<16x81xbf16>
    %cst_140 = arith.constant dense<0.000000e+00> : vector<16x192xf32>
    %220 = tpu.matmul %219, %210, %cst_140 {dimension_numbers = #tpu.dot_dimension_numbers<[1], [0], [0], [1], [0, 0, 1, 1], [], []>} : vector<16x81xbf16>, vector<81x192xbf16>, vector<16x192xf32> -> vector<16x192xf32>
    %221 = arith.truncf %220 : vector<16x192xf32> to vector<16x192xbf16>
    %c1_141 = arith.constant 1 : index
    %c0_142 = arith.constant 0 : index
    %c0_143 = arith.constant 0 : index
    %222 = vector.load %arg11[%c1_141, %c0_142, %c0_143] : memref<9x192x192xbf16, #tpu.memory_space<vmem>>, vector<1x192x192xbf16>
    %223 = vector.shape_cast %222 : vector<1x192x192xbf16> to vector<192x192xbf16>
    %cst_144 = arith.constant dense<0.000000e+00> : vector<16x192xf32>
    %224 = tpu.matmul %221, %223, %cst_144 {dimension_numbers = #tpu.dot_dimension_numbers<[1], [0], [0], [1], [0, 0, 1, 1], [], []>} : vector<16x192xbf16>, vector<192x192xbf16>, vector<16x192xf32> -> vector<16x192xf32>
    %225 = arith.addf %217, %224 : vector<16x192xf32>
    %c2_145 = arith.constant 2 : index
    %c0_146 = arith.constant 0 : index
    %c0_147 = arith.constant 0 : index
    %226 = vector.load %arg14[%c2_145, %c0_146, %c0_147] : memref<9x16x81xbf16, #tpu.memory_space<vmem>>, vector<1x16x81xbf16>
    %227 = vector.shape_cast %226 : vector<1x16x81xbf16> to vector<16x81xbf16>
    %cst_148 = arith.constant dense<0.000000e+00> : vector<16x192xf32>
    %228 = tpu.matmul %227, %210, %cst_148 {dimension_numbers = #tpu.dot_dimension_numbers<[1], [0], [0], [1], [0, 0, 1, 1], [], []>} : vector<16x81xbf16>, vector<81x192xbf16>, vector<16x192xf32> -> vector<16x192xf32>
    %229 = arith.truncf %228 : vector<16x192xf32> to vector<16x192xbf16>
    %c2_149 = arith.constant 2 : index
    %c0_150 = arith.constant 0 : index
    %c0_151 = arith.constant 0 : index
    %230 = vector.load %arg11[%c2_149, %c0_150, %c0_151] : memref<9x192x192xbf16, #tpu.memory_space<vmem>>, vector<1x192x192xbf16>
    %231 = vector.shape_cast %230 : vector<1x192x192xbf16> to vector<192x192xbf16>
    %cst_152 = arith.constant dense<0.000000e+00> : vector<16x192xf32>
    %232 = tpu.matmul %229, %231, %cst_152 {dimension_numbers = #tpu.dot_dimension_numbers<[1], [0], [0], [1], [0, 0, 1, 1], [], []>} : vector<16x192xbf16>, vector<192x192xbf16>, vector<16x192xf32> -> vector<16x192xf32>
    %233 = arith.addf %225, %232 : vector<16x192xf32>
    %c3_153 = arith.constant 3 : index
    %c0_154 = arith.constant 0 : index
    %c0_155 = arith.constant 0 : index
    %234 = vector.load %arg14[%c3_153, %c0_154, %c0_155] : memref<9x16x81xbf16, #tpu.memory_space<vmem>>, vector<1x16x81xbf16>
    %235 = vector.shape_cast %234 : vector<1x16x81xbf16> to vector<16x81xbf16>
    %cst_156 = arith.constant dense<0.000000e+00> : vector<16x192xf32>
    %236 = tpu.matmul %235, %210, %cst_156 {dimension_numbers = #tpu.dot_dimension_numbers<[1], [0], [0], [1], [0, 0, 1, 1], [], []>} : vector<16x81xbf16>, vector<81x192xbf16>, vector<16x192xf32> -> vector<16x192xf32>
    %237 = arith.truncf %236 : vector<16x192xf32> to vector<16x192xbf16>
    %c3_157 = arith.constant 3 : index
    %c0_158 = arith.constant 0 : index
    %c0_159 = arith.constant 0 : index
    %238 = vector.load %arg11[%c3_157, %c0_158, %c0_159] : memref<9x192x192xbf16, #tpu.memory_space<vmem>>, vector<1x192x192xbf16>
    %239 = vector.shape_cast %238 : vector<1x192x192xbf16> to vector<192x192xbf16>
    %cst_160 = arith.constant dense<0.000000e+00> : vector<16x192xf32>
    %240 = tpu.matmul %237, %239, %cst_160 {dimension_numbers = #tpu.dot_dimension_numbers<[1], [0], [0], [1], [0, 0, 1, 1], [], []>} : vector<16x192xbf16>, vector<192x192xbf16>, vector<16x192xf32> -> vector<16x192xf32>
    %241 = arith.addf %233, %240 : vector<16x192xf32>
    %c4_161 = arith.constant 4 : index
    %c0_162 = arith.constant 0 : index
    %c0_163 = arith.constant 0 : index
    %242 = vector.load %arg14[%c4_161, %c0_162, %c0_163] : memref<9x16x81xbf16, #tpu.memory_space<vmem>>, vector<1x16x81xbf16>
    %243 = vector.shape_cast %242 : vector<1x16x81xbf16> to vector<16x81xbf16>
    %cst_164 = arith.constant dense<0.000000e+00> : vector<16x192xf32>
    %244 = tpu.matmul %243, %210, %cst_164 {dimension_numbers = #tpu.dot_dimension_numbers<[1], [0], [0], [1], [0, 0, 1, 1], [], []>} : vector<16x81xbf16>, vector<81x192xbf16>, vector<16x192xf32> -> vector<16x192xf32>
    %245 = arith.truncf %244 : vector<16x192xf32> to vector<16x192xbf16>
    %c4_165 = arith.constant 4 : index
    %c0_166 = arith.constant 0 : index
    %c0_167 = arith.constant 0 : index
    %246 = vector.load %arg11[%c4_165, %c0_166, %c0_167] : memref<9x192x192xbf16, #tpu.memory_space<vmem>>, vector<1x192x192xbf16>
    %247 = vector.shape_cast %246 : vector<1x192x192xbf16> to vector<192x192xbf16>
    %cst_168 = arith.constant dense<0.000000e+00> : vector<16x192xf32>
    %248 = tpu.matmul %245, %247, %cst_168 {dimension_numbers = #tpu.dot_dimension_numbers<[1], [0], [0], [1], [0, 0, 1, 1], [], []>} : vector<16x192xbf16>, vector<192x192xbf16>, vector<16x192xf32> -> vector<16x192xf32>
    %249 = arith.addf %241, %248 : vector<16x192xf32>
    %c5_169 = arith.constant 5 : index
    %c0_170 = arith.constant 0 : index
    %c0_171 = arith.constant 0 : index
    %250 = vector.load %arg14[%c5_169, %c0_170, %c0_171] : memref<9x16x81xbf16, #tpu.memory_space<vmem>>, vector<1x16x81xbf16>
    %251 = vector.shape_cast %250 : vector<1x16x81xbf16> to vector<16x81xbf16>
    %cst_172 = arith.constant dense<0.000000e+00> : vector<16x192xf32>
    %252 = tpu.matmul %251, %210, %cst_172 {dimension_numbers = #tpu.dot_dimension_numbers<[1], [0], [0], [1], [0, 0, 1, 1], [], []>} : vector<16x81xbf16>, vector<81x192xbf16>, vector<16x192xf32> -> vector<16x192xf32>
    %253 = arith.truncf %252 : vector<16x192xf32> to vector<16x192xbf16>
    %c5_173 = arith.constant 5 : index
    %c0_174 = arith.constant 0 : index
    %c0_175 = arith.constant 0 : index
    %254 = vector.load %arg11[%c5_173, %c0_174, %c0_175] : memref<9x192x192xbf16, #tpu.memory_space<vmem>>, vector<1x192x192xbf16>
    %255 = vector.shape_cast %254 : vector<1x192x192xbf16> to vector<192x192xbf16>
    %cst_176 = arith.constant dense<0.000000e+00> : vector<16x192xf32>
    %256 = tpu.matmul %253, %255, %cst_176 {dimension_numbers = #tpu.dot_dimension_numbers<[1], [0], [0], [1], [0, 0, 1, 1], [], []>} : vector<16x192xbf16>, vector<192x192xbf16>, vector<16x192xf32> -> vector<16x192xf32>
    %257 = arith.addf %249, %256 : vector<16x192xf32>
    %c6_177 = arith.constant 6 : index
    %c0_178 = arith.constant 0 : index
    %c0_179 = arith.constant 0 : index
    %258 = vector.load %arg14[%c6_177, %c0_178, %c0_179] : memref<9x16x81xbf16, #tpu.memory_space<vmem>>, vector<1x16x81xbf16>
    %259 = vector.shape_cast %258 : vector<1x16x81xbf16> to vector<16x81xbf16>
    %cst_180 = arith.constant dense<0.000000e+00> : vector<16x192xf32>
    %260 = tpu.matmul %259, %210, %cst_180 {dimension_numbers = #tpu.dot_dimension_numbers<[1], [0], [0], [1], [0, 0, 1, 1], [], []>} : vector<16x81xbf16>, vector<81x192xbf16>, vector<16x192xf32> -> vector<16x192xf32>
    %261 = arith.truncf %260 : vector<16x192xf32> to vector<16x192xbf16>
    %c6_181 = arith.constant 6 : index
    %c0_182 = arith.constant 0 : index
    %c0_183 = arith.constant 0 : index
    %262 = vector.load %arg11[%c6_181, %c0_182, %c0_183] : memref<9x192x192xbf16, #tpu.memory_space<vmem>>, vector<1x192x192xbf16>
    %263 = vector.shape_cast %262 : vector<1x192x192xbf16> to vector<192x192xbf16>
    %cst_184 = arith.constant dense<0.000000e+00> : vector<16x192xf32>
    %264 = tpu.matmul %261, %263, %cst_184 {dimension_numbers = #tpu.dot_dimension_numbers<[1], [0], [0], [1], [0, 0, 1, 1], [], []>} : vector<16x192xbf16>, vector<192x192xbf16>, vector<16x192xf32> -> vector<16x192xf32>
    %265 = arith.addf %257, %264 : vector<16x192xf32>
    %c7_185 = arith.constant 7 : index
    %c0_186 = arith.constant 0 : index
    %c0_187 = arith.constant 0 : index
    %266 = vector.load %arg14[%c7_185, %c0_186, %c0_187] : memref<9x16x81xbf16, #tpu.memory_space<vmem>>, vector<1x16x81xbf16>
    %267 = vector.shape_cast %266 : vector<1x16x81xbf16> to vector<16x81xbf16>
    %cst_188 = arith.constant dense<0.000000e+00> : vector<16x192xf32>
    %268 = tpu.matmul %267, %210, %cst_188 {dimension_numbers = #tpu.dot_dimension_numbers<[1], [0], [0], [1], [0, 0, 1, 1], [], []>} : vector<16x81xbf16>, vector<81x192xbf16>, vector<16x192xf32> -> vector<16x192xf32>
    %269 = arith.truncf %268 : vector<16x192xf32> to vector<16x192xbf16>
    %c7_189 = arith.constant 7 : index
    %c0_190 = arith.constant 0 : index
    %c0_191 = arith.constant 0 : index
    %270 = vector.load %arg11[%c7_189, %c0_190, %c0_191] : memref<9x192x192xbf16, #tpu.memory_space<vmem>>, vector<1x192x192xbf16>
    %271 = vector.shape_cast %270 : vector<1x192x192xbf16> to vector<192x192xbf16>
    %cst_192 = arith.constant dense<0.000000e+00> : vector<16x192xf32>
    %272 = tpu.matmul %269, %271, %cst_192 {dimension_numbers = #tpu.dot_dimension_numbers<[1], [0], [0], [1], [0, 0, 1, 1], [], []>} : vector<16x192xbf16>, vector<192x192xbf16>, vector<16x192xf32> -> vector<16x192xf32>
    %273 = arith.addf %265, %272 : vector<16x192xf32>
    %c8_193 = arith.constant 8 : index
    %c0_194 = arith.constant 0 : index
    %c0_195 = arith.constant 0 : index
    %274 = vector.load %arg14[%c8_193, %c0_194, %c0_195] : memref<9x16x81xbf16, #tpu.memory_space<vmem>>, vector<1x16x81xbf16>
    %275 = vector.shape_cast %274 : vector<1x16x81xbf16> to vector<16x81xbf16>
    %cst_196 = arith.constant dense<0.000000e+00> : vector<16x192xf32>
    %276 = tpu.matmul %275, %210, %cst_196 {dimension_numbers = #tpu.dot_dimension_numbers<[1], [0], [0], [1], [0, 0, 1, 1], [], []>} : vector<16x81xbf16>, vector<81x192xbf16>, vector<16x192xf32> -> vector<16x192xf32>
    %277 = arith.truncf %276 : vector<16x192xf32> to vector<16x192xbf16>
    %c8_197 = arith.constant 8 : index
    %c0_198 = arith.constant 0 : index
    %c0_199 = arith.constant 0 : index
    %278 = vector.load %arg11[%c8_197, %c0_198, %c0_199] : memref<9x192x192xbf16, #tpu.memory_space<vmem>>, vector<1x192x192xbf16>
    %279 = vector.shape_cast %278 : vector<1x192x192xbf16> to vector<192x192xbf16>
    %cst_200 = arith.constant dense<0.000000e+00> : vector<16x192xf32>
    %280 = tpu.matmul %277, %279, %cst_200 {dimension_numbers = #tpu.dot_dimension_numbers<[1], [0], [0], [1], [0, 0, 1, 1], [], []>} : vector<16x192xbf16>, vector<192x192xbf16>, vector<16x192xf32> -> vector<16x192xf32>
    %281 = arith.addf %273, %280 : vector<16x192xf32>
    %c0_201 = arith.constant 0 : index
    %c0_202 = arith.constant 0 : index
    %282 = vector.load %arg12[%c0_201, %c0_202] : memref<2x192xf32, #tpu.memory_space<vmem>>, vector<1x192xf32>
    %283 = vector.broadcast %282 : vector<1x192xf32> to vector<16x192xf32>
    %284 = arith.mulf %281, %283 : vector<16x192xf32>
    %c1_203 = arith.constant 1 : index
    %c0_204 = arith.constant 0 : index
    %285 = vector.load %arg12[%c1_203, %c0_204] : memref<2x192xf32, #tpu.memory_space<vmem>>, vector<1x192xf32>
    %286 = vector.broadcast %285 : vector<1x192xf32> to vector<16x192xf32>
    %287 = arith.addf %284, %286 : vector<16x192xf32>
    %cst_205 = arith.constant 0.000000e+00 : f32
    %288 = vector.broadcast %cst_205 : f32 to vector<16x192xf32>
    %289 = arith.maximumf %287, %288 : vector<16x192xf32>
    %290 = arith.extf %1 : vector<81x32xbf16> to vector<81x32xf32>
    %cst_206 = arith.constant 0.000000e+00 : f32
    %291 = vector.broadcast %cst_206 : f32 to vector<1x32xf32>
    %292 = vector.extract_strided_slice %290 {offsets = [1, 0], sizes = [80, 32], strides = [1, 1]} : vector<81x32xf32> to vector<80x32xf32>
    %293 = tpu.concatenate %292, %291 in 0 : vector<80x32xf32>, vector<1x32xf32> -> vector<81x32xf32>
    %294 = arith.maximumf %290, %293 : vector<81x32xf32>
    %cst_207 = arith.constant 0.000000e+00 : f32
    %295 = vector.broadcast %cst_207 : f32 to vector<2x32xf32>
    %296 = vector.extract_strided_slice %290 {offsets = [2, 0], sizes = [79, 32], strides = [1, 1]} : vector<81x32xf32> to vector<79x32xf32>
    %297 = tpu.concatenate %296, %295 in 0 : vector<79x32xf32>, vector<2x32xf32> -> vector<81x32xf32>
    %298 = arith.maximumf %294, %297 : vector<81x32xf32>
    %cst_208 = arith.constant 0.000000e+00 : f32
    %299 = vector.broadcast %cst_208 : f32 to vector<9x32xf32>
    %300 = vector.extract_strided_slice %290 {offsets = [9, 0], sizes = [72, 32], strides = [1, 1]} : vector<81x32xf32> to vector<72x32xf32>
    %301 = tpu.concatenate %300, %299 in 0 : vector<72x32xf32>, vector<9x32xf32> -> vector<81x32xf32>
    %302 = arith.maximumf %298, %301 : vector<81x32xf32>
    %cst_209 = arith.constant 0.000000e+00 : f32
    %303 = vector.broadcast %cst_209 : f32 to vector<10x32xf32>
    %304 = vector.extract_strided_slice %290 {offsets = [10, 0], sizes = [71, 32], strides = [1, 1]} : vector<81x32xf32> to vector<71x32xf32>
    %305 = tpu.concatenate %304, %303 in 0 : vector<71x32xf32>, vector<10x32xf32> -> vector<81x32xf32>
    %306 = arith.maximumf %302, %305 : vector<81x32xf32>
    %cst_210 = arith.constant 0.000000e+00 : f32
    %307 = vector.broadcast %cst_210 : f32 to vector<11x32xf32>
    %308 = vector.extract_strided_slice %290 {offsets = [11, 0], sizes = [70, 32], strides = [1, 1]} : vector<81x32xf32> to vector<70x32xf32>
    %309 = tpu.concatenate %308, %307 in 0 : vector<70x32xf32>, vector<11x32xf32> -> vector<81x32xf32>
    %310 = arith.maximumf %306, %309 : vector<81x32xf32>
    %cst_211 = arith.constant 0.000000e+00 : f32
    %311 = vector.broadcast %cst_211 : f32 to vector<18x32xf32>
    %312 = vector.extract_strided_slice %290 {offsets = [18, 0], sizes = [63, 32], strides = [1, 1]} : vector<81x32xf32> to vector<63x32xf32>
    %313 = tpu.concatenate %312, %311 in 0 : vector<63x32xf32>, vector<18x32xf32> -> vector<81x32xf32>
    %314 = arith.maximumf %310, %313 : vector<81x32xf32>
    %cst_212 = arith.constant 0.000000e+00 : f32
    %315 = vector.broadcast %cst_212 : f32 to vector<19x32xf32>
    %316 = vector.extract_strided_slice %290 {offsets = [19, 0], sizes = [62, 32], strides = [1, 1]} : vector<81x32xf32> to vector<62x32xf32>
    %317 = tpu.concatenate %316, %315 in 0 : vector<62x32xf32>, vector<19x32xf32> -> vector<81x32xf32>
    %318 = arith.maximumf %314, %317 : vector<81x32xf32>
    %cst_213 = arith.constant 0.000000e+00 : f32
    %319 = vector.broadcast %cst_213 : f32 to vector<20x32xf32>
    %320 = vector.extract_strided_slice %290 {offsets = [20, 0], sizes = [61, 32], strides = [1, 1]} : vector<81x32xf32> to vector<61x32xf32>
    %321 = tpu.concatenate %320, %319 in 0 : vector<61x32xf32>, vector<20x32xf32> -> vector<81x32xf32>
    %322 = arith.maximumf %318, %321 : vector<81x32xf32>
    %c0_214 = arith.constant 0 : index
    %c0_215 = arith.constant 0 : index
    %c0_216 = arith.constant 0 : index
    %323 = vector.load %arg14[%c0_214, %c0_215, %c0_216] : memref<9x16x81xbf16, #tpu.memory_space<vmem>>, vector<1x16x81xbf16>
    %324 = vector.shape_cast %323 : vector<1x16x81xbf16> to vector<16x81xbf16>
    %325 = arith.truncf %322 : vector<81x32xf32> to vector<81x32xbf16>
    %cst_217 = arith.constant dense<0.000000e+00> : vector<16x32xf32>
    %326 = tpu.matmul %324, %325, %cst_217 {dimension_numbers = #tpu.dot_dimension_numbers<[1], [0], [0], [1], [0, 0, 1, 1], [], []>} : vector<16x81xbf16>, vector<81x32xbf16>, vector<16x32xf32> -> vector<16x32xf32>
    %c0_218 = arith.constant 0 : index
    %c0_219 = arith.constant 0 : index
    %c0_220 = arith.constant 0 : index
    %327 = vector.load %arg15[%c0_218, %c0_219, %c0_220] : memref<1x16x544xf32, #tpu.memory_space<vmem>>, vector<1x16x320xf32>
    %328 = vector.shape_cast %327 : vector<1x16x320xf32> to vector<16x320xf32>
    %329 = vector.shape_cast %209 : vector<16x320xf32> to vector<1x16x320xf32>
    tpu.vector_store %arg15[%c0_218, %c0_219, %c0_220], %329 {strides = array<i32>} : memref<1x16x544xf32, #tpu.memory_space<vmem>>, vector<1x16x320xf32>,
    %c0_221 = arith.constant 0 : index
    %c0_222 = arith.constant 0 : index
    %c320 = arith.constant 320 : index
    %330 = vector.load %arg15[%c0_221, %c0_222, %c320] : memref<1x16x544xf32, #tpu.memory_space<vmem>>, vector<1x16x192xf32>
    %331 = vector.shape_cast %330 : vector<1x16x192xf32> to vector<16x192xf32>
    %332 = vector.shape_cast %289 : vector<16x192xf32> to vector<1x16x192xf32>
    tpu.vector_store %arg15[%c0_221, %c0_222, %c320], %332 {strides = array<i32>} : memref<1x16x544xf32, #tpu.memory_space<vmem>>, vector<1x16x192xf32>,
    %c0_223 = arith.constant 0 : index
    %c0_224 = arith.constant 0 : index
    %c512 = arith.constant 512 : index
    %333 = vector.load %arg15[%c0_223, %c0_224, %c512] : memref<1x16x544xf32, #tpu.memory_space<vmem>>, vector<1x16x32xf32>
    %334 = vector.shape_cast %333 : vector<1x16x32xf32> to vector<16x32xf32>
    %335 = vector.shape_cast %326 : vector<16x32xf32> to vector<1x16x32xf32>
    tpu.vector_store %arg15[%c0_223, %c0_224, %c512], %335 {strides = array<i32>} : memref<1x16x544xf32, #tpu.memory_space<vmem>>, vector<1x16x32xf32>,
    return
  }
  func.func @transform_0(%arg0: i32) -> (i32, i32, i32) {
    %c0_i32 = arith.constant 0 : i32
    %c0_i32_0 = arith.constant 0 : i32
    %c0_i32_1 = arith.constant 0 : i32
    return %arg0, %c0_i32, %c0_i32_0 : i32, i32, i32
  }
  func.func @transform_1(%arg0: i32) -> (i32, i32) {
    %c0_i32 = arith.constant 0 : i32
    %c0_i32_0 = arith.constant 0 : i32
    %c0_i32_1 = arith.constant 0 : i32
    return %c0_i32, %c0_i32_0 : i32, i32
  }
  func.func @transform_2(%arg0: i32) -> (i32, i32) {
    %c0_i32 = arith.constant 0 : i32
    %c0_i32_0 = arith.constant 0 : i32
    %c0_i32_1 = arith.constant 0 : i32
    return %c0_i32, %c0_i32_0 : i32, i32
  }
  func.func @transform_3(%arg0: i32) -> (i32, i32) {
    %c0_i32 = arith.constant 0 : i32
    %c0_i32_0 = arith.constant 0 : i32
    %c0_i32_1 = arith.constant 0 : i32
    return %c0_i32, %c0_i32_0 : i32, i32
  }
  func.func @transform_4(%arg0: i32) -> (i32, i32) {
    %c0_i32 = arith.constant 0 : i32
    %c0_i32_0 = arith.constant 0 : i32
    %c0_i32_1 = arith.constant 0 : i32
    return %c0_i32, %c0_i32_0 : i32, i32
  }
  func.func @transform_5(%arg0: i32) -> (i32, i32) {
    %c0_i32 = arith.constant 0 : i32
    %c0_i32_0 = arith.constant 0 : i32
    %c0_i32_1 = arith.constant 0 : i32
    return %c0_i32, %c0_i32_0 : i32, i32
  }
  func.func @transform_6(%arg0: i32) -> (i32, i32) {
    %c0_i32 = arith.constant 0 : i32
    %c0_i32_0 = arith.constant 0 : i32
    %c0_i32_1 = arith.constant 0 : i32
    return %c0_i32, %c0_i32_0 : i32, i32
  }
  func.func @transform_7(%arg0: i32) -> (i32, i32) {
    %c0_i32 = arith.constant 0 : i32
    %c0_i32_0 = arith.constant 0 : i32
    %c0_i32_1 = arith.constant 0 : i32
    return %c0_i32, %c0_i32_0 : i32, i32
  }
  func.func @transform_8(%arg0: i32) -> (i32, i32, i32) {
    %c0_i32 = arith.constant 0 : i32
    %c0_i32_0 = arith.constant 0 : i32
    %c0_i32_1 = arith.constant 0 : i32
    %c0_i32_2 = arith.constant 0 : i32
    return %c0_i32, %c0_i32_0, %c0_i32_1 : i32, i32, i32
  }
  func.func @transform_9(%arg0: i32) -> (i32, i32) {
    %c0_i32 = arith.constant 0 : i32
    %c0_i32_0 = arith.constant 0 : i32
    %c0_i32_1 = arith.constant 0 : i32
    return %c0_i32, %c0_i32_0 : i32, i32
  }
  func.func @transform_10(%arg0: i32) -> (i32, i32, i32) {
    %c0_i32 = arith.constant 0 : i32
    %c0_i32_0 = arith.constant 0 : i32
    %c0_i32_1 = arith.constant 0 : i32
    %c0_i32_2 = arith.constant 0 : i32
    return %c0_i32, %c0_i32_0, %c0_i32_1 : i32, i32, i32
  }
  func.func @transform_11(%arg0: i32) -> (i32, i32) {
    %c0_i32 = arith.constant 0 : i32
    %c0_i32_0 = arith.constant 0 : i32
    %c0_i32_1 = arith.constant 0 : i32
    return %c0_i32, %c0_i32_0 : i32, i32
  }
  func.func @transform_12(%arg0: i32) -> (i32, i32, i32) {
    %c0_i32 = arith.constant 0 : i32
    %c0_i32_0 = arith.constant 0 : i32
    %c0_i32_1 = arith.constant 0 : i32
    %c0_i32_2 = arith.constant 0 : i32
    return %c0_i32, %c0_i32_0, %c0_i32_1 : i32, i32, i32
  }
  func.func @transform_13(%arg0: i32) -> (i32, i32, i32) {
    %c0_i32 = arith.constant 0 : i32
    %c0_i32_0 = arith.constant 0 : i32
    %c0_i32_1 = arith.constant 0 : i32
    %c0_i32_2 = arith.constant 0 : i32
    return %c0_i32, %c0_i32_0, %c0_i32_1 : i32, i32, i32
  }
  func.func @transform_14(%arg0: i32) -> (i32, i32, i32) {
    %c0_i32 = arith.constant 0 : i32
    %c0_i32_0 = arith.constant 0 : i32
    %c0_i32_1 = arith.constant 0 : i32
    return %arg0, %c0_i32, %c0_i32_0 : i32, i32, i32
  }
}

</mosaic_0001>

<bundles_post_ra>
// kernel: inception_d_forward.1
= control target key start
LH: loop header
LB: loop body
LE: loop exit
PB: predicated region body
PF: predicated region fallthrough
CT: control target
= control target key end

     0   :  { %s15515_s29 = smov 0   ;;  %s20969_s0 = inlined_call_operand.vmem [shape: bf16[2,81,32], index: 0, kind: input, shape index: {}]   ;;  %s20970_s1 = inlined_call_operand.vmem [shape: bf16[32,512], index: 1, kind: input, shape index: {}]   ;;  %s20971_s2 = inlined_call_operand.vmem [shape: f32[2,192], index: 2, kind: input, shape index: {}]   ;;  %s20972_s3 = inlined_call_operand.vmem [shape: f32[2,192], index: 3, kind: input, shape index: {}]   ;;  %s20973_s4 = inlined_call_operand.vmem [shape: bf16[192,1792], index: 4, kind: input, shape index: {}]   ;;  %s20974_s5 = inlined_call_operand.vmem [shape: f32[2,192], index: 5, kind: input, shape index: {}]   ;;  %s20975_s6 = inlined_call_operand.vmem [shape: bf16[192,1792], index: 6, kind: input, shape index: {}]   ;;  %s20976_s7 = inlined_call_operand.vmem [shape: f32[2,192], index: 7, kind: input, shape index: {}]   ;;  %s20977_s8 = inlined_call_operand.vmem [shape: bf16[9,192,320], index: 8, kind: input, shape index: {}]   ;;  %s20978_s9 = inlined_call_operand.vmem [shape: f32[2,320], index: 9, kind: input, shape index: {}]   ;;  %s20979_s10 = inlined_call_operand.vmem [shape: bf16[9,192,192], index: 10, kind: input, shape index: {}]   ;;  %s20980_s11 = inlined_call_operand.vmem [shape: f32[2,192], index: 11, kind: input, shape index: {}]   ;;  %s20981_s12 = inlined_call_operand.vmem [shape: f32[7,81,1], index: 12, kind: input, shape index: {}]   ;;  %s20982_s13 = inlined_call_operand.vmem [shape: bf16[9,16,81], index: 13, kind: input, shape index: {}]   ;;  %s20983_s14 = inlined_call_operand.vmem [shape: f32[2,16,544], index: 14, kind: output, shape index: {}]  }
   0x1 LB: > { %s12285_s30 = sadd.s32 4294967295, %s15434_s29   ;;  %p12289_p0 = scmp.ge.s32.totalorder %s15434_s29, 1  ;;  %s15434_s29 = sphi %s15515_s29, %s24_s29  }
   0x2   : > { %p412_p1 = scmp.lt.s32.totalorder %s15434_s29, 3 }
   0x4   : > { %p413_p2 = pnand %p12289_p0, %p412_p1 }
   0x6   : > { %416 = sbr.rel (%p413_p2) target bundleno = 3844 (0xf04), region = 76 }
   0xd   : > { %v14123_v0 = vld [vmem:[%s20970_s1 + $0xc] ss:$16 sps:$4 sm:$0xff]   ;;  %p458_p3 = scmp.lt.s32.totalorder %s12285_s30, 1  ;;  %v14125_v1 = vld [vmem:[%s20970_s1 + $0x8] ss:$16 sps:$4 sm:$0xff]   ;;  %v20984_v2 = vmov 0  }
   0xe   : > { %698 = vmatprep.mubr.bf16.mxu1 %v20984_v2  ;;  %607 = vmatprep.mubr.bf16.mxu0 %v20984_v2  ;;  %v14126_v3 = vld [vmem:[%s20970_s1 + $0x2c] ss:$16 sps:$4 sm:$0xff]   ;;  %v14128_v4 = vld [vmem:[%s20970_s1 + $0x28] ss:$16 sps:$4 sm:$0xff]   ;;  %v14135_v5 = vld [vmem:[%s20970_s1 + $0x4] ss:$16 sps:$4 sm:$0xff]  }
   0xf   : > { %666 = vmatprep.subr.bf16.mxu1 %v14123_v0  ;;  %s21316_s30 = smov (!%p458_p3, %s12285_s30), 1  ;;  %14121 = vset.pattern.permute.xlu0 %v20984_v2  ;;  %v14137_v6 = vld [vmem:[%s20970_s1] ss:$16 sps:$4 sm:$0xff]   ;;  %v14138_v7 = vld [vmem:[%s20970_s1 + $0x24] ss:$16 sps:$4 sm:$0xff]   ;;  %vm556_vm0 = vcmask 261120  }
  0x10   : > { %667 = vmatpush1.bf16.msra.mxu1 %v14125_v1  ;;  %14122 = vset.pattern.permute.xlu1 %v20984_v2  ;;  %s14107_s25 = smul.u32 44, %s21316_s30  ;;  %v14140_v8 = vld [vmem:[%s20970_s1 + $0x20] ss:$16 sps:$4 sm:$0xff]   ;;  %v14143_v10 = vld [vmem:[%s20973_s4 + $0x4] ss:$56 sps:$4 sm:$0xff]   ;;  %vm1959_vm1 = vcmask 523264  }
  0x11   : > { %668 = vmatprep.subr.bf16.mxu1 %v14126_v3  ;;  %575 = vmatprep.subr.bf16.mxu0 %v14135_v5  ;;  %v14144_v11 = vld [vmem:[%s20973_s4 + $0x28] ss:$56 sps:$4 sm:$0xff]   ;;  %v14146_v14 = vld [vmem:[%s20973_s4 + $0x2c] ss:$56 sps:$4 sm:$0xff]   ;;  %v14150_v16 = vld [vmem:[%s20973_s4 + $0x98] ss:$56 sps:$4 sm:$0xff]  }
  0x12   : > { %s15554_s18 = scalar_lea.vmem %s20969_s0, %s14107_s25  ;;  %576 = vmatpush1.bf16.msra.mxu0 %v14137_v6  ;;  %v14141_v13 = vld [vmem:[%s20973_s4] ss:$56 sps:$4 sm:$0xff]   ;;  %v14149_v15 = vld [vmem:[%s20973_s4 + $0x74] ss:$56 sps:$4 sm:$0xff]   ;;  %v14147_v18 = vld [vmem:[%s20973_s4 + $0x70] ss:$56 sps:$4 sm:$0xff]  }
  0x13   : > { %v469_v9 = vld [vmem:[%s15554_s18] sm:$0xff]   ;;  %577 = vmatprep.subr.bf16.mxu0 %v14138_v7  ;;  %v471_v12 = vld [vmem:[%s15554_s18 + $0x8] sm:$0xff]   ;;  %v14152_v17 = vld [vmem:[%s20973_s4 + $0x9c] ss:$56 sps:$4 sm:$0xff]   ;;  %vm3407_vm2 = vcmask 1045504   ;;  %vm2629_vm3 = vcmask 1042432  }
  0x14   : > { %669 = vmatpush1.bf16.msra.mxu1 %v14128_v4  ;;  %v14155_v19 = vld [vmem:[%s20973_s4 + $0xe4] ss:$56 sps:$4 sm:$0xff]   ;;  %v473_v21 = vld [vmem:[%s15554_s18 + $0x10] sm:$0xff]   ;;  %v14156_v22 = vld [vmem:[%s20973_s4 + $0x108] ss:$56 sps:$4 sm:$0xff]   ;;  %vm2822_vm4 = vcmask 1041408  }
  0x15   : > { %2427 = vmatprep.subr.bf16.mxu1 %v14146_v14  ;;  %v14158_v20 = vld [vmem:[%s20973_s4 + $0x10c] ss:$56 sps:$4 sm:$0xff]   ;;  %v14153_v23 = vld [vmem:[%s20973_s4 + $0xe0] ss:$56 sps:$4 sm:$0xff]   ;;  %v14164_v25 = vld [vmem:[%s20973_s4 + $0x17c] ss:$56 sps:$4 sm:$0xff]  }
  0x16   : > { %578 = vmatpush1.bf16.msra.mxu0 %v14140_v8  ;;  %v14161_v24 = vld [vmem:[%s20973_s4 + $0x154] ss:$56 sps:$4 sm:$0xff]   ;;  %v14162_v26 = vld [vmem:[%s20973_s4 + $0x178] ss:$56 sps:$4 sm:$0xff]   ;;  %v14167_v28 = vld [vmem:[%s20973_s4 + $0x1c4] ss:$56 sps:$4 sm:$0xff]  }
  0x17   : > { %12312 = vmatmul.mubr.msk.bf16.vlgmr.msra.gmra.mrb[0].mxu1 %vm556_vm0, %v469_v9  ;;  %1978 = vmatprep.subr.bf16.mxu0 %v14143_v10  ;;  %v14159_v27 = vld [vmem:[%s20973_s4 + $0x150] ss:$56 sps:$4 sm:$0xff]   ;;  %v14170_v29 = vld [vmem:[%s20973_s4 + $0x1ec] ss:$56 sps:$4 sm:$0xff]   ;;  %v475_v30 = vld [vmem:[%s15554_s18 + $0x18] sm:$0xff]   ;;  %vm3016_vm5 = vcmask 1040384  }
  0x18   : > { %708 = vmatprep.mubr.bf16.mxu1 %v20984_v2  ;;  %2428 = vmatpush1.bf16.msra.mxu1 %v14144_v11  ;;  %v14168_v31 = vld [vmem:[%s20973_s4 + $0x1e8] ss:$56 sps:$4 sm:$0xff]   ;;  %v14173_v33 = vld [vmem:[%s20973_s4 + $0x234] ss:$56 sps:$4 sm:$0xff]   ;;  %v14174_v35 = vld [vmem:[%s20973_s4 + $0x258] ss:$56 sps:$4 sm:$0xff]  }
  0x19   : > { %12306 = vmatmul.mubr.msk.bf16.vlgmr.msra.gmra.mrb[0].mxu0 %vm556_vm0, %v469_v9  ;;  %2429 = vmatprep.subr.bf16.mxu1 %v14152_v17  ;;  %v14165_v32 = vld [vmem:[%s20973_s4 + $0x1c0] ss:$56 sps:$4 sm:$0xff]   ;;  %v14176_v34 = vld [vmem:[%s20973_s4 + $0x25c] ss:$56 sps:$4 sm:$0xff]   ;;  %v14171_v36 = vld [vmem:[%s20973_s4 + $0x230] ss:$56 sps:$4 sm:$0xff]  }
  0x1a   : > { %1979 = vmatpush1.bf16.msra.mxu0 %v14141_v13  ;;  %617 = vmatprep.mubr.bf16.mxu0 %v20984_v2  ;;  %v14179_v37 = vld [vmem:[%s20973_s4 + $0x2a4] ss:$56 sps:$4 sm:$0xff]   ;;  %v14180_v38 = vld [vmem:[%s20973_s4 + $0x2c8] ss:$56 sps:$4 sm:$0xff]   ;;  %v14185_v42 = vld [vmem:[%s20973_s4 + $0x314] ss:$56 sps:$4 sm:$0xff]  }
  0x1b   : > { %1980 = vmatprep.subr.bf16.mxu0 %v14149_v15  ;;  %v14177_v39 = vld [vmem:[%s20973_s4 + $0x2a0] ss:$56 sps:$4 sm:$0xff]   ;;  %v14182_v40 = vld [vmem:[%s20973_s4 + $0x2cc] ss:$56 sps:$4 sm:$0xff]   ;;  %v14188_v43 = vld [vmem:[%s20973_s4 + $0x33c] ss:$56 sps:$4 sm:$0xff]  }
  0x1c   : > { %2430 = vmatpush1.bf16.msra.mxu1 %v14150_v16  ;;  %v477_v41 = vld [vmem:[%s15554_s18 + $0x20] sm:$0xff]   ;;  %v14186_v44 = vld [vmem:[%s20973_s4 + $0x338] ss:$56 sps:$4 sm:$0xff]   ;;  %v479_v50 = vld [vmem:[%s15554_s18 + $0x28] sm:$0x1]  ;;  %vm3212_vm6 = vcmask 1046528  }
  0x1d   : > { %2431 = vmatprep.subr.bf16.mxu1 %v14158_v20  ;;  %v14183_v45 = vld [vmem:[%s20973_s4 + $0x310] ss:$56 sps:$4 sm:$0xff]   ;;  %v14191_v46 = vld [vmem:[%s20973_s4 + $0x384] ss:$56 sps:$4 sm:$0xff]   ;;  %v14189_v49 = vld [vmem:[%s20973_s4 + $0x380] ss:$56 sps:$4 sm:$0xff]   ;;  %v12297_v51 = vcombine.low %v479_v50, %v479_v50 }
  0x1e   : > { %1981 = vmatpush1.bf16.msra.mxu0 %v14147_v18  ;;  %v14194_v47 = vld [vmem:[%s20973_s4 + $0x3ac] ss:$56 sps:$4 sm:$0xff]   ;;  %v14192_v48 = vld [vmem:[%s20973_s4 + $0x3a8] ss:$56 sps:$4 sm:$0xff]   ;;  %v14200_v53 = vld [vmem:[%s20973_s4 + $0x41c] ss:$56 sps:$4 sm:$0xff]  }
  0x1f   : > { %12313 = vmatmul.mubr.msk.bf16.gmra.mrb[4].mxu1 %vm556_vm0, %v471_v12  ;;  %1982 = vmatprep.subr.bf16.mxu0 %v14155_v19  ;;  %v14197_v52 = vld [vmem:[%s20973_s4 + $0x3f4] ss:$56 sps:$4 sm:$0xff]   ;;  %v14195_v54 = vld [vmem:[%s20973_s4 + $0x3f0] ss:$56 sps:$4 sm:$0xff]   ;;  %v14203_v56 = vld [vmem:[%s20973_s4 + $0x464] ss:$56 sps:$4 sm:$0xff]  }
  0x20   : > { %718 = vmatprep.mubr.bf16.mxu1 %v20984_v2  ;;  %2432 = vmatpush1.bf16.msra.mxu1 %v14156_v22  ;;  %v14198_v55 = vld [vmem:[%s20973_s4 + $0x418] ss:$56 sps:$4 sm:$0xff]   ;;  %v14206_v57 = vld [vmem:[%s20973_s4 + $0x48c] ss:$56 sps:$4 sm:$0xff]   ;;  %v14204_v59 = vld [vmem:[%s20973_s4 + $0x488] ss:$56 sps:$4 sm:$0xff]  }
  0x21   : > { %12307 = vmatmul.mubr.msk.bf16.gmra.mrb[4].mxu0 %vm556_vm0, %v471_v12  ;;  %2433 = vmatprep.subr.bf16.mxu1 %v14164_v25  ;;  %v14201_v58 = vld [vmem:[%s20973_s4 + $0x460] ss:$56 sps:$4 sm:$0xff]   ;;  %v14209_v60 = vld [vmem:[%s20973_s4 + $0x4d4] ss:$56 sps:$4 sm:$0xff]   ;;  %v14207_v62 = vld [vmem:[%s20973_s4 + $0x4d0] ss:$56 sps:$4 sm:$0xff]  }
  0x22   : > { %1983 = vmatpush1.bf16.msra.mxu0 %v14153_v23  ;;  %627 = vmatprep.mubr.bf16.mxu0 %v20984_v2  ;;  %v14212_v61 = vld [vmem:[%s20973_s4 + $0x4fc] ss:$56 sps:$4 sm:$0xff]   ;;  %v14210_v63 = vld [vmem:[%s20973_s4 + $0x4f8] ss:$56 sps:$4 sm:$0xff]   ;;  %v14215_v0 = vld [vmem:[%s20973_s4 + $0xc] ss:$56 sps:$4 sm:$0xff]  }
  0x23   : > { %1984 = vmatprep.subr.bf16.mxu0 %v14161_v24  ;;  %v2692_v1 = vld [vmem:[%s20981_s12] sm:$0xff]  ;;  %v12530_v3 = vld [vmem:[%s20981_s12 + $0x58] sm:$0xff]  ;;  %v2693_v4 = vld [vmem:[%s20981_s12 + $0x8] sm:$0xff]  ;;  %vm3604_vm7 = vcmask 1044480   ;;  %vm6163_vm8 = vcmask 662528   ;;  %s14108_s26 = smul.u32 80, %s21316_s30 }
  0x24   : > { %2434 = vmatpush1.bf16.msra.mxu1 %v14162_v26  ;;  %2705 = vperm.xlu0 %14121, %v2692_v1   ;;  %v12531_v5 = vld [vmem:[%s20981_s12 + $0x60] sm:$0xff]  ;;  %v12541_v6 = vld [vmem:[%s20981_s12 + $0xb0] sm:$0xff]  ;;  %v12542_v7 = vld [vmem:[%s20981_s12 + $0xb8] sm:$0xff]  ;;  %vm12111_vm9 = vcmask 1043456   ;;  %vm15438_vm10 = vmmov 0   ;;  %vm12223_vm11 = vcmask 1048064  }
  0x25   : > { %2435 = vmatprep.subr.bf16.mxu1 %v14170_v29  ;;  %2899 = vperm.xlu1 %14122, %v12530_v3   ;;  %v12552_v8 = vld [vmem:[%s20981_s12 + $0x160] sm:$0xff]  ;;  %v12553_v9 = vld [vmem:[%s20981_s12 + $0x168] sm:$0xff]  ;;  %v2694_v10 = vld [vmem:[%s20981_s12 + $0x10] sm:$0xff]  ;;  %s20088_s30 = scalar_lea.vmem %s20983_s14, %s14108_s26 }
  0x26   : > { %1985 = vmatpush1.bf16.msra.mxu0 %v14159_v27  ;;  %v2695_v11 = vld [vmem:[%s20981_s12 + $0x18] sm:$0xff]  ;;  %v12564_v13 = vld [vmem:[%s20981_s12 + $0x1c0] sm:$0xff]  ;;  %v12532_v14 = vld [vmem:[%s20981_s12 + $0x68] sm:$0xff] }
  0x27   : > { %12314 = vmatmul.mubr.msk.bf16.gmra.mrb[8].mxu1 %vm556_vm0, %v473_v21  ;;  %1986 = vmatprep.subr.bf16.mxu0 %v14167_v28  ;;  %v12563_v12 = vld [vmem:[%s20981_s12 + $0x1b8] sm:$0xff]  ;;  %v12533_v15 = vld [vmem:[%s20981_s12 + $0x70] sm:$0xff]  ;;  %v12543_v18 = vld [vmem:[%s20981_s12 + $0xc0] sm:$0xff] }
  0x28   : > { %728 = vmatprep.mubr.bf16.mxu1 %v20984_v2  ;;  %2436 = vmatpush1.bf16.msra.mxu1 %v14168_v31  ;;  %v12574_v16 = vld [vmem:[%s20981_s12 + $0x210] sm:$0xff]  ;;  %v12575_v17 = vld [vmem:[%s20981_s12 + $0x218] sm:$0xff]  ;;  %v12544_v19 = vld [vmem:[%s20981_s12 + $0xc8] sm:$0xff] }
  0x29   : > { %12308 = vmatmul.mubr.msk.bf16.gmra.mrb[8].mxu0 %vm556_vm0, %v473_v21  ;;  %2437 = vmatprep.subr.bf16.mxu1 %v14176_v34  ;;  %v12554_v20 = vld [vmem:[%s20981_s12 + $0x170] sm:$0xff]  ;;  %v12555_v21 = vld [vmem:[%s20981_s12 + $0x178] sm:$0xff]  ;;  %v2696_v22 = vld [vmem:[%s20981_s12 + $0x20] sm:$0xff] }
  0x2a   : > { %1987 = vmatpush1.bf16.msra.mxu0 %v14165_v32  ;;  %637 = vmatprep.mubr.bf16.mxu0 %v20984_v2  ;;  %v2697_v23 = vld [vmem:[%s20981_s12 + $0x28] sm:$0xff]  ;;  %v12566_v25 = vld [vmem:[%s20981_s12 + $0x1d0] sm:$0xff]  ;;  %v12534_v26 = vld [vmem:[%s20981_s12 + $0x78] sm:$0xff] }
  0x2b   : > { %1988 = vmatprep.subr.bf16.mxu0 %v14173_v33  ;;  %2710 = vperm.xlu0 %14121, %v2693_v4   ;;  %v12565_v24 = vld [vmem:[%s20981_s12 + $0x1c8] sm:$0xff]  ;;  %v12535_v27 = vld [vmem:[%s20981_s12 + $0x80] sm:$0xff]  ;;  %v12546_v31 = vld [vmem:[%s20981_s12 + $0xd8] sm:$0xff] }
  0x2c   : > { %2438 = vmatpush1.bf16.msra.mxu1 %v14174_v35  ;;  %2904 = vperm.xlu1 %14122, %v12531_v5   ;;  %v12576_v28 = vld [vmem:[%s20981_s12 + $0x220] sm:$0xff]  ;;  %v12577_v29 = vld [vmem:[%s20981_s12 + $0x228] sm:$0xff]  ;;  %v2698_v34 = vld [vmem:[%s20981_s12 + $0x30] sm:$0xff] }
  0x2d   : > { %2439 = vmatprep.subr.bf16.mxu1 %v14182_v40  ;;  %v12556_v32 = vld [vmem:[%s20981_s12 + $0x180] sm:$0xff]  ;;  %v12557_v33 = vld [vmem:[%s20981_s12 + $0x188] sm:$0xff]  ;;  %v2699_v35 = vld [vmem:[%s20981_s12 + $0x38] sm:$0xff] }
  0x2e   : > { %1989 = vmatpush1.bf16.msra.mxu0 %v14171_v36  ;;  %v12567_v36 = vld [vmem:[%s20981_s12 + $0x1d8] sm:$0xff]  ;;  %v12578_v40 = vld [vmem:[%s20981_s12 + $0x230] sm:$0xff]  ;;  %v12560_v1 = vld [vmem:[%s20981_s12 + $0x1a0] sm:$0xff] }
  0x2f   : > { %12315 = vmatmul.mubr.msk.bf16.gmra.mrb[12].mxu1 %vm556_vm0, %v475_v30  ;;  %1990 = vmatprep.subr.bf16.mxu0 %v14179_v37  ;;  %v12568_v37 = vld [vmem:[%s20981_s12 + $0x1e0] sm:$0xff]  ;;  %v12570_v50 = vld [vmem:[%s20981_s12 + $0x1f0] sm:$0xff] }
  0x30   : > { %738 = vmatprep.mubr.bf16.mxu1 %v20984_v2  ;;  %2440 = vmatpush1.bf16.msra.mxu1 %v14180_v38  ;;  %v12536_v38 = vld [vmem:[%s20981_s12 + $0x88] sm:$0xff] }
  0x31   : > { %12309 = vmatmul.mubr.msk.bf16.gmra.mrb[12].mxu0 %vm556_vm0, %v475_v30  ;;  %2441 = vmatprep.subr.bf16.mxu1 %v14188_v43  ;;  %v12545_v30 = vld [vmem:[%s20981_s12 + $0xd0] sm:$0xff]  ;;  %v12548_v43 = vld [vmem:[%s20981_s12 + $0xe8] sm:$0xff] }
  0x32   : > { %1991 = vmatpush1.bf16.msra.mxu0 %v14177_v39  ;;  %647 = vmatprep.mubr.bf16.mxu0 %v20984_v2  ;;  %v12537_v39 = vld [vmem:[%s20981_s12 + $0x90] sm:$0xff] }
  0x33   : > { %1992 = vmatprep.subr.bf16.mxu0 %v14185_v42  ;;  %3093 = vperm.xlu0 %14121, %v12541_v6   ;;  %v12547_v42 = vld [vmem:[%s20981_s12 + $0xe0] sm:$0xff] }
  0x34   : > { %2442 = vmatpush1.bf16.msra.mxu1 %v14186_v44  ;;  %3098 = vperm.xlu1 %14122, %v12542_v7   ;;  %v12558_v44 = vld [vmem:[%s20981_s12 + $0x190] sm:$0xff]  ;;  %v12561_v7 = vld [vmem:[%s20981_s12 + $0x1a8] sm:$0xff] }
  0x35   : > { %2443 = vmatprep.subr.bf16.mxu1 %v14194_v47  ;;  %v2701_v47 = vld [vmem:[%s20981_s12 + $0x48] sm:$0xff] }
  0x36   : > { %1993 = vmatpush1.bf16.msra.mxu0 %v14183_v45  ;;  %v12559_v45 = vld [vmem:[%s20981_s12 + $0x198] sm:$0xff] }
  0x37   : > { %12316 = vmatmul.mubr.msk.bf16.gmra.mrb[16].mxu1 %vm556_vm0, %v477_v41  ;;  %1994 = vmatprep.subr.bf16.mxu0 %v14191_v46  ;;  %v2700_v46 = vld [vmem:[%s20981_s12 + $0x40] sm:$0xff] }
  0x38   : > { %748 = vmatprep.mubr.bf16.mxu1 %v20984_v2  ;;  %2444 = vmatpush1.bf16.msra.mxu1 %v14192_v48  ;;  %v12569_v48 = vld [vmem:[%s20981_s12 + $0x1e8] sm:$0xff] }
  0x39   : > { %12310 = vmatmul.mubr.msk.bf16.gmra.mrb[16].mxu0 %vm556_vm0, %v477_v41  ;;  %2445 = vmatprep.subr.bf16.mxu1 %v14200_v53  ;;  %v12579_v41 = vld [vmem:[%s20981_s12 + $0x238] sm:$0xff]  ;;  %v12539_v53 = vld [vmem:[%s20981_s12 + $0xa0] sm:$0xff] }
  0x3a   : > { %1995 = vmatpush1.bf16.msra.mxu0 %v14189_v49  ;;  %657 = vmatprep.mubr.bf16.mxu0 %v20984_v2  ;;  %v759_v49 = vlaneseq }
  0x3b   : > { %1996 = vmatprep.subr.bf16.mxu0 %v14197_v52  ;;  %3289 = vperm.xlu0 %14121, %v12552_v8  }
  0x3c   : > { %2446 = vmatpush1.bf16.msra.mxu1 %v14198_v55  ;;  %3294 = vperm.xlu1 %14122, %v12553_v9   ;;  %v15881_v52 = vshrl.u32 %v759_v49, 7  ;;  %v848_v55 = vld [vmem:[%s20972_s3] ss:$2 sm:$0x3] }
  0x3d   : > { %2447 = vmatprep.subr.bf16.mxu1 %v14206_v57  ;;  %v12581_v57 = vld [vmem:[%s20981_s12 + $0x248] sm:$0xff] }
  0x3e   : > { %1997 = vmatpush1.bf16.msra.mxu0 %v14195_v54  ;;  %21075 = vst [vmem:[#allocation2_spill] sm:$0xff] %v15881_v52  ;;  %v12580_v54 = vld [vmem:[%s20981_s12 + $0x240] sm:$0xff] }
  0x3f   : > { %12317 = vmatmul.mubr.msk.bf16.gmra.mrb[20].mxu1 %vm556_vm0, %v12297_v51  ;;  %1998 = vmatprep.subr.bf16.mxu0 %v14203_v56  ;;  %v15893_v56 = vsub.s32 0, %v15881_v52 }
  0x40   : > { %2448 = vmatpush1.bf16.msra.mxu1 %v14204_v59  ;;  %2715 = vperm.xlu0 %14121, %v2694_v10   ;;  %v15902_v59 = vsub.s32 1, %v15881_v52 }
  0x41   : > { %12311 = vmatmul.mubr.msk.bf16.gmra.mrb[20].mxu0 %vm556_vm0, %v12297_v51  ;;  %2449 = vmatprep.subr.bf16.mxu1 %v14212_v61  ;;  %v12538_v51 = vld [vmem:[%s20981_s12 + $0x98] sm:$0xff]  ;;  %21076 = vst [vmem:[#allocation3_spill] sm:$0xff] %v15893_v56  ;;  %v15908_v61 = vrot.slane %v848_v55, %v15893_v56 }
  0x42   : > { %1999 = vmatpush1.bf16.msra.mxu0 %v14201_v58  ;;  %2720 = vperm.xlu1 %14122, %v2695_v11   ;;  %v12319_v58 = vld [vmem:[%s20972_s3 + $0x1] ss:$2 sm:$0x3]  ;;  %21077 = vst [vmem:[#allocation4_spill] sm:$0xff] %v15902_v59 }
  0x43   : > { %2000 = vmatprep.subr.bf16.mxu0 %v14209_v60  ;;  %v12549_v60 = vld [vmem:[%s20981_s12 + $0xf0] sm:$0xff]  ;;  %v15923_v4 = vrot.slane %v12319_v58, %v15902_v59 }
  0x44   : > { %2450 = vmatpush1.bf16.msra.mxu1 %v14210_v63  ;;  %3486 = vperm.xlu0 %14121, %v12563_v12   ;;  %v15914_v63 = vrot.slane %v848_v55, %v15902_v59  ;;  %v14224_v55 = vld [vmem:[%s20973_s4 + $0x15c] ss:$56 sps:$4 sm:$0xff]  }
  0x46   : > { %2001 = vmatpush1.bf16.msra.mxu0 %v14207_v62  ;;  %3491 = vperm.xlu1 %14122, %v12564_v13   ;;  %v12550_v62 = vld [vmem:[%s20981_s12 + $0xf8] sm:$0xff]  ;;  %v2702_v13 = vld [vmem:[%s20981_s12 + $0x50] sm:$0x1] }
  0x47   : > { %2067 = vmatprep.subr.bf16.mxu0 %v14215_v0  ;;  %v15917_v0 = vrot.slane %v12319_v58, %v15893_v56 }
  0x48   : > { %2909 = vperm.xlu0 %14121, %v12532_v14  }
  0x4a   : > { %2914 = vperm.xlu1 %14122, %v12533_v15  }
  0x4c   : > { %3683 = vperm.xlu0 %14121, %v12574_v16  }
  0x4e   : > { %3688 = vperm.xlu1 %14122, %v12575_v17   ;;  %v12571_v17 = vld [vmem:[%s20981_s12 + $0x1f8] sm:$0xff] }
  0x50   : > { %3103 = vperm.xlu0 %14121, %v12543_v18  }
  0x52   : > { %3108 = vperm.xlu1 %14122, %v12544_v19  }
  0x54   : > { %3299 = vperm.xlu0 %14121, %v12554_v20  }
  0x56   : > { %3304 = vperm.xlu1 %14122, %v12555_v21  }
  0x58   : > { %2725 = vperm.xlu0 %14121, %v2696_v22  }
  0x5a   : > { %2730 = vperm.xlu1 %14122, %v2697_v23  }
  0x5c   : > { %3496 = vperm.xlu0 %14121, %v12565_v24  }
  0x5e   : > { %3501 = vperm.xlu1 %14122, %v12566_v25  }
  0x60   : > { %2919 = vperm.xlu0 %14121, %v12534_v26  }
  0x62   : > { %2924 = vperm.xlu1 %14122, %v12535_v27  }
  0x64   : > { %3693 = vperm.xlu0 %14121, %v12576_v28  }
  0x66   : > { %3698 = vperm.xlu1 %14122, %v12577_v29  }
  0x68   : > { %3113 = vperm.xlu0 %14121, %v12545_v30   ;;  %v14213_v30 = vld [vmem:[%s20973_s4 + $0x8] ss:$56 sps:$4 sm:$0xff]  }
  0x6a   : > { %3118 = vperm.xlu1 %14122, %v12546_v31   ;;  %v14218_v31 = vld [vmem:[%s20973_s4 + $0x7c] ss:$56 sps:$4 sm:$0xff]  }
  0x6c   : > { %3309 = vperm.xlu0 %14121, %v12556_v32  }
  0x6e   : > { %3314 = vperm.xlu1 %14122, %v12557_v33  }
  0x70   : > { %2735 = vperm.xlu0 %14121, %v2698_v34  }
  0x72   : > { %2740 = vperm.xlu1 %14122, %v2699_v35   ;;  %v12572_v35 = vld [vmem:[%s20981_s12 + $0x200] sm:$0xff] }
  0x74   : > { %3506 = vperm.xlu0 %14121, %v12567_v36  }
  0x76   : > { %3511 = vperm.xlu1 %14122, %v12568_v37  }
  0x78   : > { %2929 = vperm.xlu0 %14121, %v12536_v38  }
  0x7a   : > { %2934 = vperm.xlu1 %14122, %v12537_v39  }
  0x7c   : > { %3703 = vperm.xlu0 %14121, %v12578_v40   ;;  %v14216_v40 = vld [vmem:[%s20973_s4 + $0x78] ss:$56 sps:$4 sm:$0xff]  }
  0x7e   : > { %3708 = vperm.xlu1 %14122, %v12579_v41   ;;  %v14221_v41 = vld [vmem:[%s20973_s4 + $0xec] ss:$56 sps:$4 sm:$0xff]  }
  0x80   : > { %3123 = vperm.xlu0 %14121, %v12547_v42  }
  0x82   : > { %3128 = vperm.xlu1 %14122, %v12548_v43  }
  0x84   : > { %3319 = vperm.xlu0 %14121, %v12558_v44  }
  0x86   : > { %3324 = vperm.xlu1 %14122, %v12559_v45  }
  0x88   : > { %2745 = vperm.xlu0 %14121, %v2700_v46  }
  0x8a   : > { %2750 = vperm.xlu1 %14122, %v2701_v47  }
  0x8c   : > { %3516 = vperm.xlu0 %14121, %v12569_v48  }
  0x8e   : > { %3521 = vperm.xlu1 %14122, %v12570_v50  }
  0x90   : > { %2939 = vperm.xlu0 %14121, %v12538_v51  }
  0x92   : > { %2944 = vperm.xlu1 %14122, %v12539_v53  }
  0x94   : > { %3713 = vperm.xlu0 %14121, %v12580_v54   ;;  %v14219_v54 = vld [vmem:[%s20973_s4 + $0xe8] ss:$56 sps:$4 sm:$0xff]  }
  0x96   : > { %3718 = vperm.xlu1 %14122, %v12581_v57  }
  0x98   : > { %3133 = vperm.xlu0 %14121, %v12549_v60  }
  0x9a   : > { %3138 = vperm.xlu1 %14122, %v12550_v62  }
  0x9c   : > { %3329 = vperm.xlu0 %14121, %v12560_v1  }
  0x9e   : > { %3334 = vperm.xlu1 %14122, %v12561_v7  }
  0xa0   : > { %2755 = vperm.xlu0 %14121, %v2702_v13  }
  0xa2   : > { %3526 = vperm.xlu1 %14122, %v12571_v17  }
  0xa4   : > { %3531 = vperm.xlu0 %14121, %v12572_v35  }
  0xea   : > { %v700_v3 = vpop.f32.mrb[0].mxu1 }
  0xeb   : > { %v860_v5 = vmul.f32 %v15908_v61, %v700_v3  ;;  %v702_v6 = vpop.f32.mrb[1].mxu1  ;;  %v14222_v3 = vld [vmem:[%s20973_s4 + $0x158] ss:$56 sps:$4 sm:$0xff]  }
  0xec   : > { %v861_v8 = vmul.f32 %v15914_v63, %v702_v6  ;;  %v704_v9 = vpop.f32.mrb[2].mxu1 }
  0xed   : > { %v895_v10 = vadd.f32 %v15917_v0, %v860_v5  ;;  %v862_v11 = vmul.f32 %v15908_v61, %v704_v9  ;;  %v706_v12 = vpop.f32.mrb[3].mxu1  ;;  %v14227_v9 = vld [vmem:[%s20973_s4 + $0x1cc] ss:$56 sps:$4 sm:$0xff]  }
  0xee   : > { %v896_v14 = vadd.f32 %v15923_v4, %v861_v8  ;;  %v863_v15 = vmul.f32 %v15914_v63, %v706_v12 }
  0xef   : > { %v897_v16 = vadd.f32 %v15917_v0, %v862_v11  ;;  %v917_v19 = vmax.f32 %v895_v10, 0.0 }
  0xf0   : > { %v898_v18 = vadd.f32 %v15923_v4, %v863_v15  ;;  %v918_v21 = vmax.f32 %v896_v14, 0.0 }
  0xf1   : > { %v919_v20 = vmax.f32 %v897_v16, 0.0 }
  0xf2   : > { %v920_v22 = vmax.f32 %v898_v18, 0.0  ;;  %v710_v23 = vpop.f32.mrb[4].mxu1 }
  0xf3   : > { %v15942_v24 = vpack.c.bf16 %v919_v20, %v917_v19  ;;  %v864_v25 = vmul.f32 %v15908_v61, %v710_v23  ;;  %v712_v26 = vpop.f32.mrb[5].mxu1  ;;  %v14225_v19 = vld [vmem:[%s20973_s4 + $0x1c8] ss:$56 sps:$4 sm:$0xff]   ;;  %v14230_v20 = vld [vmem:[%s20973_s4 + $0x23c] ss:$56 sps:$4 sm:$0xff]  }
  0xf4   : > { %v15945_v27 = vpack.c.bf16 %v920_v22, %v918_v21  ;;  %v865_v28 = vmul.f32 %v15914_v63, %v712_v26  ;;  %v714_v29 = vpop.f32.mrb[6].mxu1 }
  0xf5   : > { %v899_v32 = vadd.f32 %v15917_v0, %v864_v25  ;;  %v866_v33 = vmul.f32 %v15908_v61, %v714_v29  ;;  %v716_v34 = vpop.f32.mrb[7].mxu1 }
  0xf6   : > { %v900_v36 = vadd.f32 %v15923_v4, %v865_v28  ;;  %v867_v37 = vmul.f32 %v15914_v63, %v716_v34  ;;  %12488 = vmatprep.mubr.msk.bf16.mxu0 %vm1959_vm1, %v15945_v27  ;;  %12518 = vmatprep.mubr.msk.bf16.mxu1 %vm1959_vm1, %v15945_v27  ;;  %v14228_v28 = vld [vmem:[%s20973_s4 + $0x238] ss:$56 sps:$4 sm:$0xff]  }
  0xf7   : > { %v901_v38 = vadd.f32 %v15917_v0, %v866_v33  ;;  %2011 = vmatmul.mubr.bf16.vlgmr.msra.gmra.mrb[24].mxu0 %v15942_v24  ;;  %2460 = vmatmul.mubr.bf16.vlgmr.msra.gmra.mrb[24].mxu1 %v15942_v24  ;;  %v921_v42 = vmax.f32 %v899_v32, 0.0  ;;  %v14233_v33 = vld [vmem:[%s20973_s4 + $0x2ac] ss:$56 sps:$4 sm:$0xff]  }
  0xf8   : > { %v902_v39 = vadd.f32 %v15923_v4, %v867_v37  ;;  %2068 = vmatpush1.bf16.msra.mxu0 %v14213_v30  ;;  %v922_v44 = vmax.f32 %v900_v36, 0.0 }
  0xf9   : > { %v923_v43 = vmax.f32 %v901_v38, 0.0  ;;  %2069 = vmatprep.subr.bf16.mxu0 %v14218_v31 }
  0xfa   : > { %v924_v45 = vmax.f32 %v902_v39, 0.0  ;;  %v720_v46 = vpop.f32.mrb[8].mxu1 }
  0xfb   : > { %v15975_v47 = vpack.c.bf16 %v923_v43, %v921_v42  ;;  %v868_v48 = vmul.f32 %v15908_v61, %v720_v46  ;;  %v722_v49 = vpop.f32.mrb[9].mxu1  ;;  %v14231_v43 = vld [vmem:[%s20973_s4 + $0x2a8] ss:$56 sps:$4 sm:$0xff]  }
  0xfc   : > { %v15978_v50 = vpack.c.bf16 %v924_v45, %v922_v44  ;;  %v869_v51 = vmul.f32 %v15914_v63, %v722_v49  ;;  %2070 = vmatpush1.bf16.msra.mxu0 %v14216_v40  ;;  %v724_v53 = vpop.f32.mrb[10].mxu1  ;;  %v14236_v44 = vld [vmem:[%s20973_s4 + $0x31c] ss:$56 sps:$4 sm:$0xff]  }
  0xfd   : > { %v903_v57 = vadd.f32 %v15917_v0, %v868_v48  ;;  %v870_v58 = vmul.f32 %v15908_v61, %v724_v53  ;;  %v726_v60 = vpop.f32.mrb[11].mxu1  ;;  %2071 = vmatprep.subr.bf16.mxu0 %v14221_v41  ;;  %v14234_v53 = vld [vmem:[%s20973_s4 + $0x318] ss:$56 sps:$4 sm:$0xff]  }
  0xfe   : > { %v904_v62 = vadd.f32 %v15923_v4, %v869_v51  ;;  %v871_v1 = vmul.f32 %v15914_v63, %v726_v60  ;;  %12489 = vmatprep.mubr.msk.bf16.mxu0 %vm1959_vm1, %v15978_v50  ;;  %12519 = vmatprep.mubr.msk.bf16.mxu1 %vm1959_vm1, %v15978_v50  ;;  %v14239_v60 = vld [vmem:[%s20973_s4 + $0x38c] ss:$56 sps:$4 sm:$0xff]  }
  0xff   : > { %v905_v5 = vadd.f32 %v15917_v0, %v870_v58  ;;  %2021 = vmatmul.mubr.bf16.gmra.mrb[28].mxu0 %v15975_v47  ;;  %2470 = vmatmul.mubr.bf16.gmra.mrb[28].mxu1 %v15975_v47  ;;  %v925_v6 = vmax.f32 %v903_v57, 0.0 }
 0x100   : > { %v926_v7 = vmax.f32 %v904_v62, 0.0  ;;  %v906_v8 = vadd.f32 %v15923_v4, %v871_v1  ;;  %2072 = vmatpush1.bf16.msra.mxu0 %v14219_v54 }
 0x101   : > { %v927_v10 = vmax.f32 %v905_v5, 0.0  ;;  %2073 = vmatprep.subr.bf16.mxu0 %v14224_v55 }
 0x102   : > { %v928_v11 = vmax.f32 %v906_v8, 0.0  ;;  %v730_v12 = vpop.f32.mrb[12].mxu1 }
 0x103   : > { %v16005_v13 = vpack.c.bf16 %v927_v10, %v925_v6  ;;  %v872_v14 = vmul.f32 %v15908_v61, %v730_v12  ;;  %v732_v15 = vpop.f32.mrb[13].mxu1  ;;  %v14242_v12 = vld [vmem:[%s20973_s4 + $0x3fc] ss:$56 sps:$4 sm:$0xff]  }
 0x104   : > { %v16008_v16 = vpack.c.bf16 %v928_v11, %v926_v7  ;;  %v873_v17 = vmul.f32 %v15914_v63, %v732_v15  ;;  %2074 = vmatpush1.bf16.msra.mxu0 %v14222_v3  ;;  %v734_v18 = vpop.f32.mrb[14].mxu1  ;;  %v14237_v11 = vld [vmem:[%s20973_s4 + $0x388] ss:$56 sps:$4 sm:$0xff]  }
 0x105   : > { %v907_v21 = vadd.f32 %v15917_v0, %v872_v14  ;;  %v874_v22 = vmul.f32 %v15908_v61, %v734_v18  ;;  %v736_v23 = vpop.f32.mrb[15].mxu1  ;;  %2075 = vmatprep.subr.bf16.mxu0 %v14227_v9 }
 0x106   : > { %v908_v25 = vadd.f32 %v15923_v4, %v873_v17  ;;  %v875_v26 = vmul.f32 %v15914_v63, %v736_v23  ;;  %12490 = vmatprep.mubr.msk.bf16.mxu0 %vm1959_vm1, %v16008_v16  ;;  %12520 = vmatprep.mubr.msk.bf16.mxu1 %vm1959_vm1, %v16008_v16  ;;  %v757_v17 = vld [vmem:[%s20971_s2] ss:$2 sm:$0x3] }
 0x107   : > { %v909_v29 = vadd.f32 %v15917_v0, %v874_v22  ;;  %2031 = vmatmul.mubr.bf16.gmra.mrb[32].mxu0 %v16005_v13  ;;  %2480 = vmatmul.mubr.bf16.gmra.mrb[32].mxu1 %v16005_v13  ;;  %v929_v30 = vmax.f32 %v907_v21, 0.0  ;;  %v16087_v18 = vrot.slane %v757_v17, %v15893_v56  ;;  %v14240_v21 = vld [vmem:[%s20973_s4 + $0x3f8] ss:$56 sps:$4 sm:$0xff]   ;;  %v14245_v22 = vld [vmem:[%s20973_s4 + $0x46c] ss:$56 sps:$4 sm:$0xff]  }
 0x108   : > { %v930_v31 = vmax.f32 %v908_v25, 0.0  ;;  %v910_v32 = vadd.f32 %v15923_v4, %v875_v26  ;;  %2076 = vmatpush1.bf16.msra.mxu0 %v14225_v19  ;;  %v16105_v26 = vrot.slane %v757_v17, %v15902_v59 }
 0x109   : > { %v931_v34 = vmax.f32 %v909_v29, 0.0  ;;  %2077 = vmatprep.subr.bf16.mxu0 %v14230_v20  ;;  %21078 = vst [vmem:[#allocation5_spill] sm:$0xff] %v16087_v18 }
 0x10a   : > { %v932_v35 = vmax.f32 %v910_v32, 0.0  ;;  %v740_v36 = vpop.f32.mrb[16].mxu1  ;;  %21080 = vst [vmem:[#allocation7_spill] sm:$0xff] %v16105_v26 }
 0x10b   : > { %v16035_v37 = vpack.c.bf16 %v931_v34, %v929_v30  ;;  %v876_v38 = vmul.f32 %v15908_v61, %v740_v36  ;;  %v742_v39 = vpop.f32.mrb[17].mxu1  ;;  %v14243_v36 = vld [vmem:[%s20973_s4 + $0x468] ss:$56 sps:$4 sm:$0xff]  }
 0x10c   : > { %v16038_v40 = vpack.c.bf16 %v932_v35, %v930_v31  ;;  %v877_v41 = vmul.f32 %v15914_v63, %v742_v39  ;;  %2078 = vmatpush1.bf16.msra.mxu0 %v14228_v28  ;;  %v744_v42 = vpop.f32.mrb[18].mxu1 }
 0x10d   : > { %v911_v45 = vadd.f32 %v15917_v0, %v876_v38  ;;  %v878_v46 = vmul.f32 %v15908_v61, %v744_v42  ;;  %v746_v48 = vpop.f32.mrb[19].mxu1  ;;  %2079 = vmatprep.subr.bf16.mxu0 %v14233_v33  ;;  %v14248_v38 = vld [vmem:[%s20973_s4 + $0x4dc] ss:$56 sps:$4 sm:$0xff]  }
 0x10e   : > { %v912_v49 = vadd.f32 %v15923_v4, %v877_v41  ;;  %v879_v51 = vmul.f32 %v15914_v63, %v746_v48  ;;  %12491 = vmatprep.mubr.msk.bf16.mxu0 %vm1959_vm1, %v16038_v40  ;;  %12521 = vmatprep.mubr.msk.bf16.mxu1 %vm1959_vm1, %v16038_v40 }
 0x10f   : > { %v913_v54 = vadd.f32 %v15917_v0, %v878_v46  ;;  %2041 = vmatmul.mubr.bf16.gmra.mrb[36].mxu0 %v16035_v37  ;;  %2490 = vmatmul.mubr.bf16.gmra.mrb[36].mxu1 %v16035_v37  ;;  %v933_v55 = vmax.f32 %v911_v45, 0.0  ;;  %v12540_v45 = vld [vmem:[%s20981_s12 + $0xa8] sm:$0x1] }
 0x110   : > { %v934_v57 = vmax.f32 %v912_v49, 0.0  ;;  %v914_v58 = vadd.f32 %v15923_v4, %v879_v51  ;;  %2080 = vmatpush1.bf16.msra.mxu0 %v14231_v43  ;;  %2949 = vperm.xlu1 %14122, %v12540_v45  }
 0x111   : > { %v935_v62 = vmax.f32 %v913_v54, 0.0  ;;  %2081 = vmatprep.subr.bf16.mxu0 %v14236_v44  ;;  %v14246_v54 = vld [vmem:[%s20973_s4 + $0x4d8] ss:$56 sps:$4 sm:$0xff]  }
 0x112   : > { %v936_v1 = vmax.f32 %v914_v58, 0.0  ;;  %v750_v3 = vpop.f32.mrb[20].mxu1 }
 0x113   : > { %v16065_v5 = vpack.c.bf16 %v935_v62, %v933_v55  ;;  %v880_v6 = vmul.f32 %v15908_v61, %v750_v3  ;;  %v752_v7 = vpop.f32.mrb[21].mxu1  ;;  %v609_v61 = vpop.f32.mrb[0].mxu0  ;;  %v14251_v55 = vld [vmem:[%s20973_s4 + $0x14] ss:$56 sps:$4 sm:$0xff]  }
 0x114   : > { %v16068_v8 = vpack.c.bf16 %v936_v1, %v934_v57  ;;  %v881_v9 = vmul.f32 %v15914_v63, %v752_v7  ;;  %2082 = vmatpush1.bf16.msra.mxu0 %v14234_v53  ;;  %v754_v10 = vpop.f32.mrb[22].mxu1  ;;  %v769_v23 = vmul.f32 %v16087_v18, %v609_v61  ;;  %v611_v25 = vpop.f32.mrb[1].mxu0 }
 0x115   : > { %v915_v14 = vadd.f32 %v15917_v0, %v880_v6  ;;  %v755_v15 = vpop.f32.mrb[23].mxu1  ;;  %2083 = vmatprep.subr.bf16.mxu0 %v14239_v60  ;;  %v12318_v0 = vld [vmem:[%s20971_s2 + $0x1] ss:$2 sm:$0x3]  ;;  %v613_v29 = vpop.f32.mrb[2].mxu0  ;;  %v770_v32 = vmul.f32 %v16105_v26, %v611_v25 }
 0x116   : > { %v916_v63 = vadd.f32 %v15923_v4, %v881_v9  ;;  %12492 = vmatprep.mubr.msk.bf16.mxu0 %vm1959_vm1, %v16068_v8  ;;  %12522 = vmatprep.mubr.msk.bf16.mxu1 %vm1959_vm1, %v16068_v8  ;;  %v16095_v4 = vrot.slane %v12318_v0, %v15893_v56  ;;  %v16108_v28 = vrot.slane %v12318_v0, %v15902_v59  ;;  %v615_v34 = vpop.f32.mrb[3].mxu0 }
 0x117   : > { %v937_v19 = vmax.f32 %v915_v14, 0.0  ;;  %2051 = vmatmul.mubr.bf16.gmra.mrb[40].mxu0 %v16065_v5  ;;  %2500 = vmatmul.mubr.bf16.gmra.mrb[40].mxu1 %v16065_v5  ;;  %v771_v33 = vmul.f32 %v16087_v18, %v613_v29  ;;  %v772_v35 = vmul.f32 %v16105_v26, %v615_v34  ;;  %v619_v46 = vpop.f32.mrb[4].mxu0  ;;  %v14255_v34 = vld [vmem:[%s20973_s4 + $0xf0] ss:$56 sps:$4 sm:$0xff]  }
 0x118   : > { %21079 = vst [vmem:[#allocation6_spill] sm:$0xff] %v16095_v4  ;;  %v938_v20 = vmax.f32 %v916_v63, 0.0  ;;  %2084 = vmatpush1.bf16.msra.mxu0 %v14237_v11  ;;  %21081 = vst [vmem:[#allocation8_spill] sm:$0xff] %v16108_v28  ;;  %v804_v31 = vadd.f32 %v16095_v4, %v769_v23  ;;  %v805_v41 = vadd.f32 %v16108_v28, %v770_v32  ;;  %v621_v60 = vpop.f32.mrb[5].mxu0  ;;  %v14249_v11 = vld [vmem:[%s20973_s4 + $0x10] ss:$56 sps:$4 sm:$0xff]  }
 0x119   : > { %2085 = vmatprep.subr.bf16.mxu0 %v14242_v12  ;;  %v806_v42 = vadd.f32 %v16095_v4, %v771_v33  ;;  %v16126_v43 = vpack.c.bf16 %v937_v19, %v937_v19  ;;  %v807_v44 = vadd.f32 %v16108_v28, %v772_v35  ;;  %v773_v51 = vmul.f32 %v16087_v18, %v619_v46  ;;  %v623_v3 = vpop.f32.mrb[6].mxu0  ;;  %v14254_v12 = vld [vmem:[%s20973_s4 + $0x84] ss:$56 sps:$4 sm:$0xff]  }
 0x11a   : > { %v16110_v30 = vpack.c.bf16 %v938_v20, %v938_v20  ;;  %v826_v39 = vmax.f32 %v804_v31, 0.0  ;;  %v827_v48 = vmax.f32 %v805_v41, 0.0  ;;  %v774_v1 = vmul.f32 %v16105_v26, %v621_v60  ;;  %v625_v7 = vpop.f32.mrb[7].mxu0  ;;  %v14260_v41 = vld [vmem:[%s20973_s4 + $0x164] ss:$56 sps:$4 sm:$0xff]  }
 0x11b   : > { %v828_v49 = vmax.f32 %v806_v42, 0.0  ;;  %v829_v53 = vmax.f32 %v807_v44, 0.0  ;;  %v808_v58 = vadd.f32 %v16095_v4, %v773_v51  ;;  %v775_v6 = vmul.f32 %v16087_v18, %v623_v3  ;;  %v629_v63 = vpop.f32.mrb[8].mxu0 }
 0x11c   : > { %2086 = vmatpush1.bf16.msra.mxu0 %v14240_v21  ;;  %12493 = vmatprep.mubr.msk.bf16.mxu0 %vm1959_vm1, %v16110_v30  ;;  %v809_v9 = vadd.f32 %v16108_v28, %v774_v1  ;;  %v776_v10 = vmul.f32 %v16105_v26, %v625_v7  ;;  %v777_v19 = vmul.f32 %v16087_v18, %v629_v63  ;;  %v14252_v21 = vld [vmem:[%s20973_s4 + $0x80] ss:$56 sps:$4 sm:$0xff]   ;;  %v631_v29 = vpop.f32.mrb[9].mxu0 }
 0x11d   : > { %12523 = vmatprep.mubr.msk.bf16.mxu1 %vm1959_vm1, %v16110_v30  ;;  %2087 = vmatprep.subr.bf16.mxu0 %v14245_v22  ;;  %v16145_v57 = vpack.c.bf16 %v828_v49, %v826_v39  ;;  %v16148_v62 = vpack.c.bf16 %v829_v53, %v827_v48  ;;  %v830_v14 = vmax.f32 %v808_v58, 0.0  ;;  %v810_v15 = vadd.f32 %v16095_v4, %v775_v6  ;;  %v14257_v22 = vld [vmem:[%s20973_s4 + $0xf4] ss:$56 sps:$4 sm:$0xff]   ;;  %v633_v33 = vpop.f32.mrb[10].mxu0 }
 0x11e   : > { %v831_v61 = vmax.f32 %v809_v9, 0.0  ;;  %v811_v17 = vadd.f32 %v16108_v28, %v776_v10  ;;  %v812_v25 = vadd.f32 %v16095_v4, %v777_v19  ;;  %v778_v32 = vmul.f32 %v16105_v26, %v631_v29  ;;  %v14261_v9 = vld [vmem:[%s20973_s4 + $0x1d0] ss:$56 sps:$4 sm:$0xff]   ;;  %v14269_v29 = vld [vmem:[%s20973_s4 + $0x2b4] ss:$56 sps:$4 sm:$0xff]  }
 0x11f   : > { %2061 = vmatmul.mubr.bf16.gmra.mrb[44].mxu0 %v16126_v43  ;;  %2510 = vmatmul.mubr.bf16.gmra.mrb[44].mxu1 %v16126_v43  ;;  %21082 = vst [vmem:[#allocation9_spill] sm:$0xff] %v16145_v57  ;;  %21083 = vst [vmem:[#allocation10_spill] sm:$0xff] %v16148_v62  ;;  %v832_v0 = vmax.f32 %v810_v15, 0.0  ;;  %v779_v35 = vmul.f32 %v16087_v18, %v633_v33  ;;  %v14266_v15 = vld [vmem:[%s20973_s4 + $0x244] ss:$56 sps:$4 sm:$0xff]  }
 0x120   : > { %2088 = vmatpush1.bf16.msra.mxu0 %v14243_v36  ;;  %12494 = vmatprep.mubr.msk.bf16.mxu0 %vm1959_vm1, %v15945_v27  ;;  %v833_v20 = vmax.f32 %v811_v17, 0.0  ;;  %v635_v36 = vpop.f32.mrb[11].mxu0  ;;  %v834_v42 = vmax.f32 %v812_v25, 0.0  ;;  %v14264_v25 = vld [vmem:[%s20973_s4 + $0x240] ss:$56 sps:$4 sm:$0xff]  }
 0x121   : > { %2089 = vmatprep.subr.bf16.mxu0 %v14248_v38  ;;  %v16172_v23 = vpack.c.bf16 %v832_v0, %v830_v14  ;;  %v813_v38 = vadd.f32 %v16108_v28, %v778_v32  ;;  %v780_v39 = vmul.f32 %v16105_v26, %v635_v36  ;;  %v814_v44 = vadd.f32 %v16095_v4, %v779_v35  ;;  %v639_v48 = vpop.f32.mrb[12].mxu0 }
 0x122   : > { %v16175_v31 = vpack.c.bf16 %v833_v20, %v831_v61  ;;  %v781_v51 = vmul.f32 %v16087_v18, %v639_v48  ;;  %v641_v1 = vpop.f32.mrb[13].mxu0 }
 0x123   : > { %21084 = vst [vmem:[#allocation11_spill] sm:$0xff] %v16172_v23  ;;  %v835_v45 = vmax.f32 %v813_v38, 0.0  ;;  %v815_v46 = vadd.f32 %v16108_v28, %v780_v39  ;;  %v836_v49 = vmax.f32 %v814_v44, 0.0  ;;  %v782_v6 = vmul.f32 %v16105_v26, %v641_v1  ;;  %v643_v7 = vpop.f32.mrb[14].mxu0  ;;  %v14267_v39 = vld [vmem:[%s20973_s4 + $0x2b0] ss:$56 sps:$4 sm:$0xff]  }
 0x124   : > { %2090 = vmatpush1.bf16.msra.mxu0 %v14246_v54  ;;  %21085 = vst [vmem:[#allocation12_spill] sm:$0xff] %v16175_v31  ;;  %v14258_v54 = vld [vmem:[%s20973_s4 + $0x160] ss:$56 sps:$4 sm:$0xff]   ;;  %v816_v60 = vadd.f32 %v16095_v4, %v781_v51  ;;  %v783_v10 = vmul.f32 %v16087_v18, %v643_v7 }
 0x125   : > { %2156 = vmatprep.subr.bf16.mxu0 %v14251_v55  ;;  %v837_v53 = vmax.f32 %v815_v46, 0.0  ;;  %v14263_v55 = vld [vmem:[%s20973_s4 + $0x1d4] ss:$56 sps:$4 sm:$0xff]   ;;  %v16199_v58 = vpack.c.bf16 %v836_v49, %v834_v42  ;;  %v14272_v46 = vld [vmem:[%s20973_s4 + $0x324] ss:$56 sps:$4 sm:$0xff]  }
 0x126   : > { %v838_v61 = vmax.f32 %v816_v60, 0.0  ;;  %v818_v17 = vadd.f32 %v16095_v4, %v783_v10  ;;  %v14270_v1 = vld [vmem:[%s20973_s4 + $0x320] ss:$56 sps:$4 sm:$0xff]  }
 0x127   : > { %2100 = vmatmul.mubr.bf16.vlgmr.msra.gmra.mrb[48].mxu0 %v15942_v24  ;;  %21086 = vst [vmem:[#allocation13_spill] sm:$0xff] %v16199_v58  ;;  %v16202_v3 = vpack.c.bf16 %v837_v53, %v835_v45 }
 0x128   : > { %2157 = vmatpush1.bf16.msra.mxu0 %v14249_v11  ;;  %12495 = vmatprep.mubr.msk.bf16.mxu0 %vm1959_vm1, %v15978_v50  ;;  %v645_v11 = vpop.f32.mrb[15].mxu0  ;;  %v840_v20 = vmax.f32 %v818_v17, 0.0  ;;  %v14281_v17 = vld [vmem:[%s20973_s4 + $0x474] ss:$56 sps:$4 sm:$0xff]  }
 0x129   : > { %2158 = vmatprep.subr.bf16.mxu0 %v14254_v12  ;;  %21087 = vst [vmem:[#allocation14_spill] sm:$0xff] %v16202_v3  ;;  %v817_v12 = vadd.f32 %v16108_v28, %v782_v6  ;;  %v784_v14 = vmul.f32 %v16105_v26, %v645_v11  ;;  %v649_v19 = vpop.f32.mrb[16].mxu0  ;;  %v14275_v6 = vld [vmem:[%s20973_s4 + $0x394] ss:$56 sps:$4 sm:$0xff]  }
 0x12a   : > { %v16226_v32 = vpack.c.bf16 %v840_v20, %v838_v61  ;;  %v14276_v61 = vld [vmem:[%s20973_s4 + $0x400] ss:$56 sps:$4 sm:$0xff]  }
 0x12b   : > { %v839_v63 = vmax.f32 %v817_v12, 0.0  ;;  %v819_v0 = vadd.f32 %v16108_v28, %v784_v14  ;;  %v14273_v14 = vld [vmem:[%s20973_s4 + $0x390] ss:$56 sps:$4 sm:$0xff]   ;;  %v14282_v20 = vld [vmem:[%s20973_s4 + $0x4e0] ss:$56 sps:$4 sm:$0xff]  }
 0x12c   : > { %2159 = vmatpush1.bf16.msra.mxu0 %v14252_v21  ;;  %v785_v21 = vmul.f32 %v16087_v18, %v649_v19  ;;  %21088 = vst [vmem:[#allocation15_spill] sm:$0xff] %v16226_v32  ;;  %v14284_v19 = vld [vmem:[%s20973_s4 + $0x4e4] ss:$56 sps:$4 sm:$0xff]  }
 0x12d   : > { %2160 = vmatprep.subr.bf16.mxu0 %v14257_v22  ;;  %v841_v22 = vmax.f32 %v819_v0, 0.0  ;;  %v12582_v0 = vld [vmem:[%s20981_s12 + $0x250] sm:$0xff] }
 0x12e   : > { %v820_v33 = vadd.f32 %v16095_v4, %v785_v21  ;;  %3723 = vperm.xlu0 %14121, %v12582_v0   ;;  %v12551_v21 = vld [vmem:[%s20981_s12 + $0x100] sm:$0x1]  ;;  %v14323_v0 = vld [vmem:[%s20973_s4 + $0x24] ss:$56 sps:$4 sm:$0xff]  }
 0x12f   : > { %2110 = vmatmul.mubr.bf16.gmra.mrb[52].mxu0 %v15975_v47  ;;  %v16229_v35 = vpack.c.bf16 %v841_v22, %v839_v63  ;;  %v14279_v63 = vld [vmem:[%s20973_s4 + $0x470] ss:$56 sps:$4 sm:$0xff]   ;;  %v14287_v22 = vld [vmem:[%s20973_s4 + $0x1c] ss:$56 sps:$4 sm:$0xff]  }
 0x130   : > { %2161 = vmatpush1.bf16.msra.mxu0 %v14255_v34  ;;  %12496 = vmatprep.mubr.msk.bf16.mxu0 %vm1959_vm1, %v16008_v16  ;;  %v651_v34 = vpop.f32.mrb[17].mxu0  ;;  %v842_v48 = vmax.f32 %v820_v33, 0.0  ;;  %v14288_v33 = vld [vmem:[%s20973_s4 + $0x88] ss:$56 sps:$4 sm:$0xff]  }
 0x131   : > { %2162 = vmatprep.subr.bf16.mxu0 %v14260_v41  ;;  %21089 = vst [vmem:[#allocation16_spill] sm:$0xff] %v16229_v35  ;;  %v786_v36 = vmul.f32 %v16105_v26, %v651_v34  ;;  %v653_v38 = vpop.f32.mrb[18].mxu0  ;;  %v14293_v34 = vld [vmem:[%s20973_s4 + $0xfc] ss:$56 sps:$4 sm:$0xff]  }
 0x132   : > { %v787_v41 = vmul.f32 %v16087_v18, %v653_v38  ;;  %v655_v42 = vpop.f32.mrb[19].mxu0  ;;  %3143 = vperm.xlu0 %14121, %v12551_v21   ;;  %v14296_v38 = vld [vmem:[%s20973_s4 + $0x16c] ss:$56 sps:$4 sm:$0xff]   ;;  %v14324_v21 = vld [vmem:[%s20973_s4 + $0x90] ss:$56 sps:$4 sm:$0xff]  }
 0x133   : > { %v821_v44 = vadd.f32 %v16108_v28, %v786_v36  ;;  %v788_v45 = vmul.f32 %v16105_v26, %v655_v42  ;;  %v14291_v36 = vld [vmem:[%s20973_s4 + $0xf8] ss:$56 sps:$4 sm:$0xff]  }
 0x134   : > { %2163 = vmatpush1.bf16.msra.mxu0 %v14258_v54  ;;  %v822_v49 = vadd.f32 %v16095_v4, %v787_v41  ;;  %v16243_v54 = vpop.f32.mrb[20].mxu0  ;;  %v14299_v41 = vld [vmem:[%s20973_s4 + $0x1dc] ss:$56 sps:$4 sm:$0xff]   ;;  %v14297_v42 = vld [vmem:[%s20973_s4 + $0x1d8] ss:$56 sps:$4 sm:$0xff]  }
 0x135   : > { %2164 = vmatprep.subr.bf16.mxu0 %v14263_v55  ;;  %v843_v51 = vmax.f32 %v821_v44, 0.0  ;;  %v823_v53 = vadd.f32 %v16108_v28, %v788_v45  ;;  %21090 = vst [vmem:[#allocation17_spill] sm:$0xff] %v16243_v54  ;;  %v14302_v44 = vld [vmem:[%s20973_s4 + $0x24c] ss:$56 sps:$4 sm:$0xff]   ;;  %v14300_v45 = vld [vmem:[%s20973_s4 + $0x248] ss:$56 sps:$4 sm:$0xff]  }
 0x136   : > { %v844_v55 = vmax.f32 %v822_v49, 0.0  ;;  %v14303_v49 = vld [vmem:[%s20973_s4 + $0x2b8] ss:$56 sps:$4 sm:$0xff]  }
 0x137   : > { %2120 = vmatmul.mubr.bf16.gmra.mrb[56].mxu0 %v16005_v13  ;;  %v845_v60 = vmax.f32 %v823_v53, 0.0  ;;  %v12562_v53 = vld [vmem:[%s20981_s12 + $0x1b0] sm:$0x1] }
 0x138   : > { %2165 = vmatpush1.bf16.msra.mxu0 %v14261_v9  ;;  %12497 = vmatprep.mubr.msk.bf16.mxu0 %vm1959_vm1, %v16038_v40  ;;  %v16254_v7 = vpack.c.bf16 %v844_v55, %v842_v48  ;;  %v16256_v9 = vpop.f32.mrb[21].mxu0  ;;  %v12583_v48 = vld [vmem:[%s20981_s12 + $0x258] sm:$0xff]  ;;  %v12573_v55 = vld [vmem:[%s20981_s12 + $0x208] sm:$0x1] }
 0x139   : > { %2166 = vmatprep.subr.bf16.mxu0 %v14266_v15  ;;  %21092 = vst [vmem:[#allocation19_spill] sm:$0xff] %v16256_v9  ;;  %v16258_v10 = vpack.c.bf16 %v845_v60, %v843_v51  ;;  %v663_v11 = vpop.f32.mrb[22].mxu0  ;;  %v14278_v15 = vld [vmem:[%s20973_s4 + $0x404] ss:$56 sps:$4 sm:$0xff]   ;;  %3728 = vperm.xlu1 %14122, %v12583_v48   ;;  %v14306_v60 = vld [vmem:[%s20973_s4 + $0x328] ss:$56 sps:$4 sm:$0xff]  }
 0x13a   : > { %21091 = vst [vmem:[#allocation18_spill] sm:$0xff] %v16254_v7  ;;  %v664_v12 = vpop.f32.mrb[23].mxu0  ;;  %v14308_v51 = vld [vmem:[%s20973_s4 + $0x32c] ss:$56 sps:$4 sm:$0xff]   ;;  %3536 = vperm.xlu0 %14121, %v12573_v55   ;;  %v14309_v11 = vld [vmem:[%s20973_s4 + $0x398] ss:$56 sps:$4 sm:$0xff]  }
 0x13b   : > { %21093 = vst [vmem:[#allocation20_spill] sm:$0xff] %v16258_v10  ;;  %v14314_v12 = vld [vmem:[%s20973_s4 + $0x40c] ss:$56 sps:$4 sm:$0xff]   ;;  %v14345_v48 = vld [vmem:[%s20973_s4 + $0x3a0] ss:$56 sps:$4 sm:$0xff]  }
 0x13c   : > { %2167 = vmatpush1.bf16.msra.mxu0 %v14264_v25  ;;  %v14285_v25 = vld [vmem:[%s20973_s4 + $0x18] ss:$56 sps:$4 sm:$0xff]  }
 0x13d   : > { %2168 = vmatprep.subr.bf16.mxu0 %v14269_v29  ;;  %v14290_v29 = vld [vmem:[%s20973_s4 + $0x8c] ss:$56 sps:$4 sm:$0xff]   ;;  %3339 = vperm.xlu1 %14122, %v12562_v53   ;;  %v14351_v55 = vld [vmem:[%s20973_s4 + $0x480] ss:$56 sps:$4 sm:$0xff]   ;;  %v14387_v4 = vld [vmem:[%s20973_s4 + $0x490] ss:$56 sps:$4 sm:$0xff]  }
 0x13e   : > { %v14353_v53 = vld [vmem:[%s20973_s4 + $0x484] ss:$56 sps:$4 sm:$0xff]  }
 0x13f   : > { %2130 = vmatmul.mubr.bf16.gmra.mrb[60].mxu0 %v16035_v37 }
 0x140   : > { %2169 = vmatpush1.bf16.msra.mxu0 %v14267_v39  ;;  %12498 = vmatprep.mubr.msk.bf16.mxu0 %vm1959_vm1, %v16068_v8  ;;  %v14294_v39 = vld [vmem:[%s20973_s4 + $0x168] ss:$56 sps:$4 sm:$0xff]  }
 0x141   : > { %2170 = vmatprep.subr.bf16.mxu0 %v14272_v46  ;;  %v14305_v46 = vld [vmem:[%s20973_s4 + $0x2bc] ss:$56 sps:$4 sm:$0xff]  }
 0x144   : > { %2171 = vmatpush1.bf16.msra.mxu0 %v14270_v1  ;;  %v14311_v1 = vld [vmem:[%s20973_s4 + $0x39c] ss:$56 sps:$4 sm:$0xff]  }
 0x145   : > { %2172 = vmatprep.subr.bf16.mxu0 %v14275_v6  ;;  %v12584_v6 = vld [vmem:[%s20981_s12 + $0x260] sm:$0x1] }
 0x146   : > { %3733 = vperm.xlu1 %14122, %v12584_v6   ;;  %v14359_v6 = vld [vmem:[%s20973_s4 + $0x34] ss:$56 sps:$4 sm:$0xff]  }
 0x147   : > { %2140 = vmatmul.mubr.bf16.gmra.mrb[64].mxu0 %v16065_v5 }
 0x148   : > { %2173 = vmatpush1.bf16.msra.mxu0 %v14273_v14  ;;  %12499 = vmatprep.mubr.msk.bf16.mxu0 %vm1959_vm1, %v16110_v30  ;;  %v14312_v14 = vld [vmem:[%s20973_s4 + $0x408] ss:$56 sps:$4 sm:$0xff]  }
 0x149   : > { %2174 = vmatprep.subr.bf16.mxu0 %v14278_v15  ;;  %v14317_v15 = vld [vmem:[%s20973_s4 + $0x47c] ss:$56 sps:$4 sm:$0xff]  }
 0x14c   : > { %2175 = vmatpush1.bf16.msra.mxu0 %v14276_v61  ;;  %v14315_v61 = vld [vmem:[%s20973_s4 + $0x478] ss:$56 sps:$4 sm:$0xff]  }
 0x14d   : > { %2176 = vmatprep.subr.bf16.mxu0 %v14281_v17  ;;  %v14320_v17 = vld [vmem:[%s20973_s4 + $0x4ec] ss:$56 sps:$4 sm:$0xff]  }
 0x14f   : > { %2150 = vmatmul.mubr.bf16.gmra.mrb[68].mxu0 %v16126_v43 }
 0x150   : > { %2177 = vmatpush1.bf16.msra.mxu0 %v14279_v63  ;;  %12500 = vmatprep.mubr.msk.bf16.mxu0 %vm1959_vm1, %v15945_v27  ;;  %v14318_v63 = vld [vmem:[%s20973_s4 + $0x4e8] ss:$56 sps:$4 sm:$0xff]  }
 0x151   : > { %2178 = vmatprep.subr.bf16.mxu0 %v14284_v19  ;;  %v14321_v19 = vld [vmem:[%s20973_s4 + $0x20] ss:$56 sps:$4 sm:$0xff]  }
 0x154   : > { %2179 = vmatpush1.bf16.msra.mxu0 %v14282_v20  ;;  %v14326_v20 = vld [vmem:[%s20973_s4 + $0x94] ss:$56 sps:$4 sm:$0xff]  }
 0x155   : > { %2245 = vmatprep.subr.bf16.mxu0 %v14287_v22  ;;  %v14329_v22 = vld [vmem:[%s20973_s4 + $0x104] ss:$56 sps:$4 sm:$0xff]  }
 0x157   : > { %2189 = vmatmul.mubr.bf16.vlgmr.msra.gmra.mrb[72].mxu0 %v15942_v24 }
 0x158   : > { %2246 = vmatpush1.bf16.msra.mxu0 %v14285_v25  ;;  %12501 = vmatprep.mubr.msk.bf16.mxu0 %vm1959_vm1, %v15978_v50  ;;  %v14327_v25 = vld [vmem:[%s20973_s4 + $0x100] ss:$56 sps:$4 sm:$0xff]  }
 0x159   : > { %2247 = vmatprep.subr.bf16.mxu0 %v14290_v29  ;;  %v14332_v29 = vld [vmem:[%s20973_s4 + $0x174] ss:$56 sps:$4 sm:$0xff]  }
 0x15c   : > { %2248 = vmatpush1.bf16.msra.mxu0 %v14288_v33  ;;  %v14330_v33 = vld [vmem:[%s20973_s4 + $0x170] ss:$56 sps:$4 sm:$0xff]  }
 0x15d   : > { %2249 = vmatprep.subr.bf16.mxu0 %v14293_v34  ;;  %v14335_v34 = vld [vmem:[%s20973_s4 + $0x1e4] ss:$56 sps:$4 sm:$0xff]  }
 0x15f   : > { %2199 = vmatmul.mubr.bf16.gmra.mrb[76].mxu0 %v15975_v47 }
 0x160   : > { %2250 = vmatpush1.bf16.msra.mxu0 %v14291_v36  ;;  %12502 = vmatprep.mubr.msk.bf16.mxu0 %vm1959_vm1, %v16008_v16  ;;  %v14333_v36 = vld [vmem:[%s20973_s4 + $0x1e0] ss:$56 sps:$4 sm:$0xff]  }
 0x161   : > { %2251 = vmatprep.subr.bf16.mxu0 %v14296_v38  ;;  %v14338_v38 = vld [vmem:[%s20973_s4 + $0x254] ss:$56 sps:$4 sm:$0xff]  }
 0x164   : > { %2252 = vmatpush1.bf16.msra.mxu0 %v14294_v39  ;;  %v14336_v39 = vld [vmem:[%s20973_s4 + $0x250] ss:$56 sps:$4 sm:$0xff]  }
 0x165   : > { %2253 = vmatprep.subr.bf16.mxu0 %v14299_v41  ;;  %v14341_v41 = vld [vmem:[%s20973_s4 + $0x2c4] ss:$56 sps:$4 sm:$0xff]  }
 0x167   : > { %2209 = vmatmul.mubr.bf16.gmra.mrb[80].mxu0 %v16005_v13 }
 0x168   : > { %2254 = vmatpush1.bf16.msra.mxu0 %v14297_v42  ;;  %12503 = vmatprep.mubr.msk.bf16.mxu0 %vm1959_vm1, %v16038_v40  ;;  %v14339_v42 = vld [vmem:[%s20973_s4 + $0x2c0] ss:$56 sps:$4 sm:$0xff]  }
 0x169   : > { %2255 = vmatprep.subr.bf16.mxu0 %v14302_v44  ;;  %v14344_v44 = vld [vmem:[%s20973_s4 + $0x334] ss:$56 sps:$4 sm:$0xff]  }
 0x16c   : > { %2256 = vmatpush1.bf16.msra.mxu0 %v14300_v45  ;;  %v14342_v45 = vld [vmem:[%s20973_s4 + $0x330] ss:$56 sps:$4 sm:$0xff]  }
 0x16d   : > { %2257 = vmatprep.subr.bf16.mxu0 %v14305_v46  ;;  %v14347_v46 = vld [vmem:[%s20973_s4 + $0x3a4] ss:$56 sps:$4 sm:$0xff]  }
 0x16f   : > { %2219 = vmatmul.mubr.bf16.gmra.mrb[84].mxu0 %v16035_v37 }
 0x170   : > { %2258 = vmatpush1.bf16.msra.mxu0 %v14303_v49  ;;  %12504 = vmatprep.mubr.msk.bf16.mxu0 %vm1959_vm1, %v16068_v8  ;;  %v14350_v49 = vld [vmem:[%s20973_s4 + $0x414] ss:$56 sps:$4 sm:$0xff]  }
 0x171   : > { %2259 = vmatprep.subr.bf16.mxu0 %v14308_v51  ;;  %v14348_v51 = vld [vmem:[%s20973_s4 + $0x410] ss:$56 sps:$4 sm:$0xff]  }
 0x174   : > { %2260 = vmatpush1.bf16.msra.mxu0 %v14306_v60  ;;  %v14356_v60 = vld [vmem:[%s20973_s4 + $0x4f4] ss:$56 sps:$4 sm:$0xff]  }
 0x175   : > { %2261 = vmatprep.subr.bf16.mxu0 %v14311_v1  ;;  %v14354_v1 = vld [vmem:[%s20973_s4 + $0x4f0] ss:$56 sps:$4 sm:$0xff]  }
 0x177   : > { %2229 = vmatmul.mubr.bf16.gmra.mrb[88].mxu0 %v16065_v5 }
 0x178   : > { %2262 = vmatpush1.bf16.msra.mxu0 %v14309_v11  ;;  %12505 = vmatprep.mubr.msk.bf16.mxu0 %vm1959_vm1, %v16110_v30  ;;  %v14357_v11 = vld [vmem:[%s20973_s4 + $0x30] ss:$56 sps:$4 sm:$0xff]  }
 0x179   : > { %2263 = vmatprep.subr.bf16.mxu0 %v14314_v12  ;;  %v14362_v12 = vld [vmem:[%s20973_s4 + $0xa4] ss:$56 sps:$4 sm:$0xff]  }
 0x17c   : > { %2264 = vmatpush1.bf16.msra.mxu0 %v14312_v14  ;;  %v14360_v14 = vld [vmem:[%s20973_s4 + $0xa0] ss:$56 sps:$4 sm:$0xff]  }
 0x17d   : > { %2265 = vmatprep.subr.bf16.mxu0 %v14317_v15  ;;  %v14365_v15 = vld [vmem:[%s20973_s4 + $0x114] ss:$56 sps:$4 sm:$0xff]  }
 0x17f   : > { %2239 = vmatmul.mubr.bf16.gmra.mrb[92].mxu0 %v16126_v43 }
 0x180   : > { %2266 = vmatpush1.bf16.msra.mxu0 %v14315_v61  ;;  %12506 = vmatprep.mubr.msk.bf16.mxu0 %vm1959_vm1, %v15945_v27  ;;  %v14363_v61 = vld [vmem:[%s20973_s4 + $0x110] ss:$56 sps:$4 sm:$0xff]  }
 0x181   : > { %2267 = vmatprep.subr.bf16.mxu0 %v14320_v17  ;;  %v14368_v17 = vld [vmem:[%s20973_s4 + $0x184] ss:$56 sps:$4 sm:$0xff]  }
 0x184   : > { %2268 = vmatpush1.bf16.msra.mxu0 %v14318_v63  ;;  %v14366_v63 = vld [vmem:[%s20973_s4 + $0x180] ss:$56 sps:$4 sm:$0xff]  }
 0x185   : > { %2336 = vmatprep.subr.bf16.mxu0 %v14323_v0  ;;  %v14371_v0 = vld [vmem:[%s20973_s4 + $0x1f4] ss:$56 sps:$4 sm:$0xff]  }
 0x187   : > { %2278 = vmatmul.mubr.bf16.vlgmr.msra.gmra.mrb[96].mxu0 %v15942_v24 }
 0x188   : > { %2337 = vmatpush1.bf16.msra.mxu0 %v14321_v19  ;;  %12507 = vmatprep.mubr.msk.bf16.mxu0 %vm1959_vm1, %v15978_v50  ;;  %v16518_v19 = vpop.permute.xlu0 %2705 }
 0x189   : > { %2338 = vmatprep.subr.bf16.mxu0 %v14326_v20  ;;  %v14369_v20 = vld [vmem:[%s20973_s4 + $0x1f0] ss:$56 sps:$4 sm:$0xff]  }
 0x18c   : > { %2339 = vmatpush1.bf16.msra.mxu0 %v14324_v21  ;;  %v14374_v21 = vld [vmem:[%s20973_s4 + $0x264] ss:$56 sps:$4 sm:$0xff]  }
 0x18d   : > { %2340 = vmatprep.subr.bf16.mxu0 %v14329_v22  ;;  %v14372_v22 = vld [vmem:[%s20973_s4 + $0x260] ss:$56 sps:$4 sm:$0xff]  }
 0x18f   : > { %2288 = vmatmul.mubr.bf16.gmra.mrb[100].mxu0 %v15975_v47 }
 0x190   : > { %2341 = vmatpush1.bf16.msra.mxu0 %v14327_v25  ;;  %12508 = vmatprep.mubr.msk.bf16.mxu0 %vm1959_vm1, %v16008_v16  ;;  %v16532_v25 = vpop.permute.xlu1 %2899 }
 0x191   : > { %2342 = vmatprep.subr.bf16.mxu0 %v14332_v29  ;;  %v16534_v29 = vpop.permute.xlu0 %2710 }
 0x194   : > { %2343 = vmatpush1.bf16.msra.mxu0 %v14330_v33  ;;  %v14377_v33 = vld [vmem:[%s20973_s4 + $0x2d4] ss:$56 sps:$4 sm:$0xff]  }
 0x195   : > { %2344 = vmatprep.subr.bf16.mxu0 %v14335_v34 }
 0x197   : > { %2298 = vmatmul.mubr.bf16.gmra.mrb[104].mxu0 %v16005_v13 }
 0x198   : > { %2345 = vmatpush1.bf16.msra.mxu0 %v14333_v36  ;;  %12509 = vmatprep.mubr.msk.bf16.mxu0 %vm1959_vm1, %v16038_v40 }
 0x199   : > { %2346 = vmatprep.subr.bf16.mxu0 %v14338_v38 }
 0x19c   : > { %2347 = vmatpush1.bf16.msra.mxu0 %v14336_v39 }
 0x19d   : > { %2348 = vmatprep.subr.bf16.mxu0 %v14341_v41 }
 0x19f   : > { %2308 = vmatmul.mubr.bf16.gmra.mrb[108].mxu0 %v16035_v37 }
 0x1a0   : > { %2349 = vmatpush1.bf16.msra.mxu0 %v14339_v42  ;;  %12510 = vmatprep.mubr.msk.bf16.mxu0 %vm1959_vm1, %v16068_v8 }
 0x1a1   : > { %2350 = vmatprep.subr.bf16.mxu0 %v14344_v44  ;;  %v14375_v44 = vld [vmem:[%s20973_s4 + $0x2d0] ss:$56 sps:$4 sm:$0xff]  }
 0x1a4   : > { %2351 = vmatpush1.bf16.msra.mxu0 %v14342_v45  ;;  %v14380_v45 = vld [vmem:[%s20973_s4 + $0x344] ss:$56 sps:$4 sm:$0xff]  }
 0x1a5   : > { %2352 = vmatprep.subr.bf16.mxu0 %v14347_v46 }
 0x1a7   : > { %2318 = vmatmul.mubr.bf16.gmra.mrb[112].mxu0 %v16065_v5 }
 0x1a8   : > { %2353 = vmatpush1.bf16.msra.mxu0 %v14345_v48  ;;  %12511 = vmatprep.mubr.msk.bf16.mxu0 %vm1959_vm1, %v16110_v30 }
 0x1a9   : > { %2354 = vmatprep.subr.bf16.mxu0 %v14350_v49 }
 0x1ac   : > { %2355 = vmatpush1.bf16.msra.mxu0 %v14348_v51 }
 0x1ad   : > { %2356 = vmatprep.subr.bf16.mxu0 %v14353_v53 }
 0x1af   : > { %2328 = vmatmul.mubr.bf16.gmra.mrb[116].mxu0 %v16126_v43 }
 0x1b0   : > { %2357 = vmatpush1.bf16.msra.mxu0 %v14351_v55  ;;  %12512 = vmatprep.mubr.msk.bf16.mxu0 %vm1959_vm1, %v15945_v27 }
 0x1b1   : > { %2358 = vmatprep.subr.bf16.mxu0 %v14356_v60 }
 0x1b4   : > { %2359 = vmatpush1.bf16.msra.mxu0 %v14354_v1 }
 0x1b5   : > { %2518 = vmatprep.subr.bf16.mxu0 %v14359_v6 }
 0x1b7   : > { %2369 = vmatmul.mubr.bf16.vlgmr.msra.gmra.mrb[120].mxu0 %v15942_v24 }
 0x1b8   : > { %2519 = vmatpush1.bf16.msra.mxu0 %v14357_v11  ;;  %12513 = vmatprep.mubr.msk.bf16.mxu0 %vm1959_vm1, %v15978_v50 }
 0x1b9   : > { %2520 = vmatprep.subr.bf16.mxu0 %v14362_v12 }
 0x1bc   : > { %2521 = vmatpush1.bf16.msra.mxu0 %v14360_v14 }
 0x1bd   : > { %2522 = vmatprep.subr.bf16.mxu0 %v14365_v15 }
 0x1bf   : > { %2379 = vmatmul.mubr.bf16.gmra.mrb[124].mxu0 %v15975_v47 }
 0x1c0   : > { %2523 = vmatpush1.bf16.msra.mxu0 %v14363_v61  ;;  %12514 = vmatprep.mubr.msk.bf16.mxu0 %vm1959_vm1, %v16008_v16  ;;  %v14378_v61 = vld [vmem:[%s20973_s4 + $0x340] ss:$56 sps:$4 sm:$0xff]  }
 0x1c1   : > { %2524 = vmatprep.subr.bf16.mxu0 %v14368_v17  ;;  %v16568_v17 = vpop.permute.xlu1 %2904 }
 0x1c4   : > { %2525 = vmatpush1.bf16.msra.mxu0 %v14366_v63  ;;  %v16570_v63 = vpop.permute.xlu0 %3093 }
 0x1c5   : > { %2526 = vmatprep.subr.bf16.mxu0 %v14371_v0  ;;  %v14383_v0 = vld [vmem:[%s20973_s4 + $0x3b4] ss:$56 sps:$4 sm:$0xff]  }
 0x1c7   : > { %2389 = vmatmul.mubr.bf16.gmra.mrb[128].mxu0 %v16005_v13 }
 0x1c8   : > { %2527 = vmatpush1.bf16.msra.mxu0 %v14369_v20  ;;  %12515 = vmatprep.mubr.msk.bf16.mxu0 %vm1959_vm1, %v16038_v40 }
 0x1c9   : > { %2528 = vmatprep.subr.bf16.mxu0 %v14374_v21 }
 0x1ca   : > { %v16539_v34 = vpop.f32.mrb[24].mxu0  ;;  %v2461_v36 = vpop.f32.mrb[24].mxu1 }
 0x1cb   : > { %v16541_v38 = vpop.f32.mrb[25].mxu0  ;;  %v2463_v39 = vpop.f32.mrb[25].mxu1  ;;  %v20987_v46 = vrot.slane %v16539_v34, 5  ;;  %v3408_v48 = vrot.slane %v2461_v36, 2 }
 0x1cc   : > { %2529 = vmatpush1.bf16.msra.mxu0 %v14372_v22  ;;  %v2016_v41 = vpop.f32.mrb[26].mxu0  ;;  %v2465_v42 = vpop.f32.mrb[26].mxu1  ;;  %v3411_v60 = vrot.slane %v2463_v39, 2  ;;  %v20986_v11 = vrot.slane %v16541_v38, 5 }
 0x1cd   : > { %v2632_v49 = vrot.slane %v2016_v41, 5  ;;  %v3409_v51 = vrot.slane %v2465_v42, 2  ;;  %v2018_v53 = vpop.f32.mrb[27].mxu0  ;;  %v2467_v55 = vpop.f32.mrb[27].mxu1  ;;  %2530 = vmatprep.subr.bf16.mxu0 %v14377_v33 }
 0x1ce   : > { %v2634_v1 = vrot.slane %v2018_v53, 5  ;;  %v3412_v6 = vrot.slane %v2467_v55, 2  ;;  %v14381_v53 = vld [vmem:[%s20973_s4 + $0x3b0] ss:$56 sps:$4 sm:$0xff]  }
 0x1cf   : > { %v16552_v12 = vsel %vm3407_vm2, %v3408_v48, %v3409_v51  ;;  %2399 = vmatmul.mubr.bf16.gmra.mrb[132].mxu0 %v16035_v37  ;;  %v16558_v14 = vsel %vm2629_vm3, %v20987_v46, %v2632_v49 }
 0x1d0   : > { %21094 = vst [vmem:[#allocation21_spill] sm:$0xff] %v16552_v12  ;;  %v16561_v15 = vsel %vm3407_vm2, %v3411_v60, %v3412_v6  ;;  %2531 = vmatpush1.bf16.msra.mxu0 %v14375_v44  ;;  %12516 = vmatprep.mubr.msk.bf16.mxu0 %vm1959_vm1, %v16068_v8  ;;  %v16578_v20 = vsel %vm2629_vm3, %v20986_v11, %v2634_v1 }
 0x1d1   : > { %21095 = vst [vmem:[#allocation22_spill] sm:$0xff] %v16561_v15  ;;  %2532 = vmatprep.subr.bf16.mxu0 %v14380_v45 }
 0x1d2   : > { %v2022_v21 = vpop.f32.mrb[28].mxu0  ;;  %v2471_v22 = vpop.f32.mrb[28].mxu1 }
 0x1d3   : > { %v2636_v33 = vrot.slane %v2022_v21, 5  ;;  %v3414_v36 = vrot.slane %v2471_v22, 2  ;;  %v2024_v39 = vpop.f32.mrb[29].mxu0  ;;  %v2473_v41 = vpop.f32.mrb[29].mxu1  ;;  %v14386_v21 = vld [vmem:[%s20973_s4 + $0x424] ss:$56 sps:$4 sm:$0xff]  }
 0x1d4   : > { %v2638_v42 = vrot.slane %v2024_v39, 5  ;;  %v3416_v44 = vrot.slane %v2473_v41, 2  ;;  %2533 = vmatpush1.bf16.msra.mxu0 %v14378_v61  ;;  %v2026_v48 = vpop.f32.mrb[30].mxu0  ;;  %v2475_v45 = vpop.f32.mrb[30].mxu1 }
 0x1d5   : > { %v16584_v55 = vsel %vm3407_vm2, %v3409_v51, %v3414_v36  ;;  %v2640_v60 = vrot.slane %v2026_v48, 5  ;;  %v3418_v2 = vrot.slane %v2475_v45, 2  ;;  %v2028_v11 = vpop.f32.mrb[31].mxu0  ;;  %v2477_v46 = vpop.f32.mrb[31].mxu1  ;;  %2534 = vmatprep.subr.bf16.mxu0 %v14383_v0  ;;  %v16590_v61 = vsel %vm2629_vm3, %v2632_v49, %v2636_v33  ;;  %v14384_v49 = vld [vmem:[%s20973_s4 + $0x420] ss:$56 sps:$4 sm:$0xff]  }
 0x1d6   : > { %21096 = vst [vmem:[#allocation23_spill] sm:$0xff] %v16584_v55  ;;  %v16593_v22 = vsel %vm3407_vm2, %v3412_v6, %v3416_v44  ;;  %v2642_v39 = vrot.slane %v2028_v11, 5  ;;  %v3420_v41 = vrot.slane %v2477_v46, 2  ;;  %v16600_v48 = vsel %vm2629_vm3, %v2634_v1, %v2638_v42  ;;  %v16610_v46 = vpop.permute.xlu1 %3098  ;;  %v16612_v6 = vpop.permute.xlu0 %3289  ;;  %v14389_v1 = vld [vmem:[%s20973_s4 + $0x494] ss:$56 sps:$4 sm:$0xff]  }
 0x1d7   : > { %21097 = vst [vmem:[#allocation24_spill] sm:$0xff] %v16593_v22  ;;  %v16596_v51 = vsel %vm3407_vm2, %v3414_v36, %v3418_v2  ;;  %2409 = vmatmul.mubr.bf16.gmra.mrb[136].mxu0 %v16065_v5  ;;  %21100 = vst [vmem:[#allocation27_spill] sm:$0xff] %v16612_v6  ;;  %v16618_v11 = vsel %vm2629_vm3, %v2636_v33, %v2640_v60 }
 0x1d8   : > { %21098 = vst [vmem:[#allocation25_spill] sm:$0xff] %v16596_v51  ;;  %v16603_v0 = vsel %vm3407_vm2, %v3416_v44, %v3420_v41  ;;  %2535 = vmatpush1.bf16.msra.mxu0 %v14381_v53  ;;  %12517 = vmatprep.mubr.msk.bf16.mxu0 %vm1959_vm1, %v16110_v30  ;;  %v16621_v36 = vsel %vm2629_vm3, %v2638_v42, %v2642_v39 }
 0x1d9   : > { %21099 = vst [vmem:[#allocation26_spill] sm:$0xff] %v16603_v0  ;;  %2536 = vmatprep.subr.bf16.mxu0 %v14386_v21 }
 0x1da   : > { %v2032_v44 = vpop.f32.mrb[32].mxu0  ;;  %v2481_v45 = vpop.f32.mrb[32].mxu1 }
 0x1db   : > { %v2644_v53 = vrot.slane %v2032_v44, 5  ;;  %v3422_v52 = vrot.slane %v2481_v45, 2  ;;  %v2034_v7 = vpop.f32.mrb[33].mxu0  ;;  %v2483_v10 = vpop.f32.mrb[33].mxu1 }
 0x1dc   : > { %v2646_v32 = vrot.slane %v2034_v7, 5  ;;  %v3424_v35 = vrot.slane %v2483_v10, 2  ;;  %2537 = vmatpush1.bf16.msra.mxu0 %v14384_v49  ;;  %v2036_v21 = vpop.f32.mrb[34].mxu0  ;;  %v2485_v58 = vpop.f32.mrb[34].mxu1  ;;  %v14392_v7 = vld [vmem:[%s20973_s4 + $0x504] ss:$56 sps:$4 sm:$0xff]  }
 0x1dd   : > { %v16627_v33 = vsel %vm3407_vm2, %v3418_v2, %v3422_v52  ;;  %v2648_v42 = vrot.slane %v2036_v21, 5  ;;  %v3426_v3 = vrot.slane %v2485_v58, 2  ;;  %v2038_v23 = vpop.f32.mrb[35].mxu0  ;;  %v2487_v28 = vpop.f32.mrb[35].mxu1  ;;  %2538 = vmatprep.subr.bf16.mxu0 %v14389_v1  ;;  %v16633_v10 = vsel %vm2629_vm3, %v2640_v60, %v2644_v53 }
 0x1de   : > { %21101 = vst [vmem:[#allocation28_spill] sm:$0xff] %v16627_v33  ;;  %v16636_v49 = vsel %vm3407_vm2, %v3420_v41, %v3424_v35  ;;  %v2650_v44 = vrot.slane %v2038_v23, 5  ;;  %v3428_v45 = vrot.slane %v2487_v28, 2  ;;  %v16643_v58 = vsel %vm2629_vm3, %v2642_v39, %v2646_v32  ;;  %v14390_v23 = vld [vmem:[%s20973_s4 + $0x500] ss:$56 sps:$4 sm:$0xff]   ;;  %v16653_v28 = vpop.permute.xlu1 %3294 }
 0x1df   : > { %21102 = vst [vmem:[#allocation29_spill] sm:$0xff] %v16636_v49  ;;  %v16639_v2 = vsel %vm3407_vm2, %v3422_v52, %v3426_v3  ;;  %2419 = vmatmul.mubr.bf16.gmra.mrb[140].mxu0 %v16126_v43  ;;  %21105 = vst [vmem:[#allocation32_spill] sm:$0xff] %v16653_v28  ;;  %v16655_v52 = vpop.permute.xlu0 %2715  ;;  %v16658_v60 = vsel %vm2629_vm3, %v2644_v53, %v2648_v42 }
 0x1e0   : > { %21103 = vst [vmem:[#allocation30_spill] sm:$0xff] %v16639_v2  ;;  %v16646_v1 = vsel %vm3407_vm2, %v3424_v35, %v3428_v45  ;;  %2539 = vmatpush1.bf16.msra.mxu0 %v14387_v4  ;;  %12524 = vmatprep.mubr.msk.bf16.mxu0 %vm1959_vm1, %v15945_v27  ;;  %v16661_v39 = vsel %vm2629_vm3, %v2646_v32, %v2650_v44 }
 0x1e1   : > { %21104 = vst [vmem:[#allocation31_spill] sm:$0xff] %v16646_v1  ;;  %2540 = vmatprep.subr.bf16.mxu0 %v14392_v7 }
 0x1e2   : > { %v2042_v35 = vpop.f32.mrb[36].mxu0  ;;  %v2491_v4 = vpop.f32.mrb[36].mxu1 }
 0x1e3   : > { %v2652_v41 = vrot.slane %v2042_v35, 5  ;;  %v3430_v21 = vrot.slane %v2491_v4, 2  ;;  %v2044_v27 = vpop.f32.mrb[37].mxu0  ;;  %v2493_v31 = vpop.f32.mrb[37].mxu1 }
 0x1e4   : > { %v2654_v18 = vrot.slane %v2044_v27, 5  ;;  %v3432_v54 = vrot.slane %v2493_v31, 2  ;;  %2541 = vmatpush1.bf16.msra.mxu0 %v14390_v23  ;;  %v2046_v57 = vpop.f32.mrb[38].mxu0  ;;  %v2495_v26 = vpop.f32.mrb[38].mxu1 }
 0x1e5   : > { %v16664_v9 = vsel %vm3407_vm2, %v3426_v3, %v3430_v21  ;;  %v2656_v7 = vrot.slane %v2046_v57, 5  ;;  %v3434_v53 = vrot.slane %v2495_v26, 2  ;;  %v2048_v62 = vpop.f32.mrb[39].mxu0  ;;  %v2497_v59 = vpop.f32.mrb[39].mxu1  ;;  %v16667_v32 = vsel %vm2629_vm3, %v2648_v42, %v2652_v41 }
 0x1e6   : > { %21106 = vst [vmem:[#allocation33_spill] sm:$0xff] %v16664_v9  ;;  %21107 = vst [vmem:[#allocation34_spill] sm:$0xff] %v16667_v32  ;;  %v16670_v35 = vsel %vm3407_vm2, %v3428_v45, %v3432_v54  ;;  %v2658_v4 = vrot.slane %v2048_v62, 5  ;;  %v3436_v56 = vrot.slane %v2497_v59, 2  ;;  %v16677_v3 = vsel %vm2629_vm3, %v2650_v44, %v2654_v18  ;;  %v16687_v42 = vpop.permute.xlu1 %2720  ;;  %v16689_v59 = vpop.permute.xlu0 %3486 }
 0x1e7   : > { %21108 = vst [vmem:[#allocation35_spill] sm:$0xff] %v16670_v35  ;;  %v16673_v31 = vsel %vm3407_vm2, %v3430_v21, %v3434_v53  ;;  %2551 = vmatmul.mubr.bf16.vlgmr.msra.gmra.mrb[144].mxu0 %v15942_v24  ;;  %21110 = vst [vmem:[#allocation37_spill] sm:$0xff] %v16677_v3  ;;  %v16685_v57 = vsel %vm2629_vm3, %v2652_v41, %v2656_v7  ;;  %v14419_v3 = vld [vmem:[%s20975_s6 + $0x1c4] ss:$56 sps:$4 sm:$0xff]  }
 0x1e8   : > { %21109 = vst [vmem:[#allocation36_spill] sm:$0xff] %v16673_v31  ;;  %v16680_v26 = vsel %vm3407_vm2, %v3432_v54, %v3436_v56  ;;  %12525 = vmatprep.mubr.msk.bf16.mxu0 %vm1959_vm1, %v15978_v50  ;;  %21112 = vst [vmem:[#allocation39_spill] sm:$0xff] %v16685_v57  ;;  %v16692_v62 = vsel %vm2629_vm3, %v2654_v18, %v2658_v4 }
 0x1e9   : > { %21111 = vst [vmem:[#allocation38_spill] sm:$0xff] %v16680_v26  ;;  %21113 = vst [vmem:[#allocation40_spill] sm:$0xff] %v16689_v59 }
 0x1ea   : > { %21114 = vst [vmem:[#allocation41_spill] sm:$0xff] %v16692_v62  ;;  %v2052_v24 = vpop.f32.mrb[40].mxu0  ;;  %v2501_v45 = vpop.f32.mrb[40].mxu1 }
 0x1eb   : > { %v2660_v44 = vrot.slane %v2052_v24, 5  ;;  %v3438_v23 = vrot.slane %v2501_v45, 2  ;;  %v2054_v21 = vpop.f32.mrb[41].mxu0  ;;  %v2503_v54 = vpop.f32.mrb[41].mxu1 }
 0x1ec   : > { %v2662_v27 = vrot.slane %v2054_v21, 5  ;;  %v3440_v26 = vrot.slane %v2503_v54, 2  ;;  %v16694_v31 = vpop.f32.mrb[42].mxu0  ;;  %v2505_v50 = vpop.f32.mrb[42].mxu1 }
 0x1ed   : > { %21115 = vst [vmem:[#allocation42_spill] sm:$0xff] %v16694_v31  ;;  %v16697_v41 = vsel %vm3407_vm2, %v3434_v53, %v3438_v23  ;;  %v21007_v35 = vrot.slane %v16694_v31, 5  ;;  %v3442_v9 = vrot.slane %v2505_v50, 2  ;;  %v16700_v1 = vpop.f32.mrb[43].mxu0  ;;  %v2507_v18 = vpop.f32.mrb[43].mxu1  ;;  %v16703_v2 = vsel %vm2629_vm3, %v2656_v7, %v2660_v44 }
 0x1ee   : > { %21116 = vst [vmem:[#allocation43_spill] sm:$0xff] %v16697_v41  ;;  %21117 = vst [vmem:[#allocation44_spill] sm:$0xff] %v16700_v1  ;;  %v16706_v24 = vsel %vm3407_vm2, %v3436_v56, %v3440_v26  ;;  %v21008_v45 = vrot.slane %v16700_v1, 5  ;;  %v3444_v21 = vrot.slane %v2507_v18, 2  ;;  %v16713_v53 = vpop.permute.xlu0 %2909  ;;  %v16720_v7 = vpop.permute.xlu1 %3491  ;;  %v16723_v56 = vsel %vm2629_vm3, %v2658_v4, %v2662_v27 }
 0x1ef   : > { %21118 = vst [vmem:[#allocation45_spill] sm:$0xff] %v16703_v2  ;;  %21119 = vst [vmem:[#allocation46_spill] sm:$0xff] %v16706_v24  ;;  %v16710_v54 = vsel %vm3407_vm2, %v3438_v23, %v3442_v9  ;;  %2561 = vmatmul.mubr.bf16.gmra.mrb[148].mxu0 %v15975_v47  ;;  %v16728_v23 = vsel %vm2629_vm3, %v2660_v44, %v21007_v35 }
 0x1f0   : > { %21120 = vst [vmem:[#allocation47_spill] sm:$0xff] %v16710_v54  ;;  %v16716_v50 = vsel %vm3407_vm2, %v3440_v26, %v3444_v21  ;;  %12526 = vmatprep.mubr.msk.bf16.mxu0 %vm1959_vm1, %v16008_v16  ;;  %21122 = vst [vmem:[#allocation49_spill] sm:$0xff] %v16720_v7  ;;  %v16733_v26 = vsel %vm2629_vm3, %v2662_v27, %v21008_v45 }
 0x1f1   : > { %21121 = vst [vmem:[#allocation48_spill] sm:$0xff] %v16716_v50  ;;  %21123 = vst [vmem:[#allocation50_spill] sm:$0xff] %v16723_v56  ;;  %v14407_v56 = vld [vmem:[%s20975_s6 + $0xe4] ss:$56 sps:$4 sm:$0xff]  }
 0x1f2   : > { %21124 = vst [vmem:[#allocation51_spill] sm:$0xff] %v16728_v23  ;;  %v2062_v18 = vpop.f32.mrb[44].mxu0  ;;  %v2511_v47 = vpop.f32.mrb[44].mxu1  ;;  %21125 = vst [vmem:[#allocation52_spill] sm:$0xff] %v16733_v26 }
 0x1f3   : > { %v3446_v50 = vrot.slane %v2511_v47, 2  ;;  %v2063_v54 = vpop.f32.mrb[45].mxu0  ;;  %v2513_v16 = vpop.f32.mrb[45].mxu1 }
 0x1f4   : > { %v3448_v24 = vrot.slane %v2513_v16, 2  ;;  %v2064_v41 = vpop.f32.mrb[46].mxu0  ;;  %v2515_v49 = vpop.f32.mrb[46].mxu1 }
 0x1f5   : > { %v2065_v4 = vpop.f32.mrb[47].mxu0  ;;  %v2516_v33 = vpop.f32.mrb[47].mxu1  ;;  %v16736_v0 = vsel %vm3407_vm2, %v3442_v9, %v3446_v50 }
 0x1f6   : > { %21126 = vst [vmem:[#allocation53_spill] sm:$0xff] %v16736_v0  ;;  %v16738_v44 = vpop.permute.xlu0 %3683  ;;  %v16741_v18 = vsel %vm3407_vm2, %v3444_v21, %v3448_v24  ;;  %v16743_v35 = vpop.permute.xlu1 %2914 }
 0x1f7   : > { %21127 = vst [vmem:[#allocation54_spill] sm:$0xff] %v16738_v44  ;;  %21128 = vst [vmem:[#allocation55_spill] sm:$0xff] %v16741_v18  ;;  %2571 = vmatmul.mubr.bf16.gmra.mrb[152].mxu0 %v16005_v13 }
 0x1f8   : > { %12527 = vmatprep.mubr.msk.bf16.mxu0 %vm1959_vm1, %v16038_v40 }
 0x1fa   : > { %v16748_v27 = vpop.f32.mrb[48].mxu0  ;;  %v16752_v33 = vpop.permute.xlu0 %3103 }
 0x1fb   : > { %v16750_v49 = vpop.f32.mrb[49].mxu0  ;;  %v16754_v41 = vpop.permute.xlu1 %3688  ;;  %v21010_v54 = vrot.slane %v16748_v27, 6 }
 0x1fc   : > { %v2105_v9 = vpop.f32.mrb[50].mxu0  ;;  %21129 = vst [vmem:[#allocation56_spill] sm:$0xff] %v16754_v41  ;;  %v21012_v50 = vrot.slane %v16750_v49, 6 }
 0x1fd   : > { %v2825_v24 = vrot.slane %v2105_v9, 6  ;;  %v2107_v21 = vpop.f32.mrb[51].mxu0 }
 0x1fe   : > { %v2827_v13 = vrot.slane %v2107_v21, 6  ;;  %v16771_v16 = vpop.permute.xlu0 %3299 }
 0x1ff   : > { %v16761_v40 = vsel %vm2822_vm4, %v21010_v54, %v2825_v24  ;;  %2581 = vmatmul.mubr.bf16.gmra.mrb[156].mxu0 %v16035_v37  ;;  %21130 = vst [vmem:[#allocation57_spill] sm:$0xff] %v16771_v16  ;;  %v16773_v9 = vpop.permute.xlu1 %3108 }
 0x200   : > { %v16767_v47 = vsel %vm2822_vm4, %v21012_v50, %v2827_v13  ;;  %12528 = vmatprep.mubr.msk.bf16.mxu0 %vm1959_vm1, %v16068_v8 }
 0x202   : > { %v2111_v4 = vpop.f32.mrb[52].mxu0  ;;  %v16785_v51 = vpop.permute.xlu0 %2725 }
 0x203   : > { %v2829_v21 = vrot.slane %v2111_v4, 6  ;;  %v2113_v45 = vpop.f32.mrb[53].mxu0 }
 0x204   : > { %v2831_v41 = vrot.slane %v2113_v45, 6  ;;  %v2115_v54 = vpop.f32.mrb[54].mxu0  ;;  %v16792_v45 = vpop.permute.xlu1 %3304 }
 0x205   : > { %v16776_v44 = vsel %vm2822_vm4, %v2825_v24, %v2829_v21  ;;  %v2833_v37 = vrot.slane %v2115_v54, 6  ;;  %v2117_v18 = vpop.f32.mrb[55].mxu0  ;;  %21131 = vst [vmem:[#allocation58_spill] sm:$0xff] %v16792_v45 }
 0x206   : > { %v16779_v50 = vsel %vm2822_vm4, %v2827_v13, %v2831_v41  ;;  %v2835_v0 = vrot.slane %v2117_v18, 6  ;;  %v16797_v7 = vpop.permute.xlu0 %3496 }
 0x207   : > { %v16782_v8 = vsel %vm2822_vm4, %v2829_v21, %v2833_v37  ;;  %2591 = vmatmul.mubr.bf16.gmra.mrb[160].mxu0 %v16065_v5  ;;  %21132 = vst [vmem:[#allocation59_spill] sm:$0xff] %v16797_v7 }
 0x208   : > { %v16788_v4 = vsel %vm2822_vm4, %v2831_v41, %v2835_v0  ;;  %12529 = vmatprep.mubr.msk.bf16.mxu0 %vm1959_vm1, %v16110_v30  ;;  %v16802_v28 = vpop.permute.xlu1 %2730 }
 0x20a   : > { %v2121_v54 = vpop.f32.mrb[56].mxu0  ;;  %v16811_v45 = vpop.permute.xlu0 %2919 }
 0x20b   : > { %v2837_v24 = vrot.slane %v2121_v54, 6  ;;  %v2123_v13 = vpop.f32.mrb[57].mxu0 }
 0x20c   : > { %v2839_v22 = vrot.slane %v2123_v13, 6  ;;  %v2125_v18 = vpop.f32.mrb[58].mxu0 }
 0x20d   : > { %v16795_v21 = vsel %vm2822_vm4, %v2833_v37, %v2837_v24  ;;  %v2841_v16 = vrot.slane %v2125_v18, 6  ;;  %v2127_v5 = vpop.f32.mrb[59].mxu0 }
 0x20e   : > { %v16800_v41 = vsel %vm2822_vm4, %v2835_v0, %v2839_v22  ;;  %v2843_v55 = vrot.slane %v2127_v5, 6  ;;  %v16813_v0 = vpop.permute.xlu1 %3501  ;;  %v16827_v6 = vpop.permute.xlu0 %3693 }
 0x20f   : > { %v16805_v30 = vsel %vm2822_vm4, %v2837_v24, %v2841_v16  ;;  %2601 = vmatmul.mubr.bf16.gmra.mrb[164].mxu0 %v16126_v43  ;;  %21135 = vst [vmem:[#allocation62_spill] sm:$0xff] %v16813_v0  ;;  %21140 = vst [vmem:[#allocation67_spill] sm:$0xff] %v16827_v6 }
 0x210   : > { %21133 = vst [vmem:[#allocation60_spill] sm:$0xff] %v16805_v30  ;;  %v16809_v54 = vsel %vm2822_vm4, %v2839_v22, %v2843_v55  ;;  %v14443_v30 = vld [vmem:[%s20975_s6 + $0x384] ss:$56 sps:$4 sm:$0xff]  }
 0x211   : > { %21134 = vst [vmem:[#allocation61_spill] sm:$0xff] %v16809_v54  ;;  %v14434_v54 = vld [vmem:[%s20975_s6 + $0x2ac] ss:$56 sps:$4 sm:$0xff]  }
 0x212   : > { %v2131_v37 = vpop.f32.mrb[60].mxu0  ;;  %v16829_v1 = vpop.permute.xlu1 %2924 }
 0x213   : > { %v2845_v13 = vrot.slane %v2131_v37, 6  ;;  %v2133_v18 = vpop.f32.mrb[61].mxu0  ;;  %21141 = vst [vmem:[#allocation68_spill] sm:$0xff] %v16829_v1 }
 0x214   : > { %v2847_v7 = vrot.slane %v2133_v18, 6  ;;  %v2135_v15 = vpop.f32.mrb[62].mxu0 }
 0x215   : > { %v16816_v5 = vsel %vm2822_vm4, %v2841_v16, %v2845_v13  ;;  %v2849_v59 = vrot.slane %v2135_v15, 6  ;;  %v2137_v24 = vpop.f32.mrb[63].mxu0 }
 0x216   : > { %21136 = vst [vmem:[#allocation63_spill] sm:$0xff] %v16816_v5  ;;  %v16819_v12 = vsel %vm2822_vm4, %v2843_v55, %v2847_v7  ;;  %v2851_v43 = vrot.slane %v2137_v24, 6  ;;  %v16855_v26 = vpop.permute.xlu1 %3698 }
 0x217   : > { %21137 = vst [vmem:[#allocation64_spill] sm:$0xff] %v16819_v12  ;;  %v16822_v22 = vsel %vm2822_vm4, %v2845_v13, %v2849_v59  ;;  %21148 = vst [vmem:[#allocation75_spill] sm:$0xff] %v16855_v26  ;;  %v14399_v26 = vld [vmem:[%s20975_s6 + $0x70] ss:$56 sps:$4 sm:$0xff]  }
 0x218   : > { %21138 = vst [vmem:[#allocation65_spill] sm:$0xff] %v16822_v22  ;;  %v16825_v37 = vsel %vm2822_vm4, %v2847_v7, %v2851_v43  ;;  %v14411_v22 = vld [vmem:[%s20975_s6 + $0x150] ss:$56 sps:$4 sm:$0xff]  }
 0x219   : > { %21139 = vst [vmem:[#allocation66_spill] sm:$0xff] %v16825_v37 }
 0x21a   : > { %v2141_v18 = vpop.f32.mrb[64].mxu0 }
 0x21b   : > { %v2853_v0 = vrot.slane %v2141_v18, 6  ;;  %v2143_v16 = vpop.f32.mrb[65].mxu0 }
 0x21c   : > { %v2855_v31 = vrot.slane %v2143_v16, 6  ;;  %v16831_v15 = vpop.f32.mrb[66].mxu0  ;;  %v16848_v16 = vpop.permute.xlu0 %3113 }
 0x21d   : > { %21142 = vst [vmem:[#allocation69_spill] sm:$0xff] %v16831_v15  ;;  %v16834_v55 = vsel %vm2822_vm4, %v2849_v59, %v2853_v0  ;;  %v21025_v24 = vrot.slane %v16831_v15, 6  ;;  %v16837_v13 = vpop.f32.mrb[67].mxu0  ;;  %v14395_v15 = vld [vmem:[%s20975_s6 + $0x4] ss:$56 sps:$4 sm:$0xff]  }
 0x21e   : > { %21143 = vst [vmem:[#allocation70_spill] sm:$0xff] %v16834_v55  ;;  %21144 = vst [vmem:[#allocation71_spill] sm:$0xff] %v16837_v13  ;;  %v16840_v7 = vsel %vm2822_vm4, %v2851_v43, %v2855_v31  ;;  %v21026_v6 = vrot.slane %v16837_v13, 6  ;;  %4908 = vmatprep.subr.bf16.mxu1 %v14395_v15  ;;  %v14402_v15 = vld [vmem:[%s20975_s6 + $0x78] ss:$56 sps:$4 sm:$0xff]  }
 0x21f   : > { %21145 = vst [vmem:[#allocation72_spill] sm:$0xff] %v16840_v7  ;;  %v16846_v18 = vsel %vm2822_vm4, %v2853_v0, %v21025_v24  ;;  %v14398_v0 = vld [vmem:[%s20975_s6 + $0xc] ss:$56 sps:$4 sm:$0xff]  }
 0x220   : > { %21146 = vst [vmem:[#allocation73_spill] sm:$0xff] %v16846_v18  ;;  %v16853_v59 = vsel %vm2822_vm4, %v2855_v31, %v21026_v6  ;;  %v16863_v24 = vpop.permute.xlu0 %3309  ;;  %v14393_v31 = vld [vmem:[%s20975_s6] ss:$56 sps:$4 sm:$0xff]   ;;  %4991 = vmatprep.subr.bf16.mxu0 %v14398_v0 }
 0x221   : > { %21147 = vst [vmem:[#allocation74_spill] sm:$0xff] %v16853_v59  ;;  %21149 = vst [vmem:[#allocation76_spill] sm:$0xff] %v16863_v24  ;;  %4909 = vmatpush1.bf16.msra.mxu1 %v14393_v31 }
 0x222   : > { %v2151_v23 = vpop.f32.mrb[68].mxu0 }
 0x223   : > { %v2152_v55 = vpop.f32.mrb[69].mxu0  ;;  %v14396_v23 = vld [vmem:[%s20975_s6 + $0x8] ss:$56 sps:$4 sm:$0xff]  }
 0x224   : > { %v2153_v43 = vpop.f32.mrb[70].mxu0  ;;  %v16871_v55 = vpop.permute.xlu1 %3118  ;;  %4992 = vmatpush1.bf16.msra.mxu0 %v14396_v23 }
 0x225   : > { %v2154_v7 = vpop.f32.mrb[71].mxu0  ;;  %21150 = vst [vmem:[#allocation77_spill] sm:$0xff] %v16871_v55  ;;  %v14404_v43 = vld [vmem:[%s20975_s6 + $0x7c] ss:$56 sps:$4 sm:$0xff]   ;;  %v16889_v31 = vpop.permute.xlu0 %2735 }
 0x226   : > { %v14401_v7 = vld [vmem:[%s20975_s6 + $0x74] ss:$56 sps:$4 sm:$0xff]   ;;  %4993 = vmatprep.subr.bf16.mxu0 %v14404_v43  ;;  %21151 = vst [vmem:[#allocation78_spill] sm:$0xff] %v16889_v31  ;;  %v14405_v43 = vld [vmem:[%s20975_s6 + $0xe0] ss:$56 sps:$4 sm:$0xff]  }
 0x227   : > { %4910 = vmatprep.subr.bf16.mxu1 %v14401_v7  ;;  %v14422_v31 = vld [vmem:[%s20975_s6 + $0x1cc] ss:$56 sps:$4 sm:$0xff]  }
 0x228   : > { %4911 = vmatpush1.bf16.msra.mxu1 %v14399_v26  ;;  %4994 = vmatpush1.bf16.msra.mxu0 %v14402_v15  ;;  %v16891_v24 = vpop.permute.xlu1 %3314  ;;  %v14408_v26 = vld [vmem:[%s20975_s6 + $0xe8] ss:$56 sps:$4 sm:$0xff]   ;;  %v14431_v55 = vld [vmem:[%s20975_s6 + $0x2a4] ss:$56 sps:$4 sm:$0xff]  }
 0x229   : > { %21152 = vst [vmem:[#allocation79_spill] sm:$0xff] %v16891_v24  ;;  %4912 = vmatprep.subr.bf16.mxu1 %v14407_v56  ;;  %v14413_v24 = vld [vmem:[%s20975_s6 + $0x154] ss:$56 sps:$4 sm:$0xff]   ;;  %v16923_v56 = vpop.permute.xlu0 %3506 }
 0x22a   : > { %v16879_v6 = vpop.f32.mrb[72].mxu0  ;;  %21153 = vst [vmem:[#allocation80_spill] sm:$0xff] %v16923_v56 }
 0x22b   : > { %v16887_v0 = vpop.f32.mrb[73].mxu0  ;;  %v21031_v13 = vrot.slane %v16879_v6, 7 }
 0x22c   : > { %v2194_v23 = vpop.f32.mrb[74].mxu0  ;;  %v21032_v2 = vrot.slane %v16887_v0, 7  ;;  %4913 = vmatpush1.bf16.msra.mxu1 %v14405_v43  ;;  %v14414_v43 = vld [vmem:[%s20975_s6 + $0x158] ss:$56 sps:$4 sm:$0xff]  }
 0x22d   : > { %v3019_v59 = vrot.slane %v2194_v23, 7  ;;  %v2196_v18 = vpop.f32.mrb[75].mxu0  ;;  %v14410_v23 = vld [vmem:[%s20975_s6 + $0xec] ss:$56 sps:$4 sm:$0xff]   ;;  %4914 = vmatprep.subr.bf16.mxu1 %v14413_v24 }
 0x22e   : > { %v3021_v7 = vrot.slane %v2196_v18, 7  ;;  %4995 = vmatprep.subr.bf16.mxu0 %v14410_v23  ;;  %v16931_v23 = vpop.permute.xlu1 %2740 }
 0x22f   : > { %v16907_v15 = vsel %vm3016_vm5, %v21031_v13, %v3019_v59  ;;  %v14416_v13 = vld [vmem:[%s20975_s6 + $0x15c] ss:$56 sps:$4 sm:$0xff]   ;;  %4996 = vmatpush1.bf16.msra.mxu0 %v14408_v26  ;;  %21154 = vst [vmem:[#allocation81_spill] sm:$0xff] %v16931_v23 }
 0x230   : > { %v16915_v18 = vsel %vm3016_vm5, %v21032_v2, %v3021_v7  ;;  %4997 = vmatprep.subr.bf16.mxu0 %v14416_v13  ;;  %4915 = vmatpush1.bf16.msra.mxu1 %v14411_v22  ;;  %v14420_v22 = vld [vmem:[%s20975_s6 + $0x1c8] ss:$56 sps:$4 sm:$0xff]  }
 0x231   : > { %4916 = vmatprep.subr.bf16.mxu1 %v14419_v3  ;;  %v14423_v3 = vld [vmem:[%s20975_s6 + $0x230] ss:$56 sps:$4 sm:$0xff]  }
 0x232   : > { %v2200_v37 = vpop.f32.mrb[76].mxu0 }
 0x233   : > { %v3023_v2 = vrot.slane %v2200_v37, 7  ;;  %v2202_v62 = vpop.f32.mrb[77].mxu0  ;;  %4998 = vmatpush1.bf16.msra.mxu0 %v14414_v43  ;;  %v14428_v43 = vld [vmem:[%s20975_s6 + $0x23c] ss:$56 sps:$4 sm:$0xff]  }
 0x234   : > { %v3025_v12 = vrot.slane %v2202_v62, 7  ;;  %v2204_v57 = vpop.f32.mrb[78].mxu0  ;;  %4999 = vmatprep.subr.bf16.mxu0 %v14422_v31 }
 0x235   : > { %v3024_v56 = vsel %vm3016_vm5, %v3019_v59, %v3023_v2  ;;  %v3027_v26 = vrot.slane %v2204_v57, 7  ;;  %v2206_v5 = vpop.f32.mrb[79].mxu0  ;;  %v14417_v57 = vld [vmem:[%s20975_s6 + $0x1c0] ss:$56 sps:$4 sm:$0xff]   ;;  %v16955_v59 = vpop.permute.xlu0 %2929 }
 0x236   : > { %v16941_v37 = vmul.f32 %v16752_v33, %v3024_v56  ;;  %v16944_v24 = vsel %vm3016_vm5, %v3021_v7, %v3025_v12  ;;  %v3029_v62 = vrot.slane %v2206_v5, 7  ;;  %21155 = vst [vmem:[#allocation82_spill] sm:$0xff] %v16955_v59  ;;  %4917 = vmatpush1.bf16.msra.mxu1 %v14417_v57  ;;  %v16960_v5 = vpop.permute.xlu1 %3511  ;;  %v14425_v56 = vld [vmem:[%s20975_s6 + $0x234] ss:$56 sps:$4 sm:$0xff]  }
 0x237   : > { %v16953_v13 = vsel %vm3016_vm5, %v3023_v2, %v3027_v26  ;;  %21156 = vst [vmem:[#allocation83_spill] sm:$0xff] %v16960_v5  ;;  %5000 = vmatpush1.bf16.msra.mxu0 %v14420_v22  ;;  %4918 = vmatprep.subr.bf16.mxu1 %v14425_v56 }
 0x238   : > { %v16958_v7 = vsel %vm3016_vm5, %v3025_v12, %v3029_v62  ;;  %v14426_v12 = vld [vmem:[%s20975_s6 + $0x238] ss:$56 sps:$4 sm:$0xff]   ;;  %5001 = vmatprep.subr.bf16.mxu0 %v14428_v43 }
 0x23a   : > { %v2210_v2 = vpop.f32.mrb[80].mxu0  ;;  %4919 = vmatpush1.bf16.msra.mxu1 %v14423_v3  ;;  %v16994_v3 = vpop.permute.xlu1 %2934 }
 0x23b   : > { %v3031_v31 = vrot.slane %v2210_v2, 7  ;;  %v2212_v57 = vpop.f32.mrb[81].mxu0  ;;  %v16983_v2 = vpop.permute.xlu0 %3703  ;;  %5002 = vmatpush1.bf16.msra.mxu0 %v14426_v12  ;;  %21159 = vst [vmem:[#allocation86_spill] sm:$0xff] %v16994_v3  ;;  %4920 = vmatprep.subr.bf16.mxu1 %v14431_v55  ;;  %v14437_v12 = vld [vmem:[%s20975_s6 + $0x314] ss:$56 sps:$4 sm:$0xff]  }
 0x23c   : > { %v3033_v5 = vrot.slane %v2212_v57, 7  ;;  %v2214_v23 = vpop.f32.mrb[82].mxu0  ;;  %21157 = vst [vmem:[#allocation84_spill] sm:$0xff] %v16983_v2  ;;  %5003 = vmatprep.subr.bf16.mxu0 %v14434_v54  ;;  %v14438_v54 = vld [vmem:[%s20975_s6 + $0x318] ss:$56 sps:$4 sm:$0xff]  }
 0x23d   : > { %v16975_v59 = vsel %vm3016_vm5, %v3027_v26, %v3031_v31  ;;  %v3035_v32 = vrot.slane %v2214_v23, 7  ;;  %v2216_v22 = vpop.f32.mrb[83].mxu0  ;;  %v14429_v23 = vld [vmem:[%s20975_s6 + $0x2a0] ss:$56 sps:$4 sm:$0xff]  }
 0x23e   : > { %v16986_v56 = vsel %vm3016_vm5, %v3029_v62, %v3033_v5  ;;  %v3037_v43 = vrot.slane %v2216_v22, 7  ;;  %v14432_v26 = vld [vmem:[%s20975_s6 + $0x2a8] ss:$56 sps:$4 sm:$0xff]   ;;  %4921 = vmatpush1.bf16.msra.mxu1 %v14429_v23  ;;  %v14440_v22 = vld [vmem:[%s20975_s6 + $0x31c] ss:$56 sps:$4 sm:$0xff]  }
 0x23f   : > { %21158 = vst [vmem:[#allocation85_spill] sm:$0xff] %v16986_v56  ;;  %v16997_v57 = vsel %vm3016_vm5, %v3031_v31, %v3035_v32  ;;  %5004 = vmatpush1.bf16.msra.mxu0 %v14432_v26  ;;  %v14435_v31 = vld [vmem:[%s20975_s6 + $0x310] ss:$56 sps:$4 sm:$0xff]   ;;  %4922 = vmatprep.subr.bf16.mxu1 %v14437_v12  ;;  %v17014_v23 = vpop.permute.xlu0 %3123 }
 0x240   : > { %21160 = vst [vmem:[#allocation87_spill] sm:$0xff] %v16997_v57  ;;  %v17000_v62 = vsel %vm3016_vm5, %v3033_v5, %v3037_v43  ;;  %5005 = vmatprep.subr.bf16.mxu0 %v14440_v22  ;;  %21162 = vst [vmem:[#allocation89_spill] sm:$0xff] %v17014_v23  ;;  %v17016_v57 = vpop.permute.xlu1 %3708  ;;  %v14455_v23 = vld [vmem:[%s20975_s6 + $0x464] ss:$56 sps:$4 sm:$0xff]  }
 0x241   : > { %21161 = vst [vmem:[#allocation88_spill] sm:$0xff] %v17000_v62  ;;  %21163 = vst [vmem:[#allocation90_spill] sm:$0xff] %v17016_v57 }
 0x242   : > { %v2220_v2 = vpop.f32.mrb[84].mxu0  ;;  %4923 = vmatpush1.bf16.msra.mxu1 %v14435_v31 }
 0x243   : > { %v3039_v55 = vrot.slane %v2220_v2, 7  ;;  %v2222_v5 = vpop.f32.mrb[85].mxu0  ;;  %v14446_v2 = vld [vmem:[%s20975_s6 + $0x38c] ss:$56 sps:$4 sm:$0xff]   ;;  %5006 = vmatpush1.bf16.msra.mxu0 %v14438_v54  ;;  %4924 = vmatprep.subr.bf16.mxu1 %v14443_v30  ;;  %v17048_v54 = vpop.permute.xlu0 %3319  ;;  %v14447_v30 = vld [vmem:[%s20975_s6 + $0x3f0] ss:$56 sps:$4 sm:$0xff]  }
 0x244   : > { %v3041_v3 = vrot.slane %v2222_v5, 7  ;;  %v2224_v62 = vpop.f32.mrb[86].mxu0  ;;  %5007 = vmatprep.subr.bf16.mxu0 %v14446_v2  ;;  %21167 = vst [vmem:[#allocation94_spill] sm:$0xff] %v17048_v54 }
 0x245   : > { %v17019_v26 = vsel %vm3016_vm5, %v3035_v32, %v3039_v55  ;;  %v3043_v56 = vrot.slane %v2224_v62, 7  ;;  %v2226_v1 = vpop.f32.mrb[87].mxu0  ;;  %v14441_v32 = vld [vmem:[%s20975_s6 + $0x380] ss:$56 sps:$4 sm:$0xff]  }
 0x246   : > { %v17028_v12 = vsel %vm3016_vm5, %v3037_v43, %v3041_v3  ;;  %v3045_v22 = vrot.slane %v2226_v1, 7  ;;  %v14444_v62 = vld [vmem:[%s20975_s6 + $0x388] ss:$56 sps:$4 sm:$0xff]   ;;  %4925 = vmatpush1.bf16.msra.mxu1 %v14441_v32  ;;  %v14449_v1 = vld [vmem:[%s20975_s6 + $0x3f4] ss:$56 sps:$4 sm:$0xff]  }
 0x247   : > { %21164 = vst [vmem:[#allocation91_spill] sm:$0xff] %v17028_v12  ;;  %v17037_v31 = vsel %vm3016_vm5, %v3039_v55, %v3043_v56  ;;  %v14452_v43 = vld [vmem:[%s20975_s6 + $0x3fc] ss:$56 sps:$4 sm:$0xff]   ;;  %5008 = vmatpush1.bf16.msra.mxu0 %v14444_v62  ;;  %v17056_v55 = vpop.permute.xlu1 %3128  ;;  %4926 = vmatprep.subr.bf16.mxu1 %v14449_v1 }
 0x248   : > { %21165 = vst [vmem:[#allocation92_spill] sm:$0xff] %v17037_v31  ;;  %v17040_v5 = vsel %vm3016_vm5, %v3041_v3, %v3045_v22  ;;  %v14450_v3 = vld [vmem:[%s20975_s6 + $0x3f8] ss:$56 sps:$4 sm:$0xff]   ;;  %5009 = vmatprep.subr.bf16.mxu0 %v14452_v43 }
 0x249   : > { %21166 = vst [vmem:[#allocation93_spill] sm:$0xff] %v17040_v5 }
 0x24a   : > { %v2230_v57 = vpop.f32.mrb[88].mxu0  ;;  %4927 = vmatpush1.bf16.msra.mxu1 %v14447_v30  ;;  %v14456_v30 = vld [vmem:[%s20975_s6 + $0x468] ss:$56 sps:$4 sm:$0xff]  }
 0x24b   : > { %v3047_v2 = vrot.slane %v2230_v57, 7  ;;  %v2232_v32 = vpop.f32.mrb[89].mxu0  ;;  %v14458_v57 = vld [vmem:[%s20975_s6 + $0x46c] ss:$56 sps:$4 sm:$0xff]   ;;  %5010 = vmatpush1.bf16.msra.mxu0 %v14450_v3  ;;  %4928 = vmatprep.subr.bf16.mxu1 %v14455_v23 }
 0x24c   : > { %v3049_v5 = vrot.slane %v2232_v32, 7  ;;  %v17058_v31 = vpop.f32.mrb[90].mxu0  ;;  %5011 = vmatprep.subr.bf16.mxu0 %v14458_v57  ;;  %v14459_v57 = vld [vmem:[%s20975_s6 + $0x4d0] ss:$56 sps:$4 sm:$0xff]  }
 0x24d   : > { %21168 = vst [vmem:[#allocation95_spill] sm:$0xff] %v17058_v31  ;;  %v17061_v62 = vsel %vm3016_vm5, %v3043_v56, %v3047_v2  ;;  %v21046_v54 = vrot.slane %v17058_v31, 7  ;;  %v17064_v12 = vpop.f32.mrb[91].mxu0  ;;  %v14453_v56 = vld [vmem:[%s20975_s6 + $0x460] ss:$56 sps:$4 sm:$0xff]  }
 0x24e   : > { %21169 = vst [vmem:[#allocation96_spill] sm:$0xff] %v17061_v62  ;;  %21170 = vst [vmem:[#allocation97_spill] sm:$0xff] %v17064_v12  ;;  %v17073_v1 = vsel %vm3016_vm5, %v3045_v22, %v3049_v5  ;;  %v21045_v43 = vrot.slane %v17064_v12, 7  ;;  %v17087_v22 = vpop.permute.xlu0 %2745  ;;  %4929 = vmatpush1.bf16.msra.mxu1 %v14453_v56  ;;  %v14461_v62 = vld [vmem:[%s20975_s6 + $0x4d4] ss:$56 sps:$4 sm:$0xff]   ;;  %v21176_v12 = vrot.slane %v16539_v34, 5 }
 0x24f   : > { %21171 = vst [vmem:[#allocation98_spill] sm:$0xff] %v17073_v1  ;;  %v17085_v32 = vsel %vm3016_vm5, %v3047_v2, %v21046_v54  ;;  %v17094_v1 = vpop.permute.xlu1 %3324  ;;  %v14464_v2 = vld [vmem:[%s20975_s6 + $0x4dc] ss:$56 sps:$4 sm:$0xff]   ;;  %5012 = vmatpush1.bf16.msra.mxu0 %v14456_v30  ;;  %4930 = vmatprep.subr.bf16.mxu1 %v14461_v62 }
 0x250   : > { %21172 = vst [vmem:[#allocation99_spill] sm:$0xff] %v17085_v32  ;;  %v17092_v3 = vsel %vm3016_vm5, %v3049_v5, %v21045_v43  ;;  %21174 = vst [vmem:[#allocation101_spill] sm:$0xff] %v17094_v1  ;;  %v14462_v5 = vld [vmem:[%s20975_s6 + $0x4d8] ss:$56 sps:$4 sm:$0xff]   ;;  %5013 = vmatprep.subr.bf16.mxu0 %v14464_v2  ;;  %v14467_v1 = vld [vmem:[%s20975_s6 + $0x14] ss:$56 sps:$4 sm:$0xff]  }
 0x251   : > { %21173 = vst [vmem:[#allocation100_spill] sm:$0xff] %v17092_v3  ;;  %v14470_v30 = vld [vmem:[%s20975_s6 + $0x1c] ss:$56 sps:$4 sm:$0xff]   ;;  %v2690_v31 = vsel %vm2629_vm3, 0.0, %v21176_v12  ;;  %v21179_v2 = vrot.slane %v16748_v27, 6  ;;  %v21181_v12 = vrot.slane %v16879_v6, 7 }
 0x252   : > { %v2240_v23 = vpop.f32.mrb[92].mxu0  ;;  %4931 = vmatpush1.bf16.msra.mxu1 %v14459_v57  ;;  %v2758_v34 = vmul.f32 %v16518_v19, %v2690_v31 }
 0x253   : > { %v2241_v56 = vpop.f32.mrb[93].mxu0  ;;  %v17114_v23 = vpop.permute.xlu0 %3516  ;;  %5014 = vmatpush1.bf16.msra.mxu0 %v14462_v5  ;;  %5076 = vmatprep.subr.bf16.mxu1 %v14467_v1  ;;  %v2883_v57 = vsel %vm2822_vm4, 0.0, %v21179_v2  ;;  %v3077_v5 = vsel %vm3016_vm5, 0.0, %v21181_v12 }
 0x254   : > { %v2242_v43 = vpop.f32.mrb[94].mxu0  ;;  %21175 = vst [vmem:[#allocation102_spill] sm:$0xff] %v17114_v23  ;;  %v17119_v62 = vpop.permute.xlu1 %2750  ;;  %5163 = vmatprep.subr.bf16.mxu0 %v14470_v30  ;;  %v21180_v56 = vrot.slane %v16750_v49, 6  ;;  %v2952_v1 = vmul.f32 %v16532_v25, %v2883_v57  ;;  %v21182_v30 = vrot.slane %v16887_v0, 7  ;;  %v2760_v49 = vmul.f32 %v16534_v29, %v16558_v14 }
 0x255   : > { %v2243_v54 = vpop.f32.mrb[95].mxu0  ;;  %21177 = vst [vmem:[#allocation103_spill] sm:$0xff] %v17119_v62  ;;  %v21178_v43 = vrot.slane %v16541_v38, 5  ;;  %v3146_v0 = vmul.f32 %v16570_v63, %v3077_v5  ;;  %v3149_v5 = vmul.f32 %v16610_v46, %v16915_v18 }
 0x256   : > { %v2884_v23 = vsel %vm2822_vm4, 0.0, %v21180_v56  ;;  %v3078_v27 = vsel %vm3016_vm5, 0.0, %v21182_v30 }
 0x257   : > { %v2691_v54 = vsel %vm2629_vm3, 0.0, %v21178_v43  ;;  %v17141_v56 = vpop.permute.xlu0 %2939  ;;  %v2953_v6 = vmul.f32 %v16532_v25, %v2884_v23  ;;  %v3147_v14 = vmul.f32 %v16570_v63, %v3078_v27  ;;  %v2955_v25 = vmul.f32 %v16568_v17, %v16767_v47 }
 0x258   : > { %v2759_v38 = vmul.f32 %v16518_v19, %v2691_v54  ;;  %v2761_v19 = vmul.f32 %v16534_v29, %v16578_v20  ;;  %v17146_v54 = vpop.permute.xlu1 %3521  ;;  %v3148_v29 = vmul.f32 %v16610_v46, %v16907_v15  ;;  %v2762_v63 = vmul.f32 %v16655_v52, %v16590_v61 }
 0x259   : > { %v2763_v15 = vmul.f32 %v16655_v52, %v16600_v48  ;;  %v2956_v46 = vmul.f32 %v16713_v53, %v16776_v44  ;;  %v2957_v61 = vmul.f32 %v16713_v53, %v16779_v50  ;;  %v2958_v52 = vmul.f32 %v16743_v35, %v16782_v8 }
 0x25a   : > { %v2279_v3 = vpop.f32.mrb[96].mxu0  ;;  %v3151_v44 = vmul.f32 %v16752_v33, %v16944_v24  ;;  %v3152_v53 = vmul.f32 %v16773_v9, %v16953_v13  ;;  %v3153_v8 = vmul.f32 %v16773_v9, %v16958_v7  ;;  %v2767_v13 = vmul.f32 %v16785_v51, %v16643_v58 }
 0x25b   : > { %v2780_v43 = vadd.f32 %v2758_v34, %v2279_v3  ;;  %v2281_v2 = vpop.f32.mrb[97].mxu0  ;;  %v2954_v3 = vmul.f32 %v16568_v17, %v16761_v40  ;;  %v17166_v27 = vpop.permute.xlu0 %3713  ;;  %v2960_v9 = vmul.f32 %v16811_v45, %v16795_v21 }
 0x25c   : > { %v2781_v31 = vadd.f32 %v2759_v38, %v2281_v2  ;;  %v2283_v12 = vpop.f32.mrb[98].mxu0 }
 0x25d   : > { %v2974_v57 = vadd.f32 %v2952_v1, %v2780_v43  ;;  %v2782_v30 = vadd.f32 %v2760_v49, %v2283_v12  ;;  %v2285_v34 = vpop.f32.mrb[99].mxu0  ;;  %v17172_v43 = vpop.permute.xlu1 %2944 }
 0x25e   : > { %v2975_v32 = vadd.f32 %v2953_v6, %v2781_v31  ;;  %v2783_v62 = vadd.f32 %v2761_v19, %v2285_v34  ;;  %v2765_v6 = vmul.f32 %v16687_v42, %v16621_v36  ;;  %v2768_v34 = vmul.f32 %v16802_v28, %v16658_v60  ;;  %v21185_v60 = vld [vmem:[#allocation85_spill] sm:$0xff] }
 0x25f   : > { %v17156_v20 = vadd.f32 %v3146_v0, %v2974_v57  ;;  %v2976_v23 = vadd.f32 %v2954_v3, %v2782_v30 }
 0x260   : > { %v17160_v38 = vadd.f32 %v3147_v14, %v2975_v32  ;;  %v2977_v40 = vadd.f32 %v2955_v25, %v2783_v62  ;;  %v2764_v32 = vmul.f32 %v16687_v42, %v16618_v11  ;;  %v2959_v11 = vmul.f32 %v16743_v35, %v16788_v4  ;;  %v17193_v42 = vpop.permute.xlu0 %3133 }
 0x261   : > { %v17162_v1 = vadd.f32 %v3148_v29, %v2976_v23  ;;  %v17199_v24 = vpop.permute.xlu1 %3718  ;;  %v2766_v35 = vmul.f32 %v16785_v51, %v16633_v10  ;;  %v2961_v25 = vmul.f32 %v16811_v45, %v16800_v41  ;;  %v2769_v10 = vmul.f32 %v16802_v28, %v16661_v39  ;;  %v21186_v41 = vld [vmem:[#allocation61_spill] sm:$0xff]  ;;  %v21187_v39 = vld [vmem:[#allocation87_spill] sm:$0xff] }
 0x262   : > { %v17168_v17 = vadd.f32 %v3149_v5, %v2977_v40  ;;  %v2289_v47 = vpop.f32.mrb[100].mxu0  ;;  %v3154_v23 = vmul.f32 %v16848_v16, %v16975_v59  ;;  %v21183_v5 = vld [vmem:[#allocation60_spill] sm:$0xff]  ;;  %v21188_v59 = vld [vmem:[#allocation77_spill] sm:$0xff] }
 0x263   : > { %v2784_v2 = vadd.f32 %v2762_v63, %v2289_v47  ;;  %v2291_v18 = vpop.f32.mrb[101].mxu0  ;;  %v21184_v40 = vld [vmem:[#allocation68_spill] sm:$0xff] }
 0x264   : > { %v2785_v62 = vadd.f32 %v2763_v15, %v2291_v18  ;;  %v2293_v49 = vpop.f32.mrb[102].mxu0  ;;  %v2962_v21 = vmul.f32 %v21184_v40, %v21183_v5  ;;  %v17221_v47 = vpop.permute.xlu0 %3329  ;;  %v3155_v15 = vmul.f32 %v16848_v16, %v21185_v60  ;;  %v3156_v18 = vmul.f32 %v21188_v59, %v21187_v39  ;;  %v21203_v39 = vld [vmem:[#allocation66_spill] sm:$0xff] }
 0x265   : > { %v2978_v31 = vadd.f32 %v2956_v46, %v2784_v2  ;;  %v2786_v48 = vadd.f32 %v2764_v32, %v2293_v49  ;;  %v2295_v12 = vpop.f32.mrb[103].mxu0  ;;  %v2963_v46 = vmul.f32 %v21184_v40, %v21186_v41  ;;  %v17227_v28 = vpop.permute.xlu1 %3138 }
 0x266   : > { %v2979_v19 = vadd.f32 %v2957_v61, %v2785_v62  ;;  %v2787_v0 = vadd.f32 %v2765_v6, %v2295_v12  ;;  %v21189_v61 = vld [vmem:[#allocation88_spill] sm:$0xff] }
 0x267   : > { %v17191_v50 = vadd.f32 %v16941_v37, %v2978_v31  ;;  %v2980_v36 = vadd.f32 %v2958_v52, %v2786_v48  ;;  %v3157_v49 = vmul.f32 %v21188_v59, %v21189_v61  ;;  %v21190_v48 = vld [vmem:[#allocation34_spill] sm:$0xff] }
 0x268   : > { %v17197_v57 = vadd.f32 %v3151_v44, %v2979_v19  ;;  %v2981_v33 = vadd.f32 %v2959_v11, %v2787_v0  ;;  %v21191_v52 = vld [vmem:[#allocation78_spill] sm:$0xff]  ;;  %v21192_v0 = vld [vmem:[#allocation37_spill] sm:$0xff] }
 0x269   : > { %v17201_v30 = vadd.f32 %v3152_v53, %v2980_v36  ;;  %v2770_v12 = vmul.f32 %v21191_v52, %v21190_v48  ;;  %v2771_v11 = vmul.f32 %v21191_v52, %v21192_v0  ;;  %v21193_v36 = vld [vmem:[#allocation63_spill] sm:$0xff]  ;;  %v21206_v0 = vld [vmem:[#allocation45_spill] sm:$0xff] }
 0x26a   : > { %v17205_v4 = vadd.f32 %v3153_v8, %v2981_v33  ;;  %v2299_v37 = vpop.f32.mrb[104].mxu0  ;;  %v21194_v8 = vld [vmem:[#allocation82_spill] sm:$0xff] }
 0x26b   : > { %v2788_v3 = vadd.f32 %v2766_v35, %v2299_v37  ;;  %v2301_v7 = vpop.f32.mrb[105].mxu0  ;;  %v2964_v33 = vmul.f32 %v21194_v8, %v21193_v36  ;;  %v21195_v37 = vld [vmem:[#allocation39_spill] sm:$0xff] }
 0x26c   : > { %v2789_v14 = vadd.f32 %v2767_v13, %v2301_v7  ;;  %v2303_v29 = vpop.f32.mrb[106].mxu0  ;;  %v21196_v13 = vld [vmem:[#allocation81_spill] sm:$0xff] }
 0x26d   : > { %v2982_v51 = vadd.f32 %v2960_v9, %v2788_v3  ;;  %v2790_v58 = vadd.f32 %v2768_v34, %v2303_v29  ;;  %v2305_v63 = vpop.f32.mrb[107].mxu0  ;;  %v2772_v3 = vmul.f32 %v21196_v13, %v21195_v37  ;;  %v2756_v9 = vpop.permute.xlu0 %2755  ;;  %v21197_v34 = vld [vmem:[#allocation64_spill] sm:$0xff]  ;;  %v21198_v29 = vld [vmem:[#allocation41_spill] sm:$0xff] }
 0x26e   : > { %v2983_v2 = vadd.f32 %v2961_v25, %v2789_v14  ;;  %v2791_v45 = vadd.f32 %v2769_v10, %v2305_v63  ;;  %v2965_v14 = vmul.f32 %v21194_v8, %v21197_v34  ;;  %v2773_v10 = vmul.f32 %v21196_v13, %v21198_v29  ;;  %v21201_v63 = vld [vmem:[#allocation86_spill] sm:$0xff]  ;;  %v21210_v34 = vld [vmem:[#allocation103_spill] sm:$0xff] }
 0x26f   : > { %v17231_v32 = vadd.f32 %v3154_v23, %v2982_v51  ;;  %v2984_v62 = vadd.f32 %v2962_v21, %v2790_v58  ;;  %v17253_v23 = vpop.permute.xlu1 %3334  ;;  %v21199_v51 = vld [vmem:[#allocation89_spill] sm:$0xff]  ;;  %v2967_v59 = vmul.f32 %v21201_v63, %v21203_v39  ;;  %v21207_v8 = vld [vmem:[#allocation50_spill] sm:$0xff] }
 0x270   : > { %v17235_v6 = vadd.f32 %v3155_v15, %v2983_v2  ;;  %v2985_v31 = vadd.f32 %v2963_v46, %v2791_v45  ;;  %v3158_v58 = vmul.f32 %v21199_v51, %v17019_v26  ;;  %v21200_v21 = vld [vmem:[#allocation65_spill] sm:$0xff]  ;;  %v21202_v2 = vld [vmem:[#allocation91_spill] sm:$0xff]  ;;  %v21208_v13 = vld [vmem:[#allocation70_spill] sm:$0xff] }
 0x271   : > { %v17237_v16 = vadd.f32 %v3156_v18, %v2984_v62  ;;  %v2966_v60 = vmul.f32 %v21201_v63, %v21200_v21  ;;  %v3159_v45 = vmul.f32 %v21199_v51, %v21202_v2  ;;  %v21204_v18 = vld [vmem:[#allocation92_spill] sm:$0xff] }
 0x272   : > { %v17241_v44 = vadd.f32 %v3157_v49, %v2985_v31  ;;  %v2309_v19 = vpop.f32.mrb[108].mxu0  ;;  %v3160_v62 = vmul.f32 %v17056_v55, %v21204_v18  ;;  %v17267_v49 = vpop.permute.xlu0 %3531  ;;  %v21205_v31 = vld [vmem:[#allocation93_spill] sm:$0xff]  ;;  %v21216_v18 = vld [vmem:[#allocation74_spill] sm:$0xff] }
 0x273   : > { %v2792_v53 = vadd.f32 %v2770_v12, %v2309_v19  ;;  %v2311_v35 = vpop.f32.mrb[109].mxu0  ;;  %v3161_v48 = vmul.f32 %v17056_v55, %v21205_v31  ;;  %v2968_v55 = vmul.f32 %v17141_v56, %v21208_v13 }
 0x274   : > { %v2793_v7 = vadd.f32 %v2771_v11, %v2311_v35  ;;  %v2313_v25 = vpop.f32.mrb[110].mxu0  ;;  %v2774_v11 = vmul.f32 %v17087_v22, %v21206_v0  ;;  %v17281_v35 = vpop.permute.xlu1 %3526  ;;  %v21218_v0 = vld [vmem:[#allocation100_spill] sm:$0xff] }
 0x275   : > { %v2986_v5 = vadd.f32 %v2964_v33, %v2792_v53  ;;  %v2794_v40 = vadd.f32 %v2772_v3, %v2313_v25  ;;  %v2315_v15 = vpop.f32.mrb[111].mxu0  ;;  %v2775_v33 = vmul.f32 %v17087_v22, %v21207_v8 }
 0x276   : > { %v2987_v41 = vadd.f32 %v2965_v14, %v2793_v7  ;;  %v2795_v46 = vadd.f32 %v2773_v10, %v2315_v15  ;;  %v21209_v7 = vld [vmem:[#allocation51_spill] sm:$0xff]  ;;  %v17287_v25 = vpop.permute.xlu0 %3723  ;;  %v21211_v10 = vld [vmem:[#allocation72_spill] sm:$0xff]  ;;  %v21214_v15 = vld [vmem:[#allocation73_spill] sm:$0xff] }
 0x277   : > { %v17265_v61 = vadd.f32 %v3158_v58, %v2986_v5  ;;  %v2988_v26 = vadd.f32 %v2966_v60, %v2794_v40  ;;  %v2776_v14 = vmul.f32 %v21210_v34, %v21209_v7  ;;  %v2969_v51 = vmul.f32 %v17141_v56, %v21211_v10  ;;  %v21212_v5 = vld [vmem:[#allocation52_spill] sm:$0xff] }
 0x278   : > { %v17271_v52 = vadd.f32 %v3159_v45, %v2987_v41  ;;  %v2989_v12 = vadd.f32 %v2967_v59, %v2795_v46  ;;  %v2777_v22 = vmul.f32 %v21210_v34, %v21212_v5  ;;  %v21213_v40 = vld [vmem:[#allocation96_spill] sm:$0xff]  ;;  %v2970_v2 = vmul.f32 %v17172_v43, %v21214_v15  ;;  %v21215_v41 = vld [vmem:[#allocation98_spill] sm:$0xff]  ;;  %v21225_v5 = vld [vmem:[#allocation71_spill] sm:$0xff] }
 0x279   : > { %v17273_v19 = vadd.f32 %v3160_v62, %v2988_v26  ;;  %v3162_v21 = vmul.f32 %v17193_v42, %v21213_v40  ;;  %v3163_v46 = vmul.f32 %v17193_v42, %v21215_v41  ;;  %v2971_v56 = vmul.f32 %v17172_v43, %v21216_v18  ;;  %v21217_v62 = vld [vmem:[#allocation99_spill] sm:$0xff] }
 0x27a   : > { %v17277_v53 = vadd.f32 %v3161_v48, %v2989_v12  ;;  %v2319_v36 = vpop.f32.mrb[112].mxu0  ;;  %v3164_v26 = vmul.f32 %v17227_v28, %v21217_v62  ;;  %v2950_v12 = vpop.permute.xlu1 %2949 }
 0x27b   : > { %v2796_v37 = vadd.f32 %v2774_v11, %v2319_v36  ;;  %v2321_v3 = vpop.f32.mrb[113].mxu0  ;;  %v3165_v11 = vmul.f32 %v17227_v28, %v21218_v0  ;;  %v3144_v7 = vpop.permute.xlu0 %3143 }
 0x27c   : > { %v2797_v29 = vadd.f32 %v2775_v33, %v2321_v3  ;;  %v2323_v58 = vpop.f32.mrb[114].mxu0  ;;  %v21219_v33 = vld [vmem:[#allocation42_spill] sm:$0xff] }
 0x27d   : > { %v2990_v63 = vadd.f32 %v2968_v55, %v2796_v37  ;;  %v2798_v60 = vadd.f32 %v2776_v14, %v2323_v58  ;;  %v2325_v45 = vpop.f32.mrb[115].mxu0  ;;  %v21220_v42 = vrot.slane %v21219_v33, 5  ;;  %v21221_v55 = vld [vmem:[#allocation44_spill] sm:$0xff] }
 0x27e   : > { %v2991_v39 = vadd.f32 %v2969_v51, %v2797_v29  ;;  %v2799_v59 = vadd.f32 %v2777_v22, %v2325_v45  ;;  %v21222_v43 = vrot.slane %v21221_v55, 5  ;;  %v21223_v29 = vld [vmem:[#allocation69_spill] sm:$0xff]  ;;  %v21226_v22 = vrot.slane %v21225_v5, 6 }
 0x27f   : > { %v17303_v31 = vadd.f32 %v3162_v21, %v2990_v63  ;;  %v2992_v48 = vadd.f32 %v2970_v2, %v2798_v60  ;;  %v2778_v37 = vmul.f32 %v2756_v9, %v21220_v42  ;;  %v21224_v10 = vrot.slane %v21223_v29, 6  ;;  %v21227_v60 = vld [vmem:[#allocation95_spill] sm:$0xff] }
 0x280   : > { %v17307_v36 = vadd.f32 %v3163_v46, %v2991_v39  ;;  %v2993_v8 = vadd.f32 %v2971_v56, %v2799_v59  ;;  %v2779_v3 = vmul.f32 %v2756_v9, %v21222_v43  ;;  %v2973_v40 = vmul.f32 %v2950_v12, %v21226_v22  ;;  %v21229_v9 = vld [vmem:[#allocation97_spill] sm:$0xff] }
 0x281   : > { %v17311_v13 = vadd.f32 %v3164_v26, %v2992_v48  ;;  %v2972_v51 = vmul.f32 %v2950_v12, %v21224_v10  ;;  %v21228_v15 = vrot.slane %v21227_v60, 7  ;;  %v21230_v46 = vrot.slane %v21229_v9, 7  ;;  %v21235_v9 = vld [vmem:[#allocation32_spill] sm:$0xff] }
 0x282   : > { %v17315_v34 = vadd.f32 %v3165_v11, %v2993_v8  ;;  %v2329_v14 = vpop.f32.mrb[116].mxu0 }
 0x283   : > { %v2800_v58 = vadd.f32 %v2778_v37, %v2329_v14  ;;  %v2331_v28 = vpop.f32.mrb[117].mxu0  ;;  %v3166_v2 = vmul.f32 %v3144_v7, %v21228_v15  ;;  %v3167_v39 = vmul.f32 %v3144_v7, %v21230_v46  ;;  %v21231_v37 = vld [vmem:[#allocation27_spill] sm:$0xff]  ;;  %v21232_v7 = vld [vmem:[#allocation21_spill] sm:$0xff]  ;;  %v21233_v14 = vld [vmem:[#allocation40_spill] sm:$0xff] }
 0x284   : > { %v2801_v21 = vadd.f32 %v2779_v3, %v2331_v28  ;;  %v2333_v63 = vpop.f32.mrb[118].mxu0  ;;  %v3539_v29 = vmul.f32 %v21233_v14, %v21232_v7 }
 0x285   : > { %v2994_v45 = vadd.f32 %v2972_v51, %v2800_v58  ;;  %v2334_v41 = vpop.f32.mrb[119].mxu0  ;;  %v21234_v58 = vld [vmem:[#allocation22_spill] sm:$0xff] }
 0x286   : > { %v2995_v59 = vadd.f32 %v2973_v40, %v2801_v21  ;;  %v3540_v28 = vmul.f32 %v21233_v14, %v21234_v58 }
 0x287   : > { %v17325_v18 = vadd.f32 %v3166_v2, %v2994_v45 }
 0x288   : > { %v17327_v56 = vadd.f32 %v3167_v39, %v2995_v59 }
 0x28a   : > { %v2370_v62 = vpop.f32.mrb[120].mxu0 }
 0x28b   : > { %v2372_v26 = vpop.f32.mrb[121].mxu0  ;;  %v3213_v0 = vrot.slane %v2370_v62, 1  ;;  %v21236_v62 = vld [vmem:[#allocation23_spill] sm:$0xff] }
 0x28c   : > { %v2374_v48 = vpop.f32.mrb[122].mxu0  ;;  %v3216_v8 = vrot.slane %v2372_v26, 1  ;;  %v21237_v26 = vld [vmem:[#allocation49_spill] sm:$0xff] }
 0x28d   : > { %v3214_v12 = vrot.slane %v2374_v48, 1  ;;  %v2376_v11 = vpop.f32.mrb[123].mxu0  ;;  %v3541_v48 = vmul.f32 %v21237_v26, %v21236_v62  ;;  %v21244_v62 = vld [vmem:[#allocation28_spill] sm:$0xff] }
 0x28e   : > { %v3217_v33 = vrot.slane %v2376_v11, 1  ;;  %v21238_v11 = vld [vmem:[#allocation57_spill] sm:$0xff] }
 0x28f   : > { %v3215_v42 = vsel %vm3212_vm6, %v3213_v0, %v3214_v12 }
 0x290   : > { %v3342_v55 = vmul.f32 %v21231_v37, %v3215_v42  ;;  %v3218_v43 = vsel %vm3212_vm6, %v3216_v8, %v3217_v33  ;;  %v21239_v42 = vld [vmem:[#allocation24_spill] sm:$0xff] }
 0x291   : > { %v3343_v3 = vmul.f32 %v21231_v37, %v3218_v43  ;;  %v3542_v37 = vmul.f32 %v21237_v26, %v21239_v42  ;;  %v21240_v43 = vld [vmem:[#allocation25_spill] sm:$0xff]  ;;  %v21245_v26 = vld [vmem:[#allocation62_spill] sm:$0xff] }
 0x292   : > { %v3363_v10 = vadd.f32 %v3342_v55, %v17156_v20  ;;  %v2380_v51 = vpop.f32.mrb[124].mxu0 }
 0x293   : > { %v3364_v5 = vadd.f32 %v3343_v3, %v17160_v38  ;;  %v3219_v22 = vrot.slane %v2380_v51, 1  ;;  %v2382_v40 = vpop.f32.mrb[125].mxu0  ;;  %v21241_v3 = vld [vmem:[#allocation59_spill] sm:$0xff] }
 0x294   : > { %v3221_v21 = vrot.slane %v2382_v40, 1  ;;  %v2384_v63 = vpop.f32.mrb[126].mxu0  ;;  %v17339_v60 = vadd.f32 %v3539_v29, %v3363_v10  ;;  %v3543_v7 = vmul.f32 %v21241_v3, %v21240_v43 }
 0x295   : > { %v3220_v15 = vsel %vm3212_vm6, %v3214_v12, %v3219_v22  ;;  %v3223_v2 = vrot.slane %v2384_v63, 1  ;;  %v2386_v45 = vpop.f32.mrb[127].mxu0  ;;  %v17342_v41 = vadd.f32 %v3540_v28, %v3364_v5 }
 0x296   : > { %v3344_v20 = vmul.f32 %v21235_v9, %v3220_v15  ;;  %v3222_v46 = vsel %vm3212_vm6, %v3217_v33, %v3221_v21  ;;  %v3225_v39 = vrot.slane %v2386_v45, 1 }
 0x297   : > { %v3345_v59 = vmul.f32 %v21235_v9, %v3222_v46  ;;  %v3224_v38 = vsel %vm3212_vm6, %v3219_v22, %v3223_v2  ;;  %v21243_v9 = vld [vmem:[#allocation58_spill] sm:$0xff] }
 0x298   : > { %v3365_v0 = vadd.f32 %v3344_v20, %v17162_v1  ;;  %v3346_v12 = vmul.f32 %v21238_v11, %v3224_v38  ;;  %v3226_v8 = vsel %vm3212_vm6, %v3221_v21, %v3225_v39  ;;  %v21242_v1 = vld [vmem:[#allocation26_spill] sm:$0xff] }
 0x299   : > { %v3366_v55 = vadd.f32 %v3345_v59, %v17168_v17  ;;  %v3347_v33 = vmul.f32 %v21238_v11, %v3226_v8  ;;  %v3544_v51 = vmul.f32 %v21241_v3, %v21242_v1  ;;  %v21246_v11 = vld [vmem:[#allocation76_spill] sm:$0xff]  ;;  %v21247_v8 = vld [vmem:[#allocation29_spill] sm:$0xff] }
 0x29a   : > { %v3367_v14 = vadd.f32 %v3346_v12, %v17191_v50  ;;  %v2390_v29 = vpop.f32.mrb[128].mxu0  ;;  %v17360_v10 = vadd.f32 %v3541_v48, %v3365_v0  ;;  %v3545_v48 = vmul.f32 %v21245_v26, %v21244_v62  ;;  %v3546_v42 = vmul.f32 %v21245_v26, %v21247_v8  ;;  %v21252_v62 = vld [vmem:[#allocation33_spill] sm:$0xff]  ;;  %v21253_v26 = vld [vmem:[#allocation83_spill] sm:$0xff] }
 0x29b   : > { %v3368_v58 = vadd.f32 %v3347_v33, %v17197_v57  ;;  %v3227_v28 = vrot.slane %v2390_v29, 1  ;;  %v2392_v5 = vpop.f32.mrb[129].mxu0  ;;  %v17365_v22 = vadd.f32 %v3542_v37, %v3366_v55  ;;  %v21248_v55 = vld [vmem:[#allocation30_spill] sm:$0xff]  ;;  %v21249_v33 = vld [vmem:[#allocation80_spill] sm:$0xff] }
 0x29c   : > { %v3229_v17 = vrot.slane %v2392_v5, 1  ;;  %v2394_v40 = vpop.f32.mrb[130].mxu0  ;;  %v17367_v21 = vadd.f32 %v3543_v7, %v3367_v14  ;;  %v3547_v43 = vmul.f32 %v21249_v33, %v21248_v55 }
 0x29d   : > { %v3228_v63 = vsel %vm3212_vm6, %v3223_v2, %v3227_v28  ;;  %v3231_v15 = vrot.slane %v2394_v40, 1  ;;  %v2396_v50 = vpop.f32.mrb[131].mxu0  ;;  %v17370_v45 = vadd.f32 %v3544_v51, %v3368_v58 }
 0x29e   : > { %v3348_v20 = vmul.f32 %v21243_v9, %v3228_v63  ;;  %v3230_v46 = vsel %vm3212_vm6, %v3225_v39, %v3229_v17  ;;  %v3233_v59 = vrot.slane %v2396_v50, 1 }
 0x29f   : > { %v3349_v57 = vmul.f32 %v21243_v9, %v3230_v46  ;;  %v3232_v38 = vsel %vm3212_vm6, %v3227_v28, %v3231_v15  ;;  %v21251_v9 = vld [vmem:[#allocation79_spill] sm:$0xff] }
 0x2a0   : > { %v3369_v0 = vadd.f32 %v3348_v20, %v17201_v30  ;;  %v3350_v2 = vmul.f32 %v21246_v11, %v3232_v38  ;;  %v3234_v12 = vsel %vm3212_vm6, %v3229_v17, %v3233_v59  ;;  %v21250_v30 = vld [vmem:[#allocation31_spill] sm:$0xff] }
 0x2a1   : > { %v3370_v37 = vadd.f32 %v3349_v57, %v17205_v4  ;;  %v3351_v39 = vmul.f32 %v21246_v11, %v3234_v12  ;;  %v3548_v29 = vmul.f32 %v21249_v33, %v21250_v30  ;;  %v21254_v11 = vld [vmem:[#allocation94_spill] sm:$0xff]  ;;  %v21255_v12 = vld [vmem:[#allocation35_spill] sm:$0xff] }
 0x2a2   : > { %v3371_v3 = vadd.f32 %v3350_v2, %v17231_v32  ;;  %v2400_v7 = vpop.f32.mrb[132].mxu0  ;;  %v17388_v14 = vadd.f32 %v3545_v48, %v3369_v0  ;;  %v3549_v48 = vmul.f32 %v21253_v26, %v21252_v62  ;;  %v3550_v8 = vmul.f32 %v21253_v26, %v21255_v12  ;;  %v21260_v62 = vld [vmem:[#allocation43_spill] sm:$0xff] }
 0x2a3   : > { %v3372_v1 = vadd.f32 %v3351_v39, %v17235_v6  ;;  %v3235_v51 = vrot.slane %v2400_v7, 1  ;;  %v2402_v58 = vpop.f32.mrb[133].mxu0  ;;  %v17393_v28 = vadd.f32 %v3546_v42, %v3370_v37  ;;  %v21256_v37 = vld [vmem:[#allocation36_spill] sm:$0xff]  ;;  %v21257_v39 = vld [vmem:[#allocation102_spill] sm:$0xff]  ;;  %v3553_v26 = vmul.f32 %v17146_v54, %v21260_v62  ;;  %v21262_v12 = vld [vmem:[#allocation47_spill] sm:$0xff] }
 0x2a4   : > { %v3237_v4 = vrot.slane %v2402_v58, 1  ;;  %v2404_v5 = vpop.f32.mrb[134].mxu0  ;;  %v17395_v17 = vadd.f32 %v3547_v43, %v3371_v3  ;;  %v3551_v55 = vmul.f32 %v21257_v39, %v21256_v37 }
 0x2a5   : > { %v3236_v40 = vsel %vm3212_vm6, %v3231_v15, %v3235_v51  ;;  %v3239_v63 = vrot.slane %v2404_v5, 1  ;;  %v2406_v32 = vpop.f32.mrb[135].mxu0  ;;  %v17398_v50 = vadd.f32 %v3548_v29, %v3372_v1 }
 0x2a6   : > { %v3352_v20 = vmul.f32 %v21251_v9, %v3236_v40  ;;  %v3238_v46 = vsel %vm3212_vm6, %v3233_v59, %v3237_v4  ;;  %v3241_v57 = vrot.slane %v2406_v32, 1 }
 0x2a7   : > { %v3353_v6 = vmul.f32 %v21251_v9, %v3238_v46  ;;  %v3240_v38 = vsel %vm3212_vm6, %v3235_v51, %v3239_v63  ;;  %v21259_v9 = vld [vmem:[#allocation101_spill] sm:$0xff] }
 0x2a8   : > { %v3373_v0 = vadd.f32 %v3352_v20, %v17237_v16  ;;  %v3354_v15 = vmul.f32 %v21254_v11, %v3240_v38  ;;  %v3242_v2 = vsel %vm3212_vm6, %v3237_v4, %v3241_v57  ;;  %v21258_v16 = vld [vmem:[#allocation38_spill] sm:$0xff] }
 0x2a9   : > { %v3374_v42 = vadd.f32 %v3353_v6, %v17241_v44  ;;  %v3355_v59 = vmul.f32 %v21254_v11, %v3242_v2  ;;  %v3552_v7 = vmul.f32 %v21257_v39, %v21258_v16  ;;  %v21261_v11 = vld [vmem:[#allocation46_spill] sm:$0xff] }
 0x2aa   : > { %v3375_v33 = vadd.f32 %v3354_v15, %v17265_v61  ;;  %v2410_v43 = vpop.f32.mrb[136].mxu0  ;;  %v17416_v3 = vadd.f32 %v3549_v48, %v3373_v0  ;;  %v3554_v15 = vmul.f32 %v17146_v54, %v21261_v11 }
 0x2ab   : > { %v3376_v30 = vadd.f32 %v3355_v59, %v17271_v52  ;;  %v3243_v29 = vrot.slane %v2410_v43, 1  ;;  %v2412_v1 = vpop.f32.mrb[137].mxu0  ;;  %v17421_v51 = vadd.f32 %v3550_v8, %v3374_v42  ;;  %v3555_v8 = vmul.f32 %v17281_v35, %v21262_v12 }
 0x2ac   : > { %v3245_v44 = vrot.slane %v2412_v1, 1  ;;  %v2414_v58 = vpop.f32.mrb[138].mxu0  ;;  %v17423_v4 = vadd.f32 %v3551_v55, %v3375_v33 }
 0x2ad   : > { %v3244_v5 = vsel %vm3212_vm6, %v3239_v63, %v3243_v29  ;;  %v3247_v40 = vrot.slane %v2414_v58, 1  ;;  %v2416_v61 = vpop.f32.mrb[139].mxu0  ;;  %v17426_v32 = vadd.f32 %v3552_v7, %v3376_v30  ;;  %v21264_v7 = vld [vmem:[#allocation53_spill] sm:$0xff] }
 0x2ae   : > { %v3356_v20 = vmul.f32 %v21259_v9, %v3244_v5  ;;  %v3246_v46 = vsel %vm3212_vm6, %v3241_v57, %v3245_v44  ;;  %v3249_v6 = vrot.slane %v2416_v61, 1  ;;  %v3470_v30 = vsel %vm3212_vm6, %v21264_v7, 0.0 }
 0x2af   : > { %v3357_v52 = vmul.f32 %v21259_v9, %v3246_v46  ;;  %v3248_v38 = vsel %vm3212_vm6, %v3243_v29, %v3247_v40  ;;  %v3557_v61 = vmul.f32 %v17267_v49, %v3470_v30 }
 0x2b0   : > { %v3377_v48 = vadd.f32 %v3356_v20, %v17273_v19  ;;  %v3358_v63 = vmul.f32 %v17221_v47, %v3248_v38  ;;  %v3250_v0 = vsel %vm3212_vm6, %v3245_v44, %v3249_v6  ;;  %v21263_v19 = vld [vmem:[#allocation48_spill] sm:$0xff]  ;;  %v21265_v44 = vld [vmem:[#allocation55_spill] sm:$0xff] }
 0x2b1   : > { %v3378_v2 = vadd.f32 %v3357_v52, %v17277_v53  ;;  %v3359_v57 = vmul.f32 %v17221_v47, %v3250_v0  ;;  %v3556_v39 = vmul.f32 %v17281_v35, %v21263_v19  ;;  %v3471_v35 = vsel %vm3212_vm6, %v21265_v44, 0.0 }
 0x2b2   : > { %v3379_v42 = vadd.f32 %v3358_v63, %v17303_v31  ;;  %v2420_v59 = vpop.f32.mrb[140].mxu0  ;;  %v17444_v37 = vadd.f32 %v3553_v26, %v3377_v48  ;;  %v3558_v20 = vmul.f32 %v17267_v49, %v3471_v35  ;;  %v21269_v35 = vld [vmem:[#allocation56_spill] sm:$0xff] }
 0x2b3   : > { %v3380_v55 = vadd.f32 %v3359_v57, %v17307_v36  ;;  %v3251_v33 = vrot.slane %v2420_v59, 1  ;;  %v2422_v43 = vpop.f32.mrb[141].mxu0  ;;  %v17449_v54 = vadd.f32 %v3554_v15, %v3378_v2  ;;  %v21267_v57 = vld [vmem:[#allocation3_spill] sm:$0xff] }
 0x2b4   : > { %v3253_v53 = vrot.slane %v2422_v43, 1  ;;  %v2424_v16 = vpop.f32.mrb[142].mxu0  ;;  %v17451_v47 = vadd.f32 %v3555_v8, %v3379_v42  ;;  %v12585_v8 = vld [vmem:[%s20974_s5 + $0x1] ss:$2 sm:$0x3] }
 0x2b5   : > { %v3252_v31 = vsel %vm3212_vm6, %v3247_v40, %v3251_v33  ;;  %v2425_v29 = vpop.f32.mrb[143].mxu0  ;;  %v17456_v1 = vadd.f32 %v3556_v39, %v3380_v55  ;;  %v21268_v33 = vld [vmem:[#allocation4_spill] sm:$0xff]  ;;  %v17491_v30 = vrot.slane %v12585_v8, %v21267_v57 }
 0x2b6   : > { %v3360_v36 = vmul.f32 %v17253_v23, %v3252_v31  ;;  %v3254_v58 = vsel %vm3212_vm6, %v3249_v6, %v3253_v53 }
 0x2b7   : > { %v3361_v5 = vmul.f32 %v17253_v23, %v3254_v58 }
 0x2b8   : > { %v3381_v9 = vadd.f32 %v3360_v36, %v17311_v13  ;;  %v3779_v13 = vld [vmem:[%s20974_s5] ss:$2 sm:$0x3] }
 0x2b9   : > { %v3382_v40 = vadd.f32 %v3361_v5, %v17315_v34  ;;  %v21266_v34 = vld [vmem:[#allocation54_spill] sm:$0xff]  ;;  %v17479_v12 = vrot.slane %v3779_v13, %v21267_v57  ;;  %v17487_v43 = vrot.slane %v3779_v13, %v21268_v33  ;;  %v17498_v5 = vrot.slane %v12585_v8, %v21268_v33 }
 0x2ba   : > { %v17467_v46 = vadd.f32 %v3557_v61, %v3381_v9  ;;  %v2552_v52 = vpop.f32.mrb[144].mxu0 }
 0x2bb   : > { %v17469_v38 = vadd.f32 %v3558_v20, %v3382_v40  ;;  %v2554_v62 = vpop.f32.mrb[145].mxu0  ;;  %v3605_v48 = vrot.slane %v2552_v52, 3  ;;  %v21270_v52 = vld [vmem:[#allocation67_spill] sm:$0xff] }
 0x2bc   : > { %v2556_v26 = vpop.f32.mrb[146].mxu0  ;;  %v3608_v23 = vrot.slane %v2554_v62, 3 }
 0x2bd   : > { %v3606_v6 = vrot.slane %v2556_v26, 3  ;;  %v2558_v63 = vpop.f32.mrb[147].mxu0 }
 0x2be   : > { %v3609_v0 = vrot.slane %v2558_v63, 3 }
 0x2bf   : > { %v3607_v49 = vsel %vm3604_vm7, %v3605_v48, %v3606_v6 }
 0x2c0   : > { %v3736_v11 = vmul.f32 %v21266_v34, %v3607_v49  ;;  %v3610_v15 = vsel %vm3604_vm7, %v3608_v23, %v3609_v0 }
 0x2c1   : > { %v3737_v2 = vmul.f32 %v21266_v34, %v3610_v15 }
 0x2c2   : > { %v3757_v42 = vadd.f32 %v3736_v11, %v17339_v60  ;;  %v2562_v59 = vpop.f32.mrb[148].mxu0 }
 0x2c3   : > { %v3758_v19 = vadd.f32 %v3737_v2, %v17342_v41  ;;  %v3611_v39 = vrot.slane %v2562_v59, 3  ;;  %v2564_v55 = vpop.f32.mrb[149].mxu0 }
 0x2c4   : > { %v3791_v53 = vmul.f32 %v17479_v12, %v3757_v42  ;;  %v3613_v16 = vrot.slane %v2564_v55, 3  ;;  %v2566_v7 = vpop.f32.mrb[150].mxu0 }
 0x2c5   : > { %v3612_v31 = vsel %vm3604_vm7, %v3606_v6, %v3611_v39  ;;  %v3615_v29 = vrot.slane %v2566_v7, 3  ;;  %v2568_v44 = vpop.f32.mrb[151].mxu0  ;;  %v3792_v60 = vmul.f32 %v17487_v43, %v3758_v19 }
 0x2c6   : > { %v3738_v41 = vmul.f32 %v21269_v35, %v3612_v31  ;;  %v3614_v36 = vsel %vm3604_vm7, %v3609_v0, %v3613_v16  ;;  %v3617_v58 = vrot.slane %v2568_v44, 3  ;;  %v3826_v20 = vadd.f32 %v17491_v30, %v3791_v53 }
 0x2c7   : > { %v3739_v61 = vmul.f32 %v21269_v35, %v3614_v36  ;;  %v3616_v9 = vsel %vm3604_vm7, %v3611_v39, %v3615_v29  ;;  %v3827_v63 = vadd.f32 %v17498_v5, %v3792_v60 }
 0x2c8   : > { %v3759_v40 = vadd.f32 %v3738_v41, %v17360_v10  ;;  %v3740_v62 = vmul.f32 %v21270_v52, %v3616_v9  ;;  %v3618_v26 = vsel %vm3604_vm7, %v3613_v16, %v3617_v58  ;;  %v3848_v15 = vmax.f32 %v3826_v20, 0.0  ;;  %v17527_v20 = vpop.permute.xlu1 %3728 }
 0x2c9   : > { %v3760_v48 = vadd.f32 %v3739_v61, %v17365_v22  ;;  %v3741_v6 = vmul.f32 %v21270_v52, %v3618_v26  ;;  %v3849_v53 = vmax.f32 %v3827_v63, 0.0  ;;  %v14465_v26 = vld [vmem:[%s20975_s6 + $0x10] ss:$56 sps:$4 sm:$0xff]  }
 0x2ca   : > { %v3793_v23 = vmul.f32 %v17479_v12, %v3759_v40  ;;  %v3761_v0 = vadd.f32 %v3740_v62, %v17367_v21  ;;  %v2572_v13 = vpop.f32.mrb[152].mxu0 }
 0x2cb   : > { %v3794_v49 = vmul.f32 %v17487_v43, %v3760_v48  ;;  %v3762_v34 = vadd.f32 %v3741_v6, %v17370_v45  ;;  %v3619_v10 = vrot.slane %v2572_v13, 3  ;;  %v2574_v11 = vpop.f32.mrb[153].mxu0  ;;  %v21271_v45 = vld [vmem:[#allocation75_spill] sm:$0xff]  ;;  %v14468_v48 = vld [vmem:[%s20975_s6 + $0x18] ss:$56 sps:$4 sm:$0xff]  }
 0x2cc   : > { %v3828_v2 = vadd.f32 %v17491_v30, %v3793_v23  ;;  %v3795_v22 = vmul.f32 %v17479_v12, %v3761_v0  ;;  %v3621_v8 = vrot.slane %v2574_v11, 3  ;;  %v2576_v42 = vpop.f32.mrb[154].mxu0  ;;  %v14473_v23 = vld [vmem:[%s20975_s6 + $0x84] ss:$56 sps:$4 sm:$0xff]  }
 0x2cd   : > { %v3829_v59 = vadd.f32 %v17498_v5, %v3794_v49  ;;  %v3796_v19 = vmul.f32 %v17487_v43, %v3762_v34  ;;  %v3620_v21 = vsel %vm3604_vm7, %v3615_v29, %v3619_v10  ;;  %v3623_v39 = vrot.slane %v2576_v42, 3  ;;  %v2578_v55 = vpop.f32.mrb[155].mxu0  ;;  %v21272_v29 = vld [vmem:[#allocation84_spill] sm:$0xff] }
 0x2ce   : > { %v3850_v16 = vmax.f32 %v3828_v2, 0.0  ;;  %v3742_v7 = vmul.f32 %v21271_v45, %v3620_v21  ;;  %v3622_v31 = vsel %vm3604_vm7, %v3617_v58, %v3621_v8  ;;  %v3830_v60 = vadd.f32 %v17491_v30, %v3795_v22 }
 0x2cf   : > { %v3851_v44 = vmax.f32 %v3829_v59, 0.0  ;;  %v3743_v35 = vmul.f32 %v21271_v45, %v3622_v31  ;;  %v3624_v41 = vsel %vm3604_vm7, %v3619_v10, %v3623_v39  ;;  %v3831_v52 = vadd.f32 %v17498_v5, %v3796_v19 }
 0x2d0   : > { %v17523_v36 = vpack.c.bf16 %v3850_v16, %v3848_v15  ;;  %v3763_v61 = vadd.f32 %v3742_v7, %v17388_v14  ;;  %v3744_v9 = vmul.f32 %v21272_v29, %v3624_v41  ;;  %v3625_v62 = vrot.slane %v2578_v55, 3  ;;  %v14471_v55 = vld [vmem:[%s20975_s6 + $0x80] ss:$56 sps:$4 sm:$0xff]  }
 0x2d1   : > { %v17529_v40 = vpack.c.bf16 %v3851_v44, %v3849_v53  ;;  %v3764_v58 = vadd.f32 %v3743_v35, %v17393_v28  ;;  %v14476_v28 = vld [vmem:[%s20975_s6 + $0x8c] ss:$56 sps:$4 sm:$0xff]   ;;  %v3852_v0 = vmax.f32 %v3830_v60, 0.0  ;;  %v3340_v60 = vpop.permute.xlu1 %3339  ;;  %v3537_v35 = vpop.permute.xlu0 %3536 }
 0x2d2   : > { %v3797_v14 = vmul.f32 %v17479_v12, %v3763_v61  ;;  %v3765_v6 = vadd.f32 %v3744_v9, %v17395_v17  ;;  %v2582_v63 = vpop.f32.mrb[156].mxu0  ;;  %v3626_v49 = vsel %vm3604_vm7, %v3621_v8, %v3625_v62  ;;  %v3853_v8 = vmax.f32 %v3831_v52, 0.0  ;;  %v21273_v7 = vld [vmem:[#allocation90_spill] sm:$0xff]  ;;  %v14479_v44 = vld [vmem:[%s20975_s6 + $0xf4] ss:$56 sps:$4 sm:$0xff]  }
 0x2d3   : > { %v3798_v13 = vmul.f32 %v17487_v43, %v3764_v58  ;;  %v3627_v34 = vrot.slane %v2582_v63, 3  ;;  %v2584_v10 = vpop.f32.mrb[157].mxu0  ;;  %12754 = vmatprep.mubr.msk.bf16.mxu1 %vm1959_vm1, %v17529_v40  ;;  %12760 = vmatprep.mubr.msk.bf16.mxu0 %vm1959_vm1, %v17529_v40  ;;  %v3745_v15 = vmul.f32 %v21272_v29, %v3626_v49  ;;  %v17582_v9 = vmul.f32 0.0, %v3340_v60  ;;  %v14477_v63 = vld [vmem:[%s20975_s6 + $0xf0] ss:$56 sps:$4 sm:$0xff]  }
 0x2d4   : > { %v3832_v17 = vadd.f32 %v17491_v30, %v3797_v14  ;;  %v3799_v11 = vmul.f32 %v17479_v12, %v3765_v6  ;;  %v3629_v2 = vrot.slane %v2584_v10, 3  ;;  %v17556_v22 = vpop.f32.mrb[158].mxu0  ;;  %4941 = vmatmul.mubr.bf16.vlgmr.msra.gmra.mrb[48].mxu1 %v17523_v36  ;;  %5024 = vmatmul.mubr.bf16.vlgmr.msra.gmra.mrb[168].mxu0 %v17523_v36  ;;  %v14485_v10 = vld [vmem:[%s20975_s6 + $0x164] ss:$56 sps:$4 sm:$0xff]  }
 0x2d5   : > { %v3833_v42 = vadd.f32 %v17498_v5, %v3798_v13  ;;  %v3628_v59 = vsel %vm3604_vm7, %v3623_v39, %v3627_v34  ;;  %v3631_v19 = vrot.slane %v17556_v22, 3  ;;  %v17563_v21 = vpop.f32.mrb[159].mxu0  ;;  %5077 = vmatpush1.bf16.msra.mxu1 %v14465_v26  ;;  %5164 = vmatpush1.bf16.msra.mxu0 %v14468_v48  ;;  %v3766_v45 = vadd.f32 %v3745_v15, %v17398_v50  ;;  %v14474_v39 = vld [vmem:[%s20975_s6 + $0x88] ss:$56 sps:$4 sm:$0xff]   ;;  %v3734_v60 = vpop.permute.xlu1 %3733 }
 0x2d6   : > { %v3854_v53 = vmax.f32 %v3832_v17, 0.0  ;;  %v17569_v16 = vadd.f32 %v17491_v30, %v3799_v11  ;;  %v3746_v31 = vmul.f32 %v21273_v7, %v3628_v59  ;;  %5078 = vmatprep.subr.bf16.mxu1 %v14473_v23  ;;  %5165 = vmatprep.subr.bf16.mxu0 %v14476_v28  ;;  %v3630_v61 = vsel %vm3604_vm7, %v3625_v62, %v3629_v2  ;;  %v14482_v23 = vld [vmem:[%s20975_s6 + $0xfc] ss:$56 sps:$4 sm:$0xff]  }
 0x2d7   : > { %v3855_v41 = vmax.f32 %v3833_v42, 0.0  ;;  %v3632_v29 = vsel %vm3604_vm7, %v3627_v34, %v3631_v19  ;;  %v3633_v50 = vrot.slane %v17563_v21, 3  ;;  %v3800_v58 = vmul.f32 %v17487_v43, %v3766_v45  ;;  %v14480_v34 = vld [vmem:[%s20975_s6 + $0xf8] ss:$56 sps:$4 sm:$0xff]  }
 0x2d8   : > { %v17584_v52 = vpack.c.bf16 %v3854_v53, %v3852_v0  ;;  %v3767_v26 = vadd.f32 %v3746_v31, %v17416_v3  ;;  %v3747_v14 = vmul.f32 %v21273_v7, %v3630_v61  ;;  %v3748_v6 = vmul.f32 %v17166_v27, %v3632_v29 }
 0x2d9   : > { %v17588_v48 = vpack.c.bf16 %v3855_v41, %v3853_v8  ;;  %v3634_v62 = vsel %vm3604_vm7, %v3629_v2, %v3633_v50  ;;  %5079 = vmatpush1.bf16.msra.mxu1 %v14471_v55  ;;  %v17599_v28 = vmul.f32 0.0, %v3537_v35  ;;  %v3384_v3 = vadd.f32 %v17582_v9, %v17327_v56  ;;  %5166 = vmatpush1.bf16.msra.mxu0 %v14474_v39 }
 0x2da   : > { %v3801_v0 = vmul.f32 %v17479_v12, %v3767_v26  ;;  %v3749_v13 = vmul.f32 %v17166_v27, %v3634_v62  ;;  %v2592_v49 = vpop.f32.mrb[160].mxu0  ;;  %5080 = vmatprep.subr.bf16.mxu1 %v14479_v44  ;;  %v3856_v17 = vmax.f32 %v17569_v16, 0.0  ;;  %v3768_v11 = vadd.f32 %v3747_v14, %v17421_v51  ;;  %v14488_v27 = vld [vmem:[%s20975_s6 + $0x16c] ss:$56 sps:$4 sm:$0xff]   ;;  %5167 = vmatprep.subr.bf16.mxu0 %v14482_v23 }
 0x2db   : > { %v3769_v56 = vadd.f32 %v3748_v6, %v17423_v4  ;;  %v3635_v15 = vrot.slane %v2592_v49, 3  ;;  %v2594_v2 = vpop.f32.mrb[161].mxu0  ;;  %12755 = vmatprep.mubr.msk.bf16.mxu1 %vm1959_vm1, %v17588_v48  ;;  %12761 = vmatprep.mubr.msk.bf16.mxu0 %vm1959_vm1, %v17588_v48  ;;  %v3835_v22 = vadd.f32 %v17498_v5, %v3800_v58  ;;  %v14491_v44 = vld [vmem:[%s20975_s6 + $0x1d4] ss:$56 sps:$4 sm:$0xff]   ;;  %v3581_v35 = vadd.f32 %v17599_v28, %v3384_v3 }
 0x2dc   : > { %v3836_v8 = vadd.f32 %v17491_v30, %v3801_v0  ;;  %v3770_v51 = vadd.f32 %v3749_v13, %v17426_v32  ;;  %v3637_v42 = vrot.slane %v2594_v2, 3  ;;  %v2596_v4 = vpop.f32.mrb[162].mxu0  ;;  %4951 = vmatmul.mubr.bf16.gmra.mrb[52].mxu1 %v17584_v52  ;;  %5034 = vmatmul.mubr.bf16.gmra.mrb[172].mxu0 %v17584_v52  ;;  %v3802_v59 = vmul.f32 %v17487_v43, %v3768_v11  ;;  %v14483_v32 = vld [vmem:[%s20975_s6 + $0x160] ss:$56 sps:$4 sm:$0xff]  }
 0x2dd   : > { %v3803_v21 = vmul.f32 %v17479_v12, %v3769_v56  ;;  %v3636_v55 = vsel %vm3604_vm7, %v3631_v19, %v3635_v15  ;;  %v3639_v53 = vrot.slane %v2596_v4, 3  ;;  %v17629_v16 = vpop.f32.mrb[163].mxu0  ;;  %5081 = vmatpush1.bf16.msra.mxu1 %v14477_v63  ;;  %5168 = vmatpush1.bf16.msra.mxu0 %v14480_v34  ;;  %v14486_v19 = vld [vmem:[%s20975_s6 + $0x168] ss:$56 sps:$4 sm:$0xff]   ;;  %v3857_v58 = vmax.f32 %v3835_v22, 0.0 }
 0x2de   : > { %v3858_v45 = vmax.f32 %v3836_v8, 0.0  ;;  %v3804_v7 = vmul.f32 %v17487_v43, %v3770_v51  ;;  %v3750_v31 = vmul.f32 %v17199_v24, %v3636_v55  ;;  %v3638_v39 = vsel %vm3604_vm7, %v3633_v50, %v3637_v42  ;;  %5082 = vmatprep.subr.bf16.mxu1 %v14485_v10  ;;  %5169 = vmatprep.subr.bf16.mxu0 %v14488_v27  ;;  %v14494_v50 = vld [vmem:[%s20975_s6 + $0x1dc] ss:$56 sps:$4 sm:$0xff]   ;;  %v14489_v56 = vld [vmem:[%s20975_s6 + $0x1d0] ss:$56 sps:$4 sm:$0xff]  }
 0x2df   : > { %v3837_v41 = vadd.f32 %v17498_v5, %v3802_v59  ;;  %v3751_v61 = vmul.f32 %v17199_v24, %v3638_v39  ;;  %v3640_v29 = vsel %vm3604_vm7, %v3635_v15, %v3639_v53  ;;  %v3838_v63 = vadd.f32 %v17491_v30, %v3803_v21  ;;  %v14492_v15 = vld [vmem:[%s20975_s6 + $0x1d8] ss:$56 sps:$4 sm:$0xff]   ;;  %v14497_v51 = vld [vmem:[%s20975_s6 + $0x244] ss:$56 sps:$4 sm:$0xff]  }
 0x2e0   : > { %v17650_v26 = vpack.c.bf16 %v3858_v45, %v3856_v17  ;;  %v3771_v14 = vadd.f32 %v3750_v31, %v17444_v37  ;;  %v3752_v6 = vmul.f32 %v17287_v25, %v3640_v29  ;;  %v3641_v24 = vrot.slane %v17629_v16, 3  ;;  %v14495_v39 = vld [vmem:[%s20975_s6 + $0x240] ss:$56 sps:$4 sm:$0xff]  }
 0x2e1   : > { %v3859_v62 = vmax.f32 %v3837_v41, 0.0  ;;  %v3772_v23 = vadd.f32 %v3751_v61, %v17449_v54  ;;  %5083 = vmatpush1.bf16.msra.mxu1 %v14483_v32  ;;  %v3756_v3 = vmul.f32 0.0, %v3734_v60  ;;  %v3839_v0 = vadd.f32 %v17498_v5, %v3804_v7  ;;  %5170 = vmatpush1.bf16.msra.mxu0 %v14486_v19 }
 0x2e2   : > { %v3805_v13 = vmul.f32 %v17479_v12, %v3771_v14  ;;  %v3773_v49 = vadd.f32 %v3752_v6, %v17451_v47  ;;  %v2602_v34 = vpop.f32.mrb[164].mxu0  ;;  %5084 = vmatprep.subr.bf16.mxu1 %v14491_v44  ;;  %v3642_v17 = vsel %vm3604_vm7, %v3637_v42, %v3641_v24  ;;  %5171 = vmatprep.subr.bf16.mxu0 %v14494_v50  ;;  %v14500_v42 = vld [vmem:[%s20975_s6 + $0x24c] ss:$56 sps:$4 sm:$0xff]   ;;  %v3860_v59 = vmax.f32 %v3838_v63, 0.0 }
 0x2e3   : > { %v17660_v37 = vpack.c.bf16 %v3859_v62, %v3857_v58  ;;  %v3806_v10 = vmul.f32 %v17487_v43, %v3772_v23  ;;  %v3643_v54 = vrot.slane %v2602_v34, 3  ;;  %v2604_v11 = vpop.f32.mrb[165].mxu0  ;;  %v3383_v47 = vadd.f32 %v17582_v9, %v17325_v18  ;;  %v14503_v50 = vld [vmem:[%s20975_s6 + $0x2b4] ss:$56 sps:$4 sm:$0xff]  }
 0x2e4   : > { %v3840_v2 = vadd.f32 %v17491_v30, %v3805_v13  ;;  %v3753_v27 = vmul.f32 %v17287_v25, %v3642_v17  ;;  %v3645_v22 = vrot.slane %v2604_v11, 3  ;;  %v2606_v8 = vpop.f32.mrb[166].mxu0  ;;  %v3778_v4 = vadd.f32 %v3756_v3, %v3581_v35  ;;  %v14512_v23 = vld [vmem:[%s20975_s6 + $0x32c] ss:$56 sps:$4 sm:$0xff]   ;;  %v14507_v17 = vld [vmem:[%s20975_s6 + $0x320] ss:$56 sps:$4 sm:$0xff]  }
 0x2e5   : > { %v3841_v21 = vadd.f32 %v17498_v5, %v3806_v10  ;;  %v3644_v18 = vsel %vm3604_vm7, %v3639_v53, %v3643_v54  ;;  %12756 = vmatprep.mubr.msk.bf16.mxu1 %vm1959_vm1, %v17660_v37  ;;  %12762 = vmatprep.mubr.msk.bf16.mxu0 %vm1959_vm1, %v17660_v37  ;;  %v2607_v25 = vpop.f32.mrb[167].mxu0  ;;  %v3861_v9 = vmax.f32 %v3839_v0, 0.0  ;;  %v3807_v53 = vmul.f32 %v17479_v12, %v3773_v49  ;;  %v14515_v11 = vld [vmem:[%s20975_s6 + $0x394] ss:$56 sps:$4 sm:$0xff]  }
 0x2e6   : > { %v3862_v55 = vmax.f32 %v3840_v2, 0.0  ;;  %v3774_v16 = vadd.f32 %v3753_v27, %v17456_v1  ;;  %v3667_v32 = vsel %vm3407_vm2, %v3644_v18, 0.0  ;;  %4961 = vmatmul.mubr.bf16.gmra.mrb[56].mxu1 %v17650_v26  ;;  %5044 = vmatmul.mubr.bf16.gmra.mrb[176].mxu0 %v17650_v26  ;;  %v3646_v31 = vsel %vm3604_vm7, %v3641_v24, %v3645_v22  ;;  %v14498_v1 = vld [vmem:[%s20975_s6 + $0x248] ss:$56 sps:$4 sm:$0xff]   ;;  %v14516_v22 = vld [vmem:[%s20975_s6 + $0x398] ss:$56 sps:$4 sm:$0xff]  }
 0x2e7   : > { %v3863_v45 = vmax.f32 %v3841_v21, 0.0  ;;  %v3754_v7 = vmul.f32 %v17527_v20, %v3667_v32  ;;  %5085 = vmatpush1.bf16.msra.mxu1 %v14489_v56  ;;  %5172 = vmatpush1.bf16.msra.mxu0 %v14492_v15  ;;  %v3580_v19 = vadd.f32 %v17599_v28, %v3383_v47  ;;  %v3668_v60 = vsel %vm3407_vm2, %v3646_v31, 0.0  ;;  %v14506_v28 = vld [vmem:[%s20975_s6 + $0x2bc] ss:$56 sps:$4 sm:$0xff]  }
 0x2e8   : > { %v17700_v44 = vpack.c.bf16 %v3862_v55, %v3860_v59  ;;  %5086 = vmatprep.subr.bf16.mxu1 %v14497_v51  ;;  %5173 = vmatprep.subr.bf16.mxu0 %v14500_v42  ;;  %v3808_v41 = vmul.f32 %v17487_v43, %v3774_v16  ;;  %v3755_v29 = vmul.f32 %v17527_v20, %v3668_v60  ;;  %v14504_v20 = vld [vmem:[%s20975_s6 + $0x2b8] ss:$56 sps:$4 sm:$0xff]   ;;  %v14521_v51 = vld [vmem:[%s20975_s6 + $0x404] ss:$56 sps:$4 sm:$0xff]   ;;  %v14522_v59 = vld [vmem:[%s20975_s6 + $0x408] ss:$56 sps:$4 sm:$0xff]  }
 0x2e9   : > { %v17703_v35 = vpack.c.bf16 %v3863_v45, %v3861_v9  ;;  %v3775_v61 = vadd.f32 %v3754_v7, %v17467_v46  ;;  %v3812_v58 = vmul.f32 %v17487_v43, %v3778_v4  ;;  %v3842_v14 = vadd.f32 %v17491_v30, %v3807_v53  ;;  %v14501_v46 = vld [vmem:[%s20975_s6 + $0x2b0] ss:$56 sps:$4 sm:$0xff]   ;;  %v14524_v42 = vld [vmem:[%s20975_s6 + $0x40c] ss:$56 sps:$4 sm:$0xff]   ;;  %v14530_v25 = vld [vmem:[%s20975_s6 + $0x47c] ss:$56 sps:$4 sm:$0xff]  }
 0x2ea   : > { %v3776_v62 = vadd.f32 %v3755_v29, %v17469_v38  ;;  %v3777_v63 = vadd.f32 %v3756_v3, %v3580_v19  ;;  %v14509_v38 = vld [vmem:[%s20975_s6 + $0x324] ss:$56 sps:$4 sm:$0xff]   ;;  %v3843_v24 = vadd.f32 %v17498_v5, %v3808_v41  ;;  %v14527_v18 = vld [vmem:[%s20975_s6 + $0x474] ss:$56 sps:$4 sm:$0xff]   ;;  %v14525_v9 = vld [vmem:[%s20975_s6 + $0x470] ss:$56 sps:$4 sm:$0xff]  }
 0x2eb   : > { %v3809_v6 = vmul.f32 %v17479_v12, %v3775_v61  ;;  %5087 = vmatpush1.bf16.msra.mxu1 %v14495_v39  ;;  %5174 = vmatpush1.bf16.msra.mxu0 %v14498_v1  ;;  %v3847_v13 = vadd.f32 %v17498_v5, %v3812_v58  ;;  %v3864_v49 = vmax.f32 %v3842_v14, 0.0  ;;  %v14528_v55 = vld [vmem:[%s20975_s6 + $0x478] ss:$56 sps:$4 sm:$0xff]   ;;  %v14533_v32 = vld [vmem:[%s20975_s6 + $0x4e4] ss:$56 sps:$4 sm:$0xff]  }
 0x2ec   : > { %12757 = vmatprep.mubr.msk.bf16.mxu1 %vm1959_vm1, %v17703_v35  ;;  %12763 = vmatprep.mubr.msk.bf16.mxu0 %vm1959_vm1, %v17703_v35  ;;  %v3810_v3 = vmul.f32 %v17487_v43, %v3776_v62  ;;  %v14510_v43 = vld [vmem:[%s20975_s6 + $0x328] ss:$56 sps:$4 sm:$0xff]   ;;  %v3811_v54 = vmul.f32 %v17479_v12, %v3777_v63  ;;  %v3865_v56 = vmax.f32 %v3843_v24, 0.0  ;;  %v14536_v45 = vld [vmem:[%s20975_s6 + $0x4ec] ss:$56 sps:$4 sm:$0xff]  }
 0x2ed   : > { %v3844_v0 = vadd.f32 %v17491_v30, %v3809_v6  ;;  %5088 = vmatprep.subr.bf16.mxu1 %v14503_v50  ;;  %5175 = vmatprep.subr.bf16.mxu0 %v14506_v28  ;;  %v3869_v2 = vmax.f32 %v3847_v13, 0.0  ;;  %v14513_v12 = vld [vmem:[%s20975_s6 + $0x390] ss:$56 sps:$4 sm:$0xff]   ;;  %v14531_v53 = vld [vmem:[%s20975_s6 + $0x4e0] ss:$56 sps:$4 sm:$0xff]  }
 0x2ee   : > { %4971 = vmatmul.mubr.bf16.gmra.mrb[60].mxu1 %v17700_v44  ;;  %5054 = vmatmul.mubr.bf16.gmra.mrb[180].mxu0 %v17700_v44  ;;  %v3845_v10 = vadd.f32 %v17498_v5, %v3810_v3  ;;  %v14518_v5 = vld [vmem:[%s20975_s6 + $0x39c] ss:$56 sps:$4 sm:$0xff]   ;;  %v3846_v8 = vadd.f32 %v17491_v30, %v3811_v54  ;;  %v14519_v30 = vld [vmem:[%s20975_s6 + $0x400] ss:$56 sps:$4 sm:$0xff]   ;;  %v14542_v39 = vld [vmem:[%s20975_s6 + $0x2c] ss:$56 sps:$4 sm:$0xff]  }
 0x2ef   : > { %v3866_v34 = vmax.f32 %v3844_v0, 0.0  ;;  %5089 = vmatpush1.bf16.msra.mxu1 %v14501_v46  ;;  %5176 = vmatpush1.bf16.msra.mxu0 %v14504_v20  ;;  %v17775_v4 = vpack.c.bf16 %v3869_v2, %v3869_v2  ;;  %v14534_v7 = vld [vmem:[%s20975_s6 + $0x4e8] ss:$56 sps:$4 sm:$0xff]   ;;  %v14539_v31 = vld [vmem:[%s20975_s6 + $0x24] ss:$56 sps:$4 sm:$0xff]  }
 0x2f0   : > { %5090 = vmatprep.subr.bf16.mxu1 %v14509_v38  ;;  %5177 = vmatprep.subr.bf16.mxu0 %v14512_v23  ;;  %v3867_v47 = vmax.f32 %v3845_v10, 0.0  ;;  %v3868_v21 = vmax.f32 %v3846_v8, 0.0  ;;  %v14537_v1 = vld [vmem:[%s20975_s6 + $0x20] ss:$56 sps:$4 sm:$0xff]   ;;  %v14545_v60 = vld [vmem:[%s20975_s6 + $0x94] ss:$56 sps:$4 sm:$0xff]  }
 0x2f1   : > { %v17754_v15 = vpack.c.bf16 %v3866_v34, %v3864_v49  ;;  %v14540_v19 = vld [vmem:[%s20975_s6 + $0x28] ss:$56 sps:$4 sm:$0xff]   ;;  %v14548_v41 = vld [vmem:[%s20975_s6 + $0x9c] ss:$56 sps:$4 sm:$0xff]   ;;  %v14546_v29 = vld [vmem:[%s20975_s6 + $0x98] ss:$56 sps:$4 sm:$0xff]  }
 0x2f2   : > { %v17756_v27 = vpack.c.bf16 %v3867_v47, %v3865_v56  ;;  %v17801_v16 = vpack.c.bf16 %v3868_v21, %v3868_v21  ;;  %v14543_v61 = vld [vmem:[%s20975_s6 + $0x90] ss:$56 sps:$4 sm:$0xff]   ;;  %v14551_v50 = vld [vmem:[%s20975_s6 + $0x104] ss:$56 sps:$4 sm:$0xff]   ;;  %v14549_v58 = vld [vmem:[%s20975_s6 + $0x100] ss:$56 sps:$4 sm:$0xff]  }
 0x2f3   : > { %5091 = vmatpush1.bf16.msra.mxu1 %v14507_v17  ;;  %5178 = vmatpush1.bf16.msra.mxu0 %v14510_v43  ;;  %v14554_v28 = vld [vmem:[%s20975_s6 + $0x10c] ss:$56 sps:$4 sm:$0xff]   ;;  %v14552_v14 = vld [vmem:[%s20975_s6 + $0x108] ss:$56 sps:$4 sm:$0xff]   ;;  %v14560_v62 = vld [vmem:[%s20975_s6 + $0x17c] ss:$56 sps:$4 sm:$0xff]  }
 0x2f4   : > { %5092 = vmatprep.subr.bf16.mxu1 %v14515_v11  ;;  %5179 = vmatprep.subr.bf16.mxu0 %v14518_v5  ;;  %v14557_v6 = vld [vmem:[%s20975_s6 + $0x174] ss:$56 sps:$4 sm:$0xff]   ;;  %v14555_v46 = vld [vmem:[%s20975_s6 + $0x170] ss:$56 sps:$4 sm:$0xff]   ;;  %v14563_v63 = vld [vmem:[%s20975_s6 + $0x1e4] ss:$56 sps:$4 sm:$0xff]  }
 0x2f5   : > { %12758 = vmatprep.mubr.msk.bf16.mxu1 %vm1959_vm1, %v17756_v27  ;;  %12764 = vmatprep.mubr.msk.bf16.mxu0 %vm1959_vm1, %v17756_v27  ;;  %v14558_v20 = vld [vmem:[%s20975_s6 + $0x178] ss:$56 sps:$4 sm:$0xff]   ;;  %v14566_v38 = vld [vmem:[%s20975_s6 + $0x1ec] ss:$56 sps:$4 sm:$0xff]   ;;  %v14564_v24 = vld [vmem:[%s20975_s6 + $0x1e8] ss:$56 sps:$4 sm:$0xff]  }
 0x2f6   : > { %4979 = vmatmul.mubr.bf16.gmra.mrb[64].mxu1 %v17754_v15  ;;  %5064 = vmatmul.mubr.bf16.gmra.mrb[184].mxu0 %v17754_v15  ;;  %v14561_v23 = vld [vmem:[%s20975_s6 + $0x1e0] ss:$56 sps:$4 sm:$0xff]   ;;  %v14569_v0 = vld [vmem:[%s20975_s6 + $0x254] ss:$56 sps:$4 sm:$0xff]   ;;  %v14567_v13 = vld [vmem:[%s20975_s6 + $0x250] ss:$56 sps:$4 sm:$0xff]  }
 0x2f7   : > { %5093 = vmatpush1.bf16.msra.mxu1 %v14513_v12  ;;  %5180 = vmatpush1.bf16.msra.mxu0 %v14516_v22  ;;  %v14572_v3 = vld [vmem:[%s20975_s6 + $0x25c] ss:$56 sps:$4 sm:$0xff]   ;;  %v14570_v49 = vld [vmem:[%s20975_s6 + $0x258] ss:$56 sps:$4 sm:$0xff]   ;;  %v14578_v10 = vld [vmem:[%s20975_s6 + $0x2cc] ss:$56 sps:$4 sm:$0xff]  }
 0x2f8   : > { %12759 = vmatprep.mubr.msk.bf16.mxu1 %vm1959_vm1, %v17775_v4  ;;  %12765 = vmatprep.mubr.msk.bf16.mxu0 %vm1959_vm1, %v17775_v4  ;;  %v14575_v34 = vld [vmem:[%s20975_s6 + $0x2c4] ss:$56 sps:$4 sm:$0xff]   ;;  %v14573_v17 = vld [vmem:[%s20975_s6 + $0x2c0] ss:$56 sps:$4 sm:$0xff]   ;;  %v14581_v54 = vld [vmem:[%s20975_s6 + $0x334] ss:$56 sps:$4 sm:$0xff]  }
 0x2f9   : > { %5094 = vmatprep.subr.bf16.mxu1 %v14521_v51  ;;  %5181 = vmatprep.subr.bf16.mxu0 %v14524_v42  ;;  %v14576_v43 = vld [vmem:[%s20975_s6 + $0x2c8] ss:$56 sps:$4 sm:$0xff]   ;;  %v14584_v11 = vld [vmem:[%s20975_s6 + $0x33c] ss:$56 sps:$4 sm:$0xff]   ;;  %v14582_v56 = vld [vmem:[%s20975_s6 + $0x338] ss:$56 sps:$4 sm:$0xff]  }
 0x2fa   : > { %v14579_v5 = vld [vmem:[%s20975_s6 + $0x330] ss:$56 sps:$4 sm:$0xff]   ;;  %v14587_v47 = vld [vmem:[%s20975_s6 + $0x3a4] ss:$56 sps:$4 sm:$0xff]   ;;  %v14585_v12 = vld [vmem:[%s20975_s6 + $0x3a0] ss:$56 sps:$4 sm:$0xff]  }
 0x2fb   : > { %5095 = vmatpush1.bf16.msra.mxu1 %v14519_v30  ;;  %5182 = vmatpush1.bf16.msra.mxu0 %v14522_v59  ;;  %v14590_v2 = vld [vmem:[%s20975_s6 + $0x3ac] ss:$56 sps:$4 sm:$0xff]   ;;  %v14588_v22 = vld [vmem:[%s20975_s6 + $0x3a8] ss:$56 sps:$4 sm:$0xff]   ;;  %v14596_v51 = vld [vmem:[%s20975_s6 + $0x41c] ss:$56 sps:$4 sm:$0xff]  }
 0x2fc   : > { %5096 = vmatprep.subr.bf16.mxu1 %v14527_v18  ;;  %5183 = vmatprep.subr.bf16.mxu0 %v14530_v25  ;;  %v14593_v8 = vld [vmem:[%s20975_s6 + $0x414] ss:$56 sps:$4 sm:$0xff]   ;;  %v14591_v42 = vld [vmem:[%s20975_s6 + $0x410] ss:$56 sps:$4 sm:$0xff]   ;;  %v14599_v59 = vld [vmem:[%s20975_s6 + $0x484] ss:$56 sps:$4 sm:$0xff]  }
 0x2fd   : > { %v14594_v30 = vld [vmem:[%s20975_s6 + $0x418] ss:$56 sps:$4 sm:$0xff]   ;;  %v14602_v21 = vld [vmem:[%s20975_s6 + $0x48c] ss:$56 sps:$4 sm:$0xff]   ;;  %v14600_v25 = vld [vmem:[%s20975_s6 + $0x488] ss:$56 sps:$4 sm:$0xff]  }
 0x2fe   : > { %4985 = vmatmul.mubr.bf16.gmra.mrb[68].mxu1 %v17801_v16  ;;  %5070 = vmatmul.mubr.bf16.gmra.mrb[188].mxu0 %v17801_v16  ;;  %v14597_v18 = vld [vmem:[%s20975_s6 + $0x480] ss:$56 sps:$4 sm:$0xff]  }
 0x2ff   : > { %5097 = vmatpush1.bf16.msra.mxu1 %v14525_v9  ;;  %5184 = vmatpush1.bf16.msra.mxu0 %v14528_v55  ;;  %v14605_v9 = vld [vmem:[%s20975_s6 + $0x4f4] ss:$56 sps:$4 sm:$0xff]  }
 0x300   : > { %12766 = vmatprep.mubr.msk.bf16.mxu1 %vm1959_vm1, %v17529_v40  ;;  %12772 = vmatprep.mubr.msk.bf16.mxu0 %vm1959_vm1, %v17529_v40  ;;  %v14608_v55 = vld [vmem:[%s20975_s6 + $0x4fc] ss:$56 sps:$4 sm:$0xff]  }
 0x301   : > { %5098 = vmatprep.subr.bf16.mxu1 %v14533_v32  ;;  %5185 = vmatprep.subr.bf16.mxu0 %v14536_v45  ;;  %v14603_v32 = vld [vmem:[%s20975_s6 + $0x4f0] ss:$56 sps:$4 sm:$0xff]  }
 0x302   : > { %v14606_v45 = vld [vmem:[%s20975_s6 + $0x4f8] ss:$56 sps:$4 sm:$0xff]  }
 0x303   : > { %5099 = vmatpush1.bf16.msra.mxu1 %v14531_v53  ;;  %5186 = vmatpush1.bf16.msra.mxu0 %v14534_v7  ;;  %v14611_v53 = vld [vmem:[%s20975_s6 + $0x34] ss:$56 sps:$4 sm:$0xff]   ;;  %v14609_v7 = vld [vmem:[%s20975_s6 + $0x30] ss:$56 sps:$4 sm:$0xff]  }
 0x304   : > { %5254 = vmatprep.subr.bf16.mxu1 %v14539_v31  ;;  %5343 = vmatprep.subr.bf16.mxu0 %v14542_v39  ;;  %v21274_v31 = vld [vmem:[#allocation10_spill] sm:$0xff] }
 0x305   : > { %v14614_v39 = vld [vmem:[%s20975_s6 + $0xa4] ss:$56 sps:$4 sm:$0xff]  }
 0x306   : > { %5109 = vmatmul.mubr.bf16.vlgmr.msra.gmra.mrb[72].mxu1 %v17523_v36  ;;  %5196 = vmatmul.mubr.bf16.vlgmr.msra.gmra.mrb[192].mxu0 %v17523_v36 }
 0x307   : > { %5255 = vmatpush1.bf16.msra.mxu1 %v14537_v1  ;;  %5344 = vmatpush1.bf16.msra.mxu0 %v14540_v19  ;;  %v21275_v1 = vld [vmem:[#allocation19_spill] sm:$0xff] }
 0x308   : > { %12767 = vmatprep.mubr.msk.bf16.mxu1 %vm1959_vm1, %v17588_v48  ;;  %12773 = vmatprep.mubr.msk.bf16.mxu0 %vm1959_vm1, %v17588_v48  ;;  %v21276_v19 = vld [vmem:[#allocation7_spill] sm:$0xff] }
 0x309   : > { %5256 = vmatprep.subr.bf16.mxu1 %v14545_v60  ;;  %5345 = vmatprep.subr.bf16.mxu0 %v14548_v41  ;;  %v790_v60 = vmul.f32 %v21276_v19, %v21275_v1  ;;  %v21277_v41 = vld [vmem:[#allocation9_spill] sm:$0xff] }
 0x30b   : > { %5257 = vmatpush1.bf16.msra.mxu1 %v14543_v61  ;;  %5346 = vmatpush1.bf16.msra.mxu0 %v14546_v29  ;;  %v14612_v61 = vld [vmem:[%s20975_s6 + $0xa0] ss:$56 sps:$4 sm:$0xff]   ;;  %v14617_v29 = vld [vmem:[%s20975_s6 + $0x114] ss:$56 sps:$4 sm:$0xff]  }
 0x30c   : > { %5258 = vmatprep.subr.bf16.mxu1 %v14551_v50  ;;  %5347 = vmatprep.subr.bf16.mxu0 %v14554_v28  ;;  %v21278_v50 = vld [vmem:[#allocation17_spill] sm:$0xff] }
 0x30d   : > { %v21279_v28 = vld [vmem:[#allocation5_spill] sm:$0xff] }
 0x30e   : > { %5119 = vmatmul.mubr.bf16.gmra.mrb[76].mxu1 %v17584_v52  ;;  %5206 = vmatmul.mubr.bf16.gmra.mrb[196].mxu0 %v17584_v52 }
 0x30f   : > { %5259 = vmatpush1.bf16.msra.mxu1 %v14549_v58  ;;  %5348 = vmatpush1.bf16.msra.mxu0 %v14552_v14  ;;  %v789_v58 = vmul.f32 %v21279_v28, %v21278_v50  ;;  %v21280_v14 = vld [vmem:[#allocation12_spill] sm:$0xff] }
 0x310   : > { %12768 = vmatprep.mubr.msk.bf16.mxu1 %vm1959_vm1, %v17660_v37  ;;  %12774 = vmatprep.mubr.msk.bf16.mxu0 %vm1959_vm1, %v17660_v37 }
 0x311   : > { %5260 = vmatprep.subr.bf16.mxu1 %v14557_v6  ;;  %5349 = vmatprep.subr.bf16.mxu0 %v14560_v62  ;;  %v21281_v6 = vld [vmem:[#allocation8_spill] sm:$0xff] }
 0x312   : > { %v825_v62 = vadd.f32 %v21281_v6, %v790_v60 }
 0x313   : > { %5261 = vmatpush1.bf16.msra.mxu1 %v14555_v46  ;;  %5350 = vmatpush1.bf16.msra.mxu0 %v14558_v20  ;;  %v21282_v46 = vld [vmem:[#allocation11_spill] sm:$0xff] }
 0x314   : > { %5262 = vmatprep.subr.bf16.mxu1 %v14563_v63  ;;  %5351 = vmatprep.subr.bf16.mxu0 %v14566_v38  ;;  %v14615_v20 = vld [vmem:[%s20975_s6 + $0x110] ss:$56 sps:$4 sm:$0xff]   ;;  %v21283_v63 = vld [vmem:[#allocation14_spill] sm:$0xff] }
 0x315   : > { %v21284_v38 = vld [vmem:[#allocation6_spill] sm:$0xff] }
 0x316   : > { %5129 = vmatmul.mubr.bf16.gmra.mrb[80].mxu1 %v17650_v26  ;;  %5216 = vmatmul.mubr.bf16.gmra.mrb[200].mxu0 %v17650_v26 }
 0x317   : > { %5263 = vmatpush1.bf16.msra.mxu1 %v14561_v23  ;;  %5352 = vmatpush1.bf16.msra.mxu0 %v14564_v24  ;;  %v824_v23 = vadd.f32 %v21284_v38, %v789_v58  ;;  %v14620_v24 = vld [vmem:[%s20975_s6 + $0x184] ss:$56 sps:$4 sm:$0xff]  }
 0x318   : > { %12769 = vmatprep.mubr.msk.bf16.mxu1 %vm1959_vm1, %v17703_v35  ;;  %12775 = vmatprep.mubr.msk.bf16.mxu0 %vm1959_vm1, %v17703_v35 }
 0x319   : > { %5264 = vmatprep.subr.bf16.mxu1 %v14569_v0  ;;  %5353 = vmatprep.subr.bf16.mxu0 %v14572_v3  ;;  %v847_v0 = vmax.f32 %v825_v62, 0.0  ;;  %v21285_v3 = vld [vmem:[#allocation13_spill] sm:$0xff] }
 0x31b   : > { %5265 = vmatpush1.bf16.msra.mxu1 %v14567_v13  ;;  %5354 = vmatpush1.bf16.msra.mxu0 %v14570_v49  ;;  %v14618_v13 = vld [vmem:[%s20975_s6 + $0x180] ss:$56 sps:$4 sm:$0xff]   ;;  %v14623_v49 = vld [vmem:[%s20975_s6 + $0x1f4] ss:$56 sps:$4 sm:$0xff]  }
 0x31c   : > { %5266 = vmatprep.subr.bf16.mxu1 %v14575_v34  ;;  %5355 = vmatprep.subr.bf16.mxu0 %v14578_v10  ;;  %v846_v34 = vmax.f32 %v824_v23, 0.0  ;;  %v21286_v10 = vld [vmem:[#allocation16_spill] sm:$0xff] }
 0x31e   : > { %5139 = vmatmul.mubr.bf16.gmra.mrb[84].mxu1 %v17700_v44  ;;  %5226 = vmatmul.mubr.bf16.gmra.mrb[204].mxu0 %v17700_v44 }
 0x31f   : > { %5267 = vmatpush1.bf16.msra.mxu1 %v14573_v17  ;;  %5356 = vmatpush1.bf16.msra.mxu0 %v14576_v43  ;;  %v6155_v17 = vpack.c.bf16 %v847_v0, %v847_v0  ;;  %v21287_v43 = vld [vmem:[#allocation15_spill] sm:$0xff] }
 0x320   : > { %12770 = vmatprep.mubr.msk.bf16.mxu1 %vm1959_vm1, %v17756_v27  ;;  %12776 = vmatprep.mubr.msk.bf16.mxu0 %vm1959_vm1, %v17756_v27 }
 0x321   : > { %5268 = vmatprep.subr.bf16.mxu1 %v14581_v54  ;;  %5357 = vmatprep.subr.bf16.mxu0 %v14584_v11  ;;  %v14621_v54 = vld [vmem:[%s20975_s6 + $0x1f0] ss:$56 sps:$4 sm:$0xff]   ;;  %v21288_v11 = vmov 0  }
 0x323   : > { %5269 = vmatpush1.bf16.msra.mxu1 %v14579_v5  ;;  %5358 = vmatpush1.bf16.msra.mxu0 %v14582_v56  ;;  %v18059_v5 = vsel %vm3016_vm5, 65535, %v21288_v11  ;;  %v21290_v56 = vld [vmem:[#allocation20_spill] sm:$0xff] }
 0x324   : > { %5270 = vmatprep.subr.bf16.mxu1 %v14587_v47  ;;  %5359 = vmatprep.subr.bf16.mxu0 %v14590_v2  ;;  %21289 = vst [vmem:[#allocation60_spill] sm:$0xff] %v18059_v5  ;;  %v6154_v47 = vpack.c.bf16 %v846_v34, %v846_v34  ;;  %v14626_v2 = vld [vmem:[%s20975_s6 + $0x264] ss:$56 sps:$4 sm:$0xff]  }
 0x326   : > { %5149 = vmatmul.mubr.bf16.gmra.mrb[88].mxu1 %v17754_v15  ;;  %5236 = vmatmul.mubr.bf16.gmra.mrb[208].mxu0 %v17754_v15 }
 0x327   : > { %5271 = vmatpush1.bf16.msra.mxu1 %v14585_v12  ;;  %5360 = vmatpush1.bf16.msra.mxu0 %v14588_v22  ;;  %v18068_v12 = vand.u32 %v18059_v5, %v6155_v17  ;;  %v21292_v22 = vld [vmem:[#allocation18_spill] sm:$0xff] }
 0x328   : > { %12771 = vmatprep.mubr.msk.bf16.mxu1 %vm1959_vm1, %v17775_v4  ;;  %12777 = vmatprep.mubr.msk.bf16.mxu0 %vm1959_vm1, %v17775_v4 }
 0x329   : > { %5272 = vmatprep.subr.bf16.mxu1 %v14593_v8  ;;  %5361 = vmatprep.subr.bf16.mxu0 %v14596_v51  ;;  %21291 = vst [vmem:[#allocation68_spill] sm:$0xff] %v18068_v12  ;;  %v14624_v8 = vld [vmem:[%s20975_s6 + $0x260] ss:$56 sps:$4 sm:$0xff]   ;;  %v14629_v51 = vld [vmem:[%s20975_s6 + $0x2d4] ss:$56 sps:$4 sm:$0xff]  }
 0x32b   : > { %5273 = vmatpush1.bf16.msra.mxu1 %v14591_v42  ;;  %5362 = vmatpush1.bf16.msra.mxu0 %v14594_v30  ;;  %v18082_v42 = vand.u32 %v18059_v5, %v6154_v47  ;;  %v14627_v30 = vld [vmem:[%s20975_s6 + $0x2d0] ss:$56 sps:$4 sm:$0xff]  }
 0x32c   : > { %5274 = vmatprep.subr.bf16.mxu1 %v14599_v59  ;;  %5363 = vmatprep.subr.bf16.mxu0 %v14602_v21  ;;  %v14632_v59 = vld [vmem:[%s20975_s6 + $0x344] ss:$56 sps:$4 sm:$0xff]   ;;  %v14630_v21 = vld [vmem:[%s20975_s6 + $0x340] ss:$56 sps:$4 sm:$0xff]  }
 0x32d   : > { %21293 = vst [vmem:[#allocation85_spill] sm:$0xff] %v18082_v42 }
 0x32e   : > { %5157 = vmatmul.mubr.bf16.gmra.mrb[92].mxu1 %v17801_v16  ;;  %5246 = vmatmul.mubr.bf16.gmra.mrb[212].mxu0 %v17801_v16 }
 0x32f   : > { %5275 = vmatpush1.bf16.msra.mxu1 %v14597_v18  ;;  %5364 = vmatpush1.bf16.msra.mxu0 %v14600_v25  ;;  %v14635_v18 = vld [vmem:[%s20975_s6 + $0x3b4] ss:$56 sps:$4 sm:$0xff]   ;;  %v14633_v25 = vld [vmem:[%s20975_s6 + $0x3b0] ss:$56 sps:$4 sm:$0xff]  }
 0x330   : > { %12778 = vmatprep.mubr.msk.bf16.mxu1 %vm1959_vm1, %v17529_v40  ;;  %12784 = vmatprep.mubr.msk.bf16.mxu0 %vm1959_vm1, %v17529_v40 }
 0x331   : > { %5276 = vmatprep.subr.bf16.mxu1 %v14605_v9  ;;  %5365 = vmatprep.subr.bf16.mxu0 %v14608_v55  ;;  %v14638_v9 = vld [vmem:[%s20975_s6 + $0x424] ss:$56 sps:$4 sm:$0xff]   ;;  %v14636_v55 = vld [vmem:[%s20975_s6 + $0x420] ss:$56 sps:$4 sm:$0xff]  }
 0x333   : > { %5277 = vmatpush1.bf16.msra.mxu1 %v14603_v32  ;;  %5366 = vmatpush1.bf16.msra.mxu0 %v14606_v45  ;;  %v14641_v32 = vld [vmem:[%s20975_s6 + $0x494] ss:$56 sps:$4 sm:$0xff]   ;;  %v14639_v45 = vld [vmem:[%s20975_s6 + $0x490] ss:$56 sps:$4 sm:$0xff]  }
 0x334   : > { %6175 = vmatprep.subr.bf16.mxu0 %v21274_v31  ;;  %5430 = vmatprep.subr.bf16.mxu1 %v14611_v53  ;;  %v14644_v53 = vld [vmem:[%s20975_s6 + $0x504] ss:$56 sps:$4 sm:$0xff]  }
 0x336   : > { %5287 = vmatmul.mubr.bf16.vlgmr.msra.gmra.mrb[96].mxu1 %v17523_v36  ;;  %5376 = vmatmul.mubr.bf16.vlgmr.msra.gmra.mrb[216].mxu0 %v17523_v36 }
 0x337   : > { %5431 = vmatpush1.bf16.msra.mxu1 %v14609_v7  ;;  %6176 = vmatpush1.bf16.msra.mxu0 %v21277_v41  ;;  %v14642_v7 = vld [vmem:[%s20975_s6 + $0x500] ss:$56 sps:$4 sm:$0xff]  }
 0x338   : > { %12779 = vmatprep.mubr.msk.bf16.mxu1 %vm1959_vm1, %v17588_v48  ;;  %12785 = vmatprep.mubr.msk.bf16.mxu0 %vm1959_vm1, %v17588_v48 }
 0x339   : > { %6177 = vmatprep.subr.bf16.mxu0 %v21280_v14  ;;  %5432 = vmatprep.subr.bf16.mxu1 %v14614_v39  ;;  %v14646_v39 = vld [vmem:[%s20982_s13] sm:$0xff]  }
 0x33b   : > { %5433 = vmatpush1.bf16.msra.mxu1 %v14612_v61  ;;  %6178 = vmatpush1.bf16.msra.mxu0 %v21282_v46 }
 0x33c   : > { %6179 = vmatprep.subr.bf16.mxu0 %v21283_v63  ;;  %5434 = vmatprep.subr.bf16.mxu1 %v14617_v29 }
 0x33e   : > { %5295 = vmatmul.mubr.bf16.gmra.mrb[100].mxu1 %v17584_v52  ;;  %5382 = vmatmul.mubr.bf16.gmra.mrb[220].mxu0 %v17584_v52 }
 0x33f   : > { %5435 = vmatpush1.bf16.msra.mxu1 %v14615_v20  ;;  %6180 = vmatpush1.bf16.msra.mxu0 %v21285_v3 }
 0x340   : > { %12780 = vmatprep.mubr.msk.bf16.mxu1 %vm1959_vm1, %v17660_v37  ;;  %12786 = vmatprep.mubr.msk.bf16.mxu0 %vm1959_vm1, %v17660_v37 }
 0x341   : > { %6181 = vmatprep.subr.bf16.mxu0 %v21286_v10  ;;  %5436 = vmatprep.subr.bf16.mxu1 %v14620_v24 }
 0x343   : > { %5437 = vmatpush1.bf16.msra.mxu1 %v14618_v13  ;;  %6182 = vmatpush1.bf16.msra.mxu0 %v21287_v43 }
 0x344   : > { %6183 = vmatprep.subr.bf16.mxu0 %v21290_v56  ;;  %5438 = vmatprep.subr.bf16.mxu1 %v14623_v49 }
 0x346   : > { %5305 = vmatmul.mubr.bf16.gmra.mrb[104].mxu1 %v17650_v26  ;;  %5392 = vmatmul.mubr.bf16.gmra.mrb[224].mxu0 %v17650_v26 }
 0x347   : > { %5439 = vmatpush1.bf16.msra.mxu1 %v14621_v54  ;;  %6184 = vmatpush1.bf16.msra.mxu0 %v21292_v22 }
 0x348   : > { %12781 = vmatprep.mubr.msk.bf16.mxu1 %vm1959_vm1, %v17703_v35  ;;  %12787 = vmatprep.mubr.msk.bf16.mxu0 %vm1959_vm1, %v17703_v35 }
 0x349   : > { %6185 = vmatprep.subr.bf16.mxu0 %v18068_v12  ;;  %5440 = vmatprep.subr.bf16.mxu1 %v14626_v2 }
 0x34b   : > { %5441 = vmatpush1.bf16.msra.mxu1 %v14624_v8  ;;  %6186 = vmatpush1.bf16.msra.mxu0 %v18082_v42 }
 0x34c   : > { %5442 = vmatprep.subr.bf16.mxu1 %v14629_v51 }
 0x34e   : > { %5315 = vmatmul.mubr.bf16.gmra.mrb[108].mxu1 %v17700_v44  ;;  %5402 = vmatmul.mubr.bf16.gmra.mrb[228].mxu0 %v17700_v44 }
 0x34f   : > { %5443 = vmatpush1.bf16.msra.mxu1 %v14627_v30  ;;  %12782 = vmatprep.mubr.msk.bf16.mxu1 %vm1959_vm1, %v17756_v27 }
 0x350   : > { %12788 = vmatprep.mubr.msk.bf16.mxu0 %vm1959_vm1, %v17756_v27  ;;  %5444 = vmatprep.subr.bf16.mxu1 %v14632_v59 }
 0x353   : > { %5445 = vmatpush1.bf16.msra.mxu1 %v14630_v21 }
 0x354   : > { %5446 = vmatprep.subr.bf16.mxu1 %v14635_v18 }
 0x356   : > { %5325 = vmatmul.mubr.bf16.gmra.mrb[112].mxu1 %v17754_v15  ;;  %5412 = vmatmul.mubr.bf16.gmra.mrb[232].mxu0 %v17754_v15 }
 0x357   : > { %5447 = vmatpush1.bf16.msra.mxu1 %v14633_v25  ;;  %12783 = vmatprep.mubr.msk.bf16.mxu1 %vm1959_vm1, %v17775_v4 }
 0x358   : > { %12789 = vmatprep.mubr.msk.bf16.mxu0 %vm1959_vm1, %v17775_v4  ;;  %5448 = vmatprep.subr.bf16.mxu1 %v14638_v9 }
 0x35b   : > { %5449 = vmatpush1.bf16.msra.mxu1 %v14636_v55 }
 0x35c   : > { %5450 = vmatprep.subr.bf16.mxu1 %v14641_v32 }
 0x35e   : > { %5335 = vmatmul.mubr.bf16.gmra.mrb[116].mxu1 %v17801_v16  ;;  %5422 = vmatmul.mubr.bf16.gmra.mrb[236].mxu0 %v17801_v16 }
 0x35f   : > { %5451 = vmatpush1.bf16.msra.mxu1 %v14639_v45  ;;  %12790 = vmatprep.mubr.msk.bf16.mxu1 %vm1959_vm1, %v17529_v40 }
 0x360   : > { %5452 = vmatprep.subr.bf16.mxu1 %v14644_v53  ;;  %6207 = vmatprep.mubr.bf16.mxu0 %v21288_v11 }
 0x363   : > { %5453 = vmatpush1.bf16.msra.mxu1 %v14642_v7 }
 0x364   : > { %6279 = vmatprep.subr.bf16.mxu1 %v21274_v31 }
 0x366   : > { %5463 = vmatmul.mubr.bf16.vlgmr.msra.gmra.mrb[120].mxu1 %v17523_v36  ;;  %12798 = vmatmul.mubr.msk.bf16.vlgmr.msra.gmra.mrb[240].mxu0 %vm6163_vm8, %v14646_v39  ;;  %v14645_v36 = vld [vmem:[%s20982_s13 + $0x8] sm:$0xff]  }
 0x367   : > { %6280 = vmatpush1.bf16.msra.mxu1 %v21277_v41  ;;  %12791 = vmatprep.mubr.msk.bf16.mxu1 %vm1959_vm1, %v17588_v48 }
 0x368   : > { %6281 = vmatprep.subr.bf16.mxu1 %v21280_v14 }
 0x36b   : > { %6282 = vmatpush1.bf16.msra.mxu1 %v21282_v46 }
 0x36c   : > { %6283 = vmatprep.subr.bf16.mxu1 %v21283_v63 }
 0x36e   : > { %5469 = vmatmul.mubr.bf16.gmra.mrb[124].mxu1 %v17584_v52 }
 0x36f   : > { %6284 = vmatpush1.bf16.msra.mxu1 %v21285_v3  ;;  %12792 = vmatprep.mubr.msk.bf16.mxu1 %vm1959_vm1, %v17660_v37 }
 0x370   : > { %6285 = vmatprep.subr.bf16.mxu1 %v21286_v10 }
 0x373   : > { %6286 = vmatpush1.bf16.msra.mxu1 %v21287_v43 }
 0x374   : > { %6287 = vmatprep.subr.bf16.mxu1 %v21290_v56 }
 0x376   : > { %5477 = vmatmul.mubr.bf16.gmra.mrb[128].mxu1 %v17650_v26 }
 0x377   : > { %6288 = vmatpush1.bf16.msra.mxu1 %v21292_v22  ;;  %12793 = vmatprep.mubr.msk.bf16.mxu1 %vm1959_vm1, %v17703_v35 }
 0x378   : > { %6289 = vmatprep.subr.bf16.mxu1 %v18068_v12 }
 0x37b   : > { %6290 = vmatpush1.bf16.msra.mxu1 %v18082_v42 }
 0x37c   : > { %6611 = vmatprep.subr.bf16.mxu1 %v21288_v11 }
 0x37e   : > { %5487 = vmatmul.mubr.bf16.gmra.mrb[132].mxu1 %v17700_v44 }
 0x37f   : > { %12794 = vmatprep.mubr.msk.bf16.mxu1 %vm1959_vm1, %v17756_v27 }
 0x386   : > { %5497 = vmatmul.mubr.bf16.gmra.mrb[136].mxu1 %v17754_v15 }
 0x387   : > { %12795 = vmatprep.mubr.msk.bf16.mxu1 %vm1959_vm1, %v17775_v4 }
 0x38e   : > { %5507 = vmatmul.mubr.bf16.gmra.mrb[140].mxu1 %v17801_v16 }
 0x38f   : > { %6311 = vmatprep.mubr.bf16.mxu1 %v21288_v11 }
 0x396   : > { %12802 = vmatmul.mubr.msk.bf16.vlgmr.msra.gmra.mrb[144].mxu1 %vm6163_vm8, %v14645_v36 }
 0x3a7   : > { %v18174_v40 = vpop.f32.mrb[48].mxu1  ;;  %v18176_v52 = vpop.f32.mrb[168].mxu0 }
 0x3a8   : > { %v18178_v48 = vpop.f32.mrb[49].mxu1  ;;  %v18180_v26 = vpop.f32.mrb[169].mxu0  ;;  %v21056_v35 = vrot.slane %v18174_v40, 5  ;;  %v21059_v15 = vrot.slane %v18176_v52, 6  ;;  %v21296_v3 = vrot.slane %v18174_v40, 5 }
 0x3a9   : > { %v4946_v37 = vpop.f32.mrb[50].mxu1  ;;  %v5029_v44 = vpop.f32.mrb[170].mxu0  ;;  %v21055_v19 = vrot.slane %v18178_v48, 5  ;;  %v21058_v60 = vrot.slane %v18180_v26, 6  ;;  %v21295_v43 = vrot.slane %v18180_v26, 6 }
 0x3aa   : > { %v5531_v27 = vrot.slane %v4946_v37, 5  ;;  %v5613_v4 = vrot.slane %v5029_v44, 6  ;;  %v4948_v16 = vpop.f32.mrb[51].mxu1  ;;  %v5031_v1 = vpop.f32.mrb[171].mxu0  ;;  %v5571_v63 = vsel %vm2629_vm3, 0.0, %v21296_v3 }
 0x3ab   : > { %v5533_v61 = vrot.slane %v4948_v16, 5  ;;  %v5615_v29 = vrot.slane %v5031_v1, 6  ;;  %v5660_v10 = vsel %vm2822_vm4, 0.0, %v21295_v43  ;;  %v14685_v26 = vld [vmem:[%s20977_s8 + $0x1fc] ss:$12 sps:$4 sm:$0xff]  }
 0x3ac   : > { %v18189_v50 = vsel %vm2822_vm4, %v21059_v15, %v5613_v4  ;;  %v18194_v28 = vsel %vm2629_vm3, %v21056_v35, %v5531_v27 }
 0x3ad   : > { %v18199_v58 = vsel %vm2822_vm4, %v21058_v60, %v5615_v29  ;;  %v18204_v6 = vsel %vm2629_vm3, %v21055_v19, %v5533_v61  ;;  %v14667_v60 = vld [vmem:[%s20977_s8 + $0x198] ss:$12 sps:$4 sm:$0xff]  }
 0x3af   : > { %v4952_v62 = vpop.f32.mrb[52].mxu1  ;;  %v5035_v20 = vpop.f32.mrb[172].mxu0 }
 0x3b0   : > { %v5535_v38 = vrot.slane %v4952_v62, 5  ;;  %v5617_v23 = vrot.slane %v5035_v20, 6  ;;  %v4954_v24 = vpop.f32.mrb[53].mxu1  ;;  %v5037_v0 = vpop.f32.mrb[173].mxu0 }
 0x3b1   : > { %v5537_v13 = vrot.slane %v4954_v24, 5  ;;  %v5619_v49 = vrot.slane %v5037_v0, 6  ;;  %v4956_v34 = vpop.f32.mrb[54].mxu1  ;;  %v5039_v17 = vpop.f32.mrb[174].mxu0 }
 0x3b2   : > { %v5539_v54 = vrot.slane %v4956_v34, 5  ;;  %v5621_v47 = vrot.slane %v5039_v17, 6  ;;  %v4958_v2 = vpop.f32.mrb[55].mxu1  ;;  %v5041_v8 = vpop.f32.mrb[175].mxu0  ;;  %v18207_v51 = vsel %vm2822_vm4, %v5613_v4, %v5617_v23  ;;  %v18210_v30 = vsel %vm2629_vm3, %v5531_v27, %v5535_v38 }
 0x3b3   : > { %v5541_v59 = vrot.slane %v4958_v2, 5  ;;  %v5623_v21 = vrot.slane %v5041_v8, 6  ;;  %v18213_v18 = vsel %vm2822_vm4, %v5615_v29, %v5619_v49  ;;  %v18216_v25 = vsel %vm2629_vm3, %v5533_v61, %v5537_v13  ;;  %v14650_v2 = vld [vmem:[%s20977_s8 + $0x128] ss:$12 sps:$4 sm:$0xff]  }
 0x3b4   : > { %v18219_v9 = vsel %vm2822_vm4, %v5617_v23, %v5621_v47  ;;  %v18222_v55 = vsel %vm2629_vm3, %v5535_v38, %v5539_v54  ;;  %6612 = vmatpush1.bf16.msra.mxu1 %v14650_v2 }
 0x3b5   : > { %v18225_v32 = vsel %vm2822_vm4, %v5619_v49, %v5623_v21  ;;  %v18228_v45 = vsel %vm2629_vm3, %v5537_v13, %v5541_v59  ;;  %6613 = vmatprep.subr.bf16.mxu1 %v21288_v11 }
 0x3b9   : > { %v4962_v53 = vpop.f32.mrb[56].mxu1  ;;  %v5045_v7 = vpop.f32.mrb[176].mxu0 }
 0x3ba   : > { %v5543_v39 = vrot.slane %v4962_v53, 5  ;;  %v5625_v36 = vrot.slane %v5045_v7, 6  ;;  %v4964_v37 = vpop.f32.mrb[57].mxu1  ;;  %v5047_v44 = vpop.f32.mrb[177].mxu0 }
 0x3bb   : > { %v5545_v27 = vrot.slane %v4964_v37, 5  ;;  %v5627_v4 = vrot.slane %v5047_v44, 6  ;;  %v4966_v16 = vpop.f32.mrb[58].mxu1  ;;  %v5049_v1 = vpop.f32.mrb[178].mxu0 }
 0x3bc   : > { %v5547_v61 = vrot.slane %v4966_v16, 5  ;;  %v5629_v29 = vrot.slane %v5049_v1, 6  ;;  %v4968_v62 = vpop.f32.mrb[59].mxu1  ;;  %v5051_v20 = vpop.f32.mrb[179].mxu0  ;;  %v18231_v38 = vsel %vm2822_vm4, %v5621_v47, %v5625_v36  ;;  %v18234_v23 = vsel %vm2629_vm3, %v5539_v54, %v5543_v39  ;;  %v14647_v47 = vld [vmem:[%s20977_s8 + $0x120] ss:$12 sps:$4 sm:$0xff]  }
 0x3bd   : > { %v5549_v24 = vrot.slane %v4968_v62, 5  ;;  %v5631_v0 = vrot.slane %v5051_v20, 6  ;;  %v18237_v13 = vsel %vm2822_vm4, %v5623_v21, %v5627_v4  ;;  %v18240_v49 = vsel %vm2629_vm3, %v5541_v59, %v5545_v27  ;;  %v14649_v54 = vld [vmem:[%s20977_s8 + $0x124] ss:$12 sps:$4 sm:$0xff]   ;;  %v14653_v1 = vld [vmem:[%s20977_s8 + $0x13c] ss:$12 sps:$4 sm:$0xff]  }
 0x3be   : > { %v18243_v34 = vsel %vm2822_vm4, %v5625_v36, %v5629_v29  ;;  %v18246_v17 = vsel %vm2629_vm3, %v5543_v39, %v5547_v61  ;;  %6568 = vmatprep.subr.bf16.mxu0 %v14649_v54 }
 0x3bf   : > { %v18258_v8 = vsel %vm2822_vm4, %v5627_v4, %v5631_v0  ;;  %v18261_v59 = vsel %vm2629_vm3, %v5545_v27, %v5549_v24  ;;  %6569 = vmatpush1.bf16.msra.mxu0 %v14647_v47 }
 0x3c0   : > { %6570 = vmatprep.subr.bf16.mxu0 %v14653_v1 }
 0x3c1   : > { %v18263_v21 = vpop.f32.mrb[60].mxu1  ;;  %v5055_v53 = vpop.f32.mrb[180].mxu0 }
 0x3c2   : > { %v21054_v7 = vrot.slane %v18263_v21, 5  ;;  %v5633_v39 = vrot.slane %v5055_v53, 6  ;;  %v18267_v36 = vpop.f32.mrb[61].mxu1  ;;  %v5057_v37 = vpop.f32.mrb[181].mxu0  ;;  %v14651_v53 = vld [vmem:[%s20977_s8 + $0x138] ss:$12 sps:$4 sm:$0xff]  }
 0x3c3   : > { %v21053_v44 = vrot.slane %v18267_v36, 5  ;;  %v5635_v4 = vrot.slane %v5057_v37, 6  ;;  %v4976_v16 = vpop.f32.mrb[62].mxu1  ;;  %v18270_v27 = vpop.f32.mrb[182].mxu0  ;;  %6571 = vmatpush1.bf16.msra.mxu0 %v14651_v53 }
 0x3c4   : > { %v21052_v62 = vrot.slane %v18270_v27, 6  ;;  %v4977_v20 = vpop.f32.mrb[63].mxu1  ;;  %v18276_v47 = vpop.f32.mrb[183].mxu0  ;;  %v18279_v54 = vsel %vm2822_vm4, %v5629_v29, %v5633_v39  ;;  %v18284_v2 = vsel %vm2629_vm3, %v5547_v61, %v21054_v7  ;;  %v14654_v61 = vld [vmem:[%s20977_s8 + $0x140] ss:$12 sps:$4 sm:$0xff]  }
 0x3c5   : > { %v21057_v37 = vrot.slane %v18276_v47, 6  ;;  %v18291_v16 = vsel %vm2822_vm4, %v5631_v0, %v5635_v4  ;;  %v18296_v20 = vsel %vm2629_vm3, %v5549_v24, %v21053_v44  ;;  %v14655_v0 = vld [vmem:[%s20977_s8 + $0x150] ss:$12 sps:$4 sm:$0xff]   ;;  %v14657_v24 = vld [vmem:[%s20977_s8 + $0x154] ss:$12 sps:$4 sm:$0xff]   ;;  %6614 = vmatpush1.bf16.msra.mxu1 %v14654_v61 }
 0x3c6   : > { %v18304_v29 = vsel %vm2822_vm4, %v5633_v39, %v21052_v62  ;;  %v14658_v39 = vld [vmem:[%s20977_s8 + $0x158] ss:$12 sps:$4 sm:$0xff]   ;;  %6572 = vmatprep.subr.bf16.mxu0 %v14657_v24  ;;  %6615 = vmatprep.subr.bf16.mxu1 %v21288_v11  ;;  %v14659_v24 = vld [vmem:[%s20977_s8 + $0x168] ss:$12 sps:$4 sm:$0xff]  }
 0x3c7   : > { %v18315_v1 = vsel %vm2822_vm4, %v5635_v4, %v21057_v37  ;;  %6573 = vmatpush1.bf16.msra.mxu0 %v14655_v0  ;;  %v14661_v4 = vld [vmem:[%s20977_s8 + $0x16c] ss:$12 sps:$4 sm:$0xff]  }
 0x3c8   : > { %6574 = vmatprep.subr.bf16.mxu0 %v14661_v4 }
 0x3c9   : > { %v4980_v53 = vpop.f32.mrb[64].mxu1  ;;  %v5065_v62 = vpop.f32.mrb[184].mxu0  ;;  %6616 = vmatpush1.bf16.msra.mxu1 %v14658_v39 }
 0x3ca   : > { %v4981_v44 = vpop.f32.mrb[65].mxu1  ;;  %v5066_v7 = vpop.f32.mrb[185].mxu0  ;;  %6617 = vmatprep.subr.bf16.mxu1 %v21288_v11 }
 0x3cb   : > { %v4982_v19 = vpop.f32.mrb[66].mxu1  ;;  %v5067_v35 = vpop.f32.mrb[186].mxu0  ;;  %v14662_v7 = vld [vmem:[%s20977_s8 + $0x170] ss:$12 sps:$4 sm:$0xff]   ;;  %6575 = vmatpush1.bf16.msra.mxu0 %v14659_v24  ;;  %v14666_v44 = vld [vmem:[%s20977_s8 + $0x188] ss:$12 sps:$4 sm:$0xff]  }
 0x3cc   : > { %v4983_v61 = vpop.f32.mrb[67].mxu1  ;;  %v5068_v37 = vpop.f32.mrb[187].mxu0  ;;  %v14665_v35 = vld [vmem:[%s20977_s8 + $0x184] ss:$12 sps:$4 sm:$0xff]   ;;  %v14663_v19 = vld [vmem:[%s20977_s8 + $0x180] ss:$12 sps:$4 sm:$0xff]  }
 0x3cd   : > { %6618 = vmatpush1.bf16.msra.mxu1 %v14662_v7  ;;  %6576 = vmatprep.subr.bf16.mxu0 %v14665_v35  ;;  %v14669_v61 = vld [vmem:[%s20977_s8 + $0x19c] ss:$12 sps:$4 sm:$0xff]   ;;  %v14670_v35 = vld [vmem:[%s20977_s8 + $0x1a0] ss:$12 sps:$4 sm:$0xff]  }
 0x3ce   : > { %6619 = vmatprep.subr.bf16.mxu1 %v21288_v11 }
 0x3cf   : > { %6577 = vmatpush1.bf16.msra.mxu0 %v14663_v19  ;;  %v14673_v19 = vld [vmem:[%s20977_s8 + $0x1b4] ss:$12 sps:$4 sm:$0xff]  }
 0x3d0   : > { %6578 = vmatprep.subr.bf16.mxu0 %v14669_v61 }
 0x3d1   : > { %v4986_v62 = vpop.f32.mrb[68].mxu1  ;;  %v5071_v37 = vpop.f32.mrb[188].mxu0  ;;  %6620 = vmatpush1.bf16.msra.mxu1 %v14666_v44  ;;  %v14671_v44 = vld [vmem:[%s20977_s8 + $0x1b0] ss:$12 sps:$4 sm:$0xff]  }
 0x3d2   : > { %v4987_v0 = vpop.f32.mrb[69].mxu1  ;;  %v5072_v39 = vpop.f32.mrb[189].mxu0  ;;  %6621 = vmatprep.subr.bf16.mxu1 %v21288_v11  ;;  %v14674_v62 = vld [vmem:[%s20977_s8 + $0x1b8] ss:$12 sps:$4 sm:$0xff]  }
 0x3d3   : > { %v4988_v53 = vpop.f32.mrb[70].mxu1  ;;  %v5073_v4 = vpop.f32.mrb[190].mxu0  ;;  %6579 = vmatpush1.bf16.msra.mxu0 %v14667_v60 }
 0x3d4   : > { %v4989_v24 = vpop.f32.mrb[71].mxu1  ;;  %v5074_v7 = vpop.f32.mrb[191].mxu0  ;;  %6580 = vmatprep.subr.bf16.mxu0 %v14673_v19  ;;  %v14675_v19 = vld [vmem:[%s20977_s8 + $0x1c8] ss:$12 sps:$4 sm:$0xff]  }
 0x3d5   : > { %6622 = vmatpush1.bf16.msra.mxu1 %v14670_v35  ;;  %v14677_v7 = vld [vmem:[%s20977_s8 + $0x1cc] ss:$12 sps:$4 sm:$0xff]  }
 0x3d6   : > { %6623 = vmatprep.subr.bf16.mxu1 %v21288_v11 }
 0x3d7   : > { %6581 = vmatpush1.bf16.msra.mxu0 %v14671_v44 }
 0x3d8   : > { %6582 = vmatprep.subr.bf16.mxu0 %v14677_v7  ;;  %v21294_v7 = vrot.slane %v18176_v52, 6 }
 0x3d9   : > { %v5110_v37 = vpop.f32.mrb[72].mxu1  ;;  %v18361_v0 = vpop.f32.mrb[192].mxu0  ;;  %6624 = vmatpush1.bf16.msra.mxu1 %v14674_v62 }
 0x3da   : > { %v5701_v60 = vrot.slane %v5110_v37, 7  ;;  %v5112_v39 = vpop.f32.mrb[73].mxu1  ;;  %v18363_v53 = vpop.f32.mrb[193].mxu0  ;;  %6625 = vmatprep.subr.bf16.mxu1 %v21288_v11 }
 0x3db   : > { %v5702_v4 = vrot.slane %v5112_v39, 7  ;;  %v5114_v61 = vpop.f32.mrb[74].mxu1  ;;  %v5201_v24 = vpop.f32.mrb[194].mxu0  ;;  %v14678_v39 = vld [vmem:[%s20977_s8 + $0x1d0] ss:$12 sps:$4 sm:$0xff]   ;;  %6583 = vmatpush1.bf16.msra.mxu0 %v14675_v19 }
 0x3dc   : > { %v5703_v35 = vrot.slane %v5114_v61, 7  ;;  %v5755_v15 = vsel %vm3016_vm5, 0.0, %v5701_v60  ;;  %v5116_v5 = vpop.f32.mrb[75].mxu1  ;;  %v5203_v42 = vpop.f32.mrb[195].mxu0 }
 0x3dd   : > { %v18373_v44 = vadd.f32 %v5755_v15, %v5201_v24  ;;  %v5705_v37 = vrot.slane %v5116_v5, 7  ;;  %v5756_v62 = vsel %vm3016_vm5, 0.0, %v5702_v4  ;;  %6626 = vmatpush1.bf16.msra.mxu1 %v14678_v39  ;;  %v14681_v15 = vld [vmem:[%s20977_s8 + $0x1e4] ss:$12 sps:$4 sm:$0xff]   ;;  %v14679_v5 = vld [vmem:[%s20977_s8 + $0x1e0] ss:$12 sps:$4 sm:$0xff]  }
 0x3de   : > { %v18379_v61 = vadd.f32 %v5756_v62, %v5203_v42  ;;  %v5704_v12 = vsel %vm3016_vm5, %v5701_v60, %v5703_v35  ;;  %6627 = vmatprep.subr.bf16.mxu1 %v21288_v11  ;;  %v14682_v42 = vld [vmem:[%s20977_s8 + $0x1e8] ss:$12 sps:$4 sm:$0xff]   ;;  %6584 = vmatprep.subr.bf16.mxu0 %v14681_v15 }
 0x3df   : > { %v5706_v22 = vsel %vm3016_vm5, %v5702_v4, %v5705_v37  ;;  %v5659_v4 = vsel %vm2822_vm4, 0.0, %v21294_v7  ;;  %6585 = vmatpush1.bf16.msra.mxu0 %v14679_v5  ;;  %v21297_v7 = vrot.slane %v18178_v48, 5 }
 0x3e0   : > { %6586 = vmatprep.subr.bf16.mxu0 %v14685_v26 }
 0x3e1   : > { %v5120_v24 = vpop.f32.mrb[76].mxu1  ;;  %v5207_v60 = vpop.f32.mrb[196].mxu0  ;;  %v5572_v15 = vsel %vm2629_vm3, 0.0, %v21297_v7  ;;  %6628 = vmatpush1.bf16.msra.mxu1 %v14682_v42 }
 0x3e2   : > { %v5707_v19 = vrot.slane %v5120_v24, 7  ;;  %v5665_v62 = vadd.f32 %v5659_v4, %v5207_v60  ;;  %v5122_v39 = vpop.f32.mrb[77].mxu1  ;;  %v5209_v56 = vpop.f32.mrb[197].mxu0  ;;  %6629 = vmatprep.subr.bf16.mxu1 %v21288_v11 }
 0x3e3   : > { %v5709_v46 = vrot.slane %v5122_v39, 7  ;;  %v5666_v14 = vadd.f32 %v5660_v10, %v5209_v56  ;;  %v5124_v41 = vpop.f32.mrb[78].mxu1  ;;  %v5211_v52 = vpop.f32.mrb[198].mxu0  ;;  %v14683_v10 = vld [vmem:[%s20977_s8 + $0x1f8] ss:$12 sps:$4 sm:$0xff]  }
 0x3e4   : > { %v5708_v43 = vsel %vm3016_vm5, %v5703_v35, %v5707_v19  ;;  %v18409_v24 = vadd.f32 %v5704_v12, %v5665_v62  ;;  %v5711_v40 = vrot.slane %v5124_v41, 7  ;;  %v5579_v3 = vadd.f32 %v5571_v63, %v5211_v52  ;;  %v5126_v5 = vpop.f32.mrb[79].mxu1  ;;  %v5213_v60 = vpop.f32.mrb[199].mxu0  ;;  %v14686_v41 = vld [vmem:[%s20977_s8 + $0x200] ss:$12 sps:$4 sm:$0xff]   ;;  %6587 = vmatpush1.bf16.msra.mxu0 %v14683_v10 }
 0x3e5   : > { %v5710_v56 = vsel %vm3016_vm5, %v5705_v37, %v5709_v46  ;;  %v18416_v48 = vadd.f32 %v5706_v22, %v5666_v14  ;;  %v5713_v42 = vrot.slane %v5126_v5, 7  ;;  %v5580_v4 = vadd.f32 %v5572_v15, %v5213_v60  ;;  %6630 = vmatpush1.bf16.msra.mxu1 %v14686_v41  ;;  %v14689_v14 = vld [vmem:[%s20977_s8 + $0x214] ss:$12 sps:$4 sm:$0xff]   ;;  %v14687_v37 = vld [vmem:[%s20977_s8 + $0x210] ss:$12 sps:$4 sm:$0xff]  }
 0x3e6   : > { %v5712_v63 = vsel %vm3016_vm5, %v5707_v19, %v5711_v40  ;;  %v5667_v12 = vadd.f32 %v18189_v50, %v5579_v3  ;;  %6631 = vmatprep.subr.bf16.mxu1 %v21288_v11  ;;  %v14690_v50 = vld [vmem:[%s20977_s8 + $0x218] ss:$12 sps:$4 sm:$0xff]   ;;  %6588 = vmatprep.subr.bf16.mxu0 %v14689_v14 }
 0x3e7   : > { %v5714_v35 = vsel %vm3016_vm5, %v5709_v46, %v5713_v42  ;;  %v5668_v62 = vadd.f32 %v18199_v58, %v5580_v4  ;;  %v14693_v60 = vld [vmem:[%s20977_s8 + $0x22c] ss:$12 sps:$4 sm:$0xff]  }
 0x3e8   : > { %v18428_v22 = vadd.f32 %v5708_v43, %v5667_v12  ;;  %6589 = vmatpush1.bf16.msra.mxu0 %v14687_v37 }
 0x3e9   : > { %v18437_v46 = vadd.f32 %v5710_v56, %v5668_v62  ;;  %v5130_v58 = vpop.f32.mrb[80].mxu1  ;;  %v5217_v19 = vpop.f32.mrb[200].mxu0  ;;  %6632 = vmatpush1.bf16.msra.mxu1 %v14690_v50  ;;  %6590 = vmatprep.subr.bf16.mxu0 %v14693_v60 }
 0x3ea   : > { %v5715_v39 = vrot.slane %v5130_v58, 7  ;;  %v5581_v52 = vadd.f32 %v18194_v28, %v5217_v19  ;;  %v5132_v7 = vpop.f32.mrb[81].mxu1  ;;  %v5219_v15 = vpop.f32.mrb[201].mxu0  ;;  %6633 = vmatprep.subr.bf16.mxu1 %v21288_v11 }
 0x3eb   : > { %v5717_v26 = vrot.slane %v5132_v7, 7  ;;  %v5582_v43 = vadd.f32 %v18204_v6, %v5219_v15  ;;  %v5134_v3 = vpop.f32.mrb[82].mxu1  ;;  %v5221_v5 = vpop.f32.mrb[202].mxu0  ;;  %v14691_v6 = vld [vmem:[%s20977_s8 + $0x228] ss:$12 sps:$4 sm:$0xff]  }
 0x3ec   : > { %v5716_v10 = vsel %vm3016_vm5, %v5711_v40, %v5715_v39  ;;  %v5669_v56 = vadd.f32 %v18207_v51, %v5581_v52  ;;  %v5719_v4 = vrot.slane %v5134_v3, 7  ;;  %v5583_v28 = vadd.f32 %v18210_v30, %v5221_v5  ;;  %v5136_v41 = vpop.f32.mrb[83].mxu1  ;;  %v5223_v12 = vpop.f32.mrb[203].mxu0  ;;  %v14694_v51 = vld [vmem:[%s20977_s8 + $0x230] ss:$12 sps:$4 sm:$0xff]   ;;  %6591 = vmatpush1.bf16.msra.mxu0 %v14691_v6 }
 0x3ed   : > { %v5718_v62 = vsel %vm3016_vm5, %v5713_v42, %v5717_v26  ;;  %v5670_v14 = vadd.f32 %v18213_v18, %v5582_v43  ;;  %v5721_v37 = vrot.slane %v5136_v41, 7  ;;  %v5584_v40 = vadd.f32 %v18216_v25, %v5223_v12  ;;  %6634 = vmatpush1.bf16.msra.mxu1 %v14694_v51  ;;  %v14697_v25 = vld [vmem:[%s20977_s8 + $0x4] ss:$12 sps:$4 sm:$0xff]  }
 0x3ee   : > { %v18457_v30 = vadd.f32 %v5712_v63, %v5669_v56  ;;  %v5720_v50 = vsel %vm3016_vm5, %v5715_v39, %v5719_v4  ;;  %v5671_v58 = vadd.f32 %v18219_v9, %v5583_v28  ;;  %6890 = vmatprep.subr.bf16.mxu1 %v21288_v11  ;;  %6847 = vmatprep.subr.bf16.mxu0 %v14697_v25 }
 0x3ef   : > { %v18461_v19 = vadd.f32 %v5714_v35, %v5670_v14  ;;  %v5722_v42 = vsel %vm3016_vm5, %v5717_v26, %v5721_v37  ;;  %v5672_v18 = vadd.f32 %v18225_v32, %v5584_v40 }
 0x3f0   : > { %v18468_v52 = vadd.f32 %v5716_v10, %v5671_v58 }
 0x3f1   : > { %v18471_v63 = vadd.f32 %v5718_v62, %v5672_v18  ;;  %v5140_v39 = vpop.f32.mrb[84].mxu1  ;;  %v5227_v9 = vpop.f32.mrb[204].mxu0 }
 0x3f2   : > { %v5723_v35 = vrot.slane %v5140_v39, 7  ;;  %v5585_v7 = vadd.f32 %v18222_v55, %v5227_v9  ;;  %v5142_v15 = vpop.f32.mrb[85].mxu1  ;;  %v5229_v26 = vpop.f32.mrb[205].mxu0 }
 0x3f3   : > { %v5725_v32 = vrot.slane %v5142_v15, 7  ;;  %v5586_v43 = vadd.f32 %v18228_v45, %v5229_v26  ;;  %v5144_v3 = vpop.f32.mrb[86].mxu1  ;;  %v5231_v5 = vpop.f32.mrb[206].mxu0 }
 0x3f4   : > { %v5724_v60 = vsel %vm3016_vm5, %v5719_v4, %v5723_v35  ;;  %v5673_v10 = vadd.f32 %v18231_v38, %v5585_v7  ;;  %v5727_v56 = vrot.slane %v5144_v3, 7  ;;  %v5587_v28 = vadd.f32 %v18234_v23, %v5231_v5  ;;  %v5146_v41 = vpop.f32.mrb[87].mxu1  ;;  %v5233_v12 = vpop.f32.mrb[207].mxu0 }
 0x3f5   : > { %v5726_v6 = vsel %vm3016_vm5, %v5721_v37, %v5725_v32  ;;  %v5674_v55 = vadd.f32 %v18237_v13, %v5586_v43  ;;  %v5729_v62 = vrot.slane %v5146_v41, 7  ;;  %v5588_v14 = vadd.f32 %v18240_v49, %v5233_v12 }
 0x3f6   : > { %v18481_v40 = vadd.f32 %v5720_v50, %v5673_v10  ;;  %v5728_v45 = vsel %vm3016_vm5, %v5723_v35, %v5727_v56  ;;  %v5675_v4 = vadd.f32 %v18243_v34, %v5587_v28 }
 0x3f7   : > { %v18485_v51 = vadd.f32 %v5722_v42, %v5674_v55  ;;  %v5730_v38 = vsel %vm3016_vm5, %v5725_v32, %v5729_v62  ;;  %v5676_v23 = vadd.f32 %v18258_v8, %v5588_v14  ;;  %v18498_v8 = vld [vmem:[%s20976_s7] ss:$2 sm:$0x3] }
 0x3f8   : > { %v18489_v58 = vadd.f32 %v5724_v60, %v5675_v4 }
 0x3f9   : > { %v18491_v37 = vadd.f32 %v5726_v6, %v5676_v23  ;;  %v5150_v13 = vpop.f32.mrb[88].mxu1  ;;  %v5237_v18 = vpop.f32.mrb[208].mxu0 }
 0x3fa   : > { %v5731_v25 = vrot.slane %v5150_v13, 7  ;;  %v5589_v49 = vadd.f32 %v18246_v17, %v5237_v18  ;;  %v5152_v50 = vpop.f32.mrb[89].mxu1  ;;  %v5239_v39 = vpop.f32.mrb[209].mxu0  ;;  %v21300_v13 = vrot.slane %v18270_v27, 6 }
 0x3fb   : > { %v5733_v9 = vrot.slane %v5152_v50, 7  ;;  %v5590_v34 = vadd.f32 %v18261_v59, %v5239_v39  ;;  %v5154_v42 = vpop.f32.mrb[90].mxu1  ;;  %v5241_v35 = vpop.f32.mrb[210].mxu0  ;;  %v18508_v59 = vld [vmem:[%s20976_s7 + $0x1] ss:$2 sm:$0x3] }
 0x3fc   : > { %v5732_v7 = vsel %vm3016_vm5, %v5727_v56, %v5731_v25  ;;  %v5677_v15 = vadd.f32 %v18279_v54, %v5589_v49  ;;  %v5591_v26 = vadd.f32 %v18284_v2, %v5241_v35  ;;  %v5155_v32 = vpop.f32.mrb[91].mxu1  ;;  %v5243_v17 = vpop.f32.mrb[211].mxu0  ;;  %v18516_v54 = vrot.slane %v18498_v8, %v21267_v57 }
 0x3fd   : > { %v5734_v43 = vsel %vm3016_vm5, %v5729_v62, %v5733_v9  ;;  %v5678_v3 = vadd.f32 %v18291_v16, %v5590_v34  ;;  %v5592_v5 = vadd.f32 %v18296_v20, %v5243_v17  ;;  %v18523_v28 = vrot.slane %v18508_v59, %v21267_v57 }
 0x3fe   : > { %v18511_v60 = vadd.f32 %v5728_v45, %v5677_v15  ;;  %v5679_v10 = vadd.f32 %v18304_v29, %v5591_v26  ;;  %v21298_v29 = vrot.slane %v18263_v21, 5  ;;  %v21299_v45 = vrot.slane %v18267_v36, 5 }
 0x3ff   : > { %v18518_v2 = vadd.f32 %v5730_v38, %v5678_v3  ;;  %v5680_v56 = vadd.f32 %v18315_v1, %v5592_v5  ;;  %v21301_v39 = vrot.slane %v18276_v47, 6 }
 0x400   : > { %v5775_v16 = vadd.f32 %v5732_v7, %v5679_v10 }
 0x401   : > { %v18525_v41 = vadd.f32 %v5734_v43, %v5680_v56  ;;  %v5158_v20 = vpop.f32.mrb[92].mxu1  ;;  %v5247_v12 = vpop.f32.mrb[212].mxu0 }
 0x402   : > { %v6083_v6 = vmul.f32 %v18516_v54, %v5775_v16  ;;  %v5593_v55 = vadd.f32 %v21298_v29, %v5247_v12  ;;  %v5159_v62 = vpop.f32.mrb[93].mxu1  ;;  %v5249_v14 = vpop.f32.mrb[213].mxu0 }
 0x403   : > { %v5594_v4 = vadd.f32 %v21299_v45, %v5249_v14  ;;  %v5160_v1 = vpop.f32.mrb[94].mxu1  ;;  %v5251_v38 = vpop.f32.mrb[214].mxu0 }
 0x404   : > { %v18533_v23 = vadd.f32 %v18523_v28, %v6083_v6  ;;  %v5681_v18 = vadd.f32 %v21300_v13, %v5593_v55  ;;  %v5161_v49 = vpop.f32.mrb[95].mxu1  ;;  %v5252_v50 = vpop.f32.mrb[215].mxu0 }
 0x405   : > { %v5682_v34 = vadd.f32 %v21301_v39, %v5594_v4 }
 0x406   : > { %v5777_v21 = vadd.f32 %v5731_v25, %v5681_v18 }
 0x407   : > { %v18539_v42 = vadd.f32 %v5733_v9, %v5682_v34 }
 0x408   : > { %v6085_v35 = vmul.f32 %v18516_v54, %v5777_v21 }
 0x409   : > { %v5288_v36 = vpop.f32.mrb[96].mxu1  ;;  %v5377_v7 = vpop.f32.mrb[216].mxu0 }
 0x40a   : > { %v18543_v15 = vadd.f32 %v18523_v28, %v6085_v35  ;;  %v5289_v26 = vpop.f32.mrb[97].mxu1  ;;  %v5378_v32 = vpop.f32.mrb[217].mxu0 }
 0x40b   : > { %v5290_v17 = vpop.f32.mrb[98].mxu1  ;;  %v5379_v27 = vpop.f32.mrb[218].mxu0 }
 0x40c   : > { %v5292_v43 = vpop.f32.mrb[99].mxu1  ;;  %v5380_v3 = vpop.f32.mrb[219].mxu0  ;;  %v5799_v47 = vrot.slane %v5290_v17, 1 }
 0x40d   : > { %v5802_v16 = vrot.slane %v5292_v43, 1 }
 0x411   : > { %v5296_v5 = vpop.f32.mrb[100].mxu1  ;;  %v5383_v10 = vpop.f32.mrb[220].mxu0 }
 0x412   : > { %v5800_v56 = vrot.slane %v5296_v5, 1  ;;  %v5298_v25 = vpop.f32.mrb[101].mxu1  ;;  %v5385_v9 = vpop.f32.mrb[221].mxu0  ;;  %v5895_v20 = vrot.slane %v5383_v10, 2 }
 0x413   : > { %v5803_v12 = vrot.slane %v5298_v25, 1  ;;  %v5300_v6 = vpop.f32.mrb[102].mxu1  ;;  %v5387_v29 = vpop.f32.mrb[222].mxu0  ;;  %v5898_v62 = vrot.slane %v5385_v9, 2 }
 0x414   : > { %v5801_v55 = vsel %vm3212_vm6, %v5799_v47, %v5800_v56  ;;  %v5805_v14 = vrot.slane %v5300_v6, 1  ;;  %v5896_v45 = vrot.slane %v5387_v29, 2  ;;  %v5302_v4 = vpop.f32.mrb[103].mxu1  ;;  %v5389_v1 = vpop.f32.mrb[223].mxu0 }
 0x415   : > { %v5855_v38 = vadd.f32 %v5801_v55, %v18361_v0  ;;  %v5804_v13 = vsel %vm3212_vm6, %v5802_v16, %v5803_v12  ;;  %v5807_v18 = vrot.slane %v5302_v4, 1  ;;  %v5899_v49 = vrot.slane %v5389_v1, 2 }
 0x416   : > { %v5856_v50 = vadd.f32 %v5804_v13, %v18363_v53  ;;  %v5806_v39 = vsel %vm3212_vm6, %v5800_v56, %v5805_v14  ;;  %v5897_v34 = vsel %vm3407_vm2, %v5895_v20, %v5896_v45 }
 0x417   : > { %v5857_v21 = vadd.f32 %v5806_v39, %v18373_v44  ;;  %v18552_v35 = vadd.f32 %v5897_v34, %v5855_v38  ;;  %v5808_v36 = vsel %vm3212_vm6, %v5803_v12, %v5807_v18  ;;  %v5900_v7 = vsel %vm3407_vm2, %v5898_v62, %v5899_v49 }
 0x418   : > { %v5858_v0 = vadd.f32 %v5808_v36, %v18379_v61  ;;  %v18557_v26 = vadd.f32 %v5900_v7, %v5856_v50 }
 0x419   : > { %v5306_v32 = vpop.f32.mrb[104].mxu1  ;;  %v5393_v17 = vpop.f32.mrb[224].mxu0 }
 0x41a   : > { %v5809_v27 = vrot.slane %v5306_v32, 1  ;;  %v5901_v53 = vrot.slane %v5393_v17, 2  ;;  %v5308_v43 = vpop.f32.mrb[105].mxu1  ;;  %v5395_v3 = vpop.f32.mrb[225].mxu0 }
 0x41b   : > { %v5811_v5 = vrot.slane %v5308_v43, 1  ;;  %v5903_v10 = vrot.slane %v5395_v3, 2  ;;  %v5310_v47 = vpop.f32.mrb[106].mxu1  ;;  %v5397_v44 = vpop.f32.mrb[226].mxu0 }
 0x41c   : > { %v5810_v56 = vsel %vm3212_vm6, %v5805_v14, %v5809_v27  ;;  %v5902_v25 = vsel %vm3407_vm2, %v5896_v45, %v5901_v53  ;;  %v5813_v9 = vrot.slane %v5310_v47, 1  ;;  %v5905_v16 = vrot.slane %v5397_v44, 2  ;;  %v5312_v20 = vpop.f32.mrb[107].mxu1  ;;  %v5399_v61 = vpop.f32.mrb[227].mxu0 }
 0x41d   : > { %v5859_v12 = vadd.f32 %v5810_v56, %v18409_v24  ;;  %v18562_v6 = vadd.f32 %v5902_v25, %v5857_v21  ;;  %v5812_v29 = vsel %vm3212_vm6, %v5807_v18, %v5811_v5  ;;  %v5904_v55 = vsel %vm3407_vm2, %v5899_v49, %v5903_v10 }
 0x41e   : > { %v5860_v62 = vadd.f32 %v5812_v29, %v18416_v48  ;;  %v18567_v4 = vadd.f32 %v5904_v55, %v5858_v0  ;;  %v5814_v14 = vsel %vm3212_vm6, %v5809_v27, %v5813_v9  ;;  %v5906_v45 = vsel %vm3407_vm2, %v5901_v53, %v5905_v16 }
 0x41f   : > { %v5861_v1 = vadd.f32 %v5814_v14, %v18428_v22  ;;  %v18572_v38 = vadd.f32 %v5906_v45, %v5859_v12  ;;  %v5815_v13 = vrot.slane %v5312_v20, 1  ;;  %v5907_v24 = vrot.slane %v5399_v61, 2 }
 0x421   : > { %v5816_v50 = vsel %vm3212_vm6, %v5811_v5, %v5815_v13  ;;  %v5908_v18 = vsel %vm3407_vm2, %v5903_v10, %v5907_v24  ;;  %v5316_v39 = vpop.f32.mrb[108].mxu1  ;;  %v5403_v49 = vpop.f32.mrb[228].mxu0 }
 0x422   : > { %v5862_v48 = vadd.f32 %v5816_v50, %v18437_v46  ;;  %v18577_v34 = vadd.f32 %v5908_v18, %v5860_v62  ;;  %v5817_v21 = vrot.slane %v5316_v39, 1  ;;  %v5909_v36 = vrot.slane %v5403_v49, 2  ;;  %v5318_v7 = vpop.f32.mrb[109].mxu1  ;;  %v5405_v0 = vpop.f32.mrb[229].mxu0 }
 0x423   : > { %v5819_v32 = vrot.slane %v5318_v7, 1  ;;  %v5911_v22 = vrot.slane %v5405_v0, 2  ;;  %v5320_v17 = vpop.f32.mrb[110].mxu1  ;;  %v5407_v27 = vpop.f32.mrb[230].mxu0 }
 0x424   : > { %v5818_v53 = vsel %vm3212_vm6, %v5813_v9, %v5817_v21  ;;  %v5910_v43 = vsel %vm3407_vm2, %v5905_v16, %v5909_v36  ;;  %v5821_v3 = vrot.slane %v5320_v17, 1  ;;  %v5913_v5 = vrot.slane %v5407_v27, 2  ;;  %v5322_v10 = vpop.f32.mrb[111].mxu1  ;;  %v5409_v47 = vpop.f32.mrb[231].mxu0 }
 0x425   : > { %v5863_v46 = vadd.f32 %v5818_v53, %v18457_v30  ;;  %v18582_v44 = vadd.f32 %v5910_v43, %v5861_v1  ;;  %v5820_v56 = vsel %vm3212_vm6, %v5815_v13, %v5819_v32  ;;  %v5912_v25 = vsel %vm3407_vm2, %v5907_v24, %v5911_v22 }
 0x426   : > { %v5864_v20 = vadd.f32 %v5820_v56, %v18461_v19  ;;  %v18587_v61 = vadd.f32 %v5912_v25, %v5862_v48  ;;  %v5822_v9 = vsel %vm3212_vm6, %v5817_v21, %v5821_v3  ;;  %v5914_v16 = vsel %vm3407_vm2, %v5909_v36, %v5913_v5 }
 0x427   : > { %v5865_v12 = vadd.f32 %v5822_v9, %v18468_v52  ;;  %v18592_v29 = vadd.f32 %v5914_v16, %v5863_v46  ;;  %v5823_v55 = vrot.slane %v5322_v10, 1  ;;  %v5915_v30 = vrot.slane %v5409_v47, 2 }
 0x429   : > { %v5824_v62 = vsel %vm3212_vm6, %v5819_v32, %v5823_v55  ;;  %v5916_v14 = vsel %vm3407_vm2, %v5911_v22, %v5915_v30  ;;  %v5326_v45 = vpop.f32.mrb[112].mxu1  ;;  %v5413_v1 = vpop.f32.mrb[232].mxu0 }
 0x42a   : > { %v5866_v19 = vadd.f32 %v5824_v62, %v18471_v63  ;;  %v18597_v13 = vadd.f32 %v5916_v14, %v5864_v20  ;;  %v5825_v24 = vrot.slane %v5326_v45, 1  ;;  %v5917_v50 = vrot.slane %v5413_v1, 2  ;;  %v5328_v18 = vpop.f32.mrb[113].mxu1  ;;  %v5415_v39 = vpop.f32.mrb[233].mxu0 }
 0x42b   : > { %v5827_v49 = vrot.slane %v5328_v18, 1  ;;  %v5919_v52 = vrot.slane %v5415_v39, 2  ;;  %v5330_v48 = vpop.f32.mrb[114].mxu1  ;;  %v5417_v21 = vpop.f32.mrb[234].mxu0  ;;  %v18616_v20 = vrot.slane %v18498_v8, %v21268_v33  ;;  %v18627_v18 = vrot.slane %v18508_v59, %v21268_v33 }
 0x42c   : > { %v5826_v36 = vsel %vm3212_vm6, %v5821_v3, %v5825_v24  ;;  %v5918_v7 = vsel %vm3407_vm2, %v5913_v5, %v5917_v50  ;;  %v5829_v0 = vrot.slane %v5330_v48, 1  ;;  %v5921_v32 = vrot.slane %v5417_v21, 2  ;;  %v5332_v22 = vpop.f32.mrb[115].mxu1  ;;  %v5419_v17 = vpop.f32.mrb[235].mxu0 }
 0x42d   : > { %v5867_v63 = vadd.f32 %v5826_v36, %v18481_v40  ;;  %v18602_v27 = vadd.f32 %v5918_v7, %v5865_v12  ;;  %v5828_v53 = vsel %vm3212_vm6, %v5823_v55, %v5827_v49  ;;  %v5920_v43 = vsel %vm3407_vm2, %v5915_v30, %v5919_v52 }
 0x42e   : > { %v5868_v10 = vadd.f32 %v5828_v53, %v18485_v51  ;;  %v18607_v47 = vadd.f32 %v5920_v43, %v5866_v19  ;;  %v5830_v3 = vsel %vm3212_vm6, %v5825_v24, %v5829_v0  ;;  %v5922_v5 = vsel %vm3407_vm2, %v5917_v50, %v5921_v32 }
 0x42f   : > { %v5869_v46 = vadd.f32 %v5830_v3, %v18489_v58  ;;  %v18612_v56 = vadd.f32 %v5922_v5, %v5867_v63  ;;  %v5831_v25 = vrot.slane %v5332_v22, 1  ;;  %v5923_v40 = vrot.slane %v5419_v17, 2 }
 0x430   : > { %v6084_v8 = vmul.f32 %v18616_v20, %v18525_v41 }
 0x431   : > { %v5832_v9 = vsel %vm3212_vm6, %v5827_v49, %v5831_v25  ;;  %v5924_v51 = vsel %vm3407_vm2, %v5919_v52, %v5923_v40  ;;  %v5336_v16 = vpop.f32.mrb[116].mxu1  ;;  %v5423_v12 = vpop.f32.mrb[236].mxu0 }
 0x432   : > { %v5870_v55 = vadd.f32 %v5832_v9, %v18491_v37  ;;  %v18621_v30 = vadd.f32 %v5924_v51, %v5868_v10  ;;  %v5833_v62 = vrot.slane %v5336_v16, 1  ;;  %v5925_v58 = vrot.slane %v5423_v12, 2  ;;  %v5338_v14 = vpop.f32.mrb[117].mxu1  ;;  %v5425_v45 = vpop.f32.mrb[237].mxu0 }
 0x433   : > { %v5835_v1 = vrot.slane %v5338_v14, 1  ;;  %v5927_v19 = vrot.slane %v5425_v45, 2  ;;  %v5340_v24 = vpop.f32.mrb[118].mxu1  ;;  %v5427_v50 = vpop.f32.mrb[238].mxu0 }
 0x434   : > { %v5834_v39 = vsel %vm3212_vm6, %v5829_v0, %v5833_v62  ;;  %v5926_v37 = vsel %vm3407_vm2, %v5921_v32, %v5925_v58  ;;  %v5341_v49 = vpop.f32.mrb[119].mxu1  ;;  %v5428_v52 = vpop.f32.mrb[239].mxu0  ;;  %v6119_v32 = vadd.f32 %v18627_v18, %v6084_v8 }
 0x435   : > { %v5871_v48 = vadd.f32 %v5834_v39, %v18511_v60  ;;  %v5945_v21 = vsel %vm3212_vm6, %v5926_v37, 0.0  ;;  %v5836_v36 = vsel %vm3212_vm6, %v5831_v25, %v5835_v1  ;;  %v5928_v7 = vsel %vm3407_vm2, %v5923_v40, %v5927_v19 }
 0x436   : > { %v5961_v22 = vadd.f32 %v5945_v21, %v5869_v46  ;;  %v5872_v41 = vadd.f32 %v5836_v36, %v18518_v2  ;;  %v5946_v59 = vsel %vm3212_vm6, %v5928_v7, 0.0  ;;  %v6140_v25 = vmax.f32 %v18533_v23, 0.0 }
 0x437   : > { %v6081_v17 = vmul.f32 %v18516_v54, %v5871_v48  ;;  %v18638_v0 = vadd.f32 %v5946_v59, %v5870_v55  ;;  %v6141_v16 = vmax.f32 %v6119_v32, 0.0 }
 0x438   : > { %v6079_v63 = vmul.f32 %v18516_v54, %v5961_v22  ;;  %v6082_v60 = vmul.f32 %v18616_v20, %v5872_v41 }
 0x439   : > { %v6116_v53 = vadd.f32 %v18523_v28, %v6081_v17  ;;  %v5464_v43 = vpop.f32.mrb[120].mxu1  ;;  %v6209_v10 = vpop.f32.mrb[240].mxu0 }
 0x43a   : > { %v18645_v3 = vadd.f32 %v18523_v28, %v6079_v63  ;;  %v6117_v2 = vadd.f32 %v18627_v18, %v6082_v60  ;;  %v5465_v5 = vpop.f32.mrb[121].mxu1  ;;  %v6211_v46 = vpop.f32.mrb[241].mxu0 }
 0x43b   : > { %v6138_v40 = vmax.f32 %v6116_v53, 0.0  ;;  %v5466_v9 = vpop.f32.mrb[122].mxu1  ;;  %v6213_v51 = vpop.f32.mrb[242].mxu0 }
 0x43c   : > { %v6139_v12 = vmax.f32 %v6117_v2, 0.0  ;;  %v5467_v55 = vpop.f32.mrb[123].mxu1  ;;  %v18649_v62 = vpack.c.bf16 %v6213_v51, %v6209_v10  ;;  %v6215_v58 = vpop.f32.mrb[243].mxu0 }
 0x43d   : > { %v18651_v14 = vpack.c.bf16 %v6140_v25, %v6138_v40  ;;  %v18653_v45 = vpack.c.bf16 %v6215_v58, %v6211_v46 }
 0x43e   : > { %v18655_v1 = vpack.c.bf16 %v6141_v16, %v6139_v12 }
 0x441   : > { %v5470_v19 = vpop.f32.mrb[124].mxu1 }
 0x442   : > { %v5471_v24 = vpop.f32.mrb[125].mxu1 }
 0x443   : > { %v5472_v50 = vpop.f32.mrb[126].mxu1 }
 0x444   : > { %v5474_v8 = vpop.f32.mrb[127].mxu1  ;;  %v5985_v39 = vrot.slane %v5472_v50, 3 }
 0x445   : > { %v5988_v52 = vrot.slane %v5474_v8, 3 }
 0x449   : > { %v5478_v23 = vpop.f32.mrb[128].mxu1 }
 0x44a   : > { %v5986_v37 = vrot.slane %v5478_v23, 3  ;;  %v5480_v49 = vpop.f32.mrb[129].mxu1 }
 0x44b   : > { %v5989_v48 = vrot.slane %v5480_v49, 3  ;;  %v5482_v21 = vpop.f32.mrb[130].mxu1 }
 0x44c   : > { %v5987_v36 = vsel %vm3604_vm7, %v5985_v39, %v5986_v37  ;;  %v5991_v7 = vrot.slane %v5482_v21, 3  ;;  %v5484_v22 = vpop.f32.mrb[131].mxu1 }
 0x44d   : > { %v6031_v41 = vadd.f32 %v5987_v36, %v18552_v35  ;;  %v5990_v59 = vsel %vm3604_vm7, %v5988_v52, %v5989_v48  ;;  %v5993_v17 = vrot.slane %v5484_v22, 3 }
 0x44e   : > { %v6032_v32 = vadd.f32 %v5990_v59, %v18557_v26  ;;  %v5992_v63 = vsel %vm3604_vm7, %v5986_v37, %v5991_v7 }
 0x44f   : > { %v6065_v60 = vmul.f32 %v18516_v54, %v6031_v41  ;;  %v6033_v53 = vadd.f32 %v5992_v63, %v18562_v6  ;;  %v5994_v43 = vsel %vm3604_vm7, %v5989_v48, %v5993_v17 }
 0x450   : > { %v6066_v10 = vmul.f32 %v18616_v20, %v6032_v32  ;;  %v6034_v2 = vadd.f32 %v5994_v43, %v18567_v4 }
 0x451   : > { %v6100_v5 = vadd.f32 %v18523_v28, %v6065_v60  ;;  %v6067_v35 = vmul.f32 %v18516_v54, %v6033_v53  ;;  %v5488_v46 = vpop.f32.mrb[132].mxu1 }
 0x452   : > { %v6101_v25 = vadd.f32 %v18627_v18, %v6066_v10  ;;  %v6068_v26 = vmul.f32 %v18616_v20, %v6034_v2  ;;  %v5995_v40 = vrot.slane %v5488_v46, 3  ;;  %v5490_v9 = vpop.f32.mrb[133].mxu1 }
 0x453   : > { %v6102_v51 = vadd.f32 %v18523_v28, %v6067_v35  ;;  %v5997_v6 = vrot.slane %v5490_v9, 3  ;;  %v5492_v16 = vpop.f32.mrb[134].mxu1  ;;  %v6122_v12 = vmax.f32 %v6100_v5, 0.0 }
 0x454   : > { %v6103_v55 = vadd.f32 %v18627_v18, %v6068_v26  ;;  %v5996_v4 = vsel %vm3604_vm7, %v5991_v7, %v5995_v40  ;;  %v5999_v58 = vrot.slane %v5492_v16, 3  ;;  %v5494_v19 = vpop.f32.mrb[135].mxu1  ;;  %v6123_v39 = vmax.f32 %v6101_v25, 0.0 }
 0x455   : > { %v6124_v24 = vmax.f32 %v6102_v51, 0.0  ;;  %v6035_v50 = vadd.f32 %v5996_v4, %v18572_v38  ;;  %v5998_v8 = vsel %vm3604_vm7, %v5993_v17, %v5997_v6  ;;  %v6001_v23 = vrot.slane %v5494_v19, 3 }
 0x456   : > { %v6125_v37 = vmax.f32 %v6103_v55, 0.0  ;;  %v6036_v49 = vadd.f32 %v5998_v8, %v18577_v34  ;;  %v6000_v52 = vsel %vm3604_vm7, %v5995_v40, %v5999_v58 }
 0x457   : > { %v18678_v48 = vpack.c.bf16 %v6124_v24, %v6122_v12  ;;  %v6069_v21 = vmul.f32 %v18516_v54, %v6035_v50  ;;  %v6037_v36 = vadd.f32 %v6000_v52, %v18582_v44  ;;  %v6002_v7 = vsel %vm3604_vm7, %v5997_v6, %v6001_v23 }
 0x458   : > { %v18683_v22 = vpack.c.bf16 %v6125_v37, %v6123_v39  ;;  %v6070_v38 = vmul.f32 %v18616_v20, %v6036_v49  ;;  %v6038_v41 = vadd.f32 %v6002_v7, %v18587_v61  ;;  %v6080_v7 = vmul.f32 %v18616_v20, %v18638_v0 }
 0x459   : > { %v6104_v59 = vadd.f32 %v18523_v28, %v6069_v21  ;;  %v6071_v34 = vmul.f32 %v18516_v54, %v6037_v36  ;;  %v5498_v17 = vpop.f32.mrb[136].mxu1 }
 0x45a   : > { %v6105_v32 = vadd.f32 %v18627_v18, %v6070_v38  ;;  %v6072_v63 = vmul.f32 %v18616_v20, %v6038_v41  ;;  %v6003_v60 = vrot.slane %v5498_v17, 3  ;;  %v5500_v53 = vpop.f32.mrb[137].mxu1 }
 0x45b   : > { %v6106_v44 = vadd.f32 %v18523_v28, %v6071_v34  ;;  %v6005_v43 = vrot.slane %v5500_v53, 3  ;;  %v5502_v10 = vpop.f32.mrb[138].mxu1  ;;  %v6126_v2 = vmax.f32 %v6104_v59, 0.0 }
 0x45c   : > { %v6107_v5 = vadd.f32 %v18627_v18, %v6072_v63  ;;  %v6004_v61 = vsel %vm3604_vm7, %v5999_v58, %v6003_v60  ;;  %v6007_v35 = vrot.slane %v5502_v10, 3  ;;  %v5504_v46 = vpop.f32.mrb[139].mxu1  ;;  %v6127_v51 = vmax.f32 %v6105_v32, 0.0 }
 0x45d   : > { %v6128_v25 = vmax.f32 %v6106_v44, 0.0  ;;  %v6039_v26 = vadd.f32 %v6004_v61, %v18592_v29  ;;  %v6006_v40 = vsel %vm3604_vm7, %v6001_v23, %v6005_v43  ;;  %v6009_v9 = vrot.slane %v5504_v46, 3 }
 0x45e   : > { %v6129_v6 = vmax.f32 %v6107_v5, 0.0  ;;  %v6040_v16 = vadd.f32 %v6006_v40, %v18597_v13  ;;  %v6008_v12 = vsel %vm3604_vm7, %v6003_v60, %v6007_v35  ;;  %v6115_v5 = vadd.f32 %v18627_v18, %v6080_v7  ;;  %v14721_v7 = vld [vmem:[%s20977_s8 + $0x94] ss:$12 sps:$4 sm:$0xff]  }
 0x45f   : > { %v18698_v55 = vpack.c.bf16 %v6128_v25, %v6126_v2  ;;  %v6073_v4 = vmul.f32 %v18516_v54, %v6039_v26  ;;  %v6041_v58 = vadd.f32 %v6008_v12, %v18602_v27  ;;  %v6010_v19 = vsel %vm3604_vm7, %v6005_v43, %v6009_v9 }
 0x460   : > { %v18703_v24 = vpack.c.bf16 %v6129_v6, %v6127_v51  ;;  %v6074_v29 = vmul.f32 %v18616_v20, %v6040_v16  ;;  %v6042_v50 = vadd.f32 %v6010_v19, %v18607_v47  ;;  %v6136_v40 = vmax.f32 %v18645_v3, 0.0  ;;  %v14701_v3 = vld [vmem:[%s20977_s8 + $0x1c] ss:$12 sps:$4 sm:$0xff]   ;;  %v14699_v19 = vld [vmem:[%s20977_s8 + $0x18] ss:$12 sps:$4 sm:$0xff]  }
 0x461   : > { %v6108_v8 = vadd.f32 %v18523_v28, %v6073_v4  ;;  %v6075_v13 = vmul.f32 %v18516_v54, %v6041_v58  ;;  %v5508_v23 = vpop.f32.mrb[140].mxu1  ;;  %v6137_v6 = vmax.f32 %v6115_v5, 0.0  ;;  %v14738_v5 = vld [vmem:[%s20977_s8 + $0xf8] ss:$12 sps:$4 sm:$0xff]  }
 0x462   : > { %v6109_v39 = vadd.f32 %v18627_v18, %v6074_v29  ;;  %v6076_v37 = vmul.f32 %v18616_v20, %v6042_v50  ;;  %v6011_v49 = vrot.slane %v5508_v23, 3  ;;  %v5510_v52 = vpop.f32.mrb[141].mxu1  ;;  %v14702_v29 = vld [vmem:[%s20977_s8 + $0x20] ss:$12 sps:$4 sm:$0xff]  }
 0x463   : > { %v6110_v27 = vadd.f32 %v18523_v28, %v6075_v13  ;;  %v6013_v21 = vrot.slane %v5510_v52, 3  ;;  %v5512_v36 = vpop.f32.mrb[142].mxu1  ;;  %v6130_v59 = vmax.f32 %v6108_v8, 0.0  ;;  %v14705_v50 = vld [vmem:[%s20977_s8 + $0x34] ss:$12 sps:$4 sm:$0xff]  }
 0x464   : > { %v6111_v47 = vadd.f32 %v18627_v18, %v6076_v37  ;;  %v6012_v38 = vsel %vm3604_vm7, %v6007_v35, %v6011_v49  ;;  %v5513_v41 = vpop.f32.mrb[143].mxu1  ;;  %v6131_v63 = vmax.f32 %v6109_v39, 0.0  ;;  %v14703_v8 = vld [vmem:[%s20977_s8 + $0x30] ss:$12 sps:$4 sm:$0xff]   ;;  %v14706_v13 = vld [vmem:[%s20977_s8 + $0x38] ss:$12 sps:$4 sm:$0xff]  }
 0x465   : > { %v6132_v34 = vmax.f32 %v6110_v27, 0.0  ;;  %v6029_v17 = vsel %vm3407_vm2, %v6012_v38, 0.0  ;;  %v6014_v32 = vsel %vm3604_vm7, %v6009_v9, %v6013_v21  ;;  %v14709_v23 = vld [vmem:[%s20977_s8 + $0x4c] ss:$12 sps:$4 sm:$0xff]   ;;  %v14710_v39 = vld [vmem:[%s20977_s8 + $0x50] ss:$12 sps:$4 sm:$0xff]  }
 0x466   : > { %v6133_v60 = vmax.f32 %v6111_v47, 0.0  ;;  %v6043_v53 = vadd.f32 %v6029_v17, %v18612_v56  ;;  %v6030_v44 = vsel %vm3407_vm2, %v6014_v32, 0.0  ;;  %v14713_v37 = vld [vmem:[%s20977_s8 + $0x64] ss:$12 sps:$4 sm:$0xff]   ;;  %v14711_v49 = vld [vmem:[%s20977_s8 + $0x60] ss:$12 sps:$4 sm:$0xff]  }
 0x467   : > { %v18720_v43 = vpack.c.bf16 %v6132_v34, %v6130_v59  ;;  %v6044_v0 = vadd.f32 %v6030_v44, %v18621_v30  ;;  %v14714_v52 = vld [vmem:[%s20977_s8 + $0x68] ss:$12 sps:$4 sm:$0xff]   ;;  %v14715_v21 = vld [vmem:[%s20977_s8 + $0x78] ss:$12 sps:$4 sm:$0xff]   ;;  %v14718_v36 = vld [vmem:[%s20977_s8 + $0x80] ss:$12 sps:$4 sm:$0xff]  }
 0x468   : > { %v18723_v10 = vpack.c.bf16 %v6133_v60, %v6131_v63  ;;  %v6077_v2 = vmul.f32 %v18516_v54, %v6043_v53  ;;  %v14695_v54 = vld [vmem:[%s20977_s8] ss:$12 sps:$4 sm:$0xff]   ;;  %v14717_v27 = vld [vmem:[%s20977_s8 + $0x7c] ss:$12 sps:$4 sm:$0xff]   ;;  %v14722_v38 = vld [vmem:[%s20977_s8 + $0x98] ss:$12 sps:$4 sm:$0xff]  }
 0x469   : > { %v6078_v61 = vmul.f32 %v18616_v20, %v6044_v0  ;;  %v6313_v35 = vpop.f32.mrb[144].mxu1  ;;  %v14719_v47 = vld [vmem:[%s20977_s8 + $0x90] ss:$12 sps:$4 sm:$0xff]   ;;  %v14725_v41 = vld [vmem:[%s20977_s8 + $0xac] ss:$12 sps:$4 sm:$0xff]  }
 0x46a   : > { %v6112_v46 = vadd.f32 %v18523_v28, %v6077_v2  ;;  %v6315_v25 = vpop.f32.mrb[145].mxu1  ;;  %v14698_v28 = vld [vmem:[%s20977_s8 + $0x8] ss:$12 sps:$4 sm:$0xff]   ;;  %v14726_v34 = vld [vmem:[%s20977_s8 + $0xb0] ss:$12 sps:$4 sm:$0xff]  }
 0x46b   : > { %v6113_v56 = vadd.f32 %v18627_v18, %v6078_v61  ;;  %v6317_v26 = vpop.f32.mrb[146].mxu1  ;;  %v14723_v59 = vld [vmem:[%s20977_s8 + $0xa8] ss:$12 sps:$4 sm:$0xff]   ;;  %v14729_v17 = vld [vmem:[%s20977_s8 + $0xc4] ss:$12 sps:$4 sm:$0xff]  }
 0x46c   : > { %v6134_v9 = vmax.f32 %v6112_v46, 0.0  ;;  %v6322_v51 = vpack.c.bf16 %v6317_v26, %v6313_v35  ;;  %v6319_v30 = vpop.f32.mrb[147].mxu1  ;;  %v14727_v32 = vld [vmem:[%s20977_s8 + $0xc0] ss:$12 sps:$4 sm:$0xff]   ;;  %v14730_v63 = vld [vmem:[%s20977_s8 + $0xc8] ss:$12 sps:$4 sm:$0xff]  }
 0x46d   : > { %v6135_v16 = vmax.f32 %v6113_v56, 0.0  ;;  %v6323_v12 = vpack.c.bf16 %v6319_v30, %v6315_v25  ;;  %v14733_v60 = vld [vmem:[%s20977_s8 + $0xdc] ss:$12 sps:$4 sm:$0xff]   ;;  %v14731_v53 = vld [vmem:[%s20977_s8 + $0xd8] ss:$12 sps:$4 sm:$0xff]  }
 0x46e   : > { %v18737_v4 = vpack.c.bf16 %v6136_v40, %v6134_v9  ;;  %v14734_v44 = vld [vmem:[%s20977_s8 + $0xe0] ss:$12 sps:$4 sm:$0xff]   ;;  %v14735_v2 = vld [vmem:[%s20977_s8 + $0xf0] ss:$12 sps:$4 sm:$0xff]   ;;  %v14739_v35 = vld [vmem:[%s20977_s8 + $0x108] ss:$12 sps:$4 sm:$0xff]  }
 0x46f   : > { %v18742_v58 = vpack.c.bf16 %v6137_v6, %v6135_v16  ;;  %12887 = vmatprep.mubr.msk.bf16.mxu0 %vm1959_vm1, %v6323_v12  ;;  %12888 = vmatprep.mubr.msk.bf16.mxu1 %vm1959_vm1, %v6323_v12  ;;  %v14737_v0 = vld [vmem:[%s20977_s8 + $0xf4] ss:$12 sps:$4 sm:$0xff]   ;;  %v14741_v61 = vld [vmem:[%s20977_s8 + $0x10c] ss:$12 sps:$4 sm:$0xff]   ;;  %v14742_v46 = vld [vmem:[%s20977_s8 + $0x110] ss:$12 sps:$4 sm:$0xff]  }
 0x470   : > { %6601 = vmatmul.mubr.bf16.vlgmr.msra.gmra.mrb[244].mxu0 %v6322_v51  ;;  %6644 = vmatmul.mubr.bf16.vlgmr.msra.gmra.mrb[148].mxu1 %v6322_v51  ;;  %v14743_v25 = vld [vmem:[%s20977_s8 + $0x248] ss:$12 sps:$4 sm:$0xff]   ;;  %v21302_v56 = vld [vmem:[#allocation9_spill] sm:$0xff]  ;;  %v14744_v26 = vld [vmem:[%s20977_s8 + $0x260] ss:$12 sps:$4 sm:$0xff]  }
 0x471   : > { %6848 = vmatpush1.bf16.msra.mxu0 %v14695_v54  ;;  %6891 = vmatpush1.bf16.msra.mxu1 %v14698_v28  ;;  %v21303_v40 = vld [vmem:[#allocation12_spill] sm:$0xff]  ;;  %v21304_v9 = vld [vmem:[#allocation11_spill] sm:$0xff]  ;;  %v21305_v51 = vld [vmem:[#allocation14_spill] sm:$0xff] }
 0x472   : > { %6849 = vmatprep.subr.bf16.mxu0 %v14701_v3  ;;  %6892 = vmatprep.subr.bf16.mxu1 %v21288_v11  ;;  %v21306_v30 = vld [vmem:[#allocation13_spill] sm:$0xff]  ;;  %v21307_v16 = vld [vmem:[#allocation16_spill] sm:$0xff]  ;;  %v21308_v12 = vld [vmem:[#allocation15_spill] sm:$0xff] }
 0x473   : > { %12925 = vmatprep.mubr.msk.bf16.mxu0 %vm1959_vm1, %v18653_v45  ;;  %12926 = vmatprep.mubr.msk.bf16.mxu1 %vm1959_vm1, %v18653_v45  ;;  %v14707_v45 = vld [vmem:[%s20977_s8 + $0x48] ss:$12 sps:$4 sm:$0xff]   ;;  %v14746_v6 = vld [vmem:[%s20977_s8 + $0x290] ss:$12 sps:$4 sm:$0xff]   ;;  %v21310_v3 = vld [vmem:[#allocation18_spill] sm:$0xff] }
 0x474   : > { %v14747_v54 = vld [vmem:[%s20977_s8 + $0x2a8] ss:$12 sps:$4 sm:$0xff]  }
 0x475   : > { %6850 = vmatpush1.bf16.msra.mxu0 %v14699_v19  ;;  %6893 = vmatpush1.bf16.msra.mxu1 %v14702_v29  ;;  %v21309_v28 = vld [vmem:[#allocation20_spill] sm:$0xff]  ;;  %v14748_v19 = vld [vmem:[%s20977_s8 + $0x2c0] ss:$12 sps:$4 sm:$0xff]  }
 0x476   : > { %6851 = vmatprep.subr.bf16.mxu0 %v14705_v50  ;;  %6894 = vmatprep.subr.bf16.mxu1 %v21288_v11  ;;  %v21311_v29 = vld [vmem:[#allocation68_spill] sm:$0xff] }
 0x477   : > { %v14758_v50 = vld [vmem:[%s20977_s8 + $0x244] ss:$12 sps:$4 sm:$0xff]  }
 0x479   : > { %6852 = vmatpush1.bf16.msra.mxu0 %v14703_v8  ;;  %6895 = vmatpush1.bf16.msra.mxu1 %v14706_v13  ;;  %v14749_v8 = vld [vmem:[%s20982_s13 + $0x10] sm:$0xff]   ;;  %v21312_v13 = vld [vmem:[#allocation85_spill] sm:$0xff] }
 0x47a   : > { %6853 = vmatprep.subr.bf16.mxu0 %v14709_v23  ;;  %6896 = vmatprep.subr.bf16.mxu1 %v21288_v11  ;;  %v14750_v23 = vld [vmem:[%s20977_s8 + $0x2d8] ss:$12 sps:$4 sm:$0xff]  }
 0x47d   : > { %6854 = vmatpush1.bf16.msra.mxu0 %v14707_v45  ;;  %6897 = vmatpush1.bf16.msra.mxu1 %v14710_v39  ;;  %v14756_v45 = vld [vmem:[%s20977_s8 + $0x240] ss:$12 sps:$4 sm:$0xff]   ;;  %v14761_v39 = vld [vmem:[%s20977_s8 + $0x25c] ss:$12 sps:$4 sm:$0xff]  }
 0x47e   : > { %6855 = vmatprep.subr.bf16.mxu0 %v14713_v37  ;;  %6898 = vmatprep.subr.bf16.mxu1 %v21288_v11  ;;  %v14751_v37 = vld [vmem:[%s20977_s8 + $0x2f0] ss:$12 sps:$4 sm:$0xff]  }
 0x481   : > { %6856 = vmatpush1.bf16.msra.mxu0 %v14711_v49  ;;  %6899 = vmatpush1.bf16.msra.mxu1 %v14714_v52  ;;  %v14759_v49 = vld [vmem:[%s20977_s8 + $0x258] ss:$12 sps:$4 sm:$0xff]   ;;  %v14764_v52 = vld [vmem:[%s20977_s8 + $0x274] ss:$12 sps:$4 sm:$0xff]  }
 0x482   : > { %6857 = vmatprep.subr.bf16.mxu0 %v14717_v27  ;;  %6900 = vmatprep.subr.bf16.mxu1 %v21288_v11  ;;  %v14752_v27 = vld [vmem:[%s20977_s8 + $0x308] ss:$12 sps:$4 sm:$0xff]  }
 0x485   : > { %6858 = vmatpush1.bf16.msra.mxu0 %v14715_v21  ;;  %6901 = vmatpush1.bf16.msra.mxu1 %v14718_v36  ;;  %v14762_v21 = vld [vmem:[%s20977_s8 + $0x270] ss:$12 sps:$4 sm:$0xff]   ;;  %v14767_v36 = vld [vmem:[%s20977_s8 + $0x28c] ss:$12 sps:$4 sm:$0xff]  }
 0x486   : > { %6859 = vmatprep.subr.bf16.mxu0 %v14721_v7  ;;  %6902 = vmatprep.subr.bf16.mxu1 %v21288_v11  ;;  %v14753_v7 = vld [vmem:[%s20977_s8 + $0x320] ss:$12 sps:$4 sm:$0xff]  }
 0x489   : > { %6860 = vmatpush1.bf16.msra.mxu0 %v14719_v47  ;;  %6903 = vmatpush1.bf16.msra.mxu1 %v14722_v38  ;;  %v14765_v47 = vld [vmem:[%s20977_s8 + $0x288] ss:$12 sps:$4 sm:$0xff]   ;;  %v14770_v38 = vld [vmem:[%s20977_s8 + $0x2a4] ss:$12 sps:$4 sm:$0xff]  }
 0x48a   : > { %6861 = vmatprep.subr.bf16.mxu0 %v14725_v41  ;;  %6904 = vmatprep.subr.bf16.mxu1 %v21288_v11  ;;  %v14754_v41 = vld [vmem:[%s20977_s8 + $0x338] ss:$12 sps:$4 sm:$0xff]  }
 0x48d   : > { %6862 = vmatpush1.bf16.msra.mxu0 %v14723_v59  ;;  %6905 = vmatpush1.bf16.msra.mxu1 %v14726_v34  ;;  %v14768_v59 = vld [vmem:[%s20977_s8 + $0x2a0] ss:$12 sps:$4 sm:$0xff]   ;;  %v14773_v34 = vld [vmem:[%s20977_s8 + $0x2bc] ss:$12 sps:$4 sm:$0xff]  }
 0x48e   : > { %6863 = vmatprep.subr.bf16.mxu0 %v14729_v17  ;;  %6906 = vmatprep.subr.bf16.mxu1 %v21288_v11  ;;  %v14755_v17 = vld [vmem:[%s20977_s8 + $0x350] ss:$12 sps:$4 sm:$0xff]  }
 0x491   : > { %6864 = vmatpush1.bf16.msra.mxu0 %v14727_v32  ;;  %6907 = vmatpush1.bf16.msra.mxu1 %v14730_v63  ;;  %v14771_v32 = vld [vmem:[%s20977_s8 + $0x2b8] ss:$12 sps:$4 sm:$0xff]   ;;  %v14776_v63 = vld [vmem:[%s20977_s8 + $0x2d4] ss:$12 sps:$4 sm:$0xff]  }
 0x492   : > { %6865 = vmatprep.subr.bf16.mxu0 %v14733_v60  ;;  %6908 = vmatprep.subr.bf16.mxu1 %v21288_v11  ;;  %v14774_v60 = vld [vmem:[%s20977_s8 + $0x2d0] ss:$12 sps:$4 sm:$0xff]  }
 0x495   : > { %6866 = vmatpush1.bf16.msra.mxu0 %v14731_v53  ;;  %6909 = vmatpush1.bf16.msra.mxu1 %v14734_v44  ;;  %v14779_v53 = vld [vmem:[%s20977_s8 + $0x2ec] ss:$12 sps:$4 sm:$0xff]   ;;  %v14777_v44 = vld [vmem:[%s20977_s8 + $0x2e8] ss:$12 sps:$4 sm:$0xff]  }
 0x496   : > { %6867 = vmatprep.subr.bf16.mxu0 %v14737_v0  ;;  %6910 = vmatprep.subr.bf16.mxu1 %v21288_v11  ;;  %v14782_v0 = vld [vmem:[%s20977_s8 + $0x304] ss:$12 sps:$4 sm:$0xff]  }
 0x499   : > { %6868 = vmatpush1.bf16.msra.mxu0 %v14735_v2  ;;  %6911 = vmatpush1.bf16.msra.mxu1 %v14738_v5  ;;  %v14780_v2 = vld [vmem:[%s20977_s8 + $0x300] ss:$12 sps:$4 sm:$0xff]   ;;  %v14785_v5 = vld [vmem:[%s20977_s8 + $0x31c] ss:$12 sps:$4 sm:$0xff]  }
 0x49a   : > { %6869 = vmatprep.subr.bf16.mxu0 %v14741_v61  ;;  %6912 = vmatprep.subr.bf16.mxu1 %v21288_v11  ;;  %v14783_v61 = vld [vmem:[%s20977_s8 + $0x318] ss:$12 sps:$4 sm:$0xff]  }
 0x49d   : > { %6870 = vmatpush1.bf16.msra.mxu0 %v14739_v35  ;;  %6913 = vmatpush1.bf16.msra.mxu1 %v14742_v46  ;;  %v14788_v35 = vld [vmem:[%s20977_s8 + $0x334] ss:$12 sps:$4 sm:$0xff]   ;;  %v14786_v46 = vld [vmem:[%s20977_s8 + $0x330] ss:$12 sps:$4 sm:$0xff]  }
 0x49e   : > { %6942 = vmatprep.subr.bf16.mxu0 %v21274_v31  ;;  %7274 = vmatprep.subr.bf16.mxu1 %v21288_v11 }
 0x4a0   : > { %6880 = vmatmul.mubr.bf16.vlgmr.msra.gmra.mrb[244].mxu0 %v18649_v62  ;;  %6923 = vmatmul.mubr.bf16.vlgmr.msra.gmra.mrb[148].mxu1 %v18649_v62  ;;  %v14745_v62 = vld [vmem:[%s20977_s8 + $0x278] ss:$12 sps:$4 sm:$0xff]  }
 0x4a1   : > { %6943 = vmatpush1.bf16.msra.mxu0 %v21302_v56  ;;  %7275 = vmatpush1.bf16.msra.mxu1 %v14743_v25  ;;  %v14791_v25 = vld [vmem:[%s20977_s8 + $0x34c] ss:$12 sps:$4 sm:$0xff]  }
 0x4a2   : > { %6944 = vmatprep.subr.bf16.mxu0 %v21303_v40  ;;  %7276 = vmatprep.subr.bf16.mxu1 %v21288_v11 }
 0x4a3   : > { %6974 = vmatprep.mubr.bf16.mxu0 %v21288_v11 }
 0x4a5   : > { %6945 = vmatpush1.bf16.msra.mxu0 %v21304_v9  ;;  %7277 = vmatpush1.bf16.msra.mxu1 %v14744_v26  ;;  %v14789_v26 = vld [vmem:[%s20977_s8 + $0x348] ss:$12 sps:$4 sm:$0xff]  }
 0x4a6   : > { %6946 = vmatprep.subr.bf16.mxu0 %v21305_v51  ;;  %7278 = vmatprep.subr.bf16.mxu1 %v21288_v11 }
 0x4a9   : > { %6947 = vmatpush1.bf16.msra.mxu0 %v21306_v30  ;;  %7279 = vmatpush1.bf16.msra.mxu1 %v14745_v62  ;;  %v14794_v62 = vld [vmem:[%s20977_s8 + $0x364] ss:$12 sps:$4 sm:$0xff]  }
 0x4aa   : > { %6948 = vmatprep.subr.bf16.mxu0 %v21307_v16  ;;  %7280 = vmatprep.subr.bf16.mxu1 %v21288_v11 }
 0x4ad   : > { %6949 = vmatpush1.bf16.msra.mxu0 %v21308_v12  ;;  %7281 = vmatpush1.bf16.msra.mxu1 %v14746_v6 }
 0x4ae   : > { %6950 = vmatprep.subr.bf16.mxu0 %v21309_v28  ;;  %7282 = vmatprep.subr.bf16.mxu1 %v21288_v11 }
 0x4b1   : > { %6951 = vmatpush1.bf16.msra.mxu0 %v21310_v3  ;;  %7283 = vmatpush1.bf16.msra.mxu1 %v14747_v54 }
 0x4b2   : > { %6952 = vmatprep.subr.bf16.mxu0 %v21311_v29  ;;  %7284 = vmatprep.subr.bf16.mxu1 %v21288_v11 }
 0x4b5   : > { %6953 = vmatpush1.bf16.msra.mxu0 %v21312_v13  ;;  %7285 = vmatpush1.bf16.msra.mxu1 %v14748_v19 }
 0x4b6   : > { %7286 = vmatprep.subr.bf16.mxu1 %v21288_v11  ;;  %7231 = vmatprep.subr.bf16.mxu0 %v14758_v50 }
 0x4b8   : > { %12930 = vmatmul.mubr.msk.bf16.vlgmr.msra.gmra.mrb[248].mxu0 %vm6163_vm8, %v14749_v8 }
 0x4b9   : > { %7287 = vmatpush1.bf16.msra.mxu1 %v14750_v23  ;;  %7232 = vmatpush1.bf16.msra.mxu0 %v14756_v45  ;;  %v14792_v45 = vld [vmem:[%s20977_s8 + $0x360] ss:$12 sps:$4 sm:$0xff]  }
 0x4ba   : > { %7288 = vmatprep.subr.bf16.mxu1 %v21288_v11  ;;  %7233 = vmatprep.subr.bf16.mxu0 %v14761_v39  ;;  %v14797_v39 = vld [vmem:[%s20977_s8 + $0x37c] ss:$12 sps:$4 sm:$0xff]  }
 0x4bd   : > { %7289 = vmatpush1.bf16.msra.mxu1 %v14751_v37  ;;  %7234 = vmatpush1.bf16.msra.mxu0 %v14759_v49  ;;  %v14795_v37 = vld [vmem:[%s20977_s8 + $0x378] ss:$12 sps:$4 sm:$0xff]   ;;  %v14800_v49 = vld [vmem:[%s20977_s8 + $0x394] ss:$12 sps:$4 sm:$0xff]  }
 0x4be   : > { %7290 = vmatprep.subr.bf16.mxu1 %v21288_v11  ;;  %7235 = vmatprep.subr.bf16.mxu0 %v14764_v52  ;;  %v14798_v52 = vld [vmem:[%s20977_s8 + $0x390] ss:$12 sps:$4 sm:$0xff]  }
 0x4c1   : > { %7291 = vmatpush1.bf16.msra.mxu1 %v14752_v27  ;;  %7236 = vmatpush1.bf16.msra.mxu0 %v14762_v21  ;;  %v14803_v27 = vld [vmem:[%s20977_s8 + $0x3ac] ss:$12 sps:$4 sm:$0xff]   ;;  %v14801_v21 = vld [vmem:[%s20977_s8 + $0x3a8] ss:$12 sps:$4 sm:$0xff]  }
 0x4c2   : > { %7292 = vmatprep.subr.bf16.mxu1 %v21288_v11  ;;  %7237 = vmatprep.subr.bf16.mxu0 %v14767_v36  ;;  %v14806_v36 = vld [vmem:[%s20977_s8 + $0x3c4] ss:$12 sps:$4 sm:$0xff]  }
 0x4c5   : > { %7293 = vmatpush1.bf16.msra.mxu1 %v14753_v7  ;;  %7238 = vmatpush1.bf16.msra.mxu0 %v14765_v47  ;;  %v14804_v7 = vld [vmem:[%s20977_s8 + $0x3c0] ss:$12 sps:$4 sm:$0xff]   ;;  %v14809_v47 = vld [vmem:[%s20977_s8 + $0x3dc] ss:$12 sps:$4 sm:$0xff]  }
 0x4c6   : > { %7294 = vmatprep.subr.bf16.mxu1 %v21288_v11  ;;  %7239 = vmatprep.subr.bf16.mxu0 %v14770_v38  ;;  %v14807_v38 = vld [vmem:[%s20977_s8 + $0x3d8] ss:$12 sps:$4 sm:$0xff]  }
 0x4c9   : > { %7295 = vmatpush1.bf16.msra.mxu1 %v14754_v41  ;;  %7240 = vmatpush1.bf16.msra.mxu0 %v14768_v59  ;;  %v14813_v41 = vld [vmem:[%s20977_s8 + $0x3f4] ss:$12 sps:$4 sm:$0xff]   ;;  %v14810_v59 = vld [vmem:[%s20982_s13 + $0x18] sm:$0xff]  }
 0x4ca   : > { %7296 = vmatprep.subr.bf16.mxu1 %v21288_v11  ;;  %7241 = vmatprep.subr.bf16.mxu0 %v14773_v34  ;;  %v14811_v34 = vld [vmem:[%s20977_s8 + $0x3f0] ss:$12 sps:$4 sm:$0xff]  }
 0x4cd   : > { %7297 = vmatpush1.bf16.msra.mxu1 %v14755_v17  ;;  %7242 = vmatpush1.bf16.msra.mxu0 %v14771_v32  ;;  %v14829_v17 = vld [vmem:[%s20977_s8 + $0x368] ss:$12 sps:$4 sm:$0xff]   ;;  %v14816_v32 = vld [vmem:[%s20977_s8 + $0x40c] ss:$12 sps:$4 sm:$0xff]  }
 0x4ce   : > { %7332 = vmatprep.subr.bf16.mxu1 %v21274_v31  ;;  %7243 = vmatprep.subr.bf16.mxu0 %v14776_v63  ;;  %v14814_v63 = vld [vmem:[%s20977_s8 + $0x408] ss:$12 sps:$4 sm:$0xff]  }
 0x4d1   : > { %7244 = vmatpush1.bf16.msra.mxu0 %v14774_v60  ;;  %v14830_v60 = vld [vmem:[%s20977_s8 + $0x380] ss:$12 sps:$4 sm:$0xff]  }
 0x4d2   : > { %7245 = vmatprep.subr.bf16.mxu0 %v14779_v53  ;;  %v14819_v53 = vld [vmem:[%s20977_s8 + $0x424] ss:$12 sps:$4 sm:$0xff]  }
 0x4d5   : > { %7246 = vmatpush1.bf16.msra.mxu0 %v14777_v44  ;;  %v14817_v44 = vld [vmem:[%s20977_s8 + $0x420] ss:$12 sps:$4 sm:$0xff]  }
 0x4d6   : > { %7247 = vmatprep.subr.bf16.mxu0 %v14782_v0  ;;  %v14831_v0 = vld [vmem:[%s20977_s8 + $0x398] ss:$12 sps:$4 sm:$0xff]  }
 0x4d9   : > { %7248 = vmatpush1.bf16.msra.mxu0 %v14780_v2  ;;  %v14822_v2 = vld [vmem:[%s20977_s8 + $0x43c] ss:$12 sps:$4 sm:$0xff]  }
 0x4da   : > { %7249 = vmatprep.subr.bf16.mxu0 %v14785_v5  ;;  %v14820_v5 = vld [vmem:[%s20977_s8 + $0x438] ss:$12 sps:$4 sm:$0xff]  }
 0x4dd   : > { %7250 = vmatpush1.bf16.msra.mxu0 %v14783_v61  ;;  %v14832_v61 = vld [vmem:[%s20977_s8 + $0x3b0] ss:$12 sps:$4 sm:$0xff]  }
 0x4de   : > { %7251 = vmatprep.subr.bf16.mxu0 %v14788_v35  ;;  %v14825_v35 = vld [vmem:[%s20977_s8 + $0x454] ss:$12 sps:$4 sm:$0xff]  }
 0x4e1   : > { %7252 = vmatpush1.bf16.msra.mxu0 %v14786_v46  ;;  %v14823_v46 = vld [vmem:[%s20977_s8 + $0x450] ss:$12 sps:$4 sm:$0xff]  }
 0x4e2   : > { %7253 = vmatprep.subr.bf16.mxu0 %v14791_v25  ;;  %v14833_v25 = vld [vmem:[%s20977_s8 + $0x3c8] ss:$12 sps:$4 sm:$0xff]  }
 0x4e5   : > { %7254 = vmatpush1.bf16.msra.mxu0 %v14789_v26  ;;  %v14828_v26 = vld [vmem:[%s20977_s8 + $0x46c] ss:$12 sps:$4 sm:$0xff]  }
 0x4e6   : > { %7621 = vmatprep.subr.bf16.mxu0 %v14794_v62  ;;  %v14826_v62 = vld [vmem:[%s20977_s8 + $0x468] ss:$12 sps:$4 sm:$0xff]  }
 0x58b   : > { %v6976_v6 = vpop.f32.mrb[248].mxu0 }
 0x58c   : > { %v6978_v54 = vpop.f32.mrb[249].mxu0 }
 0x58d   : > { %v6980_v19 = vpop.f32.mrb[250].mxu0 }
 0x58e   : > { %v6985_v50 = vpack.c.bf16 %v6980_v19, %v6976_v6  ;;  %v6982_v8 = vpop.f32.mrb[251].mxu0  ;;  %v14834_v6 = vld [vmem:[%s20977_s8 + $0x3e0] ss:$12 sps:$4 sm:$0xff]   ;;  %v14836_v19 = vld [vmem:[%s20977_s8 + $0x410] ss:$12 sps:$4 sm:$0xff]  }
 0x58f   : > { %v6986_v23 = vpack.c.bf16 %v6982_v8, %v6978_v54  ;;  %v14835_v54 = vld [vmem:[%s20977_s8 + $0x3f8] ss:$12 sps:$4 sm:$0xff]   ;;  %v14838_v8 = vld [vmem:[%s20977_s8 + $0x440] ss:$12 sps:$4 sm:$0xff]  }
 0x591   : > { %13015 = vmatprep.mubr.msk.bf16.mxu0 %vm1959_vm1, %v6986_v23  ;;  %13016 = vmatprep.mubr.msk.bf16.mxu1 %vm1959_vm1, %v6986_v23  ;;  %v14839_v23 = vld [vmem:[%s20977_s8 + $0x458] ss:$12 sps:$4 sm:$0xff]  }
 0x592   : > { %7264 = vmatmul.mubr.bf16.vlgmr.msra.gmra.mrb[244].mxu0 %v6985_v50  ;;  %7307 = vmatmul.mubr.bf16.vlgmr.msra.gmra.mrb[148].mxu1 %v6985_v50  ;;  %v14837_v50 = vld [vmem:[%s20977_s8 + $0x428] ss:$12 sps:$4 sm:$0xff]  }
 0x593   : > { %7333 = vmatpush1.bf16.msra.mxu1 %v21302_v56  ;;  %7622 = vmatpush1.bf16.msra.mxu0 %v14792_v45  ;;  %v14840_v45 = vld [vmem:[%s20977_s8 + $0x470] ss:$12 sps:$4 sm:$0xff]  }
 0x594   : > { %7334 = vmatprep.subr.bf16.mxu1 %v21303_v40  ;;  %7623 = vmatprep.subr.bf16.mxu0 %v14797_v39 }
 0x595   : > { %7364 = vmatprep.mubr.bf16.mxu1 %v21288_v11 }
 0x597   : > { %7335 = vmatpush1.bf16.msra.mxu1 %v21304_v9  ;;  %7624 = vmatpush1.bf16.msra.mxu0 %v14795_v37 }
 0x598   : > { %7336 = vmatprep.subr.bf16.mxu1 %v21305_v51  ;;  %7625 = vmatprep.subr.bf16.mxu0 %v14800_v49 }
 0x59b   : > { %7337 = vmatpush1.bf16.msra.mxu1 %v21306_v30  ;;  %7626 = vmatpush1.bf16.msra.mxu0 %v14798_v52 }
 0x59c   : > { %7338 = vmatprep.subr.bf16.mxu1 %v21307_v16  ;;  %7627 = vmatprep.subr.bf16.mxu0 %v14803_v27 }
 0x59f   : > { %7339 = vmatpush1.bf16.msra.mxu1 %v21308_v12  ;;  %7628 = vmatpush1.bf16.msra.mxu0 %v14801_v21 }
 0x5a0   : > { %7340 = vmatprep.subr.bf16.mxu1 %v21309_v28  ;;  %7629 = vmatprep.subr.bf16.mxu0 %v14806_v36  ;;  %v14841_v36 = vld [vmem:[%s20977_s8 + $0x488] ss:$12 sps:$4 sm:$0xff]  }
 0x5a3   : > { %7341 = vmatpush1.bf16.msra.mxu1 %v21310_v3  ;;  %7630 = vmatpush1.bf16.msra.mxu0 %v14804_v7  ;;  %v14842_v7 = vld [vmem:[%s20977_s8 + $0x4a0] ss:$12 sps:$4 sm:$0xff]  }
 0x5a4   : > { %7342 = vmatprep.subr.bf16.mxu1 %v21311_v29  ;;  %7631 = vmatprep.subr.bf16.mxu0 %v14809_v47  ;;  %v14843_v47 = vld [vmem:[%s20977_s8 + $0x4b8] ss:$12 sps:$4 sm:$0xff]  }
 0x5a7   : > { %7343 = vmatpush1.bf16.msra.mxu1 %v21312_v13  ;;  %7632 = vmatpush1.bf16.msra.mxu0 %v14807_v38  ;;  %v14844_v38 = vld [vmem:[%s20977_s8 + $0x4d0] ss:$12 sps:$4 sm:$0xff]  }
 0x5a8   : > { %7633 = vmatprep.subr.bf16.mxu0 %v14813_v41  ;;  %7664 = vmatprep.subr.bf16.mxu1 %v21288_v11  ;;  %v14845_v41 = vld [vmem:[%s20977_s8 + $0x4e8] ss:$12 sps:$4 sm:$0xff]  }
 0x5aa   : > { %13020 = vmatmul.mubr.msk.bf16.vlgmr.msra.gmra.mrb[152].mxu1 %vm6163_vm8, %v14810_v59  ;;  %v14846_v59 = vld [vmem:[%s20977_s8 + $0x500] ss:$12 sps:$4 sm:$0xff]  }
 0x5ab   : > { %7634 = vmatpush1.bf16.msra.mxu0 %v14811_v34  ;;  %7665 = vmatpush1.bf16.msra.mxu1 %v14829_v17  ;;  %v14856_v34 = vld [vmem:[%s20977_s8 + $0x484] ss:$12 sps:$4 sm:$0xff]  }
 0x5ac   : > { %7635 = vmatprep.subr.bf16.mxu0 %v14816_v32  ;;  %7666 = vmatprep.subr.bf16.mxu1 %v21288_v11  ;;  %v14847_v17 = vld [vmem:[%s20982_s13 + $0x20] sm:$0xff]  }
 0x5ad   : > { %v14848_v32 = vld [vmem:[%s20977_s8 + $0x518] ss:$12 sps:$4 sm:$0xff]  }
 0x5af   : > { %7636 = vmatpush1.bf16.msra.mxu0 %v14814_v63  ;;  %7667 = vmatpush1.bf16.msra.mxu1 %v14830_v60  ;;  %v14854_v63 = vld [vmem:[%s20977_s8 + $0x480] ss:$12 sps:$4 sm:$0xff]   ;;  %v14859_v60 = vld [vmem:[%s20977_s8 + $0x49c] ss:$12 sps:$4 sm:$0xff]  }
 0x5b0   : > { %7637 = vmatprep.subr.bf16.mxu0 %v14819_v53  ;;  %7668 = vmatprep.subr.bf16.mxu1 %v21288_v11  ;;  %v14849_v53 = vld [vmem:[%s20977_s8 + $0x530] ss:$12 sps:$4 sm:$0xff]  }
 0x5b3   : > { %7638 = vmatpush1.bf16.msra.mxu0 %v14817_v44  ;;  %7669 = vmatpush1.bf16.msra.mxu1 %v14831_v0  ;;  %v14857_v44 = vld [vmem:[%s20977_s8 + $0x498] ss:$12 sps:$4 sm:$0xff]   ;;  %v14862_v0 = vld [vmem:[%s20977_s8 + $0x4b4] ss:$12 sps:$4 sm:$0xff]  }
 0x5b4   : > { %7639 = vmatprep.subr.bf16.mxu0 %v14822_v2  ;;  %7670 = vmatprep.subr.bf16.mxu1 %v21288_v11  ;;  %v14850_v2 = vld [vmem:[%s20977_s8 + $0x548] ss:$12 sps:$4 sm:$0xff]  }
 0x5b7   : > { %7640 = vmatpush1.bf16.msra.mxu0 %v14820_v5  ;;  %7671 = vmatpush1.bf16.msra.mxu1 %v14832_v61  ;;  %v14860_v5 = vld [vmem:[%s20977_s8 + $0x4b0] ss:$12 sps:$4 sm:$0xff]   ;;  %v14865_v61 = vld [vmem:[%s20977_s8 + $0x4cc] ss:$12 sps:$4 sm:$0xff]  }
 0x5b8   : > { %7641 = vmatprep.subr.bf16.mxu0 %v14825_v35  ;;  %7672 = vmatprep.subr.bf16.mxu1 %v21288_v11  ;;  %v14851_v35 = vld [vmem:[%s20977_s8 + $0x560] ss:$12 sps:$4 sm:$0xff]  }
 0x5bb   : > { %7642 = vmatpush1.bf16.msra.mxu0 %v14823_v46  ;;  %7673 = vmatpush1.bf16.msra.mxu1 %v14833_v25  ;;  %v14863_v46 = vld [vmem:[%s20977_s8 + $0x4c8] ss:$12 sps:$4 sm:$0xff]   ;;  %v14868_v25 = vld [vmem:[%s20977_s8 + $0x4e4] ss:$12 sps:$4 sm:$0xff]  }
 0x5bc   : > { %7643 = vmatprep.subr.bf16.mxu0 %v14828_v26  ;;  %7674 = vmatprep.subr.bf16.mxu1 %v21288_v11  ;;  %v14852_v26 = vld [vmem:[%s20977_s8 + $0x578] ss:$12 sps:$4 sm:$0xff]  }
 0x5bf   : > { %7644 = vmatpush1.bf16.msra.mxu0 %v14826_v62  ;;  %7675 = vmatpush1.bf16.msra.mxu1 %v14834_v6  ;;  %v14866_v62 = vld [vmem:[%s20977_s8 + $0x4e0] ss:$12 sps:$4 sm:$0xff]   ;;  %v14871_v6 = vld [vmem:[%s20977_s8 + $0x4fc] ss:$12 sps:$4 sm:$0xff]  }
 0x5c0   : > { %7722 = vmatprep.subr.bf16.mxu0 %v21274_v31  ;;  %7676 = vmatprep.subr.bf16.mxu1 %v21288_v11 }
 0x5c3   : > { %7677 = vmatpush1.bf16.msra.mxu1 %v14835_v54  ;;  %v14853_v54 = vld [vmem:[%s20977_s8 + $0x590] ss:$12 sps:$4 sm:$0xff]  }
 0x5c4   : > { %7678 = vmatprep.subr.bf16.mxu1 %v21288_v11 }
 0x5c7   : > { %7679 = vmatpush1.bf16.msra.mxu1 %v14836_v19  ;;  %v14869_v19 = vld [vmem:[%s20977_s8 + $0x4f8] ss:$12 sps:$4 sm:$0xff]  }
 0x5c8   : > { %7680 = vmatprep.subr.bf16.mxu1 %v21288_v11 }
 0x5cb   : > { %7681 = vmatpush1.bf16.msra.mxu1 %v14837_v50  ;;  %v14874_v50 = vld [vmem:[%s20977_s8 + $0x514] ss:$12 sps:$4 sm:$0xff]  }
 0x5cc   : > { %7682 = vmatprep.subr.bf16.mxu1 %v21288_v11 }
 0x5cf   : > { %7683 = vmatpush1.bf16.msra.mxu1 %v14838_v8  ;;  %v14872_v8 = vld [vmem:[%s20977_s8 + $0x510] ss:$12 sps:$4 sm:$0xff]  }
 0x5d0   : > { %7684 = vmatprep.subr.bf16.mxu1 %v21288_v11 }
 0x5d3   : > { %7685 = vmatpush1.bf16.msra.mxu1 %v14839_v23  ;;  %v14877_v23 = vld [vmem:[%s20977_s8 + $0x52c] ss:$12 sps:$4 sm:$0xff]  }
 0x5d4   : > { %7686 = vmatprep.subr.bf16.mxu1 %v21288_v11 }
 0x5d7   : > { %7687 = vmatpush1.bf16.msra.mxu1 %v14840_v45  ;;  %v14875_v45 = vld [vmem:[%s20977_s8 + $0x528] ss:$12 sps:$4 sm:$0xff]  }
 0x5d8   : > { %8054 = vmatprep.subr.bf16.mxu1 %v21288_v11 }
 0x67d   : > { %v7366_v39 = vpop.f32.mrb[152].mxu1 }
 0x67e   : > { %v7368_v37 = vpop.f32.mrb[153].mxu1 }
 0x67f   : > { %v7370_v49 = vpop.f32.mrb[154].mxu1 }
 0x680   : > { %v7375_v52 = vpack.c.bf16 %v7370_v49, %v7366_v39  ;;  %v7372_v27 = vpop.f32.mrb[155].mxu1  ;;  %v14880_v39 = vld [vmem:[%s20977_s8 + $0x544] ss:$12 sps:$4 sm:$0xff]   ;;  %v14883_v49 = vld [vmem:[%s20977_s8 + $0x55c] ss:$12 sps:$4 sm:$0xff]  }
 0x681   : > { %v7376_v21 = vpack.c.bf16 %v7372_v27, %v7368_v37  ;;  %v14878_v37 = vld [vmem:[%s20977_s8 + $0x540] ss:$12 sps:$4 sm:$0xff]  }
 0x682   : > { %v14886_v27 = vld [vmem:[%s20977_s8 + $0x574] ss:$12 sps:$4 sm:$0xff]  }
 0x683   : > { %13105 = vmatprep.mubr.msk.bf16.mxu0 %vm1959_vm1, %v7376_v21  ;;  %13106 = vmatprep.mubr.msk.bf16.mxu1 %vm1959_vm1, %v7376_v21  ;;  %v14884_v21 = vld [vmem:[%s20977_s8 + $0x570] ss:$12 sps:$4 sm:$0xff]  }
 0x684   : > { %7654 = vmatmul.mubr.bf16.vlgmr.msra.gmra.mrb[244].mxu0 %v7375_v52  ;;  %7697 = vmatmul.mubr.bf16.vlgmr.msra.gmra.mrb[148].mxu1 %v7375_v52  ;;  %v14881_v52 = vld [vmem:[%s20977_s8 + $0x558] ss:$12 sps:$4 sm:$0xff]  }
 0x685   : > { %7723 = vmatpush1.bf16.msra.mxu0 %v21302_v56  ;;  %8055 = vmatpush1.bf16.msra.mxu1 %v14841_v36  ;;  %v14889_v36 = vld [vmem:[%s20977_s8 + $0x58c] ss:$12 sps:$4 sm:$0xff]  }
 0x686   : > { %7724 = vmatprep.subr.bf16.mxu0 %v21303_v40  ;;  %8056 = vmatprep.subr.bf16.mxu1 %v21288_v11 }
 0x687   : > { %7754 = vmatprep.mubr.bf16.mxu0 %v21288_v11 }
 0x689   : > { %7725 = vmatpush1.bf16.msra.mxu0 %v21304_v9  ;;  %8057 = vmatpush1.bf16.msra.mxu1 %v14842_v7  ;;  %v14887_v7 = vld [vmem:[%s20977_s8 + $0x588] ss:$12 sps:$4 sm:$0xff]  }
 0x68a   : > { %7726 = vmatprep.subr.bf16.mxu0 %v21305_v51  ;;  %8058 = vmatprep.subr.bf16.mxu1 %v21288_v11 }
 0x68d   : > { %7727 = vmatpush1.bf16.msra.mxu0 %v21306_v30  ;;  %8059 = vmatpush1.bf16.msra.mxu1 %v14843_v47  ;;  %v14892_v47 = vld [vmem:[%s20977_s8 + $0x5a4] ss:$12 sps:$4 sm:$0xff]  }
 0x68e   : > { %7728 = vmatprep.subr.bf16.mxu0 %v21307_v16  ;;  %8060 = vmatprep.subr.bf16.mxu1 %v21288_v11 }
 0x691   : > { %7729 = vmatpush1.bf16.msra.mxu0 %v21308_v12  ;;  %8061 = vmatpush1.bf16.msra.mxu1 %v14844_v38 }
 0x692   : > { %7730 = vmatprep.subr.bf16.mxu0 %v21309_v28  ;;  %8062 = vmatprep.subr.bf16.mxu1 %v21288_v11 }
 0x695   : > { %7731 = vmatpush1.bf16.msra.mxu0 %v21310_v3  ;;  %8063 = vmatpush1.bf16.msra.mxu1 %v14845_v41 }
 0x696   : > { %7732 = vmatprep.subr.bf16.mxu0 %v21311_v29  ;;  %8064 = vmatprep.subr.bf16.mxu1 %v21288_v11 }
 0x699   : > { %7733 = vmatpush1.bf16.msra.mxu0 %v21312_v13  ;;  %8065 = vmatpush1.bf16.msra.mxu1 %v14846_v59 }
 0x69a   : > { %8066 = vmatprep.subr.bf16.mxu1 %v21288_v11  ;;  %8011 = vmatprep.subr.bf16.mxu0 %v14856_v34 }
 0x69c   : > { %13110 = vmatmul.mubr.msk.bf16.vlgmr.msra.gmra.mrb[252].mxu0 %vm6163_vm8, %v14847_v17 }
 0x69d   : > { %8067 = vmatpush1.bf16.msra.mxu1 %v14848_v32  ;;  %8012 = vmatpush1.bf16.msra.mxu0 %v14854_v63  ;;  %v14890_v63 = vld [vmem:[%s20977_s8 + $0x5a0] ss:$12 sps:$4 sm:$0xff]  }
 0x69e   : > { %8068 = vmatprep.subr.bf16.mxu1 %v21288_v11  ;;  %8013 = vmatprep.subr.bf16.mxu0 %v14859_v60  ;;  %v14895_v60 = vld [vmem:[%s20977_s8 + $0x5bc] ss:$12 sps:$4 sm:$0xff]  }
 0x6a1   : > { %8069 = vmatpush1.bf16.msra.mxu1 %v14849_v53  ;;  %8014 = vmatpush1.bf16.msra.mxu0 %v14857_v44  ;;  %v14893_v53 = vld [vmem:[%s20977_s8 + $0x5b8] ss:$12 sps:$4 sm:$0xff]   ;;  %v14898_v44 = vld [vmem:[%s20977_s8 + $0x5d4] ss:$12 sps:$4 sm:$0xff]  }
 0x6a2   : > { %8070 = vmatprep.subr.bf16.mxu1 %v21288_v11  ;;  %8015 = vmatprep.subr.bf16.mxu0 %v14862_v0  ;;  %v14896_v0 = vld [vmem:[%s20977_s8 + $0x5d0] ss:$12 sps:$4 sm:$0xff]  }
 0x6a5   : > { %8071 = vmatpush1.bf16.msra.mxu1 %v14850_v2  ;;  %8016 = vmatpush1.bf16.msra.mxu0 %v14860_v5  ;;  %v14901_v2 = vld [vmem:[%s20977_s8 + $0x5ec] ss:$12 sps:$4 sm:$0xff]   ;;  %v14899_v5 = vld [vmem:[%s20977_s8 + $0x5e8] ss:$12 sps:$4 sm:$0xff]  }
 0x6a6   : > { %8072 = vmatprep.subr.bf16.mxu1 %v21288_v11  ;;  %8017 = vmatprep.subr.bf16.mxu0 %v14865_v61  ;;  %v14904_v61 = vld [vmem:[%s20977_s8 + $0x604] ss:$12 sps:$4 sm:$0xff]  }
 0x6a9   : > { %8073 = vmatpush1.bf16.msra.mxu1 %v14851_v35  ;;  %8018 = vmatpush1.bf16.msra.mxu0 %v14863_v46  ;;  %v14902_v35 = vld [vmem:[%s20977_s8 + $0x600] ss:$12 sps:$4 sm:$0xff]   ;;  %v14907_v46 = vld [vmem:[%s20977_s8 + $0x61c] ss:$12 sps:$4 sm:$0xff]  }
 0x6aa   : > { %8074 = vmatprep.subr.bf16.mxu1 %v21288_v11  ;;  %8019 = vmatprep.subr.bf16.mxu0 %v14868_v25  ;;  %v14905_v25 = vld [vmem:[%s20977_s8 + $0x618] ss:$12 sps:$4 sm:$0xff]  }
 0x6ad   : > { %8075 = vmatpush1.bf16.msra.mxu1 %v14852_v26  ;;  %8020 = vmatpush1.bf16.msra.mxu0 %v14866_v62  ;;  %v14911_v26 = vld [vmem:[%s20977_s8 + $0x634] ss:$12 sps:$4 sm:$0xff]   ;;  %v14908_v62 = vld [vmem:[%s20982_s13 + $0x28] sm:$0xff]  }
 0x6ae   : > { %8076 = vmatprep.subr.bf16.mxu1 %v21288_v11  ;;  %8021 = vmatprep.subr.bf16.mxu0 %v14871_v6  ;;  %v14909_v6 = vld [vmem:[%s20977_s8 + $0x630] ss:$12 sps:$4 sm:$0xff]  }
 0x6b1   : > { %8077 = vmatpush1.bf16.msra.mxu1 %v14853_v54  ;;  %8022 = vmatpush1.bf16.msra.mxu0 %v14869_v19  ;;  %v14927_v54 = vld [vmem:[%s20977_s8 + $0x5a8] ss:$12 sps:$4 sm:$0xff]   ;;  %v14914_v19 = vld [vmem:[%s20977_s8 + $0x64c] ss:$12 sps:$4 sm:$0xff]  }
 0x6b2   : > { %8112 = vmatprep.subr.bf16.mxu1 %v21274_v31  ;;  %8023 = vmatprep.subr.bf16.mxu0 %v14874_v50  ;;  %v14912_v50 = vld [vmem:[%s20977_s8 + $0x648] ss:$12 sps:$4 sm:$0xff]  }
 0x6b5   : > { %8024 = vmatpush1.bf16.msra.mxu0 %v14872_v8  ;;  %v14928_v8 = vld [vmem:[%s20977_s8 + $0x5c0] ss:$12 sps:$4 sm:$0xff]  }
 0x6b6   : > { %8025 = vmatprep.subr.bf16.mxu0 %v14877_v23  ;;  %v14917_v23 = vld [vmem:[%s20977_s8 + $0x664] ss:$12 sps:$4 sm:$0xff]  }
 0x6b9   : > { %8026 = vmatpush1.bf16.msra.mxu0 %v14875_v45  ;;  %v14915_v45 = vld [vmem:[%s20977_s8 + $0x660] ss:$12 sps:$4 sm:$0xff]  }
 0x6ba   : > { %8027 = vmatprep.subr.bf16.mxu0 %v14880_v39  ;;  %v14929_v39 = vld [vmem:[%s20977_s8 + $0x5d8] ss:$12 sps:$4 sm:$0xff]  }
 0x6bd   : > { %8028 = vmatpush1.bf16.msra.mxu0 %v14878_v37  ;;  %v14920_v37 = vld [vmem:[%s20977_s8 + $0x67c] ss:$12 sps:$4 sm:$0xff]  }
 0x6be   : > { %8029 = vmatprep.subr.bf16.mxu0 %v14883_v49  ;;  %v14918_v49 = vld [vmem:[%s20977_s8 + $0x678] ss:$12 sps:$4 sm:$0xff]  }
 0x6c1   : > { %8030 = vmatpush1.bf16.msra.mxu0 %v14881_v52  ;;  %v14930_v52 = vld [vmem:[%s20977_s8 + $0x5f0] ss:$12 sps:$4 sm:$0xff]  }
 0x6c2   : > { %8031 = vmatprep.subr.bf16.mxu0 %v14886_v27  ;;  %v14923_v27 = vld [vmem:[%s20977_s8 + $0x694] ss:$12 sps:$4 sm:$0xff]  }
 0x6c5   : > { %8032 = vmatpush1.bf16.msra.mxu0 %v14884_v21  ;;  %v14921_v21 = vld [vmem:[%s20977_s8 + $0x690] ss:$12 sps:$4 sm:$0xff]  }
 0x6c6   : > { %8033 = vmatprep.subr.bf16.mxu0 %v14889_v36  ;;  %v14931_v36 = vld [vmem:[%s20977_s8 + $0x608] ss:$12 sps:$4 sm:$0xff]  }
 0x6c9   : > { %8034 = vmatpush1.bf16.msra.mxu0 %v14887_v7  ;;  %v14926_v7 = vld [vmem:[%s20977_s8 + $0x6ac] ss:$12 sps:$4 sm:$0xff]  }
 0x6ca   : > { %8401 = vmatprep.subr.bf16.mxu0 %v14892_v47  ;;  %v14924_v47 = vld [vmem:[%s20977_s8 + $0x6a8] ss:$12 sps:$4 sm:$0xff]  }
 0x76f   : > { %v7756_v38 = vpop.f32.mrb[252].mxu0 }
 0x770   : > { %v7758_v41 = vpop.f32.mrb[253].mxu0 }
 0x771   : > { %v7760_v59 = vpop.f32.mrb[254].mxu0 }
 0x772   : > { %v7765_v34 = vpack.c.bf16 %v7760_v59, %v7756_v38  ;;  %v7762_v17 = vpop.f32.mrb[255].mxu0  ;;  %v14932_v38 = vld [vmem:[%s20977_s8 + $0x620] ss:$12 sps:$4 sm:$0xff]   ;;  %v14934_v59 = vld [vmem:[%s20977_s8 + $0x650] ss:$12 sps:$4 sm:$0xff]  }
 0x773   : > { %v7766_v32 = vpack.c.bf16 %v7762_v17, %v7758_v41  ;;  %v14933_v41 = vld [vmem:[%s20977_s8 + $0x638] ss:$12 sps:$4 sm:$0xff]   ;;  %v14936_v17 = vld [vmem:[%s20977_s8 + $0x680] ss:$12 sps:$4 sm:$0xff]  }
 0x775   : > { %13195 = vmatprep.mubr.msk.bf16.mxu0 %vm1959_vm1, %v7766_v32  ;;  %13196 = vmatprep.mubr.msk.bf16.mxu1 %vm1959_vm1, %v7766_v32  ;;  %v14937_v32 = vld [vmem:[%s20977_s8 + $0x698] ss:$12 sps:$4 sm:$0xff]  }
 0x776   : > { %8044 = vmatmul.mubr.bf16.vlgmr.msra.gmra.mrb[244].mxu0 %v7765_v34  ;;  %8087 = vmatmul.mubr.bf16.vlgmr.msra.gmra.mrb[148].mxu1 %v7765_v34  ;;  %v14935_v34 = vld [vmem:[%s20977_s8 + $0x668] ss:$12 sps:$4 sm:$0xff]  }
 0x777   : > { %8113 = vmatpush1.bf16.msra.mxu1 %v21302_v56  ;;  %8402 = vmatpush1.bf16.msra.mxu0 %v14890_v63  ;;  %v14938_v63 = vld [vmem:[%s20977_s8 + $0x6b0] ss:$12 sps:$4 sm:$0xff]  }
 0x778   : > { %8114 = vmatprep.subr.bf16.mxu1 %v21303_v40  ;;  %8403 = vmatprep.subr.bf16.mxu0 %v14895_v60 }
 0x779   : > { %8144 = vmatprep.mubr.bf16.mxu1 %v21288_v11 }
 0x77b   : > { %8115 = vmatpush1.bf16.msra.mxu1 %v21304_v9  ;;  %8404 = vmatpush1.bf16.msra.mxu0 %v14893_v53 }
 0x77c   : > { %8116 = vmatprep.subr.bf16.mxu1 %v21305_v51  ;;  %8405 = vmatprep.subr.bf16.mxu0 %v14898_v44 }
 0x77f   : > { %8117 = vmatpush1.bf16.msra.mxu1 %v21306_v30  ;;  %8406 = vmatpush1.bf16.msra.mxu0 %v14896_v0 }
 0x780   : > { %8118 = vmatprep.subr.bf16.mxu1 %v21307_v16  ;;  %8407 = vmatprep.subr.bf16.mxu0 %v14901_v2 }
 0x783   : > { %8119 = vmatpush1.bf16.msra.mxu1 %v21308_v12  ;;  %8408 = vmatpush1.bf16.msra.mxu0 %v14899_v5 }
 0x784   : > { %8120 = vmatprep.subr.bf16.mxu1 %v21309_v28  ;;  %8409 = vmatprep.subr.bf16.mxu0 %v14904_v61  ;;  %v14939_v61 = vld [vmem:[%s20977_s8 + $0x6c8] ss:$12 sps:$4 sm:$0xff]  }
 0x787   : > { %8121 = vmatpush1.bf16.msra.mxu1 %v21310_v3  ;;  %8410 = vmatpush1.bf16.msra.mxu0 %v14902_v35  ;;  %v14940_v35 = vld [vmem:[%s20977_s8 + $0x6e0] ss:$12 sps:$4 sm:$0xff]  }
 0x788   : > { %8122 = vmatprep.subr.bf16.mxu1 %v21311_v29  ;;  %8411 = vmatprep.subr.bf16.mxu0 %v14907_v46  ;;  %v14941_v46 = vld [vmem:[%s20977_s8 + $0x6f8] ss:$12 sps:$4 sm:$0xff]  }
 0x78b   : > { %8123 = vmatpush1.bf16.msra.mxu1 %v21312_v13  ;;  %8412 = vmatpush1.bf16.msra.mxu0 %v14905_v25  ;;  %v14942_v25 = vld [vmem:[%s20977_s8 + $0x710] ss:$12 sps:$4 sm:$0xff]  }
 0x78c   : > { %8413 = vmatprep.subr.bf16.mxu0 %v14911_v26  ;;  %8444 = vmatprep.subr.bf16.mxu1 %v21288_v11  ;;  %v14943_v26 = vld [vmem:[%s20977_s8 + $0x728] ss:$12 sps:$4 sm:$0xff]  }
 0x78e   : > { %13200 = vmatmul.mubr.msk.bf16.vlgmr.msra.gmra.mrb[156].mxu1 %vm6163_vm8, %v14908_v62  ;;  %v14944_v62 = vld [vmem:[%s20977_s8 + $0x740] ss:$12 sps:$4 sm:$0xff]  }
 0x78f   : > { %8414 = vmatpush1.bf16.msra.mxu0 %v14909_v6  ;;  %8445 = vmatpush1.bf16.msra.mxu1 %v14927_v54  ;;  %v14954_v6 = vld [vmem:[%s20977_s8 + $0x6c4] ss:$12 sps:$4 sm:$0xff]  }
 0x790   : > { %8415 = vmatprep.subr.bf16.mxu0 %v14914_v19  ;;  %8446 = vmatprep.subr.bf16.mxu1 %v21288_v11  ;;  %v19457_v54 = vld [vmem:[%s20982_s13 + $0x30] sm:$0xff]   ;;  %v14946_v19 = vld [vmem:[%s20977_s8 + $0x758] ss:$12 sps:$4 sm:$0xff]  }
 0x793   : > { %8416 = vmatpush1.bf16.msra.mxu0 %v14912_v50  ;;  %8447 = vmatpush1.bf16.msra.mxu1 %v14928_v8  ;;  %v14952_v50 = vld [vmem:[%s20977_s8 + $0x6c0] ss:$12 sps:$4 sm:$0xff]   ;;  %v14957_v8 = vld [vmem:[%s20977_s8 + $0x6dc] ss:$12 sps:$4 sm:$0xff]  }
 0x794   : > { %8417 = vmatprep.subr.bf16.mxu0 %v14917_v23  ;;  %8448 = vmatprep.subr.bf16.mxu1 %v21288_v11  ;;  %v14947_v23 = vld [vmem:[%s20977_s8 + $0x770] ss:$12 sps:$4 sm:$0xff]  }
 0x797   : > { %8418 = vmatpush1.bf16.msra.mxu0 %v14915_v45  ;;  %8449 = vmatpush1.bf16.msra.mxu1 %v14929_v39  ;;  %v14955_v45 = vld [vmem:[%s20977_s8 + $0x6d8] ss:$12 sps:$4 sm:$0xff]   ;;  %v14960_v39 = vld [vmem:[%s20977_s8 + $0x6f4] ss:$12 sps:$4 sm:$0xff]  }
 0x798   : > { %8419 = vmatprep.subr.bf16.mxu0 %v14920_v37  ;;  %8450 = vmatprep.subr.bf16.mxu1 %v21288_v11  ;;  %v14948_v37 = vld [vmem:[%s20977_s8 + $0x788] ss:$12 sps:$4 sm:$0xff]  }
 0x79b   : > { %8420 = vmatpush1.bf16.msra.mxu0 %v14918_v49  ;;  %8451 = vmatpush1.bf16.msra.mxu1 %v14930_v52  ;;  %v14958_v49 = vld [vmem:[%s20977_s8 + $0x6f0] ss:$12 sps:$4 sm:$0xff]   ;;  %v14963_v52 = vld [vmem:[%s20977_s8 + $0x70c] ss:$12 sps:$4 sm:$0xff]  }
 0x79c   : > { %8421 = vmatprep.subr.bf16.mxu0 %v14923_v27  ;;  %8452 = vmatprep.subr.bf16.mxu1 %v21288_v11  ;;  %v14949_v27 = vld [vmem:[%s20977_s8 + $0x7a0] ss:$12 sps:$4 sm:$0xff]  }
 0x79f   : > { %8422 = vmatpush1.bf16.msra.mxu0 %v14921_v21  ;;  %8453 = vmatpush1.bf16.msra.mxu1 %v14931_v36  ;;  %v14961_v21 = vld [vmem:[%s20977_s8 + $0x708] ss:$12 sps:$4 sm:$0xff]   ;;  %v14966_v36 = vld [vmem:[%s20977_s8 + $0x724] ss:$12 sps:$4 sm:$0xff]  }
 0x7a0   : > { %8423 = vmatprep.subr.bf16.mxu0 %v14926_v7  ;;  %8454 = vmatprep.subr.bf16.mxu1 %v21288_v11  ;;  %v14950_v7 = vld [vmem:[%s20977_s8 + $0x7b8] ss:$12 sps:$4 sm:$0xff]  }
 0x7a3   : > { %8424 = vmatpush1.bf16.msra.mxu0 %v14924_v47  ;;  %8455 = vmatpush1.bf16.msra.mxu1 %v14932_v38  ;;  %v14964_v47 = vld [vmem:[%s20977_s8 + $0x720] ss:$12 sps:$4 sm:$0xff]   ;;  %v14969_v38 = vld [vmem:[%s20977_s8 + $0x73c] ss:$12 sps:$4 sm:$0xff]  }
 0x7a4   : > { %8502 = vmatprep.subr.bf16.mxu0 %v21274_v31  ;;  %8456 = vmatprep.subr.bf16.mxu1 %v21288_v11 }
 0x7a7   : > { %8457 = vmatpush1.bf16.msra.mxu1 %v14933_v41  ;;  %v14951_v41 = vld [vmem:[%s20977_s8 + $0x7d0] ss:$12 sps:$4 sm:$0xff]  }
 0x7a8   : > { %8458 = vmatprep.subr.bf16.mxu1 %v21288_v11 }
 0x7ab   : > { %8459 = vmatpush1.bf16.msra.mxu1 %v14934_v59  ;;  %v14967_v59 = vld [vmem:[%s20977_s8 + $0x738] ss:$12 sps:$4 sm:$0xff]  }
 0x7ac   : > { %8460 = vmatprep.subr.bf16.mxu1 %v21288_v11 }
 0x7af   : > { %8461 = vmatpush1.bf16.msra.mxu1 %v14935_v34  ;;  %v14972_v34 = vld [vmem:[%s20977_s8 + $0x754] ss:$12 sps:$4 sm:$0xff]  }
 0x7b0   : > { %8462 = vmatprep.subr.bf16.mxu1 %v21288_v11 }
 0x7b3   : > { %8463 = vmatpush1.bf16.msra.mxu1 %v14936_v17  ;;  %v14970_v17 = vld [vmem:[%s20977_s8 + $0x750] ss:$12 sps:$4 sm:$0xff]  }
 0x7b4   : > { %8464 = vmatprep.subr.bf16.mxu1 %v21288_v11 }
 0x7b7   : > { %8465 = vmatpush1.bf16.msra.mxu1 %v14937_v32  ;;  %v14975_v32 = vld [vmem:[%s20977_s8 + $0x76c] ss:$12 sps:$4 sm:$0xff]  }
 0x7b8   : > { %8466 = vmatprep.subr.bf16.mxu1 %v21288_v11 }
 0x7bb   : > { %8467 = vmatpush1.bf16.msra.mxu1 %v14938_v63  ;;  %v14973_v63 = vld [vmem:[%s20977_s8 + $0x768] ss:$12 sps:$4 sm:$0xff]  }
 0x7bc   : > { %8834 = vmatprep.subr.bf16.mxu1 %v21288_v11 }
 0x861   : > { %v8146_v60 = vpop.f32.mrb[156].mxu1 }
 0x862   : > { %v8148_v53 = vpop.f32.mrb[157].mxu1 }
 0x863   : > { %v8150_v44 = vpop.f32.mrb[158].mxu1 }
 0x864   : > { %v8155_v0 = vpack.c.bf16 %v8150_v44, %v8146_v60  ;;  %v8152_v2 = vpop.f32.mrb[159].mxu1  ;;  %v14978_v60 = vld [vmem:[%s20977_s8 + $0x784] ss:$12 sps:$4 sm:$0xff]   ;;  %v14981_v44 = vld [vmem:[%s20977_s8 + $0x79c] ss:$12 sps:$4 sm:$0xff]  }
 0x865   : > { %v8156_v5 = vpack.c.bf16 %v8152_v2, %v8148_v53  ;;  %v14976_v53 = vld [vmem:[%s20977_s8 + $0x780] ss:$12 sps:$4 sm:$0xff]  }
 0x866   : > { %v14984_v2 = vld [vmem:[%s20977_s8 + $0x7b4] ss:$12 sps:$4 sm:$0xff]  }
 0x867   : > { %13285 = vmatprep.mubr.msk.bf16.mxu0 %vm1959_vm1, %v8156_v5  ;;  %13286 = vmatprep.mubr.msk.bf16.mxu1 %vm1959_vm1, %v8156_v5  ;;  %v14982_v5 = vld [vmem:[%s20977_s8 + $0x7b0] ss:$12 sps:$4 sm:$0xff]  }
 0x868   : > { %8434 = vmatmul.mubr.bf16.vlgmr.msra.gmra.mrb[244].mxu0 %v8155_v0  ;;  %8477 = vmatmul.mubr.bf16.vlgmr.msra.gmra.mrb[148].mxu1 %v8155_v0  ;;  %v14979_v0 = vld [vmem:[%s20977_s8 + $0x798] ss:$12 sps:$4 sm:$0xff]  }
 0x869   : > { %8503 = vmatpush1.bf16.msra.mxu0 %v21302_v56  ;;  %8835 = vmatpush1.bf16.msra.mxu1 %v14939_v61  ;;  %v14987_v61 = vld [vmem:[%s20977_s8 + $0x7cc] ss:$12 sps:$4 sm:$0xff]  }
 0x86a   : > { %8504 = vmatprep.subr.bf16.mxu0 %v21303_v40  ;;  %8836 = vmatprep.subr.bf16.mxu1 %v21288_v11 }
 0x86b   : > { %8534 = vmatprep.mubr.bf16.mxu0 %v21288_v11 }
 0x86d   : > { %8505 = vmatpush1.bf16.msra.mxu0 %v21304_v9  ;;  %8837 = vmatpush1.bf16.msra.mxu1 %v14940_v35  ;;  %v14985_v35 = vld [vmem:[%s20977_s8 + $0x7c8] ss:$12 sps:$4 sm:$0xff]  }
 0x86e   : > { %8506 = vmatprep.subr.bf16.mxu0 %v21305_v51  ;;  %8838 = vmatprep.subr.bf16.mxu1 %v21288_v11 }
 0x871   : > { %8507 = vmatpush1.bf16.msra.mxu0 %v21306_v30  ;;  %8839 = vmatpush1.bf16.msra.mxu1 %v14941_v46  ;;  %v14990_v46 = vld [vmem:[%s20977_s8 + $0x7e4] ss:$12 sps:$4 sm:$0xff]  }
 0x872   : > { %8508 = vmatprep.subr.bf16.mxu0 %v21307_v16  ;;  %8840 = vmatprep.subr.bf16.mxu1 %v21288_v11 }
 0x875   : > { %8509 = vmatpush1.bf16.msra.mxu0 %v21308_v12  ;;  %8841 = vmatpush1.bf16.msra.mxu1 %v14942_v25 }
 0x876   : > { %8510 = vmatprep.subr.bf16.mxu0 %v21309_v28  ;;  %8842 = vmatprep.subr.bf16.mxu1 %v21288_v11 }
 0x879   : > { %8511 = vmatpush1.bf16.msra.mxu0 %v21310_v3  ;;  %8843 = vmatpush1.bf16.msra.mxu1 %v14943_v26 }
 0x87a   : > { %8512 = vmatprep.subr.bf16.mxu0 %v21311_v29  ;;  %8844 = vmatprep.subr.bf16.mxu1 %v21288_v11 }
 0x87d   : > { %8513 = vmatpush1.bf16.msra.mxu0 %v21312_v13  ;;  %8845 = vmatpush1.bf16.msra.mxu1 %v14944_v62 }
 0x87e   : > { %8846 = vmatprep.subr.bf16.mxu1 %v21288_v11  ;;  %8791 = vmatprep.subr.bf16.mxu0 %v14954_v6 }
 0x880   : > { %13290 = vmatmul.mubr.msk.bf16.vlgmr.msra.gmra.mrb[0].mxu0 %vm6163_vm8, %v19457_v54 }
 0x881   : > { %8847 = vmatpush1.bf16.msra.mxu1 %v14946_v19  ;;  %8792 = vmatpush1.bf16.msra.mxu0 %v14952_v50 }
 0x882   : > { %8848 = vmatprep.subr.bf16.mxu1 %v21288_v11  ;;  %8793 = vmatprep.subr.bf16.mxu0 %v14957_v8  ;;  %v14988_v8 = vld [vmem:[%s20977_s8 + $0x7e0] ss:$12 sps:$4 sm:$0xff]  }
 0x885   : > { %8849 = vmatpush1.bf16.msra.mxu1 %v14947_v23  ;;  %8794 = vmatpush1.bf16.msra.mxu0 %v14955_v45  ;;  %v14993_v23 = vld [vmem:[%s20977_s8 + $0x7fc] ss:$12 sps:$4 sm:$0xff]   ;;  %v14991_v45 = vld [vmem:[%s20977_s8 + $0x7f8] ss:$12 sps:$4 sm:$0xff]  }
 0x886   : > { %8850 = vmatprep.subr.bf16.mxu1 %v21288_v11  ;;  %8795 = vmatprep.subr.bf16.mxu0 %v14960_v39  ;;  %v14996_v39 = vld [vmem:[%s20977_s8 + $0x814] ss:$12 sps:$4 sm:$0xff]  }
 0x889   : > { %8851 = vmatpush1.bf16.msra.mxu1 %v14948_v37  ;;  %8796 = vmatpush1.bf16.msra.mxu0 %v14958_v49  ;;  %v14994_v37 = vld [vmem:[%s20977_s8 + $0x810] ss:$12 sps:$4 sm:$0xff]   ;;  %v14999_v49 = vld [vmem:[%s20977_s8 + $0x82c] ss:$12 sps:$4 sm:$0xff]  }
 0x88a   : > { %8852 = vmatprep.subr.bf16.mxu1 %v21288_v11  ;;  %8797 = vmatprep.subr.bf16.mxu0 %v14963_v52  ;;  %v14997_v52 = vld [vmem:[%s20977_s8 + $0x828] ss:$12 sps:$4 sm:$0xff]  }
 0x88d   : > { %8853 = vmatpush1.bf16.msra.mxu1 %v14949_v27  ;;  %8798 = vmatpush1.bf16.msra.mxu0 %v14961_v21  ;;  %v15002_v27 = vld [vmem:[%s20977_s8 + $0x844] ss:$12 sps:$4 sm:$0xff]   ;;  %v15000_v21 = vld [vmem:[%s20977_s8 + $0x840] ss:$12 sps:$4 sm:$0xff]  }
 0x88e   : > { %8854 = vmatprep.subr.bf16.mxu1 %v21288_v11  ;;  %8799 = vmatprep.subr.bf16.mxu0 %v14966_v36  ;;  %v15005_v36 = vld [vmem:[%s20977_s8 + $0x85c] ss:$12 sps:$4 sm:$0xff]  }
 0x891   : > { %8855 = vmatpush1.bf16.msra.mxu1 %v14950_v7  ;;  %8800 = vmatpush1.bf16.msra.mxu0 %v14964_v47  ;;  %v15003_v7 = vld [vmem:[%s20977_s8 + $0x858] ss:$12 sps:$4 sm:$0xff]   ;;  %v15009_v47 = vld [vmem:[%s20977_s8 + $0x874] ss:$12 sps:$4 sm:$0xff]  }
 0x892   : > { %8856 = vmatprep.subr.bf16.mxu1 %v21288_v11  ;;  %8801 = vmatprep.subr.bf16.mxu0 %v14969_v38  ;;  %v19611_v38 = vld [vmem:[%s20982_s13 + $0x38] sm:$0xff]  }
 0x895   : > { %8857 = vmatpush1.bf16.msra.mxu1 %v14951_v41  ;;  %8802 = vmatpush1.bf16.msra.mxu0 %v14967_v59  ;;  %v15007_v41 = vld [vmem:[%s20977_s8 + $0x870] ss:$12 sps:$4 sm:$0xff]   ;;  %v15025_v59 = vld [vmem:[%s20977_s8 + $0x7e8] ss:$12 sps:$4 sm:$0xff]  }
 0x896   : > { %8892 = vmatprep.subr.bf16.mxu1 %v21274_v31  ;;  %8803 = vmatprep.subr.bf16.mxu0 %v14972_v34  ;;  %v15012_v34 = vld [vmem:[%s20977_s8 + $0x88c] ss:$12 sps:$4 sm:$0xff]  }
 0x899   : > { %8804 = vmatpush1.bf16.msra.mxu0 %v14970_v17  ;;  %v15010_v17 = vld [vmem:[%s20977_s8 + $0x888] ss:$12 sps:$4 sm:$0xff]  }
 0x89a   : > { %8805 = vmatprep.subr.bf16.mxu0 %v14975_v32  ;;  %v15026_v32 = vld [vmem:[%s20977_s8 + $0x800] ss:$12 sps:$4 sm:$0xff]  }
 0x89d   : > { %8806 = vmatpush1.bf16.msra.mxu0 %v14973_v63  ;;  %v15015_v63 = vld [vmem:[%s20977_s8 + $0x8a4] ss:$12 sps:$4 sm:$0xff]  }
 0x89e   : > { %8807 = vmatprep.subr.bf16.mxu0 %v14978_v60  ;;  %v15013_v60 = vld [vmem:[%s20977_s8 + $0x8a0] ss:$12 sps:$4 sm:$0xff]  }
 0x8a1   : > { %8808 = vmatpush1.bf16.msra.mxu0 %v14976_v53  ;;  %v15027_v53 = vld [vmem:[%s20977_s8 + $0x818] ss:$12 sps:$4 sm:$0xff]  }
 0x8a2   : > { %8809 = vmatprep.subr.bf16.mxu0 %v14981_v44  ;;  %v15018_v44 = vld [vmem:[%s20977_s8 + $0x8bc] ss:$12 sps:$4 sm:$0xff]  }
 0x8a5   : > { %8810 = vmatpush1.bf16.msra.mxu0 %v14979_v0  ;;  %v15016_v0 = vld [vmem:[%s20977_s8 + $0x8b8] ss:$12 sps:$4 sm:$0xff]  }
 0x8a6   : > { %8811 = vmatprep.subr.bf16.mxu0 %v14984_v2  ;;  %v15028_v2 = vld [vmem:[%s20977_s8 + $0x830] ss:$12 sps:$4 sm:$0xff]  }
 0x8a9   : > { %8812 = vmatpush1.bf16.msra.mxu0 %v14982_v5  ;;  %v15021_v5 = vld [vmem:[%s20977_s8 + $0x8d4] ss:$12 sps:$4 sm:$0xff]  }
 0x8aa   : > { %8813 = vmatprep.subr.bf16.mxu0 %v14987_v61  ;;  %v15019_v61 = vld [vmem:[%s20977_s8 + $0x8d0] ss:$12 sps:$4 sm:$0xff]  }
 0x8ad   : > { %8814 = vmatpush1.bf16.msra.mxu0 %v14985_v35  ;;  %v15029_v35 = vld [vmem:[%s20977_s8 + $0x848] ss:$12 sps:$4 sm:$0xff]  }
 0x8ae   : > { %9181 = vmatprep.subr.bf16.mxu0 %v14990_v46  ;;  %v15024_v46 = vld [vmem:[%s20977_s8 + $0x8ec] ss:$12 sps:$4 sm:$0xff]  }
 0x953   : > { %v8536_v25 = vpop.f32.mrb[0].mxu0 }
 0x954   : > { %v8538_v26 = vpop.f32.mrb[1].mxu0 }
 0x955   : > { %v8540_v62 = vpop.f32.mrb[2].mxu0 }
 0x956   : > { %v8545_v6 = vpack.c.bf16 %v8540_v62, %v8536_v25  ;;  %v8542_v19 = vpop.f32.mrb[3].mxu0  ;;  %v15022_v25 = vld [vmem:[%s20977_s8 + $0x8e8] ss:$12 sps:$4 sm:$0xff]   ;;  %v15031_v62 = vld [vmem:[%s20977_s8 + $0x878] ss:$12 sps:$4 sm:$0xff]  }
 0x957   : > { %v8546_v50 = vpack.c.bf16 %v8542_v19, %v8538_v26  ;;  %v15030_v26 = vld [vmem:[%s20977_s8 + $0x860] ss:$12 sps:$4 sm:$0xff]   ;;  %v15033_v19 = vld [vmem:[%s20977_s8 + $0x8a8] ss:$12 sps:$4 sm:$0xff]  }
 0x959   : > { %13375 = vmatprep.mubr.msk.bf16.mxu0 %vm1959_vm1, %v8546_v50  ;;  %13376 = vmatprep.mubr.msk.bf16.mxu1 %vm1959_vm1, %v8546_v50  ;;  %v15035_v50 = vld [vmem:[%s20977_s8 + $0x8d8] ss:$12 sps:$4 sm:$0xff]  }
 0x95a   : > { %8824 = vmatmul.mubr.bf16.vlgmr.msra.gmra.mrb[244].mxu0 %v8545_v6  ;;  %8867 = vmatmul.mubr.bf16.vlgmr.msra.gmra.mrb[148].mxu1 %v8545_v6  ;;  %v15032_v6 = vld [vmem:[%s20977_s8 + $0x890] ss:$12 sps:$4 sm:$0xff]  }
 0x95b   : > { %8893 = vmatpush1.bf16.msra.mxu1 %v21302_v56  ;;  %9182 = vmatpush1.bf16.msra.mxu0 %v14988_v8  ;;  %v15036_v8 = vld [vmem:[%s20977_s8 + $0x8f0] ss:$12 sps:$4 sm:$0xff]  }
 0x95c   : > { %8894 = vmatprep.subr.bf16.mxu1 %v21303_v40  ;;  %9183 = vmatprep.subr.bf16.mxu0 %v14993_v23 }
 0x95d   : > { %8924 = vmatprep.mubr.bf16.mxu1 %v21288_v11 }
 0x95f   : > { %8895 = vmatpush1.bf16.msra.mxu1 %v21304_v9  ;;  %9184 = vmatpush1.bf16.msra.mxu0 %v14991_v45 }
 0x960   : > { %8896 = vmatprep.subr.bf16.mxu1 %v21305_v51  ;;  %9185 = vmatprep.subr.bf16.mxu0 %v14996_v39 }
 0x963   : > { %8897 = vmatpush1.bf16.msra.mxu1 %v21306_v30  ;;  %9186 = vmatpush1.bf16.msra.mxu0 %v14994_v37 }
 0x964   : > { %8898 = vmatprep.subr.bf16.mxu1 %v21307_v16  ;;  %9187 = vmatprep.subr.bf16.mxu0 %v14999_v49 }
 0x967   : > { %8899 = vmatpush1.bf16.msra.mxu1 %v21308_v12  ;;  %9188 = vmatpush1.bf16.msra.mxu0 %v14997_v52 }
 0x968   : > { %8900 = vmatprep.subr.bf16.mxu1 %v21309_v28  ;;  %9189 = vmatprep.subr.bf16.mxu0 %v15002_v27  ;;  %v15037_v27 = vld [vmem:[%s20977_s8 + $0x908] ss:$12 sps:$4 sm:$0xff]  }
 0x96b   : > { %8901 = vmatpush1.bf16.msra.mxu1 %v21310_v3  ;;  %9190 = vmatpush1.bf16.msra.mxu0 %v15000_v21  ;;  %v15038_v21 = vld [vmem:[%s20977_s8 + $0x920] ss:$12 sps:$4 sm:$0xff]  }
 0x96c   : > { %8902 = vmatprep.subr.bf16.mxu1 %v21311_v29  ;;  %9191 = vmatprep.subr.bf16.mxu0 %v15005_v36  ;;  %v15039_v36 = vld [vmem:[%s20977_s8 + $0x938] ss:$12 sps:$4 sm:$0xff]  }
 0x96f   : > { %8903 = vmatpush1.bf16.msra.mxu1 %v21312_v13  ;;  %9192 = vmatpush1.bf16.msra.mxu0 %v15003_v7  ;;  %v15052_v7 = vld [vmem:[%s20977_s8 + $0x930] ss:$12 sps:$4 sm:$0xff]  }
 0x970   : > { %9193 = vmatprep.subr.bf16.mxu0 %v15009_v47  ;;  %9224 = vmatprep.subr.bf16.mxu1 %v21288_v11  ;;  %v15055_v47 = vld [vmem:[%s20977_s8 + $0x9c8] ss:$12 sps:$4 sm:$0xff]  }
 0x972   : > { %13380 = vmatmul.mubr.msk.bf16.vlgmr.msra.gmra.mrb[160].mxu1 %vm6163_vm8, %v19611_v38 }
 0x973   : > { %9194 = vmatpush1.bf16.msra.mxu0 %v15007_v41  ;;  %9225 = vmatpush1.bf16.msra.mxu1 %v15025_v59  ;;  %v15058_v41 = vld [vmem:[%s20977_s8 + $0x94c] ss:$12 sps:$4 sm:$0xff]   ;;  %v15056_v59 = vld [vmem:[%s20977_s8 + $0x948] ss:$12 sps:$4 sm:$0xff]  }
 0x974   : > { %9195 = vmatprep.subr.bf16.mxu0 %v15012_v34  ;;  %9226 = vmatprep.subr.bf16.mxu1 %v21288_v11  ;;  %v15059_v34 = vld [vmem:[%s20977_s8 + $0x9e0] ss:$12 sps:$4 sm:$0xff]  }
 0x977   : > { %9196 = vmatpush1.bf16.msra.mxu0 %v15010_v17  ;;  %9227 = vmatpush1.bf16.msra.mxu1 %v15026_v32  ;;  %v15062_v17 = vld [vmem:[%s20977_s8 + $0x964] ss:$12 sps:$4 sm:$0xff]   ;;  %v15060_v32 = vld [vmem:[%s20977_s8 + $0x960] ss:$12 sps:$4 sm:$0xff]  }
 0x978   : > { %9197 = vmatprep.subr.bf16.mxu0 %v15015_v63  ;;  %9228 = vmatprep.subr.bf16.mxu1 %v21288_v11  ;;  %v15063_v63 = vld [vmem:[%s20977_s8 + $0x9f8] ss:$12 sps:$4 sm:$0xff]  }
 0x97b   : > { %9198 = vmatpush1.bf16.msra.mxu0 %v15013_v60  ;;  %9229 = vmatpush1.bf16.msra.mxu1 %v15027_v53  ;;  %v15066_v60 = vld [vmem:[%s20977_s8 + $0x97c] ss:$12 sps:$4 sm:$0xff]   ;;  %v15064_v53 = vld [vmem:[%s20977_s8 + $0x978] ss:$12 sps:$4 sm:$0xff]  }
 0x97c   : > { %9199 = vmatprep.subr.bf16.mxu0 %v15018_v44  ;;  %9230 = vmatprep.subr.bf16.mxu1 %v21288_v11  ;;  %v15067_v44 = vld [vmem:[%s20977_s8 + $0xa10] ss:$12 sps:$4 sm:$0xff]  }
 0x97f   : > { %9200 = vmatpush1.bf16.msra.mxu0 %v15016_v0  ;;  %9231 = vmatpush1.bf16.msra.mxu1 %v15028_v2  ;;  %v15070_v0 = vld [vmem:[%s20977_s8 + $0x994] ss:$12 sps:$4 sm:$0xff]   ;;  %v15068_v2 = vld [vmem:[%s20977_s8 + $0x990] ss:$12 sps:$4 sm:$0xff]  }
 0x980   : > { %9201 = vmatprep.subr.bf16.mxu0 %v15021_v5  ;;  %9232 = vmatprep.subr.bf16.mxu1 %v21288_v11  ;;  %v15073_v5 = vld [vmem:[%s20977_s8 + $0x9ac] ss:$12 sps:$4 sm:$0xff]  }
 0x983   : > { %9202 = vmatpush1.bf16.msra.mxu0 %v15019_v61  ;;  %9233 = vmatpush1.bf16.msra.mxu1 %v15029_v35  ;;  %v15071_v61 = vld [vmem:[%s20977_s8 + $0x9a8] ss:$12 sps:$4 sm:$0xff]   ;;  %v15076_v35 = vld [vmem:[%s20977_s8 + $0x9c4] ss:$12 sps:$4 sm:$0xff]  }
 0x984   : > { %9203 = vmatprep.subr.bf16.mxu0 %v15024_v46  ;;  %9234 = vmatprep.subr.bf16.mxu1 %v21288_v11  ;;  %v15074_v46 = vld [vmem:[%s20977_s8 + $0x9c0] ss:$12 sps:$4 sm:$0xff]  }
 0x987   : > { %9204 = vmatpush1.bf16.msra.mxu0 %v15022_v25  ;;  %9235 = vmatpush1.bf16.msra.mxu1 %v15030_v26  ;;  %v15079_v25 = vld [vmem:[%s20977_s8 + $0x9dc] ss:$12 sps:$4 sm:$0xff]   ;;  %v15077_v26 = vld [vmem:[%s20977_s8 + $0x9d8] ss:$12 sps:$4 sm:$0xff]  }
 0x988   : > { %9282 = vmatprep.subr.bf16.mxu0 %v21274_v31  ;;  %9236 = vmatprep.subr.bf16.mxu1 %v21288_v11  ;;  %v15034_v31 = vld [vmem:[%s20977_s8 + $0x8c0] ss:$12 sps:$4 sm:$0xff]  }
 0x98b   : > { %9237 = vmatpush1.bf16.msra.mxu1 %v15031_v62  ;;  %v15082_v62 = vld [vmem:[%s20977_s8 + $0x9f4] ss:$12 sps:$4 sm:$0xff]  }
 0x98c   : > { %9238 = vmatprep.subr.bf16.mxu1 %v21288_v11 }
 0x98f   : > { %9239 = vmatpush1.bf16.msra.mxu1 %v15032_v6  ;;  %v15080_v6 = vld [vmem:[%s20977_s8 + $0x9f0] ss:$12 sps:$4 sm:$0xff]  }
 0x990   : > { %9240 = vmatprep.subr.bf16.mxu1 %v21288_v11 }
 0x993   : > { %9241 = vmatpush1.bf16.msra.mxu1 %v15033_v19  ;;  %v15085_v19 = vld [vmem:[%s20977_s8 + $0xa0c] ss:$12 sps:$4 sm:$0xff]  }
 0x994   : > { %9242 = vmatprep.subr.bf16.mxu1 %v21288_v11 }
 0x997   : > { %9243 = vmatpush1.bf16.msra.mxu1 %v15034_v31  ;;  %v15083_v31 = vld [vmem:[%s20977_s8 + $0xa08] ss:$12 sps:$4 sm:$0xff]  }
 0x998   : > { %9244 = vmatprep.subr.bf16.mxu1 %v21288_v11 }
 0x99b   : > { %9245 = vmatpush1.bf16.msra.mxu1 %v15035_v50 }
 0x99c   : > { %9246 = vmatprep.subr.bf16.mxu1 %v21288_v11 }
 0x99f   : > { %9247 = vmatpush1.bf16.msra.mxu1 %v15036_v8 }
 0x9a0   : > { %9614 = vmatprep.subr.bf16.mxu1 %v21288_v11 }
 0xa45   : > { %v8926_v23 = vpop.f32.mrb[160].mxu1 }
 0xa46   : > { %v8928_v45 = vpop.f32.mrb[161].mxu1 }
 0xa47   : > { %v8930_v39 = vpop.f32.mrb[162].mxu1 }
 0xa48   : > { %v8935_v37 = vpack.c.bf16 %v8930_v39, %v8926_v23  ;;  %v8932_v49 = vpop.f32.mrb[163].mxu1 }
 0xa49   : > { %v8936_v52 = vpack.c.bf16 %v8932_v49, %v8928_v45  ;;  %v6086_v49 = vmul.f32 %v18616_v20, %v18539_v42  ;;  %v6142_v20 = vmax.f32 %v18543_v15, 0.0 }
 0xa4b   : > { %13465 = vmatprep.mubr.msk.bf16.mxu0 %vm1959_vm1, %v8936_v52  ;;  %13466 = vmatprep.mubr.msk.bf16.mxu1 %vm1959_vm1, %v8936_v52  ;;  %v6121_v52 = vadd.f32 %v18627_v18, %v6086_v49 }
 0xa4c   : > { %9214 = vmatmul.mubr.bf16.vlgmr.msra.gmra.mrb[244].mxu0 %v8935_v37  ;;  %9257 = vmatmul.mubr.bf16.vlgmr.msra.gmra.mrb[148].mxu1 %v8935_v37 }
 0xa4d   : > { %9283 = vmatpush1.bf16.msra.mxu0 %v21302_v56  ;;  %9615 = vmatpush1.bf16.msra.mxu1 %v15037_v27  ;;  %v15040_v56 = vld [vmem:[%s20977_s8 + $0x950] ss:$12 sps:$4 sm:$0xff]   ;;  %v6143_v42 = vmax.f32 %v6121_v52, 0.0  ;;  %v9724_v27 = vpack.c.bf16 %v6142_v20, %v6142_v20 }
 0xa4e   : > { %9284 = vmatprep.subr.bf16.mxu0 %v21303_v40  ;;  %9616 = vmatprep.subr.bf16.mxu1 %v21288_v11  ;;  %v15041_v40 = vld [vmem:[%s20977_s8 + $0x968] ss:$12 sps:$4 sm:$0xff]  }
 0xa4f   : > { %9314 = vmatprep.mubr.bf16.mxu0 %v21288_v11  ;;  %v9725_v18 = vpack.c.bf16 %v6143_v42, %v6143_v42 }
 0xa51   : > { %9285 = vmatpush1.bf16.msra.mxu0 %v21304_v9  ;;  %9617 = vmatpush1.bf16.msra.mxu1 %v15038_v21  ;;  %v15042_v9 = vld [vmem:[%s20977_s8 + $0x980] ss:$12 sps:$4 sm:$0xff]   ;;  %v21313_v21 = vld [vmem:[#allocation60_spill] sm:$0xff] }
 0xa52   : > { %9286 = vmatprep.subr.bf16.mxu0 %v21305_v51  ;;  %9618 = vmatprep.subr.bf16.mxu1 %v21288_v11  ;;  %v15046_v51 = vld [vmem:[%s20977_s8 + $0x904] ss:$12 sps:$4 sm:$0xff]   ;;  %v19873_v15 = vand.u32 %v9724_v27, %v21313_v21 }
 0xa55   : > { %9287 = vmatpush1.bf16.msra.mxu0 %v21306_v30  ;;  %9619 = vmatpush1.bf16.msra.mxu1 %v15039_v36  ;;  %v19741_v30 = vld [vmem:[%s20982_s13 + $0x40] sm:$0xff]   ;;  %v19866_v36 = vand.u32 %v9725_v18, %v21313_v21 }
 0xa56   : > { %9288 = vmatprep.subr.bf16.mxu0 %v21307_v16  ;;  %9620 = vmatprep.subr.bf16.mxu1 %v21288_v11  ;;  %v15044_v16 = vld [vmem:[%s20977_s8 + $0x900] ss:$12 sps:$4 sm:$0xff]  }
 0xa59   : > { %9289 = vmatpush1.bf16.msra.mxu0 %v21308_v12  ;;  %9621 = vmatpush1.bf16.msra.mxu1 %v15040_v56  ;;  %v15047_v12 = vld [vmem:[%s20977_s8 + $0x998] ss:$12 sps:$4 sm:$0xff]   ;;  %v15415_v56 = vld [vmem:[%s20982_s13 + $0x8] sm:$0xff]  }
 0xa5a   : > { %9290 = vmatprep.subr.bf16.mxu0 %v21309_v28  ;;  %9622 = vmatprep.subr.bf16.mxu1 %v21288_v11  ;;  %v15050_v28 = vld [vmem:[%s20977_s8 + $0x91c] ss:$12 sps:$4 sm:$0xff]  }
 0xa5d   : > { %9291 = vmatpush1.bf16.msra.mxu0 %v21310_v3  ;;  %9623 = vmatpush1.bf16.msra.mxu1 %v15041_v40  ;;  %v15048_v3 = vld [vmem:[%s20977_s8 + $0x918] ss:$12 sps:$4 sm:$0xff]  }
 0xa5e   : > { %9292 = vmatprep.subr.bf16.mxu0 %v21311_v29  ;;  %9624 = vmatprep.subr.bf16.mxu1 %v21288_v11  ;;  %v15051_v29 = vld [vmem:[%s20977_s8 + $0x9b0] ss:$12 sps:$4 sm:$0xff]   ;;  %v15416_v40 = vld [vmem:[%s20982_s13] sm:$0xff]  }
 0xa61   : > { %9293 = vmatpush1.bf16.msra.mxu0 %v21312_v13  ;;  %9625 = vmatpush1.bf16.msra.mxu1 %v15042_v9  ;;  %v15054_v13 = vld [vmem:[%s20977_s8 + $0x934] ss:$12 sps:$4 sm:$0xff]  }
 0xa62   : > { %9571 = vmatprep.subr.bf16.mxu0 %v15046_v51  ;;  %9626 = vmatprep.subr.bf16.mxu1 %v21288_v11  ;;  %v15417_v9 = vld [vmem:[%s20982_s13 + $0x10] sm:$0xff]   ;;  %v15086_v51 = vld [vmem:[%s20979_s10 + $0xc0] ss:$8 sps:$4 sm:$0xff]  }
 0xa64   : > { %13470 = vmatmul.mubr.msk.bf16.vlgmr.msra.gmra.mrb[4].mxu0 %vm6163_vm8, %v19741_v30 }
 0xa65   : > { %9572 = vmatpush1.bf16.msra.mxu0 %v15044_v16  ;;  %9627 = vmatpush1.bf16.msra.mxu1 %v15047_v12  ;;  %v15088_v16 = vld [vmem:[%s20979_s10 + $0xc4] ss:$8 sps:$4 sm:$0xff]   ;;  %v15091_v12 = vld [vmem:[%s20979_s10 + $0xd4] ss:$8 sps:$4 sm:$0xff]  }
 0xa66   : > { %9573 = vmatprep.subr.bf16.mxu0 %v15050_v28  ;;  %9628 = vmatprep.subr.bf16.mxu1 %v21288_v11  ;;  %v15089_v28 = vld [vmem:[%s20979_s10 + $0xd0] ss:$8 sps:$4 sm:$0xff]  }
 0xa69   : > { %9574 = vmatpush1.bf16.msra.mxu0 %v15048_v3  ;;  %9629 = vmatpush1.bf16.msra.mxu1 %v15051_v29  ;;  %v15094_v3 = vld [vmem:[%s20979_s10 + $0xe4] ss:$8 sps:$4 sm:$0xff]   ;;  %v15092_v29 = vld [vmem:[%s20979_s10 + $0xe0] ss:$8 sps:$4 sm:$0xff]  }
 0xa6a   : > { %9575 = vmatprep.subr.bf16.mxu0 %v15054_v13  ;;  %9630 = vmatprep.subr.bf16.mxu1 %v21288_v11  ;;  %v15097_v13 = vld [vmem:[%s20979_s10 + $0xf4] ss:$8 sps:$4 sm:$0xff]  }
 0xa6d   : > { %9576 = vmatpush1.bf16.msra.mxu0 %v15052_v7  ;;  %9631 = vmatpush1.bf16.msra.mxu1 %v15055_v47  ;;  %v15418_v7 = vld [vmem:[%s20982_s13 + $0x18] sm:$0xff]  }
 0xa6e   : > { %9577 = vmatprep.subr.bf16.mxu0 %v15058_v41  ;;  %9632 = vmatprep.subr.bf16.mxu1 %v21288_v11  ;;  %v15095_v47 = vld [vmem:[%s20979_s10 + $0xf0] ss:$8 sps:$4 sm:$0xff]   ;;  %v15100_v41 = vld [vmem:[%s20979_s10 + $0x104] ss:$8 sps:$4 sm:$0xff]  }
 0xa71   : > { %9578 = vmatpush1.bf16.msra.mxu0 %v15056_v59  ;;  %9633 = vmatpush1.bf16.msra.mxu1 %v15059_v34  ;;  %v15098_v59 = vld [vmem:[%s20979_s10 + $0x100] ss:$8 sps:$4 sm:$0xff]   ;;  %v15103_v34 = vld [vmem:[%s20979_s10 + $0x114] ss:$8 sps:$4 sm:$0xff]  }
 0xa72   : > { %9579 = vmatprep.subr.bf16.mxu0 %v15062_v17  ;;  %9634 = vmatprep.subr.bf16.mxu1 %v21288_v11  ;;  %v15101_v17 = vld [vmem:[%s20979_s10 + $0x110] ss:$8 sps:$4 sm:$0xff]  }
 0xa75   : > { %9580 = vmatpush1.bf16.msra.mxu0 %v15060_v32  ;;  %9635 = vmatpush1.bf16.msra.mxu1 %v15063_v63  ;;  %v15106_v32 = vld [vmem:[%s20979_s10 + $0x124] ss:$8 sps:$4 sm:$0xff]   ;;  %v15104_v63 = vld [vmem:[%s20979_s10 + $0x120] ss:$8 sps:$4 sm:$0xff]  }
 0xa76   : > { %9581 = vmatprep.subr.bf16.mxu0 %v15066_v60  ;;  %9636 = vmatprep.subr.bf16.mxu1 %v21288_v11  ;;  %v15109_v60 = vld [vmem:[%s20979_s10 + $0x134] ss:$8 sps:$4 sm:$0xff]  }
 0xa79   : > { %9582 = vmatpush1.bf16.msra.mxu0 %v15064_v53  ;;  %9637 = vmatpush1.bf16.msra.mxu1 %v15067_v44  ;;  %v15107_v53 = vld [vmem:[%s20979_s10 + $0x130] ss:$8 sps:$4 sm:$0xff]   ;;  %v15112_v44 = vld [vmem:[%s20979_s10 + $0x144] ss:$8 sps:$4 sm:$0xff]  }
 0xa7a   : > { %9732 = vmatprep.subr.bf16.mxu1 %v18683_v22  ;;  %9583 = vmatprep.subr.bf16.mxu0 %v15070_v0  ;;  %v15110_v0 = vld [vmem:[%s20979_s10 + $0x140] ss:$8 sps:$4 sm:$0xff]  }
 0xa7d   : > { %9584 = vmatpush1.bf16.msra.mxu0 %v15068_v2  ;;  %v15115_v2 = vld [vmem:[%s20979_s10 + $0x154] ss:$8 sps:$4 sm:$0xff]  }
 0xa7e   : > { %9585 = vmatprep.subr.bf16.mxu0 %v15073_v5  ;;  %v15419_v5 = vld [vmem:[%s20982_s13 + $0x20] sm:$0xff]  }
 0xa81   : > { %9586 = vmatpush1.bf16.msra.mxu0 %v15071_v61  ;;  %v15113_v61 = vld [vmem:[%s20979_s10 + $0x150] ss:$8 sps:$4 sm:$0xff]  }
 0xa82   : > { %9587 = vmatprep.subr.bf16.mxu0 %v15076_v35  ;;  %v15118_v35 = vld [vmem:[%s20979_s10 + $0x164] ss:$8 sps:$4 sm:$0xff]  }
 0xa85   : > { %9588 = vmatpush1.bf16.msra.mxu0 %v15074_v46  ;;  %v15116_v46 = vld [vmem:[%s20979_s10 + $0x160] ss:$8 sps:$4 sm:$0xff]  }
 0xa86   : > { %9589 = vmatprep.subr.bf16.mxu0 %v15079_v25  ;;  %v15121_v25 = vld [vmem:[%s20979_s10 + $0x174] ss:$8 sps:$4 sm:$0xff]  }
 0xa89   : > { %9590 = vmatpush1.bf16.msra.mxu0 %v15077_v26  ;;  %v15119_v26 = vld [vmem:[%s20979_s10 + $0x170] ss:$8 sps:$4 sm:$0xff]  }
 0xa8a   : > { %9591 = vmatprep.subr.bf16.mxu0 %v15082_v62  ;;  %v15124_v62 = vld [vmem:[%s20979_s10 + $0x4] ss:$8 sps:$4 sm:$0xff]  }
 0xa8d   : > { %9592 = vmatpush1.bf16.msra.mxu0 %v15080_v6  ;;  %v15420_v6 = vld [vmem:[%s20982_s13 + $0x28] sm:$0xff]  }
 0xa8e   : > { %9593 = vmatprep.subr.bf16.mxu0 %v15085_v19 }
 0xa91   : > { %9594 = vmatpush1.bf16.msra.mxu0 %v15083_v31 }
 0xa92   : > { %9801 = vmatprep.subr.bf16.mxu0 %v18683_v22 }
 0xb37   : > { %v9316_v50 = vpop.f32.mrb[4].mxu0 }
 0xb38   : > { %v9318_v8 = vpop.f32.mrb[5].mxu0 }
 0xb39   : > { %v9320_v23 = vpop.f32.mrb[6].mxu0 }
 0xb3a   : > { %v9325_v45 = vpack.c.bf16 %v9320_v23, %v9316_v50  ;;  %v9322_v39 = vpop.f32.mrb[7].mxu0 }
 0xb3b   : > { %v9326_v37 = vpack.c.bf16 %v9322_v39, %v9318_v8 }
 0xb3d   : > { %13555 = vmatprep.mubr.msk.bf16.mxu0 %vm1959_vm1, %v9326_v37  ;;  %13556 = vmatprep.mubr.msk.bf16.mxu1 %vm1959_vm1, %v9326_v37 }
 0xb3e   : > { %9604 = vmatmul.mubr.bf16.vlgmr.msra.gmra.mrb[244].mxu0 %v9325_v45  ;;  %9647 = vmatmul.mubr.bf16.vlgmr.msra.gmra.mrb[148].mxu1 %v9325_v45 }
 0xb3f   : > { %9733 = vmatpush1.bf16.msra.mxu1 %v18678_v48  ;;  %9802 = vmatpush1.bf16.msra.mxu0 %v18678_v48 }
 0xb40   : > { %9734 = vmatprep.subr.bf16.mxu1 %v18703_v24  ;;  %9803 = vmatprep.subr.bf16.mxu0 %v18703_v24 }
 0xb41   : > { %9833 = vmatprep.mubr.bf16.mxu0 %v21288_v11  ;;  %9764 = vmatprep.mubr.bf16.mxu1 %v21288_v11 }
 0xb43   : > { %9735 = vmatpush1.bf16.msra.mxu1 %v18698_v55  ;;  %9804 = vmatpush1.bf16.msra.mxu0 %v18698_v55 }
 0xb44   : > { %9736 = vmatprep.subr.bf16.mxu1 %v18723_v10  ;;  %9805 = vmatprep.subr.bf16.mxu0 %v18723_v10 }
 0xb47   : > { %9737 = vmatpush1.bf16.msra.mxu1 %v18720_v43  ;;  %9806 = vmatpush1.bf16.msra.mxu0 %v18720_v43 }
 0xb48   : > { %9738 = vmatprep.subr.bf16.mxu1 %v18742_v58  ;;  %9807 = vmatprep.subr.bf16.mxu0 %v18742_v58 }
 0xb4b   : > { %9739 = vmatpush1.bf16.msra.mxu1 %v18737_v4  ;;  %9808 = vmatpush1.bf16.msra.mxu0 %v18737_v4 }
 0xb4c   : > { %9740 = vmatprep.subr.bf16.mxu1 %v18655_v1  ;;  %9809 = vmatprep.subr.bf16.mxu0 %v18655_v1 }
 0xb4f   : > { %9741 = vmatpush1.bf16.msra.mxu1 %v18651_v14  ;;  %9810 = vmatpush1.bf16.msra.mxu0 %v18651_v14 }
 0xb50   : > { %9742 = vmatprep.subr.bf16.mxu1 %v19866_v36  ;;  %9811 = vmatprep.subr.bf16.mxu0 %v19866_v36 }
 0xb53   : > { %9743 = vmatpush1.bf16.msra.mxu1 %v19873_v15  ;;  %9812 = vmatpush1.bf16.msra.mxu0 %v19873_v15 }
 0xb54   : > { %10203 = vmatprep.subr.bf16.mxu0 %v18683_v22  ;;  %9994 = vmatprep.subr.bf16.mxu1 %v15088_v16 }
 0xb56   : > { %13559 = vmatmul.mubr.msk.bf16.vlgmr.msra.gmra.mrb[8].mxu0 %vm6163_vm8, %v15415_v56  ;;  %13558 = vmatmul.mubr.msk.bf16.vlgmr.msra.gmra.mrb[164].mxu1 %vm6163_vm8, %v15416_v40 }
 0xb57   : > { %10204 = vmatpush1.bf16.msra.mxu0 %v18678_v48  ;;  %10235 = vmatprep.mubr.bf16.mxu0 %v21288_v11 }
 0xb58   : > { %10205 = vmatprep.subr.bf16.mxu0 %v18703_v24  ;;  %9995 = vmatpush1.bf16.msra.mxu1 %v15086_v51 }
 0xb59   : > { %9996 = vmatprep.subr.bf16.mxu1 %v15091_v12 }
 0xb5b   : > { %10206 = vmatpush1.bf16.msra.mxu0 %v18698_v55 }
 0xb5c   : > { %10207 = vmatprep.subr.bf16.mxu0 %v18723_v10  ;;  %9997 = vmatpush1.bf16.msra.mxu1 %v15089_v28 }
 0xb5d   : > { %9998 = vmatprep.subr.bf16.mxu1 %v15094_v3 }
 0xb5f   : > { %10208 = vmatpush1.bf16.msra.mxu0 %v18720_v43 }
 0xb60   : > { %10209 = vmatprep.subr.bf16.mxu0 %v18742_v58  ;;  %9999 = vmatpush1.bf16.msra.mxu1 %v15092_v29 }
 0xb61   : > { %10000 = vmatprep.subr.bf16.mxu1 %v15097_v13 }
 0xb63   : > { %10210 = vmatpush1.bf16.msra.mxu0 %v18737_v4 }
 0xb64   : > { %10211 = vmatprep.subr.bf16.mxu0 %v18655_v1  ;;  %10001 = vmatpush1.bf16.msra.mxu1 %v15095_v47 }
 0xb65   : > { %10002 = vmatprep.subr.bf16.mxu1 %v15100_v41 }
 0xb67   : > { %10212 = vmatpush1.bf16.msra.mxu0 %v18651_v14 }
 0xb68   : > { %10213 = vmatprep.subr.bf16.mxu0 %v19866_v36  ;;  %10003 = vmatpush1.bf16.msra.mxu1 %v15098_v59 }
 0xb69   : > { %10004 = vmatprep.subr.bf16.mxu1 %v15103_v34 }
 0xb6b   : > { %10214 = vmatpush1.bf16.msra.mxu0 %v19873_v15 }
 0xb6c   : > { %10443 = vmatprep.subr.bf16.mxu0 %v18683_v22  ;;  %10005 = vmatpush1.bf16.msra.mxu1 %v15101_v17 }
 0xb6d   : > { %10006 = vmatprep.subr.bf16.mxu1 %v15106_v32 }
 0xb6e   : > { %13634 = vmatmul.mubr.msk.bf16.vlgmr.msra.gmra.mrb[12].mxu0 %vm6163_vm8, %v15417_v9 }
 0xb6f   : > { %10444 = vmatpush1.bf16.msra.mxu0 %v18678_v48  ;;  %10475 = vmatprep.mubr.bf16.mxu0 %v21288_v11 }
 0xb70   : > { %10445 = vmatprep.subr.bf16.mxu0 %v18703_v24  ;;  %10007 = vmatpush1.bf16.msra.mxu1 %v15104_v63  ;;  %v15122_v63 = vld [vmem:[%s20979_s10] ss:$8 sps:$4 sm:$0xff]  }
 0xb71   : > { %10008 = vmatprep.subr.bf16.mxu1 %v15109_v60 }
 0xb73   : > { %10446 = vmatpush1.bf16.msra.mxu0 %v18698_v55 }
 0xb74   : > { %10447 = vmatprep.subr.bf16.mxu0 %v18723_v10  ;;  %10009 = vmatpush1.bf16.msra.mxu1 %v15107_v53  ;;  %v15127_v53 = vld [vmem:[%s20979_s10 + $0x14] ss:$8 sps:$4 sm:$0xff]  }
 0xb75   : > { %10010 = vmatprep.subr.bf16.mxu1 %v15112_v44  ;;  %v15125_v44 = vld [vmem:[%s20979_s10 + $0x10] ss:$8 sps:$4 sm:$0xff]  }
 0xb77   : > { %10448 = vmatpush1.bf16.msra.mxu0 %v18720_v43 }
 0xb78   : > { %10449 = vmatprep.subr.bf16.mxu0 %v18742_v58  ;;  %10011 = vmatpush1.bf16.msra.mxu1 %v15110_v0  ;;  %v15130_v0 = vld [vmem:[%s20979_s10 + $0x24] ss:$8 sps:$4 sm:$0xff]  }
 0xb79   : > { %10012 = vmatprep.subr.bf16.mxu1 %v15115_v2  ;;  %v15128_v2 = vld [vmem:[%s20979_s10 + $0x20] ss:$8 sps:$4 sm:$0xff]  }
 0xb7b   : > { %10450 = vmatpush1.bf16.msra.mxu0 %v18737_v4 }
 0xb7c   : > { %10451 = vmatprep.subr.bf16.mxu0 %v18655_v1  ;;  %10013 = vmatpush1.bf16.msra.mxu1 %v15113_v61  ;;  %v15131_v61 = vld [vmem:[%s20979_s10 + $0x30] ss:$8 sps:$4 sm:$0xff]  }
 0xb7d   : > { %10014 = vmatprep.subr.bf16.mxu1 %v15118_v35  ;;  %v15136_v35 = vld [vmem:[%s20979_s10 + $0x44] ss:$8 sps:$4 sm:$0xff]  }
 0xb7f   : > { %10452 = vmatpush1.bf16.msra.mxu0 %v18651_v14 }
 0xb80   : > { %10453 = vmatprep.subr.bf16.mxu0 %v19866_v36  ;;  %10015 = vmatpush1.bf16.msra.mxu1 %v15116_v46  ;;  %v15134_v46 = vld [vmem:[%s20979_s10 + $0x40] ss:$8 sps:$4 sm:$0xff]  }
 0xb81   : > { %10016 = vmatprep.subr.bf16.mxu1 %v15121_v25  ;;  %v15139_v25 = vld [vmem:[%s20979_s10 + $0x54] ss:$8 sps:$4 sm:$0xff]  }
 0xb83   : > { %10454 = vmatpush1.bf16.msra.mxu0 %v19873_v15 }
 0xb84   : > { %10683 = vmatprep.subr.bf16.mxu0 %v18683_v22  ;;  %10017 = vmatpush1.bf16.msra.mxu1 %v15119_v26  ;;  %v15137_v26 = vld [vmem:[%s20979_s10 + $0x50] ss:$8 sps:$4 sm:$0xff]  }
 0xb85   : > { %10160 = vmatprep.subr.bf16.mxu1 %v15124_v62 }
 0xb86   : > { %13684 = vmatmul.mubr.msk.bf16.vlgmr.msra.gmra.mrb[16].mxu0 %vm6163_vm8, %v15418_v7 }
 0xb87   : > { %10684 = vmatpush1.bf16.msra.mxu0 %v18678_v48  ;;  %10715 = vmatprep.mubr.bf16.mxu0 %v21288_v11 }
 0xb88   : > { %10685 = vmatprep.subr.bf16.mxu0 %v18703_v24 }
 0xb8b   : > { %10686 = vmatpush1.bf16.msra.mxu0 %v18698_v55 }
 0xb8c   : > { %10687 = vmatprep.subr.bf16.mxu0 %v18723_v10 }
 0xb8f   : > { %10688 = vmatpush1.bf16.msra.mxu0 %v18720_v43 }
 0xb90   : > { %10689 = vmatprep.subr.bf16.mxu0 %v18742_v58 }
 0xb93   : > { %10690 = vmatpush1.bf16.msra.mxu0 %v18737_v4 }
 0xb94   : > { %10691 = vmatprep.subr.bf16.mxu0 %v18655_v1 }
 0xb97   : > { %10692 = vmatpush1.bf16.msra.mxu0 %v18651_v14 }
 0xb98   : > { %10693 = vmatprep.subr.bf16.mxu0 %v19866_v36 }
 0xb9b   : > { %10694 = vmatpush1.bf16.msra.mxu0 %v19873_v15 }
 0xb9c   : > { %10923 = vmatprep.subr.bf16.mxu0 %v18683_v22 }
 0xb9e   : > { %13734 = vmatmul.mubr.msk.bf16.vlgmr.msra.gmra.mrb[20].mxu0 %vm6163_vm8, %v15419_v5  ;;  %v15133_v5 = vld [vmem:[%s20979_s10 + $0x34] ss:$8 sps:$4 sm:$0xff]  }
 0xb9f   : > { %10924 = vmatpush1.bf16.msra.mxu0 %v18678_v48  ;;  %10955 = vmatprep.mubr.bf16.mxu0 %v21288_v11 }
 0xba0   : > { %10925 = vmatprep.subr.bf16.mxu0 %v18703_v24 }
 0xba3   : > { %10926 = vmatpush1.bf16.msra.mxu0 %v18698_v55 }
 0xba4   : > { %10927 = vmatprep.subr.bf16.mxu0 %v18723_v10 }
 0xba7   : > { %10928 = vmatpush1.bf16.msra.mxu0 %v18720_v43 }
 0xba8   : > { %10929 = vmatprep.subr.bf16.mxu0 %v18742_v58 }
 0xbab   : > { %10930 = vmatpush1.bf16.msra.mxu0 %v18737_v4 }
 0xbac   : > { %10931 = vmatprep.subr.bf16.mxu0 %v18655_v1 }
 0xbaf   : > { %10932 = vmatpush1.bf16.msra.mxu0 %v18651_v14 }
 0xbb0   : > { %10933 = vmatprep.subr.bf16.mxu0 %v19866_v36 }
 0xbb3   : > { %10934 = vmatpush1.bf16.msra.mxu0 %v19873_v15 }
 0xbb4   : > { %11163 = vmatprep.subr.bf16.mxu0 %v18683_v22 }
 0xbb6   : > { %13784 = vmatmul.mubr.msk.bf16.vlgmr.msra.gmra.mrb[24].mxu0 %vm6163_vm8, %v15420_v6  ;;  %v15142_v6 = vld [vmem:[%s20979_s10 + $0x64] ss:$8 sps:$4 sm:$0xff]  }
 0xbb7   : > { %11164 = vmatpush1.bf16.msra.mxu0 %v18678_v48  ;;  %11195 = vmatprep.mubr.bf16.mxu0 %v21288_v11 }
 0xbb8   : > { %11165 = vmatprep.subr.bf16.mxu0 %v18703_v24 }
 0xbbb   : > { %11166 = vmatpush1.bf16.msra.mxu0 %v18698_v55 }
 0xbbc   : > { %11167 = vmatprep.subr.bf16.mxu0 %v18723_v10 }
 0xbbf   : > { %11168 = vmatpush1.bf16.msra.mxu0 %v18720_v43 }
 0xbc0   : > { %11169 = vmatprep.subr.bf16.mxu0 %v18742_v58 }
 0xbc3   : > { %11170 = vmatpush1.bf16.msra.mxu0 %v18737_v4 }
 0xbc4   : > { %11171 = vmatprep.subr.bf16.mxu0 %v18655_v1 }
 0xbc7   : > { %11172 = vmatpush1.bf16.msra.mxu0 %v18651_v14 }
 0xbc8   : > { %11173 = vmatprep.subr.bf16.mxu0 %v19866_v36 }
 0xbcb   : > { %11174 = vmatpush1.bf16.msra.mxu0 %v19873_v15 }
 0xbcc   : > { %11403 = vmatprep.subr.bf16.mxu0 %v18683_v22 }
 0xbce   : > { %13834 = vmatmul.mubr.msk.bf16.vlgmr.msra.gmra.mrb[28].mxu0 %vm6163_vm8, %v19457_v54 }
 0xbcf   : > { %11404 = vmatpush1.bf16.msra.mxu0 %v18678_v48  ;;  %11435 = vmatprep.mubr.bf16.mxu0 %v21288_v11 }
 0xbd0   : > { %11405 = vmatprep.subr.bf16.mxu0 %v18703_v24 }
 0xbd3   : > { %11406 = vmatpush1.bf16.msra.mxu0 %v18698_v55 }
 0xbd4   : > { %11407 = vmatprep.subr.bf16.mxu0 %v18723_v10 }
 0xbd7   : > { %11408 = vmatpush1.bf16.msra.mxu0 %v18720_v43 }
 0xbd8   : > { %11409 = vmatprep.subr.bf16.mxu0 %v18742_v58 }
 0xbdb   : > { %11410 = vmatpush1.bf16.msra.mxu0 %v18737_v4 }
 0xbdc   : > { %11411 = vmatprep.subr.bf16.mxu0 %v18655_v1 }
 0xbdf   : > { %11412 = vmatpush1.bf16.msra.mxu0 %v18651_v14 }
 0xbe0   : > { %11413 = vmatprep.subr.bf16.mxu0 %v19866_v36 }
 0xbe3   : > { %11414 = vmatpush1.bf16.msra.mxu0 %v19873_v15 }
 0xbe4   : > { %11643 = vmatprep.subr.bf16.mxu0 %v18683_v22  ;;  %v9661_v22 = vld [vmem:[%s20978_s9] ss:$2 sm:$0x7] }
 0xbe6   : > { %13884 = vmatmul.mubr.msk.bf16.vlgmr.msra.gmra.mrb[32].mxu0 %vm6163_vm8, %v19611_v38 }
 0xbe7   : > { %11644 = vmatpush1.bf16.msra.mxu0 %v18678_v48  ;;  %11675 = vmatprep.mubr.bf16.mxu0 %v21288_v11  ;;  %v21314_v11 = vld [vmem:[#allocation2_spill] sm:$0xff] }
 0xbe8   : > { %11645 = vmatprep.subr.bf16.mxu0 %v18703_v24  ;;  %v9673_v48 = vsub.s32 2, %v21314_v11  ;;  %v9670_v24 = vrot.slane %v9661_v22, %v21268_v33 }
 0xbeb   : > { %11646 = vmatpush1.bf16.msra.mxu0 %v18698_v55  ;;  %v13557_v55 = vld [vmem:[%s20978_s9 + $0x1] ss:$2 sm:$0x7] }
 0xbec   : > { %11647 = vmatprep.subr.bf16.mxu0 %v18723_v10  ;;  %v9698_v10 = vrot.slane %v13557_v55, %v9673_v48  ;;  %v9694_v54 = vrot.slane %v13557_v55, %v21268_v33 }
 0xbef   : > { %11648 = vmatpush1.bf16.msra.mxu0 %v18720_v43  ;;  %v9690_v43 = vrot.slane %v13557_v55, %v21267_v57 }
 0xbf0   : > { %11649 = vmatprep.subr.bf16.mxu0 %v18742_v58 }
 0xbf3   : > { %11650 = vmatpush1.bf16.msra.mxu0 %v18737_v4 }
 0xbf4   : > { %11651 = vmatprep.subr.bf16.mxu0 %v18655_v1  ;;  %v9666_v1 = vrot.slane %v9661_v22, %v21267_v57 }
 0xbf7   : > { %11652 = vmatpush1.bf16.msra.mxu0 %v18651_v14  ;;  %v9674_v14 = vrot.slane %v9661_v22, %v9673_v48 }
 0xbf8   : > { %11653 = vmatprep.subr.bf16.mxu0 %v19866_v36 }
 0xbfb   : > { %11654 = vmatpush1.bf16.msra.mxu0 %v19873_v15 }
 0xbfe   : > { %13934 = vmatmul.mubr.msk.bf16.vlgmr.msra.gmra.mrb[36].mxu0 %vm6163_vm8, %v19741_v30 }
 0xc11   : > { %v9605_v4 = vpop.f32.mrb[244].mxu0  ;;  %v9648_v58 = vpop.f32.mrb[148].mxu1 }
 0xc12   : > { %v9678_v38 = vmul.f32 %v9666_v1, %v9605_v4  ;;  %v9680_v30 = vmul.f32 %v9674_v14, %v9648_v58  ;;  %v9607_v19 = vpop.f32.mrb[245].mxu0  ;;  %v9650_v31 = vpop.f32.mrb[149].mxu1  ;;  %v15146_v4 = vld [vmem:[%s20979_s10 + $0x80] ss:$8 sps:$4 sm:$0xff]   ;;  %v15151_v58 = vld [vmem:[%s20979_s10 + $0x94] ss:$8 sps:$4 sm:$0xff]  }
 0xc13   : > { %v9679_v50 = vmul.f32 %v9670_v24, %v9607_v19  ;;  %v9609_v8 = vpop.f32.mrb[246].mxu0  ;;  %v9651_v23 = vpop.f32.mrb[150].mxu1  ;;  %v15157_v19 = vld [vmem:[%s20979_s10 + $0xb4] ss:$8 sps:$4 sm:$0xff]   ;;  %v15155_v31 = vld [vmem:[%s20979_s10 + $0xb0] ss:$8 sps:$4 sm:$0xff]  }
 0xc14   : > { %v9702_v45 = vadd.f32 %v9690_v43, %v9678_v38  ;;  %v9704_v39 = vadd.f32 %v9698_v10, %v9680_v30  ;;  %v9681_v37 = vmul.f32 %v9666_v1, %v9609_v8  ;;  %v9683_v49 = vmul.f32 %v9674_v14, %v9651_v23  ;;  %v9611_v52 = vpop.f32.mrb[247].mxu0  ;;  %v9653_v42 = vpop.f32.mrb[151].mxu1  ;;  %v15140_v1 = vld [vmem:[%s20979_s10 + $0x60] ss:$8 sps:$4 sm:$0xff]   ;;  %v15154_v38 = vld [vmem:[%s20979_s10 + $0xa4] ss:$8 sps:$4 sm:$0xff]  }
 0xc15   : > { %v9703_v20 = vadd.f32 %v9694_v54, %v9679_v50  ;;  %v9682_v18 = vmul.f32 %v9670_v24, %v9611_v52  ;;  %v15145_v24 = vld [vmem:[%s20979_s10 + $0x74] ss:$8 sps:$4 sm:$0xff]   ;;  %v15152_v30 = vld [vmem:[%s20979_s10 + $0xa0] ss:$8 sps:$4 sm:$0xff]   ;;  %v15160_v8 = vld [vmem:[%s20979_s10 + $0x184] ss:$8 sps:$4 sm:$0xff]  }
 0xc16   : > { %v9708_v27 = vmax.f32 %v9702_v45, 0.0  ;;  %v9710_v36 = vmax.f32 %v9704_v39, 0.0  ;;  %v9705_v15 = vadd.f32 %v9690_v43, %v9681_v37  ;;  %v9707_v56 = vadd.f32 %v9698_v10, %v9683_v49  ;;  %v15143_v43 = vld [vmem:[%s20979_s10 + $0x70] ss:$8 sps:$4 sm:$0xff]   ;;  %v15148_v10 = vld [vmem:[%s20979_s10 + $0x84] ss:$8 sps:$4 sm:$0xff]  }
 0xc17   : > { %v9709_v40 = vmax.f32 %v9703_v20, 0.0  ;;  %v9706_v9 = vadd.f32 %v9694_v54, %v9682_v18  ;;  %v15149_v54 = vld [vmem:[%s20979_s10 + $0x90] ss:$8 sps:$4 sm:$0xff]   ;;  %v15158_v49 = vld [vmem:[%s20979_s10 + $0x180] ss:$8 sps:$4 sm:$0xff]  }
 0xc18   : > { %12199 = vst [vmem:[%s20088_s30] sm:$0xff] %v9708_v27  ;;  %12201 = vst.msk [vmem:[%s20088_s30 + $0x10] sm:$0xff] %vm1959_vm1, %v9710_v36  ;;  %v9711_v51 = vmax.f32 %v9705_v15, 0.0  ;;  %v9713_v16 = vmax.f32 %v9707_v56, 0.0  ;;  %v15163_v42 = vld [vmem:[%s20979_s10 + $0x194] ss:$8 sps:$4 sm:$0xff]  }
 0xc19   : > { %12200 = vst [vmem:[%s20088_s30 + $0x8] sm:$0xff] %v9709_v40  ;;  %v9712_v12 = vmax.f32 %v9706_v9, 0.0  ;;  %v15161_v20 = vld [vmem:[%s20979_s10 + $0x190] ss:$8 sps:$4 sm:$0xff]   ;;  %v15166_v18 = vld [vmem:[%s20979_s10 + $0x1a4] ss:$8 sps:$4 sm:$0xff]  }
 0xc1a   : > { %12202 = vst [vmem:[%s20088_s30 + $0x28] sm:$0xff] %v9711_v51  ;;  %12204 = vst.msk [vmem:[%s20088_s30 + $0x38] sm:$0xff] %vm1959_vm1, %v9713_v16  ;;  %v15164_v27 = vld [vmem:[%s20979_s10 + $0x1a0] ss:$8 sps:$4 sm:$0xff]   ;;  %v15169_v36 = vld [vmem:[%s20979_s10 + $0x1b4] ss:$8 sps:$4 sm:$0xff]  }
 0xc1b   : > { %12203 = vst [vmem:[%s20088_s30 + $0x30] sm:$0xff] %v9712_v12  ;;  %v15167_v15 = vld [vmem:[%s20979_s10 + $0x1b0] ss:$8 sps:$4 sm:$0xff]   ;;  %v15172_v56 = vld [vmem:[%s20979_s10 + $0x1c4] ss:$8 sps:$4 sm:$0xff]  }
 0xc1c   : > { %v15170_v40 = vld [vmem:[%s20979_s10 + $0x1c0] ss:$8 sps:$4 sm:$0xff]   ;;  %v15175_v9 = vld [vmem:[%s20979_s10 + $0x1d4] ss:$8 sps:$4 sm:$0xff]   ;;  %v15173_v51 = vld [vmem:[%s20979_s10 + $0x1d0] ss:$8 sps:$4 sm:$0xff]  }
 0xc1d   : > { %v15178_v12 = vld [vmem:[%s20979_s10 + $0x1e4] ss:$8 sps:$4 sm:$0xff]  }
 0xc29   : > { %v9835_v28 = vpop.f32.mrb[8].mxu0  ;;  %v20098_v3 = vpop.f32.mrb[164].mxu1 }
 0xc2a   : > { %v9837_v29 = vpop.f32.mrb[9].mxu0  ;;  %v9768_v13 = vpop.f32.mrb[165].mxu1 }
 0xc2b   : > { %v9839_v7 = vpop.f32.mrb[10].mxu0  ;;  %v20100_v47 = vpop.f32.mrb[166].mxu1 }
 0xc2c   : > { %v9844_v41 = vpack.c.bf16 %v9839_v7, %v9835_v28  ;;  %v9841_v59 = vpop.f32.mrb[11].mxu0  ;;  %v9775_v34 = vpack.c.bf16 %v20100_v47, %v20098_v3  ;;  %v9772_v17 = vpop.f32.mrb[167].mxu1  ;;  %v15176_v7 = vld [vmem:[%s20979_s10 + $0x1e0] ss:$8 sps:$4 sm:$0xff]  }
 0xc2d   : > { %v9845_v32 = vpack.c.bf16 %v9841_v59, %v9837_v29  ;;  %v9776_v60 = vpack.c.bf16 %v9772_v17, %v9768_v13  ;;  %v15179_v59 = vld [vmem:[%s20979_s10 + $0x1f0] ss:$8 sps:$4 sm:$0xff]   ;;  %v15182_v17 = vld [vmem:[%s20979_s10 + $0x200] ss:$8 sps:$4 sm:$0xff]  }
 0xc2f   : > { %13608 = vmatprep.mubr.msk.bf16.mxu1 %vm1959_vm1, %v9845_v32  ;;  %v15187_v32 = vld [vmem:[%s20979_s10 + $0x214] ss:$8 sps:$4 sm:$0xff]  }
 0xc30   : > { %10027 = vmatmul.mubr.bf16.vlgmr.msra.gmra.mrb[168].mxu1 %v9844_v41  ;;  %v15181_v41 = vld [vmem:[%s20979_s10 + $0x1f4] ss:$8 sps:$4 sm:$0xff]  }
 0xc31   : > { %10161 = vmatpush1.bf16.msra.mxu1 %v15122_v63  ;;  %13633 = vmatprep.mubr.msk.bf16.mxu1 %vm1959_vm1, %v9776_v60  ;;  %v15185_v63 = vld [vmem:[%s20979_s10 + $0x210] ss:$8 sps:$4 sm:$0xff]   ;;  %v15190_v60 = vld [vmem:[%s20979_s10 + $0x224] ss:$8 sps:$4 sm:$0xff]  }
 0xc32   : > { %10162 = vmatprep.subr.bf16.mxu1 %v15127_v53  ;;  %v15188_v53 = vld [vmem:[%s20979_s10 + $0x220] ss:$8 sps:$4 sm:$0xff]  }
 0xc35   : > { %10163 = vmatpush1.bf16.msra.mxu1 %v15125_v44  ;;  %v15193_v44 = vld [vmem:[%s20979_s10 + $0x234] ss:$8 sps:$4 sm:$0xff]  }
 0xc36   : > { %10164 = vmatprep.subr.bf16.mxu1 %v15130_v0  ;;  %v15191_v0 = vld [vmem:[%s20979_s10 + $0x230] ss:$8 sps:$4 sm:$0xff]  }
 0xc39   : > { %10165 = vmatpush1.bf16.msra.mxu1 %v15128_v2  ;;  %v15196_v2 = vld [vmem:[%s20979_s10 + $0x244] ss:$8 sps:$4 sm:$0xff]  }
 0xc3a   : > { %10166 = vmatprep.subr.bf16.mxu1 %v15133_v5  ;;  %v15194_v5 = vld [vmem:[%s20979_s10 + $0x240] ss:$8 sps:$4 sm:$0xff]  }
 0xc3d   : > { %10167 = vmatpush1.bf16.msra.mxu1 %v15131_v61  ;;  %v15199_v61 = vld [vmem:[%s20979_s10 + $0x254] ss:$8 sps:$4 sm:$0xff]  }
 0xc3e   : > { %10168 = vmatprep.subr.bf16.mxu1 %v15136_v35  ;;  %v15197_v35 = vld [vmem:[%s20979_s10 + $0x250] ss:$8 sps:$4 sm:$0xff]  }
 0xc41   : > { %10169 = vmatpush1.bf16.msra.mxu1 %v15134_v46  ;;  %v20139_v62 = vpop.f32.mrb[12].mxu0  ;;  %v15202_v46 = vld [vmem:[%s20979_s10 + $0x264] ss:$8 sps:$4 sm:$0xff]  }
 0xc42   : > { %10170 = vmatprep.subr.bf16.mxu1 %v15139_v25  ;;  %v10239_v11 = vpop.f32.mrb[13].mxu0  ;;  %v15200_v25 = vld [vmem:[%s20979_s10 + $0x260] ss:$8 sps:$4 sm:$0xff]  }
 0xc43   : > { %v20144_v48 = vpop.f32.mrb[14].mxu0 }
 0xc44   : > { %v10246_v22 = vpack.c.bf16 %v20144_v48, %v20139_v62  ;;  %v10243_v55 = vpop.f32.mrb[15].mxu0  ;;  %v15205_v62 = vld [vmem:[%s20979_s10 + $0x274] ss:$8 sps:$4 sm:$0xff]  }
 0xc45   : > { %10171 = vmatpush1.bf16.msra.mxu1 %v15137_v26  ;;  %v10247_v14 = vpack.c.bf16 %v10243_v55, %v10239_v11 }
 0xc46   : > { %10172 = vmatprep.subr.bf16.mxu1 %v15142_v6 }
 0xc49   : > { %10173 = vmatpush1.bf16.msra.mxu1 %v15140_v1  ;;  %v15208_v1 = vld [vmem:[%s20979_s10 + $0x284] ss:$8 sps:$4 sm:$0xff]  }
 0xc4a   : > { %10174 = vmatprep.subr.bf16.mxu1 %v15145_v24  ;;  %v15206_v24 = vld [vmem:[%s20979_s10 + $0x280] ss:$8 sps:$4 sm:$0xff]  }
 0xc4d   : > { %10175 = vmatpush1.bf16.msra.mxu1 %v15143_v43  ;;  %v15211_v43 = vld [vmem:[%s20979_s10 + $0x294] ss:$8 sps:$4 sm:$0xff]  }
 0xc4e   : > { %10176 = vmatprep.subr.bf16.mxu1 %v15148_v10  ;;  %v15209_v10 = vld [vmem:[%s20979_s10 + $0x290] ss:$8 sps:$4 sm:$0xff]  }
 0xc51   : > { %10177 = vmatpush1.bf16.msra.mxu1 %v15146_v4  ;;  %v15214_v4 = vld [vmem:[%s20979_s10 + $0x2a4] ss:$8 sps:$4 sm:$0xff]  }
 0xc52   : > { %10178 = vmatprep.subr.bf16.mxu1 %v15151_v58  ;;  %v15212_v58 = vld [vmem:[%s20979_s10 + $0x2a0] ss:$8 sps:$4 sm:$0xff]  }
 0xc55   : > { %10179 = vmatpush1.bf16.msra.mxu1 %v15149_v54  ;;  %v15217_v54 = vld [vmem:[%s20979_s10 + $0x2b4] ss:$8 sps:$4 sm:$0xff]  }
 0xc56   : > { %10180 = vmatprep.subr.bf16.mxu1 %v15154_v38  ;;  %v15215_v38 = vld [vmem:[%s20979_s10 + $0x2b0] ss:$8 sps:$4 sm:$0xff]  }
 0xc59   : > { %10181 = vmatpush1.bf16.msra.mxu1 %v15152_v30  ;;  %v20181_v50 = vpop.f32.mrb[16].mxu0  ;;  %v15220_v30 = vld [vmem:[%s20979_s10 + $0x2c4] ss:$8 sps:$4 sm:$0xff]  }
 0xc5a   : > { %10182 = vmatprep.subr.bf16.mxu1 %v15157_v19  ;;  %v20186_v23 = vpop.f32.mrb[17].mxu0  ;;  %v15218_v19 = vld [vmem:[%s20979_s10 + $0x2c0] ss:$8 sps:$4 sm:$0xff]  }
 0xc5b   : > { %v20188_v45 = vpop.f32.mrb[18].mxu0 }
 0xc5c   : > { %v10486_v39 = vpack.c.bf16 %v20188_v45, %v20181_v50  ;;  %v20192_v37 = vpop.f32.mrb[19].mxu0  ;;  %v15236_v50 = vld [vmem:[%s20979_s10 + $0x320] ss:$8 sps:$4 sm:$0xff]  }
 0xc5d   : > { %10183 = vmatpush1.bf16.msra.mxu1 %v15155_v31  ;;  %v10487_v52 = vpack.c.bf16 %v20192_v37, %v20186_v23  ;;  %v15223_v31 = vld [vmem:[%s20979_s10 + $0x2d4] ss:$8 sps:$4 sm:$0xff]   ;;  %v15226_v23 = vld [vmem:[%s20979_s10 + $0x2e4] ss:$8 sps:$4 sm:$0xff]   ;;  %v15224_v37 = vld [vmem:[%s20979_s10 + $0x2e0] ss:$8 sps:$4 sm:$0xff]  }
 0xc5e   : > { %10396 = vmatprep.subr.bf16.mxu1 %v15160_v8  ;;  %v15221_v8 = vld [vmem:[%s20979_s10 + $0x2d0] ss:$8 sps:$4 sm:$0xff]  }
 0xc60   : > { %10193 = vmatmul.mubr.bf16.vlgmr.msra.gmra.mrb[168].mxu1 %v9775_v34  ;;  %v15184_v34 = vld [vmem:[%s20979_s10 + $0x204] ss:$8 sps:$4 sm:$0xff]  }
 0xc61   : > { %10397 = vmatpush1.bf16.msra.mxu1 %v15158_v49  ;;  %13683 = vmatprep.mubr.msk.bf16.mxu1 %vm1959_vm1, %v10247_v14  ;;  %v15229_v49 = vld [vmem:[%s20979_s10 + $0x2f4] ss:$8 sps:$4 sm:$0xff]  }
 0xc62   : > { %10398 = vmatprep.subr.bf16.mxu1 %v15163_v42  ;;  %v15232_v42 = vld [vmem:[%s20979_s10 + $0x304] ss:$8 sps:$4 sm:$0xff]  }
 0xc65   : > { %10399 = vmatpush1.bf16.msra.mxu1 %v15161_v20  ;;  %v15230_v20 = vld [vmem:[%s20979_s10 + $0x300] ss:$8 sps:$4 sm:$0xff]  }
 0xc66   : > { %10400 = vmatprep.subr.bf16.mxu1 %v15166_v18  ;;  %v15235_v18 = vld [vmem:[%s20979_s10 + $0x314] ss:$8 sps:$4 sm:$0xff]  }
 0xc69   : > { %10401 = vmatpush1.bf16.msra.mxu1 %v15164_v27  ;;  %v15233_v27 = vld [vmem:[%s20979_s10 + $0x310] ss:$8 sps:$4 sm:$0xff]  }
 0xc6a   : > { %10402 = vmatprep.subr.bf16.mxu1 %v15169_v36  ;;  %v15238_v36 = vld [vmem:[%s20979_s10 + $0x324] ss:$8 sps:$4 sm:$0xff]  }
 0xc6d   : > { %10403 = vmatpush1.bf16.msra.mxu1 %v15167_v15 }
 0xc6e   : > { %10404 = vmatprep.subr.bf16.mxu1 %v15172_v56 }
 0xc71   : > { %10405 = vmatpush1.bf16.msra.mxu1 %v15170_v40  ;;  %v20233_v16 = vpop.f32.mrb[20].mxu0 }
 0xc72   : > { %10406 = vmatprep.subr.bf16.mxu1 %v15175_v9  ;;  %v20238_v28 = vpop.f32.mrb[21].mxu0  ;;  %v15239_v9 = vld [vmem:[%s20979_s10 + $0x330] ss:$8 sps:$4 sm:$0xff]  }
 0xc73   : > { %v20240_v3 = vpop.f32.mrb[22].mxu0 }
 0xc74   : > { %v10726_v29 = vpack.c.bf16 %v20240_v3, %v20233_v16  ;;  %v20244_v13 = vpop.f32.mrb[23].mxu0  ;;  %v15272_v16 = vld [vmem:[%s20979_s10 + $0x3e0] ss:$8 sps:$4 sm:$0xff]  }
 0xc75   : > { %10407 = vmatpush1.bf16.msra.mxu1 %v15173_v51  ;;  %v10727_v47 = vpack.c.bf16 %v20244_v13, %v20238_v28  ;;  %v15242_v13 = vld [vmem:[%s20979_s10 + $0x340] ss:$8 sps:$4 sm:$0xff]  }
 0xc76   : > { %10408 = vmatprep.subr.bf16.mxu1 %v15178_v12  ;;  %v15244_v12 = vld [vmem:[%s20979_s10 + $0x344] ss:$8 sps:$4 sm:$0xff]  }
 0xc79   : > { %10409 = vmatpush1.bf16.msra.mxu1 %v15176_v7  ;;  %v15247_v7 = vld [vmem:[%s20979_s10 + $0x354] ss:$8 sps:$4 sm:$0xff]  }
 0xc7a   : > { %10410 = vmatprep.subr.bf16.mxu1 %v15181_v41  ;;  %v15250_v41 = vld [vmem:[%s20979_s10 + $0x364] ss:$8 sps:$4 sm:$0xff]  }
 0xc7d   : > { %10411 = vmatpush1.bf16.msra.mxu1 %v15179_v59  ;;  %v15248_v59 = vld [vmem:[%s20979_s10 + $0x360] ss:$8 sps:$4 sm:$0xff]  }
 0xc7e   : > { %10412 = vmatprep.subr.bf16.mxu1 %v15184_v34  ;;  %v15253_v34 = vld [vmem:[%s20979_s10 + $0x374] ss:$8 sps:$4 sm:$0xff]  }
 0xc81   : > { %10413 = vmatpush1.bf16.msra.mxu1 %v15182_v17  ;;  %v15251_v17 = vld [vmem:[%s20979_s10 + $0x370] ss:$8 sps:$4 sm:$0xff]  }
 0xc82   : > { %10414 = vmatprep.subr.bf16.mxu1 %v15187_v32  ;;  %v15256_v32 = vld [vmem:[%s20979_s10 + $0x384] ss:$8 sps:$4 sm:$0xff]  }
 0xc85   : > { %10415 = vmatpush1.bf16.msra.mxu1 %v15185_v63  ;;  %v15254_v63 = vld [vmem:[%s20979_s10 + $0x380] ss:$8 sps:$4 sm:$0xff]  }
 0xc86   : > { %10416 = vmatprep.subr.bf16.mxu1 %v15190_v60  ;;  %v15259_v60 = vld [vmem:[%s20979_s10 + $0x394] ss:$8 sps:$4 sm:$0xff]  }
 0xc89   : > { %10417 = vmatpush1.bf16.msra.mxu1 %v15188_v53  ;;  %v20303_v26 = vpop.f32.mrb[24].mxu0  ;;  %v15257_v53 = vld [vmem:[%s20979_s10 + $0x390] ss:$8 sps:$4 sm:$0xff]  }
 0xc8a   : > { %10418 = vmatprep.subr.bf16.mxu1 %v15193_v44  ;;  %v20308_v6 = vpop.f32.mrb[25].mxu0  ;;  %v15262_v44 = vld [vmem:[%s20979_s10 + $0x3a4] ss:$8 sps:$4 sm:$0xff]  }
 0xc8b   : > { %v20310_v11 = vpop.f32.mrb[26].mxu0 }
 0xc8c   : > { %v10966_v48 = vpack.c.bf16 %v20310_v11, %v20303_v26  ;;  %v20317_v55 = vpop.f32.mrb[27].mxu0  ;;  %v15308_v11 = vld [vmem:[%s20979_s10 + $0x4a0] ss:$8 sps:$4 sm:$0xff]  }
 0xc8d   : > { %10419 = vmatpush1.bf16.msra.mxu1 %v15191_v0  ;;  %v10967_v14 = vpack.c.bf16 %v20317_v55, %v20308_v6  ;;  %v15260_v0 = vld [vmem:[%s20979_s10 + $0x3a0] ss:$8 sps:$4 sm:$0xff]  }
 0xc8e   : > { %10636 = vmatprep.subr.bf16.mxu1 %v15196_v2  ;;  %v15265_v2 = vld [vmem:[%s20979_s10 + $0x3b4] ss:$8 sps:$4 sm:$0xff]  }
 0xc90   : > { %10429 = vmatmul.mubr.bf16.vlgmr.msra.gmra.mrb[168].mxu1 %v10246_v22  ;;  %v15203_v22 = vld [vmem:[%s20979_s10 + $0x270] ss:$8 sps:$4 sm:$0xff]  }
 0xc91   : > { %10637 = vmatpush1.bf16.msra.mxu1 %v15194_v5  ;;  %13733 = vmatprep.mubr.msk.bf16.mxu1 %vm1959_vm1, %v10487_v52  ;;  %v15227_v52 = vld [vmem:[%s20979_s10 + $0x2f0] ss:$8 sps:$4 sm:$0xff]  }
 0xc92   : > { %10638 = vmatprep.subr.bf16.mxu1 %v15199_v61  ;;  %v15263_v5 = vld [vmem:[%s20979_s10 + $0x3b0] ss:$8 sps:$4 sm:$0xff]   ;;  %v15268_v61 = vld [vmem:[%s20979_s10 + $0x3c4] ss:$8 sps:$4 sm:$0xff]  }
 0xc95   : > { %10639 = vmatpush1.bf16.msra.mxu1 %v15197_v35  ;;  %v15266_v35 = vld [vmem:[%s20979_s10 + $0x3c0] ss:$8 sps:$4 sm:$0xff]  }
 0xc96   : > { %10640 = vmatprep.subr.bf16.mxu1 %v15202_v46  ;;  %v15271_v46 = vld [vmem:[%s20979_s10 + $0x3d4] ss:$8 sps:$4 sm:$0xff]  }
 0xc99   : > { %10641 = vmatpush1.bf16.msra.mxu1 %v15200_v25  ;;  %v15269_v25 = vld [vmem:[%s20979_s10 + $0x3d0] ss:$8 sps:$4 sm:$0xff]  }
 0xc9a   : > { %10642 = vmatprep.subr.bf16.mxu1 %v15205_v62  ;;  %v15274_v62 = vld [vmem:[%s20979_s10 + $0x3e4] ss:$8 sps:$4 sm:$0xff]  }
 0xc9d   : > { %10643 = vmatpush1.bf16.msra.mxu1 %v15203_v22 }
 0xc9e   : > { %10644 = vmatprep.subr.bf16.mxu1 %v15208_v1  ;;  %v15275_v1 = vld [vmem:[%s20979_s10 + $0x3f0] ss:$8 sps:$4 sm:$0xff]  }
 0xca1   : > { %10645 = vmatpush1.bf16.msra.mxu1 %v15206_v24  ;;  %v20394_v45 = vpop.f32.mrb[28].mxu0  ;;  %v15280_v24 = vld [vmem:[%s20979_s10 + $0x404] ss:$8 sps:$4 sm:$0xff]  }
 0xca2   : > { %10646 = vmatprep.subr.bf16.mxu1 %v15211_v43  ;;  %v20399_v15 = vpop.f32.mrb[29].mxu0 }
 0xca3   : > { %v20401_v56 = vpop.f32.mrb[30].mxu0 }
 0xca4   : > { %v11206_v40 = vpack.c.bf16 %v20401_v56, %v20394_v45  ;;  %v20408_v51 = vpop.f32.mrb[31].mxu0 }
 0xca5   : > { %10647 = vmatpush1.bf16.msra.mxu1 %v15209_v10  ;;  %v11207_v28 = vpack.c.bf16 %v20408_v51, %v20399_v15  ;;  %v15278_v10 = vld [vmem:[%s20979_s10 + $0x400] ss:$8 sps:$4 sm:$0xff]   ;;  %v15313_v15 = vld [vmem:[%s20979_s10 + $0x4b4] ss:$8 sps:$4 sm:$0xff]  }
 0xca6   : > { %10648 = vmatprep.subr.bf16.mxu1 %v15214_v4  ;;  %v15283_v4 = vld [vmem:[%s20979_s10 + $0x414] ss:$8 sps:$4 sm:$0xff]  }
 0xca9   : > { %10649 = vmatpush1.bf16.msra.mxu1 %v15212_v58  ;;  %v15281_v58 = vld [vmem:[%s20979_s10 + $0x410] ss:$8 sps:$4 sm:$0xff]  }
 0xcaa   : > { %10650 = vmatprep.subr.bf16.mxu1 %v15217_v54  ;;  %v15286_v54 = vld [vmem:[%s20979_s10 + $0x424] ss:$8 sps:$4 sm:$0xff]  }
 0xcad   : > { %10651 = vmatpush1.bf16.msra.mxu1 %v15215_v38  ;;  %v15284_v38 = vld [vmem:[%s20979_s10 + $0x420] ss:$8 sps:$4 sm:$0xff]  }
 0xcae   : > { %10652 = vmatprep.subr.bf16.mxu1 %v15220_v30  ;;  %v15289_v30 = vld [vmem:[%s20979_s10 + $0x434] ss:$8 sps:$4 sm:$0xff]  }
 0xcb1   : > { %10653 = vmatpush1.bf16.msra.mxu1 %v15218_v19  ;;  %v15287_v19 = vld [vmem:[%s20979_s10 + $0x430] ss:$8 sps:$4 sm:$0xff]  }
 0xcb2   : > { %10654 = vmatprep.subr.bf16.mxu1 %v15223_v31  ;;  %v15292_v31 = vld [vmem:[%s20979_s10 + $0x444] ss:$8 sps:$4 sm:$0xff]  }
 0xcb5   : > { %10655 = vmatpush1.bf16.msra.mxu1 %v15221_v8  ;;  %v15290_v8 = vld [vmem:[%s20979_s10 + $0x440] ss:$8 sps:$4 sm:$0xff]  }
 0xcb6   : > { %10656 = vmatprep.subr.bf16.mxu1 %v15226_v23  ;;  %v15295_v23 = vld [vmem:[%s20979_s10 + $0x454] ss:$8 sps:$4 sm:$0xff]  }
 0xcb9   : > { %10657 = vmatpush1.bf16.msra.mxu1 %v15224_v37  ;;  %v20485_v3 = vpop.f32.mrb[32].mxu0  ;;  %v15293_v37 = vld [vmem:[%s20979_s10 + $0x450] ss:$8 sps:$4 sm:$0xff]  }
 0xcba   : > { %10658 = vmatprep.subr.bf16.mxu1 %v15229_v49  ;;  %v20490_v6 = vpop.f32.mrb[33].mxu0  ;;  %v15298_v49 = vld [vmem:[%s20979_s10 + $0x464] ss:$8 sps:$4 sm:$0xff]  }
 0xcbb   : > { %v20492_v22 = vpop.f32.mrb[34].mxu0 }
 0xcbc   : > { %v11446_v55 = vpack.c.bf16 %v20492_v22, %v20485_v3  ;;  %v15380_v3 = vld [vmem:[%s20979_s10 + $0x620] ss:$8 sps:$4 sm:$0xff]   ;;  %v15385_v22 = vld [vmem:[%s20979_s10 + $0x634] ss:$8 sps:$4 sm:$0xff]  }
 0xcbd   : > { %10659 = vmatpush1.bf16.msra.mxu1 %v15227_v52  ;;  %v15296_v52 = vld [vmem:[%s20979_s10 + $0x460] ss:$8 sps:$4 sm:$0xff]  }
 0xcbe   : > { %10876 = vmatprep.subr.bf16.mxu1 %v15232_v42  ;;  %v15301_v42 = vld [vmem:[%s20979_s10 + $0x474] ss:$8 sps:$4 sm:$0xff]  }
 0xcc0   : > { %10669 = vmatmul.mubr.bf16.vlgmr.msra.gmra.mrb[168].mxu1 %v10486_v39  ;;  %v15241_v39 = vld [vmem:[%s20979_s10 + $0x334] ss:$8 sps:$4 sm:$0xff]  }
 0xcc1   : > { %10877 = vmatpush1.bf16.msra.mxu1 %v15230_v20  ;;  %13783 = vmatprep.mubr.msk.bf16.mxu1 %vm1959_vm1, %v10727_v47  ;;  %v15245_v47 = vld [vmem:[%s20979_s10 + $0x350] ss:$8 sps:$4 sm:$0xff]  }
 0xcc2   : > { %10878 = vmatprep.subr.bf16.mxu1 %v15235_v18  ;;  %v15299_v20 = vld [vmem:[%s20979_s10 + $0x470] ss:$8 sps:$4 sm:$0xff]   ;;  %v15304_v18 = vld [vmem:[%s20979_s10 + $0x484] ss:$8 sps:$4 sm:$0xff]  }
 0xcc5   : > { %10879 = vmatpush1.bf16.msra.mxu1 %v15233_v27  ;;  %v15302_v27 = vld [vmem:[%s20979_s10 + $0x480] ss:$8 sps:$4 sm:$0xff]  }
 0xcc6   : > { %10880 = vmatprep.subr.bf16.mxu1 %v15238_v36  ;;  %v15307_v36 = vld [vmem:[%s20979_s10 + $0x494] ss:$8 sps:$4 sm:$0xff]  }
 0xcc9   : > { %10881 = vmatpush1.bf16.msra.mxu1 %v15236_v50  ;;  %v15421_v50 = vld [vmem:[%s15554_s18] sm:$0xff]  }
 0xcca   : > { %10882 = vmatprep.subr.bf16.mxu1 %v15241_v39  ;;  %v11920_v39 = vunpack.c.l.bf16 %v15421_v50 }
 0xccd   : > { %10883 = vmatpush1.bf16.msra.mxu1 %v15239_v9  ;;  %v20561_v9 = vunpack.c.h.bf16 %v15421_v50  ;;  %v15437_v50 = vmov 0.0  }
 0xcce   : > { %10884 = vmatprep.subr.bf16.mxu1 %v15244_v12  ;;  %v15305_v12 = vld [vmem:[%s20979_s10 + $0x490] ss:$8 sps:$4 sm:$0xff]   ;;  %13995 = vmatprep.subr.bf16.mxu0 %v15437_v50 }
 0xccf   : > { %v11943_v26 = vrot.slane %v20561_v9, 1  ;;  %14007 = vmatprep.mubr.msk.bf16.mxu0 %vm15438_vm10, %v15437_v50 }
 0xcd1   : > { %10885 = vmatpush1.bf16.msra.mxu1 %v15242_v13  ;;  %v15310_v13 = vld [vmem:[%s20979_s10 + $0x4a4] ss:$8 sps:$4 sm:$0xff]  }
 0xcd2   : > { %10886 = vmatprep.subr.bf16.mxu1 %v15247_v7  ;;  %v11942_v7 = vrot.slane %v11920_v39, 1 }
 0xcd5   : > { %10887 = vmatpush1.bf16.msra.mxu1 %v15245_v47  ;;  %v11984_v47 = vrot.slane %v11920_v39, 2 }
 0xcd6   : > { %10888 = vmatprep.subr.bf16.mxu1 %v15250_v41  ;;  %v11985_v41 = vrot.slane %v20561_v9, 2 }
 0xcd9   : > { %10889 = vmatpush1.bf16.msra.mxu1 %v15248_v59 }
 0xcda   : > { %10890 = vmatprep.subr.bf16.mxu1 %v15253_v34  ;;  %v15422_v34 = vld [vmem:[%s15554_s18 + $0x8] sm:$0xff]  }
 0xcdd   : > { %10891 = vmatpush1.bf16.msra.mxu1 %v15251_v17  ;;  %v20592_v17 = vunpack.c.l.bf16 %v15422_v34 }
 0xcde   : > { %10892 = vmatprep.subr.bf16.mxu1 %v15256_v32  ;;  %v20594_v32 = vunpack.c.h.bf16 %v15422_v34 }
 0xce0   : > { %v12052_v34 = vrot.slane %v20594_v32, 3 }
 0xce1   : > { %10893 = vmatpush1.bf16.msra.mxu1 %v15254_v63  ;;  %v15423_v63 = vld [vmem:[%s15554_s18 + $0x10] sm:$0xff]  }
 0xce2   : > { %10894 = vmatprep.subr.bf16.mxu1 %v15259_v60  ;;  %v20597_v60 = vunpack.c.l.bf16 %v15423_v63 }
 0xce5   : > { %10895 = vmatpush1.bf16.msra.mxu1 %v15257_v53 }
 0xce6   : > { %10896 = vmatprep.subr.bf16.mxu1 %v15262_v44 }
 0xce9   : > { %10897 = vmatpush1.bf16.msra.mxu1 %v15260_v0  ;;  %v15311_v0 = vld [vmem:[%s20979_s10 + $0x4b0] ss:$8 sps:$4 sm:$0xff]  }
 0xcea   : > { %10898 = vmatprep.subr.bf16.mxu1 %v15265_v2 }
 0xced   : > { %10899 = vmatpush1.bf16.msra.mxu1 %v15263_v5 }
 0xcee   : > { %11116 = vmatprep.subr.bf16.mxu1 %v15268_v61  ;;  %v20608_v61 = vunpack.c.h.bf16 %v15423_v63  ;;  %v12054_v63 = vrot.slane %v20597_v60, 3 }
 0xcf0   : > { %10909 = vmatmul.mubr.bf16.vlgmr.msra.gmra.mrb[168].mxu1 %v10726_v29  ;;  %v15277_v29 = vld [vmem:[%s20979_s10 + $0x3f4] ss:$8 sps:$4 sm:$0xff]  }
 0xcf1   : > { %11117 = vmatpush1.bf16.msra.mxu1 %v15266_v35  ;;  %13833 = vmatprep.mubr.msk.bf16.mxu1 %vm1959_vm1, %v10967_v14  ;;  %v20499_v14 = vpop.f32.mrb[35].mxu0  ;;  %v15424_v35 = vld [vmem:[%s15554_s18 + $0x18] sm:$0xff]  }
 0xcf2   : > { %11118 = vmatprep.subr.bf16.mxu1 %v15271_v46  ;;  %v11447_v43 = vpack.c.bf16 %v20499_v14, %v20490_v6  ;;  %v20611_v46 = vunpack.c.l.bf16 %v15424_v35 }
 0xcf5   : > { %11119 = vmatpush1.bf16.msra.mxu1 %v15269_v25  ;;  %v15316_v25 = vld [vmem:[%s20979_s10 + $0x4c4] ss:$8 sps:$4 sm:$0xff]  }
 0xcf6   : > { %11120 = vmatprep.subr.bf16.mxu1 %v15274_v62  ;;  %v11986_v62 = vsel %vm3407_vm2, %v11984_v47, %v11985_v41  ;;  %v12050_v47 = vrot.slane %v20592_v17, 3 }
 0xcf9   : > { %11121 = vmatpush1.bf16.msra.mxu1 %v15272_v16  ;;  %v20617_v16 = vunpack.c.h.bf16 %v15424_v35 }
 0xcfa   : > { %11122 = vmatprep.subr.bf16.mxu1 %v15277_v29  ;;  %v15425_v29 = vld [vmem:[%s15554_s18 + $0x20] sm:$0xff]  }
 0xcfd   : > { %11123 = vmatpush1.bf16.msra.mxu1 %v15275_v1  ;;  %v20620_v1 = vunpack.c.l.bf16 %v15425_v29 }
 0xcfe   : > { %11124 = vmatprep.subr.bf16.mxu1 %v15280_v24  ;;  %v20622_v24 = vunpack.c.h.bf16 %v15425_v29 }
 0xd01   : > { %11125 = vmatpush1.bf16.msra.mxu1 %v15278_v10  ;;  %v11945_v10 = vrot.slane %v20592_v17, 1 }
 0xd02   : > { %11126 = vmatprep.subr.bf16.mxu1 %v15283_v4  ;;  %v11947_v4 = vrot.slane %v20594_v32, 1 }
 0xd05   : > { %11127 = vmatpush1.bf16.msra.mxu1 %v15281_v58  ;;  %v11949_v58 = vrot.slane %v20597_v60, 1 }
 0xd06   : > { %11128 = vmatprep.subr.bf16.mxu1 %v15286_v54  ;;  %v15314_v54 = vld [vmem:[%s20979_s10 + $0x4c0] ss:$8 sps:$4 sm:$0xff]  }
 0xd09   : > { %11129 = vmatpush1.bf16.msra.mxu1 %v15284_v38 }
 0xd0a   : > { %11130 = vmatprep.subr.bf16.mxu1 %v15289_v30  ;;  %v12049_v30 = vrot.slane %v20561_v9, 3 }
 0xd0d   : > { %11131 = vmatpush1.bf16.msra.mxu1 %v15287_v19  ;;  %v11951_v19 = vrot.slane %v20608_v61, 1 }
 0xd0e   : > { %11132 = vmatprep.subr.bf16.mxu1 %v15292_v31  ;;  %v11953_v31 = vrot.slane %v20611_v46, 1 }
 0xd11   : > { %11133 = vmatpush1.bf16.msra.mxu1 %v15290_v8  ;;  %v15319_v8 = vld [vmem:[%s20979_s10 + $0x4d4] ss:$8 sps:$4 sm:$0xff]  }
 0xd12   : > { %11134 = vmatprep.subr.bf16.mxu1 %v15295_v23  ;;  %v11955_v23 = vrot.slane %v20617_v16, 1 }
 0xd15   : > { %11135 = vmatpush1.bf16.msra.mxu1 %v15293_v37  ;;  %v11957_v37 = vrot.slane %v20620_v1, 1 }
 0xd16   : > { %11136 = vmatprep.subr.bf16.mxu1 %v15298_v49  ;;  %v11959_v49 = vrot.slane %v20622_v24, 1 }
 0xd19   : > { %11137 = vmatpush1.bf16.msra.mxu1 %v15296_v52  ;;  %v15426_v52 = vld [vmem:[%s15554_s18 + $0x28] sm:$0x1]  ;;  %s15439_s18 = smov 64  }
 0xd1a   : > { %11138 = vmatprep.subr.bf16.mxu1 %v15301_v42  ;;  %v20640_v42 = vunpack.c.l.bf16 %v15426_v52 }
 0xd1d   : > { %11139 = vmatpush1.bf16.msra.mxu1 %v15299_v20  ;;  %v11946_v20 = vsel %vm3212_vm6, %v11943_v26, %v11945_v10 }
 0xd1e   : > { %11356 = vmatprep.subr.bf16.mxu1 %v15304_v18  ;;  %v11948_v18 = vsel %vm3212_vm6, %v11945_v10, %v11947_v4 }
 0xd20   : > { %11149 = vmatmul.mubr.bf16.vlgmr.msra.gmra.mrb[168].mxu1 %v10966_v48  ;;  %v20580_v48 = vpop.f32.mrb[36].mxu0 }
 0xd21   : > { %11357 = vmatpush1.bf16.msra.mxu1 %v15302_v27  ;;  %13883 = vmatprep.mubr.msk.bf16.mxu1 %vm1959_vm1, %v11207_v28  ;;  %v20585_v51 = vpop.f32.mrb[37].mxu0  ;;  %v11944_v28 = vsel %vm3212_vm6, %v11942_v7, %v11943_v26  ;;  %v11950_v27 = vsel %vm3212_vm6, %v11947_v4, %v11949_v58  ;;  %v11987_v7 = vrot.slane %v20592_v17, 2  ;;  %v15322_v26 = vld [vmem:[%s20979_s10 + $0x4e4] ss:$8 sps:$4 sm:$0xff]   ;;  %v12053_v4 = vsel %vm3604_vm7, %v12050_v47, %v12052_v34 }
 0xd22   : > { %11358 = vmatprep.subr.bf16.mxu1 %v15307_v36  ;;  %v20589_v59 = vpop.f32.mrb[38].mxu0  ;;  %v11973_v5 = vmax.f32 %v11920_v39, %v11944_v28  ;;  %v15317_v36 = vld [vmem:[%s20979_s10 + $0x4d0] ss:$8 sps:$4 sm:$0xff]   ;;  %v11974_v39 = vmax.f32 %v20561_v9, %v11946_v20 }
 0xd23   : > { %v11686_v53 = vpack.c.bf16 %v20589_v59, %v20580_v48  ;;  %v20601_v44 = vpop.f32.mrb[39].mxu0  ;;  %v11988_v9 = vsel %vm3407_vm2, %v11985_v41, %v11987_v7  ;;  %v12051_v41 = vsel %vm3604_vm7, %v12049_v30, %v12050_v47  ;;  %v11952_v30 = vsel %vm3212_vm6, %v11949_v58, %v11951_v19 }
 0xd24   : > { %v11687_v2 = vpack.c.bf16 %v20601_v44, %v20585_v51  ;;  %v12016_v38 = vmax.f32 %v11973_v5, %v11986_v62  ;;  %v12017_v35 = vmax.f32 %v11974_v39, %v11988_v9  ;;  %v15320_v62 = vld [vmem:[%s20979_s10 + $0x4e0] ss:$8 sps:$4 sm:$0xff]   ;;  %v12113_v39 = vrot.slane %v20594_v32, 4  ;;  %v15388_v51 = vld [vmem:[%s20979_s10 + $0x644] ss:$8 sps:$4 sm:$0xff]  }
 0xd25   : > { %11359 = vmatpush1.bf16.msra.mxu1 %v15305_v12  ;;  %v11975_v12 = vmax.f32 %v20592_v17, %v11948_v18  ;;  %v15386_v44 = vld [vmem:[%s20979_s10 + $0x640] ss:$8 sps:$4 sm:$0xff]  }
 0xd26   : > { %11360 = vmatprep.subr.bf16.mxu1 %v15310_v13  ;;  %v11976_v13 = vmax.f32 %v20594_v32, %v11950_v27  ;;  %v12027_v28 = vmax.f32 %v12016_v38, %v11946_v20  ;;  %v12028_v38 = vmax.f32 %v12017_v35, %v11948_v18  ;;  %v12112_v20 = vrot.slane %v20592_v17, 4  ;;  %v15323_v17 = vld [vmem:[%s20979_s10 + $0x4f0] ss:$8 sps:$4 sm:$0xff]  }
 0xd27   : > { %v11977_v18 = vmax.f32 %v20597_v60, %v11952_v30  ;;  %v12056_v35 = vrot.slane %v20608_v61, 3 }
 0xd29   : > { %11361 = vmatpush1.bf16.msra.mxu1 %v15308_v11  ;;  %v11989_v11 = vrot.slane %v20594_v32, 2  ;;  %v12114_v32 = vsel %vm12111_vm9, %v12112_v20, %v12113_v39 }
 0xd2a   : > { %11362 = vmatprep.subr.bf16.mxu1 %v15313_v15  ;;  %v11991_v15 = vrot.slane %v20597_v60, 2 }
 0xd2c   : > { %v11992_v5 = vsel %vm3407_vm2, %v11989_v11, %v11991_v15 }
 0xd2d   : > { %11363 = vmatpush1.bf16.msra.mxu1 %v15311_v0  ;;  %v11990_v0 = vsel %vm3407_vm2, %v11987_v7, %v11989_v11  ;;  %v12019_v10 = vmax.f32 %v11976_v13, %v11992_v5 }
 0xd2e   : > { %11364 = vmatprep.subr.bf16.mxu1 %v15316_v25  ;;  %v12038_v25 = vmax.f32 %v12027_v28, %v11988_v9  ;;  %v12018_v29 = vmax.f32 %v11975_v12, %v11990_v0  ;;  %v12115_v12 = vrot.slane %v20597_v60, 4  ;;  %v12039_v13 = vmax.f32 %v12028_v38, %v11990_v0  ;;  %v15328_v28 = vld [vmem:[%s20979_s10 + $0x504] ss:$8 sps:$4 sm:$0xff]  }
 0xd2f   : > { %v11993_v60 = vrot.slane %v20608_v61, 2  ;;  %v11995_v9 = vrot.slane %v20611_v46, 2 }
 0xd30   : > { %v12078_v52 = vmax.f32 %v12038_v25, %v12051_v41  ;;  %v12116_v11 = vsel %vm12111_vm9, %v12113_v39, %v12115_v12  ;;  %v12058_v25 = vrot.slane %v20611_v46, 3 }
 0xd31   : > { %11365 = vmatpush1.bf16.msra.mxu1 %v15314_v54  ;;  %v15325_v54 = vld [vmem:[%s20979_s10 + $0x4f4] ss:$8 sps:$4 sm:$0xff]   ;;  %v11994_v41 = vsel %vm3407_vm2, %v11991_v15, %v11993_v60 }
 0xd32   : > { %11366 = vmatprep.subr.bf16.mxu1 %v15319_v8  ;;  %v12055_v8 = vsel %vm3604_vm7, %v12052_v34, %v12054_v63  ;;  %v12089_v7 = vmax.f32 %v12078_v52, %v11990_v0  ;;  %v12030_v0 = vmax.f32 %v12019_v10, %v11952_v30  ;;  %v12020_v38 = vmax.f32 %v11977_v18, %v11994_v41 }
 0xd33   : > { %v12057_v10 = vsel %vm3604_vm7, %v12054_v63, %v12056_v35  ;;  %v12059_v15 = vsel %vm3604_vm7, %v12056_v35, %v12058_v25  ;;  %v12117_v30 = vrot.slane %v20608_v61, 4  ;;  %v11956_v63 = vsel %vm3212_vm6, %v11953_v31, %v11955_v23 }
 0xd34   : > { %v12100_v47 = vmax.f32 %v12089_v7, %v12053_v4  ;;  %v12041_v20 = vmax.f32 %v12030_v0, %v11994_v41  ;;  %v11999_v0 = vrot.slane %v20620_v1, 2 }
 0xd35   : > { %11367 = vmatpush1.bf16.msra.mxu1 %v15317_v36  ;;  %v12029_v36 = vmax.f32 %v12018_v29, %v11950_v27 }
 0xd36   : > { %11368 = vmatprep.subr.bf16.mxu1 %v15322_v26  ;;  %v11954_v26 = vsel %vm3212_vm6, %v11951_v19, %v11953_v31  ;;  %v12079_v19 = vmax.f32 %v12039_v13, %v12053_v4  ;;  %v12138_v29 = vmax.f32 %v12100_v47, %v12114_v32  ;;  %v15326_v4 = vld [vmem:[%s20979_s10 + $0x500] ss:$8 sps:$4 sm:$0xff]   ;;  %v12081_v7 = vmax.f32 %v12041_v20, %v12057_v10 }
 0xd37   : > { %v12040_v27 = vmax.f32 %v12029_v36, %v11992_v5  ;;  %v11978_v58 = vmax.f32 %v20608_v61, %v11954_v26  ;;  %v12031_v13 = vmax.f32 %v12020_v38, %v11954_v26  ;;  %v12118_v32 = vsel %vm12111_vm9, %v12115_v12, %v12117_v30  ;;  %v15334_v12 = vld [vmem:[%s20979_s10 + $0x524] ss:$8 sps:$4 sm:$0xff]  }
 0xd38   : > { %v11958_v61 = vsel %vm3212_vm6, %v11955_v23, %v11957_v37  ;;  %v11979_v31 = vmax.f32 %v20611_v46, %v11956_v63  ;;  %v11997_v47 = vrot.slane %v20617_v16, 2  ;;  %v12123_v20 = vrot.slane %v20620_v1, 4 }
 0xd39   : > { %11369 = vmatpush1.bf16.msra.mxu1 %v15320_v62  ;;  %v12080_v34 = vmax.f32 %v12040_v27, %v12055_v8  ;;  %v12090_v62 = vmax.f32 %v12079_v19, %v11992_v5  ;;  %v15331_v5 = vld [vmem:[%s20979_s10 + $0x514] ss:$8 sps:$4 sm:$0xff]   ;;  %v11980_v23 = vmax.f32 %v20617_v16, %v11958_v61 }
 0xd3a   : > { %11370 = vmatprep.subr.bf16.mxu1 %v15325_v54  ;;  %v11996_v54 = vsel %vm3407_vm2, %v11993_v60, %v11995_v9  ;;  %v12000_v38 = vsel %vm3407_vm2, %v11997_v47, %v11999_v0 }
 0xd3b   : > { %v12021_v52 = vmax.f32 %v11978_v58, %v11996_v54  ;;  %v12101_v36 = vmax.f32 %v12090_v62, %v12055_v8  ;;  %v12091_v39 = vmax.f32 %v12080_v34, %v11994_v41  ;;  %v15329_v8 = vld [vmem:[%s20979_s10 + $0x510] ss:$8 sps:$4 sm:$0xff]   ;;  %v12042_v26 = vmax.f32 %v12031_v13, %v11996_v54 }
 0xd3c   : > { %v12092_v58 = vmax.f32 %v12081_v7, %v11996_v54  ;;  %v11998_v62 = vsel %vm3407_vm2, %v11995_v9, %v11997_v47  ;;  %v12062_v41 = vrot.slane %v20620_v1, 3  ;;  %v12121_v54 = vrot.slane %v20617_v16, 4  ;;  %v15337_v9 = vld [vmem:[%s20979_s10 + $0x534] ss:$8 sps:$4 sm:$0xff]  }
 0xd3d   : > { %11371 = vmatpush1.bf16.msra.mxu1 %v15323_v17  ;;  %v12119_v17 = vrot.slane %v20611_v46, 4  ;;  %v12139_v18 = vmax.f32 %v12101_v36, %v12116_v11  ;;  %v12102_v27 = vmax.f32 %v12091_v39, %v12057_v10  ;;  %v12082_v60 = vmax.f32 %v12042_v26, %v12059_v15  ;;  %v15340_v26 = vld [vmem:[%s20979_s10 + $0x544] ss:$8 sps:$4 sm:$0xff]  }
 0xd3e   : > { %11372 = vmatprep.subr.bf16.mxu1 %v15328_v28  ;;  %v12103_v34 = vmax.f32 %v12092_v58, %v12059_v15  ;;  %v12032_v35 = vmax.f32 %v12021_v52, %v11956_v63  ;;  %v12060_v46 = vrot.slane %v20617_v16, 3  ;;  %v12022_v52 = vmax.f32 %v11979_v31, %v11998_v62 }
 0xd3f   : > { %v12120_v28 = vsel %vm12111_vm9, %v12117_v30, %v12119_v17  ;;  %v12149_v11 = vpack.c.bf16 %v12139_v18, %v12138_v29  ;;  %v12140_v19 = vmax.f32 %v12102_v27, %v12118_v32  ;;  %v15332_v29 = vld [vmem:[%s20979_s10 + $0x520] ss:$8 sps:$4 sm:$0xff]   ;;  %v12023_v10 = vmax.f32 %v11980_v23, %v12000_v38 }
 0xd40   : > { %v12043_v16 = vmax.f32 %v12032_v35, %v11998_v62  ;;  %v12063_v36 = vsel %vm3604_vm7, %v12060_v46, %v12062_v41  ;;  %v12033_v39 = vmax.f32 %v12022_v52, %v11958_v61  ;;  %v12093_v30 = vmax.f32 %v12082_v60, %v11998_v62 }
 0xd41   : > { %11373 = vmatpush1.bf16.msra.mxu1 %v15326_v4  ;;  %13996 = vmatpush3.bf16.msra.mxu0 %v12149_v11  ;;  %v12141_v4 = vmax.f32 %v12103_v34, %v12120_v28  ;;  %v12122_v13 = vsel %vm12111_vm9, %v12119_v17, %v12121_v54  ;;  %v12124_v63 = vsel %vm12111_vm9, %v12121_v54, %v12123_v20  ;;  %v12001_v27 = vrot.slane %v20622_v24, 2 }
 0xd42   : > { %11374 = vmatprep.subr.bf16.mxu1 %v15331_v5  ;;  %13997 = vmatprep.subr.bf16.mxu0 %v15437_v50  ;;  %v12061_v5 = vsel %vm3604_vm7, %v12058_v25, %v12060_v46  ;;  %v11960_v18 = vsel %vm3212_vm6, %v11957_v37, %v11959_v49  ;;  %v15335_v25 = vld [vmem:[%s20979_s10 + $0x530] ss:$8 sps:$4 sm:$0xff]   ;;  %v12044_v32 = vmax.f32 %v12033_v39, %v12000_v38  ;;  %v12003_v17 = vrot.slane %v20640_v42, 2 }
 0xd43   : > { %v12150_v15 = vpack.c.bf16 %v12141_v4, %v12140_v19  ;;  %v12083_v7 = vmax.f32 %v12043_v16, %v12061_v5  ;;  %v12104_v61 = vmax.f32 %v12093_v30, %v12061_v5  ;;  %v12002_v58 = vsel %vm3407_vm2, %v11999_v0, %v12001_v27  ;;  %v15338_v0 = vld [vmem:[%s20979_s10 + $0x540] ss:$8 sps:$4 sm:$0xff]   ;;  %v15343_v4 = vld [vmem:[%s20979_s10 + $0x554] ss:$8 sps:$4 sm:$0xff]  }
 0xd44   : > { %v12064_v28 = vrot.slane %v20622_v24, 3  ;;  %v12066_v31 = vrot.slane %v20640_v42, 3  ;;  %v12004_v19 = vsel %vm3407_vm2, %v12001_v27, %v12003_v17  ;;  %v11961_v52 = vrot.slane %v20640_v42, 1 }
 0xd45   : > { %11375 = vmatpush1.bf16.msra.mxu1 %v15329_v8  ;;  %13998 = vmatpush3.bf16.msra.mxu0 %v12150_v15  ;;  %v12034_v8 = vmax.f32 %v12023_v10, %v11960_v18  ;;  %v12094_v37 = vmax.f32 %v12083_v7, %v12000_v38  ;;  %v12142_v11 = vmax.f32 %v12104_v61, %v12122_v13  ;;  %v12015_v60 = vsel %vm3212_vm6, %v12004_v19, 0.0 }
 0xd46   : > { %11376 = vmatprep.subr.bf16.mxu1 %v15334_v12  ;;  %13999 = vmatprep.subr.bf16.mxu0 %v15437_v50  ;;  %v12084_v12 = vmax.f32 %v12044_v32, %v12063_v36  ;;  %v12065_v34 = vsel %vm3604_vm7, %v12062_v41, %v12064_v28  ;;  %v12067_v35 = vsel %vm3604_vm7, %v12064_v28, %v12066_v31  ;;  %v12127_v41 = vrot.slane %v20640_v42, 4  ;;  %v15352_v28 = vld [vmem:[%s20979_s10 + $0x584] ss:$8 sps:$4 sm:$0xff]  }
 0xd47   : > { %v12045_v23 = vmax.f32 %v12034_v8, %v12002_v58  ;;  %v12105_v47 = vmax.f32 %v12094_v37, %v12063_v36  ;;  %v12077_v62 = vsel %vm3407_vm2, %v12067_v35, 0.0  ;;  %v11983_v36 = vmax.f32 %v20640_v42, 0.0  ;;  %v15347_v37 = vld [vmem:[%s20979_s10 + $0x570] ss:$8 sps:$4 sm:$0xff]  }
 0xd48   : > { %v12095_v54 = vmax.f32 %v12084_v12, %v12002_v58  ;;  %v11962_v30 = vsel %vm3212_vm6, %v11959_v49, %v11961_v52  ;;  %v15346_v49 = vld [vmem:[%s20979_s10 + $0x564] ss:$8 sps:$4 sm:$0xff]   ;;  %v15359_v52 = vld [vmem:[%s20979_s10 + $0x5b0] ss:$8 sps:$4 sm:$0xff]  }
 0xd49   : > { %11377 = vmatpush1.bf16.msra.mxu1 %v15332_v29  ;;  %v12085_v46 = vmax.f32 %v12045_v23, %v12065_v34  ;;  %v12125_v29 = vrot.slane %v20622_v24, 4  ;;  %v12143_v38 = vmax.f32 %v12105_v47, %v12124_v63  ;;  %v11982_v42 = vmax.f32 %v20622_v24, %v11962_v30  ;;  %v15344_v24 = vld [vmem:[%s20979_s10 + $0x560] ss:$8 sps:$4 sm:$0xff]  }
 0xd4a   : > { %11378 = vmatprep.subr.bf16.mxu1 %v15337_v9  ;;  %v11981_v9 = vmax.f32 %v20620_v1, %v11960_v18  ;;  %v12106_v16 = vmax.f32 %v12095_v54, %v12065_v34  ;;  %v15341_v1 = vld [vmem:[%s20979_s10 + $0x550] ss:$8 sps:$4 sm:$0xff]   ;;  %v12026_v7 = vmax.f32 %v11983_v36, 0.0  ;;  %v15350_v23 = vld [vmem:[%s20979_s10 + $0x580] ss:$8 sps:$4 sm:$0xff]  }
 0xd4b   : > { %v12096_v10 = vmax.f32 %v12085_v46, %v12015_v60  ;;  %v12126_v5 = vsel %vm12111_vm9, %v12123_v20, %v12125_v29  ;;  %v12151_v15 = vpack.c.bf16 %v12143_v38, %v12142_v11  ;;  %v12128_v39 = vsel %vm12111_vm9, %v12125_v29, %v12127_v41  ;;  %v15355_v34 = vld [vmem:[%s20979_s10 + $0x594] ss:$8 sps:$4 sm:$0xff]   ;;  %v15353_v46 = vld [vmem:[%s20979_s10 + $0x590] ss:$8 sps:$4 sm:$0xff]   ;;  %v15358_v29 = vld [vmem:[%s20979_s10 + $0x5a4] ss:$8 sps:$4 sm:$0xff]  }
 0xd4c   : > { %v12024_v13 = vmax.f32 %v11981_v9, %v12002_v58  ;;  %v12137_v56 = vsel %vm3604_vm7, %v12128_v39, 0.0  ;;  %v12025_v6 = vmax.f32 %v11982_v42, %v12015_v60  ;;  %v15356_v38 = vld [vmem:[%s20979_s10 + $0x5a0] ss:$8 sps:$4 sm:$0xff]   ;;  %v15361_v41 = vld [vmem:[%s20979_s10 + $0x5b4] ss:$8 sps:$4 sm:$0xff]  }
 0xd4d   : > { %11379 = vmatpush1.bf16.msra.mxu1 %v15335_v25  ;;  %v12107_v45 = vmax.f32 %v12096_v10, %v12077_v62  ;;  %14000 = vmatpush3.bf16.msra.mxu0 %v12151_v15  ;;  %v15349_v25 = vld [vmem:[%s20979_s10 + $0x574] ss:$8 sps:$4 sm:$0xff]   ;;  %v15362_v9 = vld [vmem:[%s20979_s10 + $0x5c0] ss:$8 sps:$4 sm:$0xff]   ;;  %v15371_v39 = vld [vmem:[%s20979_s10 + $0x5f0] ss:$8 sps:$4 sm:$0xff]  }
 0xd4e   : > { %11596 = vmatprep.subr.bf16.mxu1 %v15340_v26  ;;  %v12035_v20 = vmax.f32 %v12024_v13, %v11962_v30  ;;  %14001 = vmatprep.subr.bf16.mxu0 %v15437_v50  ;;  %v12036_v27 = vmax.f32 %v12025_v6, 0.0  ;;  %v15367_v10 = vld [vmem:[%s20979_s10 + $0x5d4] ss:$8 sps:$4 sm:$0xff]   ;;  %v15368_v36 = vld [vmem:[%s20979_s10 + $0x5e0] ss:$8 sps:$4 sm:$0xff]  }
 0xd4f   : > { %v12145_v63 = vmax.f32 %v12107_v45, %v12137_v56  ;;  %v15373_v15 = vld [vmem:[%s20979_s10 + $0x5f4] ss:$8 sps:$4 sm:$0xff]   ;;  %v15376_v30 = vld [vmem:[%s20979_s10 + $0x604] ss:$8 sps:$4 sm:$0xff]   ;;  %v15374_v13 = vld [vmem:[%s20979_s10 + $0x600] ss:$8 sps:$4 sm:$0xff]  }
 0xd50   : > { %11389 = vmatmul.mubr.bf16.vlgmr.msra.gmra.mrb[168].mxu1 %v11206_v40  ;;  %v12144_v40 = vmax.f32 %v12106_v16, %v12126_v5  ;;  %v12046_v14 = vmax.f32 %v12035_v20, %v12015_v60  ;;  %v12047_v17 = vmax.f32 %v12036_v27, 0.0  ;;  %v15365_v16 = vld [vmem:[%s20979_s10 + $0x5d0] ss:$8 sps:$4 sm:$0xff]   ;;  %v15370_v5 = vld [vmem:[%s20979_s10 + $0x5e4] ss:$8 sps:$4 sm:$0xff]  }
 0xd51   : > { %11597 = vmatpush1.bf16.msra.mxu1 %v15338_v0  ;;  %13933 = vmatprep.mubr.msk.bf16.mxu1 %vm1959_vm1, %v11447_v43  ;;  %v12037_v43 = vmax.f32 %v12026_v7, 0.0  ;;  %v15377_v45 = vld [vmem:[%s20979_s10 + $0x610] ss:$8 sps:$4 sm:$0xff]   ;;  %v15382_v56 = vld [vmem:[%s20979_s10 + $0x624] ss:$8 sps:$4 sm:$0xff]  }
 0xd52   : > { %11598 = vmatprep.subr.bf16.mxu1 %v15343_v4  ;;  %v12152_v18 = vpack.c.bf16 %v12145_v63, %v12144_v40  ;;  %v12086_v32 = vmax.f32 %v12046_v14, %v12077_v62  ;;  %v12087_v58 = vmax.f32 %v12047_v17, 0.0  ;;  %v15389_v40 = vld [vmem:[%s20979_s10 + $0x650] ss:$8 sps:$4 sm:$0xff]   ;;  %v15394_v42 = vld [vmem:[%s20979_s10 + $0x664] ss:$8 sps:$4 sm:$0xff]  }
 0xd53   : > { %v12048_v61 = vmax.f32 %v12037_v43, 0.0  ;;  %v15397_v20 = vld [vmem:[%s20979_s10 + $0x674] ss:$8 sps:$4 sm:$0xff]   ;;  %v15395_v7 = vld [vmem:[%s20979_s10 + $0x670] ss:$8 sps:$4 sm:$0xff]  }
 0xd54   : > { %14002 = vmatpush3.bf16.msra.mxu0 %v12152_v18  ;;  %v12097_v8 = vmax.f32 %v12086_v32, 0.0  ;;  %v12098_v11 = vmax.f32 %v12087_v58, 0.0  ;;  %v15400_v63 = vld [vmem:[%s20979_s10 + $0x684] ss:$8 sps:$4 sm:$0xff]   ;;  %v15398_v6 = vld [vmem:[%s20979_s10 + $0x680] ss:$8 sps:$4 sm:$0xff]  }
 0xd55   : > { %11599 = vmatpush1.bf16.msra.mxu1 %v15341_v1  ;;  %14003 = vmatprep.subr.bf16.mxu0 %v15437_v50  ;;  %v12088_v26 = vmax.f32 %v12048_v61, 0.0  ;;  %v15379_v1 = vld [vmem:[%s20979_s10 + $0x614] ss:$8 sps:$4 sm:$0xff]   ;;  %v15401_v43 = vld [vmem:[%s20979_s10 + $0x690] ss:$8 sps:$4 sm:$0xff]  }
 0xd56   : > { %11600 = vmatprep.subr.bf16.mxu1 %v15346_v49  ;;  %v12108_v31 = vmax.f32 %v12097_v8, 0.0  ;;  %v12109_v47 = vmax.f32 %v12098_v11, 0.0  ;;  %v15392_v49 = vld [vmem:[%s20979_s10 + $0x660] ss:$8 sps:$4 sm:$0xff]   ;;  %v15403_v14 = vld [vmem:[%s20979_s10 + $0x694] ss:$8 sps:$4 sm:$0xff]  }
 0xd57   : > { %v12099_v12 = vmax.f32 %v12088_v26, 0.0  ;;  %v15404_v18 = vld [vmem:[%s20979_s10 + $0x6a0] ss:$8 sps:$4 sm:$0xff]   ;;  %v15409_v27 = vld [vmem:[%s20979_s10 + $0x6b4] ss:$8 sps:$4 sm:$0xff]  }
 0xd58   : > { %v12146_v60 = vmax.f32 %v12108_v31, 0.0  ;;  %v12147_v0 = vmax.f32 %v12109_v47, 0.0  ;;  %v11883_v32 = vld [vmem:[%s20980_s11] ss:$2 sm:$0x3] }
 0xd59   : > { %11601 = vmatpush1.bf16.msra.mxu1 %v15344_v24  ;;  %v12110_v19 = vmax.f32 %v12099_v12, 0.0  ;;  %v15406_v24 = vld [vmem:[%s20979_s10 + $0x6a4] ss:$8 sps:$4 sm:$0xff]   ;;  %v13984_v8 = vld [vmem:[%s20980_s11 + $0x1] ss:$2 sm:$0x3]  ;;  %v11892_v48 = vrot.slane %v11883_v32, %v21268_v33 }
 0xd5a   : > { %11602 = vmatprep.subr.bf16.mxu1 %v15349_v25  ;;  %v12153_v54 = vpack.c.bf16 %v12147_v0, %v12146_v60  ;;  %v15407_v25 = vld [vmem:[%s20979_s10 + $0x6b0] ss:$8 sps:$4 sm:$0xff]   ;;  %v11905_v59 = vrot.slane %v13984_v8, %v21267_v57 }
 0xd5b   : > { %v12148_v35 = vmax.f32 %v12110_v19, 0.0 }
 0xd5c   : > { %14004 = vmatpush3.bf16.msra.mxu0 %v12153_v54 }
 0xd5d   : > { %11603 = vmatpush1.bf16.msra.mxu1 %v15347_v37  ;;  %v12154_v62 = vpack.c.bf16 %v12148_v35, %v12148_v35  ;;  %14005 = vmatprep.subr.bf16.mxu0 %v15437_v50  ;;  %v15427_v50 = vld [vmem:[%s20982_s13] sm:$0xff]   ;;  %v11888_v37 = vrot.slane %v11883_v32, %v21267_v57 }
 0xd5e   : > { %11604 = vmatprep.subr.bf16.mxu1 %v15352_v28  ;;  %v11909_v28 = vrot.slane %v13984_v8, %v21268_v33 }
 0xd5f   : > { %v12156_v4 = vand.u32 %v12154_v62, %v21313_v21  ;;  %v15364_v21 = vld [vmem:[%s20979_s10 + $0x5c4] ss:$8 sps:$4 sm:$0xff]  }
 0xd61   : > { %11605 = vmatpush1.bf16.msra.mxu1 %v15350_v23  ;;  %14006 = vmatpush3.bf16.msra.mxu0 %v12156_v4 }
 0xd62   : > { %11606 = vmatprep.subr.bf16.mxu1 %v15355_v34 }
 0xd64   : > { %14008 = vmatmul.mubr.msk.bf16.vlgmr.msra.gmra.mrb[40].mxu0 %vm6163_vm8, %v15427_v50 }
 0xd65   : > { %11607 = vmatpush1.bf16.msra.mxu1 %v15353_v46 }
 0xd66   : > { %11608 = vmatprep.subr.bf16.mxu1 %v15358_v29 }
 0xd69   : > { %11609 = vmatpush1.bf16.msra.mxu1 %v15356_v38 }
 0xd6a   : > { %11610 = vmatprep.subr.bf16.mxu1 %v15361_v41 }
 0xd6d   : > { %11611 = vmatpush1.bf16.msra.mxu1 %v15359_v52 }
 0xd6e   : > { %11612 = vmatprep.subr.bf16.mxu1 %v15364_v21 }
 0xd71   : > { %11613 = vmatpush1.bf16.msra.mxu1 %v15362_v9 }
 0xd72   : > { %11614 = vmatprep.subr.bf16.mxu1 %v15367_v10 }
 0xd75   : > { %11615 = vmatpush1.bf16.msra.mxu1 %v15365_v16 }
 0xd76   : > { %11616 = vmatprep.subr.bf16.mxu1 %v15370_v5 }
 0xd79   : > { %11617 = vmatpush1.bf16.msra.mxu1 %v15368_v36 }
 0xd7a   : > { %11618 = vmatprep.subr.bf16.mxu1 %v15373_v15 }
 0xd7d   : > { %11619 = vmatpush1.bf16.msra.mxu1 %v15371_v39 }
 0xd7e   : > { %11836 = vmatprep.subr.bf16.mxu1 %v15376_v30 }
 0xd80   : > { %11629 = vmatmul.mubr.bf16.vlgmr.msra.gmra.mrb[168].mxu1 %v11446_v55  ;;  %v15383_v55 = vld [vmem:[%s20979_s10 + $0x630] ss:$8 sps:$4 sm:$0xff]  }
 0xd81   : > { %11837 = vmatpush1.bf16.msra.mxu1 %v15374_v13  ;;  %13983 = vmatprep.mubr.msk.bf16.mxu1 %vm1959_vm1, %v11687_v2  ;;  %v15391_v2 = vld [vmem:[%s20979_s10 + $0x654] ss:$8 sps:$4 sm:$0xff]  }
 0xd82   : > { %11838 = vmatprep.subr.bf16.mxu1 %v15379_v1 }
 0xd85   : > { %11839 = vmatpush1.bf16.msra.mxu1 %v15377_v45 }
 0xd86   : > { %11840 = vmatprep.subr.bf16.mxu1 %v15382_v56 }
 0xd89   : > { %11841 = vmatpush1.bf16.msra.mxu1 %v15380_v3 }
 0xd8a   : > { %11842 = vmatprep.subr.bf16.mxu1 %v15385_v22 }
 0xd8d   : > { %11843 = vmatpush1.bf16.msra.mxu1 %v15383_v55 }
 0xd8e   : > { %11844 = vmatprep.subr.bf16.mxu1 %v15388_v51 }
 0xd91   : > { %11845 = vmatpush1.bf16.msra.mxu1 %v15386_v44 }
 0xd92   : > { %11846 = vmatprep.subr.bf16.mxu1 %v15391_v2 }
 0xd95   : > { %11847 = vmatpush1.bf16.msra.mxu1 %v15389_v40 }
 0xd96   : > { %11848 = vmatprep.subr.bf16.mxu1 %v15394_v42 }
 0xd99   : > { %11849 = vmatpush1.bf16.msra.mxu1 %v15392_v49 }
 0xd9a   : > { %11850 = vmatprep.subr.bf16.mxu1 %v15397_v20 }
 0xd9d   : > { %11851 = vmatpush1.bf16.msra.mxu1 %v15395_v7 }
 0xd9e   : > { %11852 = vmatprep.subr.bf16.mxu1 %v15400_v63 }
 0xda1   : > { %11853 = vmatpush1.bf16.msra.mxu1 %v15398_v6 }
 0xda2   : > { %11854 = vmatprep.subr.bf16.mxu1 %v15403_v14 }
 0xda5   : > { %11855 = vmatpush1.bf16.msra.mxu1 %v15401_v43 }
 0xda6   : > { %11856 = vmatprep.subr.bf16.mxu1 %v15406_v24 }
 0xda9   : > { %11857 = vmatpush1.bf16.msra.mxu1 %v15404_v18 }
 0xdaa   : > { %11858 = vmatprep.subr.bf16.mxu1 %v15409_v27 }
 0xdad   : > { %11859 = vmatpush1.bf16.msra.mxu1 %v15407_v25 }
 0xdb0   : > { %11869 = vmatmul.mubr.bf16.vlgmr.msra.gmra.mrb[168].mxu1 %v11686_v53 }
 0xe37   : > { %v12192_v61 = vpop.f32.mrb[40].mxu0 }
 0xe38   : > { %12228 = vst.msk [vmem:[%s20088_s30 + $0x20] sm:$0xff] %vm556_vm0, %v12192_v61  ;;  %v14009_v17 = vpop.f32.mrb[41].mxu0 }
 0xe39   : > { %v12195_v26 = vpop.f32.mrb[42].mxu0 }
 0xe3a   : > { %12229 = vst.msk [vmem:[%s20088_s30 + $0x48] sm:$0xff] %vm556_vm0, %v12195_v26  ;;  %v14010_v58 = vpop.f32.mrb[43].mxu0 }
 0xe83   : > { %v11870_v53 = vpop.f32.mrb[168].mxu1 }
 0xe84   : > { %v11895_v31 = vmul.f32 %v11888_v37, %v11870_v53  ;;  %v11872_v12 = vpop.f32.mrb[169].mxu1 }
 0xe85   : > { %v11896_v11 = vmul.f32 %v11892_v48, %v11872_v12  ;;  %v11874_v19 = vpop.f32.mrb[170].mxu1 }
 0xe86   : > { %v11912_v23 = vadd.f32 %v11905_v59, %v11895_v31  ;;  %v11897_v47 = vmul.f32 %v11888_v37, %v11874_v19  ;;  %v11876_v60 = vpop.f32.mrb[171].mxu1 }
 0xe87   : > { %v11913_v34 = vadd.f32 %v11909_v28, %v11896_v11  ;;  %v11898_v35 = vmul.f32 %v11892_v48, %v11876_v60 }
 0xe88   : > { %v11916_v0 = vmax.f32 %v11912_v23, 0.0  ;;  %v11914_v62 = vadd.f32 %v11905_v59, %v11897_v47 }
 0xe89   : > { %v11917_v46 = vmax.f32 %v11913_v34, 0.0  ;;  %v11915_v54 = vadd.f32 %v11909_v28, %v11898_v35 }
 0xe8a   : > { %12209 = vrot.lane.b32.xlu0 %v11916_v0, %s15439_s18  ;;  %v11918_v57 = vmax.f32 %v11914_v62, 0.0 }
 0xe8b   : > { %12211 = vrot.lane.b32.xlu1 %v11917_v46, %s15439_s18  ;;  %v11919_v33 = vmax.f32 %v11915_v54, 0.0 }
 0xe8e   : > { %12213 = vrot.lane.b32.xlu0 %v11918_v57, %s15439_s18 }
 0xe8f   : > { %12215 = vrot.lane.b32.xlu1 %v11919_v33, %s15439_s18 }
 0xefc   : > { %v12210_v29 = vpop.permute.xlu0 %12209 }
 0xefd   : > { %12224 = vst.msk [vmem:[%s20088_s30 + $0x10] sm:$0xff] %vm12223_vm11, %v12210_v29  ;;  %v12212_v4 = vpop.permute.xlu1 %12211 }
 0xefe   : > { %v12217_v38 = vsel %vm1959_vm1, %v12210_v29, %v12212_v4 }
 0xeff   : > { %12225 = vst [vmem:[%s20088_s30 + $0x18] sm:$0xff] %v12217_v38 }
 0xf00   : > { %v12214_v41 = vpop.permute.xlu0 %12213 }
 0xf01   : > { %12226 = vst.msk [vmem:[%s20088_s30 + $0x38] sm:$0xff] %vm12223_vm11, %v12214_v41  ;;  %v12216_v52 = vpop.permute.xlu1 %12215 }
 0xf02   : > { %v12218_v21 = vsel %vm1959_vm1, %v12214_v41, %v12216_v52 }
 0xf03   : > { %12227 = vst [vmem:[%s20088_s30 + $0x40] sm:$0xff] %v12218_v21 }
 0xf04 PF: > { %s24_s29 = sadd.s32 1, %s15434_s29  }
 0xf05   : > { %p21_p4 = scmp.ge.s32.totalorder %s24_s29, 4  }
 0xf07   :  { %23 = sbr.rel (!%p21_p4) target bundleno = 1 (0x1), region = 141 }

</bundles_post_ra>
